<compile_context>
chip_gen: v7x
topology: tpu7x:2x2x1
jax: 0.10.0
libtpu: 0.0.40
codegen_flags: <defaults>
</compile_context>

<pallas_src>
import functools
import numpy as np
import jax
import jax.numpy as jnp
from jax.experimental import pallas as pl
from jax.experimental.pallas import tpu as pltpu


def _round_up(x, m):
    return (x + m - 1) // m * m


# ----------------------------------------------------------------------------
# Pallas kernels
# ----------------------------------------------------------------------------

def _mm_kernel(act, x_ref, w_ref, s_ref, b_ref, o_ref, acc_ref):
    """Tiled bf16 matmul (1x1x1 conv) with fused BN scale/bias + activation."""
    @pl.when(pl.program_id(2) == 0)
    def _():
        acc_ref[...] = jnp.zeros_like(acc_ref)

    acc_ref[...] += jnp.dot(x_ref[...], w_ref[...],
                            preferred_element_type=jnp.float32)

    @pl.when(pl.program_id(2) == pl.num_programs(2) - 1)
    def _():
        y = acc_ref[...] * s_ref[...] + b_ref[...]
        if act == "relu":
            y = jnp.maximum(y, 0.0)
        o_ref[...] = y.astype(o_ref.dtype)


def _conv3_kernel(Ho, Wo, act, x_ref, w_ref, s_ref, b_ref, o_ref, acc_ref):
    """3x3x3 conv: grid axis 2 is the temporal tap (dt); the 9 spatial taps are
    accumulated in-kernel from the halo'd (Hp, Wp, Cin) plane."""
    dt = pl.program_id(2)

    @pl.when(dt == 0)
    def _():
        acc_ref[...] = jnp.zeros_like(acc_ref)

    cin = x_ref.shape[-1]
    for dh in range(3):
        for dw in range(3):
            patch = x_ref[0, 0, dh:dh + Ho, dw:dw + Wo, :].reshape(Ho * Wo, cin)
            k = (dh * 3 + dw) * cin
            wk = w_ref[0, k:k + cin, :]
            acc_ref[...] += jnp.dot(patch, wk,
                                    preferred_element_type=jnp.float32)

    @pl.when(dt == pl.num_programs(2) - 1)
    def _():
        y = acc_ref[...] * s_ref[...] + b_ref[...]
        if act == "relu":
            y = jnp.maximum(y, 0.0)
        o_ref[0, 0] = y.astype(o_ref.dtype)


def _pool_kernel(Ho, Wo, x_ref, o_ref, acc_ref):
    """3x3x3 max-pool, stride 1, SAME (zero) padding: temporal tap on the grid,
    spatial taps unrolled in-kernel."""
    dt = pl.program_id(2)

    @pl.when(dt == 0)
    def _():
        acc_ref[...] = jnp.full(acc_ref.shape, -jnp.inf, acc_ref.dtype)

    m = x_ref[0, 0, 0:Ho, 0:Wo, :]
    for dh in range(3):
        for dw in range(3):
            if dh == 0 and dw == 0:
                continue
            m = jnp.maximum(m, x_ref[0, 0, dh:dh + Ho, dw:dw + Wo, :])
    acc_ref[...] = jnp.maximum(acc_ref[...], m)

    @pl.when(dt == pl.num_programs(2) - 1)
    def _():
        o_ref[0, 0] = acc_ref[...].astype(o_ref.dtype)


# ----------------------------------------------------------------------------
# Layer wrappers
# ----------------------------------------------------------------------------

def conv1x1_bn_act(x, w, scale, bias, act="relu", out_dtype=jnp.float32):
    """1x1x1 conv as a tiled matmul.  x: (B,T,H,W,Cin) bf16, w: (Cin,Cout) bf16,
    channels already padded to multiples of 128."""
    B, T, H, W, Cin = x.shape
    Cout = w.shape[1]
    M = B * T * H * W
    x2 = x.reshape(M, Cin)

    tm = 256
    tn = 256 if Cout % 256 == 0 else 128
    if Cin <= 512:
        tk, Kp = Cin, Cin
    else:
        tk = 512
        Kp = _round_up(Cin, 512)
    Mp = _round_up(M, tm)

    xp = jnp.pad(x2, ((0, Mp - M), (0, Kp - Cin)))
    wp = jnp.pad(w, ((0, Kp - Cin), (0, 0)))
    s2 = scale.reshape(1, Cout)
    b2 = bias.reshape(1, Cout)

    grid = (Mp // tm, Cout // tn, Kp // tk)
    out = pl.pallas_call(
        functools.partial(_mm_kernel, act),
        out_shape=jax.ShapeDtypeStruct((Mp, Cout), out_dtype),
        grid_spec=pltpu.PrefetchScalarGridSpec(
            num_scalar_prefetch=0,
            grid=grid,
            in_specs=[
                pl.BlockSpec((tm, tk), lambda i, j, k: (i, k)),
                pl.BlockSpec((tk, tn), lambda i, j, k: (k, j)),
                pl.BlockSpec((1, tn), lambda i, j, k: (0, j)),
                pl.BlockSpec((1, tn), lambda i, j, k: (0, j)),
            ],
            out_specs=pl.BlockSpec((tm, tn), lambda i, j, k: (i, j)),
            scratch_shapes=[pltpu.VMEM((tm, tn), jnp.float32)],
        ),
        compiler_params=pltpu.CompilerParams(
            dimension_semantics=("parallel", "parallel", "arbitrary")),
    )(xp, wp, s2, b2)
    return out[:M].reshape(B, T, H, W, Cout)


def conv3x3_bn_act(x, w, scale, bias, act="relu", out_dtype=jnp.float32):
    """3x3x3 conv, stride 1, SAME padding.  x: (B,T,H,W,Cin) bf16,
    w: (3,3,3,Cin,Cout) bf16 (channels padded to multiples of 128)."""
    B, T, H, W, Cin = x.shape
    Cout = w.shape[-1]
    xp = jnp.pad(x, ((0, 0), (1, 1), (1, 1), (1, 1), (0, 0)))
    Hp, Wp = H + 2, W + 2
    wr = w.reshape(3, 9 * Cin, Cout)
    s2 = scale.reshape(1, Cout)
    b2 = bias.reshape(1, Cout)
    HW = H * W

    out = pl.pallas_call(
        functools.partial(_conv3_kernel, H, W, act),
        out_shape=jax.ShapeDtypeStruct((B, T, HW, Cout), out_dtype),
        grid_spec=pltpu.PrefetchScalarGridSpec(
            num_scalar_prefetch=0,
            grid=(B, T, 3),
            in_specs=[
                pl.BlockSpec((1, 1, Hp, Wp, Cin),
                             lambda b, t, dt: (b, t + dt, 0, 0, 0)),
                pl.BlockSpec((1, 9 * Cin, Cout), lambda b, t, dt: (dt, 0, 0)),
                pl.BlockSpec((1, Cout), lambda b, t, dt: (0, 0)),
                pl.BlockSpec((1, Cout), lambda b, t, dt: (0, 0)),
            ],
            out_specs=pl.BlockSpec((1, 1, HW, Cout),
                                   lambda b, t, dt: (b, t, 0, 0)),
            scratch_shapes=[pltpu.VMEM((HW, Cout), jnp.float32)],
        ),
        compiler_params=pltpu.CompilerParams(
            dimension_semantics=("parallel", "parallel", "arbitrary")),
    )(xp, wr, s2, b2)
    return out.reshape(B, T, H, W, Cout)


def maxpool3x3_same(x):
    """MaxPool3dSamePadding(kernel=3, stride=1): zero-pad 1 each side, then max."""
    B, T, H, W, C = x.shape
    xp = jnp.pad(x, ((0, 0), (1, 1), (1, 1), (1, 1), (0, 0)))
    Hp, Wp = H + 2, W + 2

    return pl.pallas_call(
        functools.partial(_pool_kernel, H, W),
        out_shape=jax.ShapeDtypeStruct((B, T, H, W, C), x.dtype),
        grid_spec=pltpu.PrefetchScalarGridSpec(
            num_scalar_prefetch=0,
            grid=(B, T, 3),
            in_specs=[pl.BlockSpec((1, 1, Hp, Wp, C),
                                   lambda b, t, dt: (b, t + dt, 0, 0, 0))],
            out_specs=pl.BlockSpec((1, 1, H, W, C),
                                   lambda b, t, dt: (b, t, 0, 0, 0)),
            scratch_shapes=[pltpu.VMEM((H, W, C), x.dtype)],
        ),
        compiler_params=pltpu.CompilerParams(
            dimension_semantics=("parallel", "parallel", "arbitrary")),
    )(xp)


# ----------------------------------------------------------------------------
# Parameters (deterministic, synthetic; channels pre-padded to 128 multiples)
# ----------------------------------------------------------------------------

def _fold_bn(cout_p, cout, eps=1e-3):
    # Eval-mode BN with fresh stats: gamma=1, beta=0, mean=0, var=1.
    # TODO(synk): training-mode BN (batch statistics) is not implemented.
    scale = np.zeros((cout_p,), np.float32)
    scale[:cout] = 1.0 / np.sqrt(1.0 + eps)
    bias = np.zeros((cout_p,), np.float32)
    return jnp.asarray(scale), jnp.asarray(bias)


def make_unit3d_params(key, cin, cout, kshape):
    kt, kh, kw = kshape
    cin_p = _round_up(cin, 128)
    cout_p = _round_up(cout, 128)
    std = 1.0 / np.sqrt(cin * kt * kh * kw)
    w = jax.random.normal(key, (kt, kh, kw, cin, cout), jnp.float32) * std
    w = jnp.pad(w, ((0, 0), (0, 0), (0, 0),
                    (0, cin_p - cin), (0, cout_p - cout))).astype(jnp.bfloat16)
    scale, bias = _fold_bn(cout_p, cout)
    return {'w': w, 'scale': scale, 'bias': bias, 'cout': cout}


# ----------------------------------------------------------------------------
# Forward pass
# ----------------------------------------------------------------------------

def inception_forward(x, params):
    """x: (B, C, T, H, W) fp32 (NCDHW, like the PyTorch reference)."""
    x = jnp.transpose(x, (0, 2, 3, 4, 1))                      # -> NDHWC
    B, T, H, W, C = x.shape
    Cp = _round_up(C, 128)
    xb = jnp.pad(x, ((0, 0), (0, 0), (0, 0), (0, 0), (0, Cp - C))
                 ).astype(jnp.bfloat16)

    p = params

    def w2d(unit):
        wu = unit['w']
        return wu.reshape(wu.shape[3], wu.shape[4])

    # Branch 0: 1x1x1 conv -> BN -> ReLU
    b0 = conv1x1_bn_act(xb, w2d(p['b0']), p['b0']['scale'], p['b0']['bias'],
                        act="relu", out_dtype=jnp.float32)
    # Branch 1: 1x1x1 -> 3x3x3
    b1 = conv1x1_bn_act(xb, w2d(p['b1a']), p['b1a']['scale'], p['b1a']['bias'],
                        act="relu", out_dtype=jnp.bfloat16)
    b1 = conv3x3_bn_act(b1, p['b1b']['w'], p['b1b']['scale'], p['b1b']['bias'],
                        act="relu", out_dtype=jnp.float32)
    # Branch 2: 1x1x1 -> 3x3x3
    b2 = conv1x1_bn_act(xb, w2d(p['b2a']), p['b2a']['scale'], p['b2a']['bias'],
                        act="relu", out_dtype=jnp.bfloat16)
    b2 = conv3x3_bn_act(b2, p['b2b']['w'], p['b2b']['scale'], p['b2b']['bias'],
                        act="relu", out_dtype=jnp.float32)
    # Branch 3: 3x3x3 max-pool (same padding) -> 1x1x1 conv
    b3 = maxpool3x3_same(xb)
    b3 = conv1x1_bn_act(b3, w2d(p['b3b']), p['b3b']['scale'], p['b3b']['bias'],
                        act="relu", out_dtype=jnp.float32)

    out = jnp.concatenate([
        b0[..., :p['b0']['cout']],
        b1[..., :p['b1b']['cout']],
        b2[..., :p['b2b']['cout']],
        b3[..., :p['b3b']['cout']],
    ], axis=-1)
    return jnp.transpose(out, (0, 4, 1, 2, 3))                 # -> NCDHW


# ----------------------------------------------------------------------------
# Main
# ----------------------------------------------------------------------------

if __name__ == "__main__":
    in_channels = 4
    out_channels = [8, 12, 16, 4, 8, 8]          # [b0, b1a, b1b, b2a, b2b, b3b]

    key = jax.random.PRNGKey(0)
    kx, k0, k1a, k1b, k2a, k2b, k3b = jax.random.split(key, 7)

    params = {
        'b0':  make_unit3d_params(k0,  in_channels,     out_channels[0], (1, 1, 1)),
        'b1a': make_unit3d_params(k1a, in_channels,     out_channels[1], (1, 1, 1)),
        'b1b': make_unit3d_params(k1b, out_channels[1], out_channels[2], (3, 3, 3)),
        'b2a': make_unit3d_params(k2a, in_channels,     out_channels[3], (1, 1, 1)),
        'b2b': make_unit3d_params(k2b, out_channels[3], out_channels[4], (3, 3, 3)),
        'b3b': make_unit3d_params(k3b, in_channels,     out_channels[5], (1, 1, 1)),
    }

    B, C, T, H, W = 2, in_channels, 8, 16, 16     # NCDHW like the PyTorch module
    x = jax.random.normal(kx, (B, C, T, H, W), jnp.float32)

    fwd = jax.jit(lambda inp: inception_forward(inp, params))
    out = jax.block_until_ready(fwd(x))

    c_total = out_channels[0] + out_channels[2] + out_channels[4] + out_channels[5]
    assert out.shape == (B, c_total, T, H, W), out.shape
    assert bool(jnp.all(jnp.isfinite(out)))
    print("KERNEL_OK")
</pallas_src>

<mosaic_0001>
module attributes {stable_mosaic.version = 11 : i64} {
  func.func @_mm_kernel(%arg0: i32, %arg1: i32, %arg2: i32, %arg3: memref<256x128xbf16, #tpu.memory_space<vmem>>, %arg4: memref<128x128xbf16, #tpu.memory_space<vmem>>, %arg5: memref<1x128xf32, #tpu.memory_space<vmem>>, %arg6: memref<1x128xf32, #tpu.memory_space<vmem>>, %arg7: memref<256x128xbf16, #tpu.memory_space<vmem>>, %arg8: memref<256x128xf32, #tpu.memory_space<vmem>>) attributes {dimension_semantics = [#tpu.dimension_semantics<parallel>, #tpu.dimension_semantics<parallel>, #tpu.dimension_semantics<arbitrary>], iteration_bounds = array<i64: 16, 1, 1>, scalar_prefetch = 0 : i64, scratch_operands = 1 : i64, tpu.core_type = #tpu.core_type<tc>, window_params = [{transform_indices = @transform_0, window_bounds = array<i64: 256, 128>}, {transform_indices = @transform_1, window_bounds = array<i64: 128, 128>}, {transform_indices = @transform_2, window_bounds = array<i64: 1, 128>}, {transform_indices = @transform_3, window_bounds = array<i64: 1, 128>}, {transform_indices = @transform_4, window_bounds = array<i64: 256, 128>}]} {
    %c0_i32 = arith.constant 0 : i32
    %0 = arith.cmpi eq, %arg2, %c0_i32 : i32
    %1 = arith.extui %0 : i1 to i32
    %c0_i32_0 = arith.constant 0 : i32
    %2 = arith.cmpi ne, %1, %c0_i32_0 : i32
    scf.if %2 {
      %cst_10 = arith.constant 0.000000e+00 : f32
      %12 = vector.broadcast %cst_10 : f32 to vector<256x128xf32>
      %c0_11 = arith.constant 0 : index
      %c0_12 = arith.constant 0 : index
      %13 = vector.load %arg8[%c0_11, %c0_12] : memref<256x128xf32, #tpu.memory_space<vmem>>, vector<256x128xf32>
      tpu.vector_store %arg8[%c0_11, %c0_12], %12 {strides = array<i32>} : memref<256x128xf32, #tpu.memory_space<vmem>>, vector<256x128xf32>,
    } else {
    }
    %c0 = arith.constant 0 : index
    %c0_1 = arith.constant 0 : index
    %3 = vector.load %arg8[%c0, %c0_1] : memref<256x128xf32, #tpu.memory_space<vmem>>, vector<256x128xf32>
    %c0_2 = arith.constant 0 : index
    %c0_3 = arith.constant 0 : index
    %4 = vector.load %arg3[%c0_2, %c0_3] : memref<256x128xbf16, #tpu.memory_space<vmem>>, vector<256x128xbf16>
    %c0_4 = arith.constant 0 : index
    %c0_5 = arith.constant 0 : index
    %5 = vector.load %arg4[%c0_4, %c0_5] : memref<128x128xbf16, #tpu.memory_space<vmem>>, vector<128x128xbf16>
    %cst = arith.constant dense<0.000000e+00> : vector<256x128xf32>
    %6 = tpu.matmul %4, %5, %cst {dimension_numbers = #tpu.dot_dimension_numbers<[1], [0], [0], [1], [0, 0, 1, 1], [], []>} : vector<256x128xbf16>, vector<128x128xbf16>, vector<256x128xf32> -> vector<256x128xf32>
    %7 = arith.addf %3, %6 : vector<256x128xf32>
    %c0_6 = arith.constant 0 : index
    %c0_7 = arith.constant 0 : index
    %8 = vector.load %arg8[%c0_6, %c0_7] : memref<256x128xf32, #tpu.memory_space<vmem>>, vector<256x128xf32>
    tpu.vector_store %arg8[%c0_6, %c0_7], %7 {strides = array<i32>} : memref<256x128xf32, #tpu.memory_space<vmem>>, vector<256x128xf32>,
    %c0_i32_8 = arith.constant 0 : i32
    %9 = arith.cmpi eq, %arg2, %c0_i32_8 : i32
    %10 = arith.extui %9 : i1 to i32
    %c0_i32_9 = arith.constant 0 : i32
    %11 = arith.cmpi ne, %10, %c0_i32_9 : i32
    scf.if %11 {
      %c0_10 = arith.constant 0 : index
      %c0_11 = arith.constant 0 : index
      %12 = vector.load %arg8[%c0_10, %c0_11] : memref<256x128xf32, #tpu.memory_space<vmem>>, vector<256x128xf32>
      %c0_12 = arith.constant 0 : index
      %c0_13 = arith.constant 0 : index
      %13 = vector.load %arg5[%c0_12, %c0_13] : memref<1x128xf32, #tpu.memory_space<vmem>>, vector<1x128xf32>
      %14 = vector.broadcast %13 : vector<1x128xf32> to vector<256x128xf32>
      %15 = arith.mulf %12, %14 : vector<256x128xf32>
      %c0_14 = arith.constant 0 : index
      %c0_15 = arith.constant 0 : index
      %16 = vector.load %arg6[%c0_14, %c0_15] : memref<1x128xf32, #tpu.memory_space<vmem>>, vector<1x128xf32>
      %17 = vector.broadcast %16 : vector<1x128xf32> to vector<256x128xf32>
      %18 = arith.addf %15, %17 : vector<256x128xf32>
      %cst_16 = arith.constant 0.000000e+00 : f32
      %19 = vector.broadcast %cst_16 : f32 to vector<256x128xf32>
      %20 = arith.maximumf %18, %19 : vector<256x128xf32>
      %21 = arith.truncf %20 : vector<256x128xf32> to vector<256x128xbf16>
      %c0_17 = arith.constant 0 : index
      %c0_18 = arith.constant 0 : index
      %22 = vector.load %arg7[%c0_17, %c0_18] : memref<256x128xbf16, #tpu.memory_space<vmem>>, vector<256x128xbf16>
      tpu.vector_store %arg7[%c0_17, %c0_18], %21 {strides = array<i32>} : memref<256x128xbf16, #tpu.memory_space<vmem>>, vector<256x128xbf16>,
    } else {
    }
    return
  }
  func.func @transform_0(%arg0: i32, %arg1: i32, %arg2: i32) -> (i32, i32) {
    %c0_i32 = arith.constant 0 : i32
    return %arg0, %arg2 : i32, i32
  }
  func.func @transform_1(%arg0: i32, %arg1: i32, %arg2: i32) -> (i32, i32) {
    %c0_i32 = arith.constant 0 : i32
    return %arg2, %arg1 : i32, i32
  }
  func.func @transform_2(%arg0: i32, %arg1: i32, %arg2: i32) -> (i32, i32) {
    %c0_i32 = arith.constant 0 : i32
    %c0_i32_0 = arith.constant 0 : i32
    return %c0_i32, %arg1 : i32, i32
  }
  func.func @transform_3(%arg0: i32, %arg1: i32, %arg2: i32) -> (i32, i32) {
    %c0_i32 = arith.constant 0 : i32
    %c0_i32_0 = arith.constant 0 : i32
    return %c0_i32, %arg1 : i32, i32
  }
  func.func @transform_4(%arg0: i32, %arg1: i32, %arg2: i32) -> (i32, i32) {
    %c0_i32 = arith.constant 0 : i32
    return %arg0, %arg1 : i32, i32
  }
}

module attributes {stable_mosaic.version = 11 : i64} {
  func.func @_conv3_kernel(%arg0: i32, %arg1: i32, %arg2: i32, %arg3: memref<1x1x18x18x128xbf16, #tpu.memory_space<vmem>>, %arg4: memref<1x1152x128xbf16, #tpu.memory_space<vmem>>, %arg5: memref<1x128xf32, #tpu.memory_space<vmem>>, %arg6: memref<1x128xf32, #tpu.memory_space<vmem>>, %arg7: memref<1x1x256x128xf32, #tpu.memory_space<vmem>>, %arg8: memref<256x128xf32, #tpu.memory_space<vmem>>) attributes {dimension_semantics = [#tpu.dimension_semantics<parallel>, #tpu.dimension_semantics<parallel>, #tpu.dimension_semantics<arbitrary>], iteration_bounds = array<i64: 2, 8, 3>, scalar_prefetch = 0 : i64, scratch_operands = 1 : i64, tpu.core_type = #tpu.core_type<tc>, window_params = [{transform_indices = @transform_0, window_bounds = array<i64: 1, 1, 18, 18, 128>}, {transform_indices = @transform_1, window_bounds = array<i64: 1, 1152, 128>}, {pipeline_mode = #tpu.pipeline_mode<synchronous>, transform_indices = @transform_2, window_bounds = array<i64: 1, 128>}, {pipeline_mode = #tpu.pipeline_mode<synchronous>, transform_indices = @transform_3, window_bounds = array<i64: 1, 128>}, {transform_indices = @transform_4, window_bounds = array<i64: 1, 1, 256, 128>}]} {
    %c0_i32 = arith.constant 0 : i32
    %0 = arith.cmpi eq, %arg2, %c0_i32 : i32
    %1 = arith.extui %0 : i1 to i32
    %c0_i32_0 = arith.constant 0 : i32
    %2 = arith.cmpi ne, %1, %c0_i32_0 : i32
    scf.if %2 {
      %cst_107 = arith.constant 0.000000e+00 : f32
      %87 = vector.broadcast %cst_107 : f32 to vector<256x128xf32>
      %c0_108 = arith.constant 0 : index
      %c0_109 = arith.constant 0 : index
      %88 = vector.load %arg8[%c0_108, %c0_109] : memref<256x128xf32, #tpu.memory_space<vmem>>, vector<256x128xf32>
      tpu.vector_store %arg8[%c0_108, %c0_109], %87 {strides = array<i32>} : memref<256x128xf32, #tpu.memory_space<vmem>>, vector<256x128xf32>,
    } else {
    }
    %c0 = arith.constant 0 : index
    %c0_1 = arith.constant 0 : index
    %c0_2 = arith.constant 0 : index
    %c0_3 = arith.constant 0 : index
    %c0_4 = arith.constant 0 : index
    %3 = vector.load %arg3[%c0, %c0_1, %c0_2, %c0_3, %c0_4] : memref<1x1x18x18x128xbf16, #tpu.memory_space<vmem>>, vector<1x1x16x16x128xbf16>
    %4 = vector.shape_cast %3 : vector<1x1x16x16x128xbf16> to vector<16x16x128xbf16>
    %5 = vector.shape_cast %4 : vector<16x16x128xbf16> to vector<256x128xbf16>
    %c0_5 = arith.constant 0 : index
    %c0_6 = arith.constant 0 : index
    %c0_7 = arith.constant 0 : index
    %6 = vector.load %arg4[%c0_5, %c0_6, %c0_7] : memref<1x1152x128xbf16, #tpu.memory_space<vmem>>, vector<1x128x128xbf16>
    %7 = vector.shape_cast %6 : vector<1x128x128xbf16> to vector<128x128xbf16>
    %c0_8 = arith.constant 0 : index
    %c0_9 = arith.constant 0 : index
    %8 = vector.load %arg8[%c0_8, %c0_9] : memref<256x128xf32, #tpu.memory_space<vmem>>, vector<256x128xf32>
    %cst = arith.constant dense<0.000000e+00> : vector<256x128xf32>
    %9 = tpu.matmul %5, %7, %cst {dimension_numbers = #tpu.dot_dimension_numbers<[1], [0], [0], [1], [0, 0, 1, 1], [], []>} : vector<256x128xbf16>, vector<128x128xbf16>, vector<256x128xf32> -> vector<256x128xf32>
    %10 = arith.addf %8, %9 : vector<256x128xf32>
    %c0_10 = arith.constant 0 : index
    %c0_11 = arith.constant 0 : index
    %11 = vector.load %arg8[%c0_10, %c0_11] : memref<256x128xf32, #tpu.memory_space<vmem>>, vector<256x128xf32>
    tpu.vector_store %arg8[%c0_10, %c0_11], %10 {strides = array<i32>} : memref<256x128xf32, #tpu.memory_space<vmem>>, vector<256x128xf32>,
    %c0_12 = arith.constant 0 : index
    %c0_13 = arith.constant 0 : index
    %c0_14 = arith.constant 0 : index
    %c1 = arith.constant 1 : index
    %c0_15 = arith.constant 0 : index
    %12 = vector.load %arg3[%c0_12, %c0_13, %c0_14, %c1, %c0_15] : memref<1x1x18x18x128xbf16, #tpu.memory_space<vmem>>, vector<1x1x16x16x128xbf16>
    %13 = vector.shape_cast %12 : vector<1x1x16x16x128xbf16> to vector<16x16x128xbf16>
    %14 = vector.shape_cast %13 : vector<16x16x128xbf16> to vector<256x128xbf16>
    %c0_16 = arith.constant 0 : index
    %c128 = arith.constant 128 : index
    %c0_17 = arith.constant 0 : index
    %15 = vector.load %arg4[%c0_16, %c128, %c0_17] : memref<1x1152x128xbf16, #tpu.memory_space<vmem>>, vector<1x128x128xbf16>
    %16 = vector.shape_cast %15 : vector<1x128x128xbf16> to vector<128x128xbf16>
    %c0_18 = arith.constant 0 : index
    %c0_19 = arith.constant 0 : index
    %17 = vector.load %arg8[%c0_18, %c0_19] : memref<256x128xf32, #tpu.memory_space<vmem>>, vector<256x128xf32>
    %cst_20 = arith.constant dense<0.000000e+00> : vector<256x128xf32>
    %18 = tpu.matmul %14, %16, %cst_20 {dimension_numbers = #tpu.dot_dimension_numbers<[1], [0], [0], [1], [0, 0, 1, 1], [], []>} : vector<256x128xbf16>, vector<128x128xbf16>, vector<256x128xf32> -> vector<256x128xf32>
    %19 = arith.addf %17, %18 : vector<256x128xf32>
    %c0_21 = arith.constant 0 : index
    %c0_22 = arith.constant 0 : index
    %20 = vector.load %arg8[%c0_21, %c0_22] : memref<256x128xf32, #tpu.memory_space<vmem>>, vector<256x128xf32>
    tpu.vector_store %arg8[%c0_21, %c0_22], %19 {strides = array<i32>} : memref<256x128xf32, #tpu.memory_space<vmem>>, vector<256x128xf32>,
    %c0_23 = arith.constant 0 : index
    %c0_24 = arith.constant 0 : index
    %c0_25 = arith.constant 0 : index
    %c2 = arith.constant 2 : index
    %c0_26 = arith.constant 0 : index
    %21 = vector.load %arg3[%c0_23, %c0_24, %c0_25, %c2, %c0_26] : memref<1x1x18x18x128xbf16, #tpu.memory_space<vmem>>, vector<1x1x16x16x128xbf16>
    %22 = vector.shape_cast %21 : vector<1x1x16x16x128xbf16> to vector<16x16x128xbf16>
    %23 = vector.shape_cast %22 : vector<16x16x128xbf16> to vector<256x128xbf16>
    %c0_27 = arith.constant 0 : index
    %c256 = arith.constant 256 : index
    %c0_28 = arith.constant 0 : index
    %24 = vector.load %arg4[%c0_27, %c256, %c0_28] : memref<1x1152x128xbf16, #tpu.memory_space<vmem>>, vector<1x128x128xbf16>
    %25 = vector.shape_cast %24 : vector<1x128x128xbf16> to vector<128x128xbf16>
    %c0_29 = arith.constant 0 : index
    %c0_30 = arith.constant 0 : index
    %26 = vector.load %arg8[%c0_29, %c0_30] : memref<256x128xf32, #tpu.memory_space<vmem>>, vector<256x128xf32>
    %cst_31 = arith.constant dense<0.000000e+00> : vector<256x128xf32>
    %27 = tpu.matmul %23, %25, %cst_31 {dimension_numbers = #tpu.dot_dimension_numbers<[1], [0], [0], [1], [0, 0, 1, 1], [], []>} : vector<256x128xbf16>, vector<128x128xbf16>, vector<256x128xf32> -> vector<256x128xf32>
    %28 = arith.addf %26, %27 : vector<256x128xf32>
    %c0_32 = arith.constant 0 : index
    %c0_33 = arith.constant 0 : index
    %29 = vector.load %arg8[%c0_32, %c0_33] : memref<256x128xf32, #tpu.memory_space<vmem>>, vector<256x128xf32>
    tpu.vector_store %arg8[%c0_32, %c0_33], %28 {strides = array<i32>} : memref<256x128xf32, #tpu.memory_space<vmem>>, vector<256x128xf32>,
    %c0_34 = arith.constant 0 : index
    %c0_35 = arith.constant 0 : index
    %c1_36 = arith.constant 1 : index
    %c0_37 = arith.constant 0 : index
    %c0_38 = arith.constant 0 : index
    %30 = vector.load %arg3[%c0_34, %c0_35, %c1_36, %c0_37, %c0_38] : memref<1x1x18x18x128xbf16, #tpu.memory_space<vmem>>, vector<1x1x16x16x128xbf16>
    %31 = vector.shape_cast %30 : vector<1x1x16x16x128xbf16> to vector<16x16x128xbf16>
    %32 = vector.shape_cast %31 : vector<16x16x128xbf16> to vector<256x128xbf16>
    %c0_39 = arith.constant 0 : index
    %c384 = arith.constant 384 : index
    %c0_40 = arith.constant 0 : index
    %33 = vector.load %arg4[%c0_39, %c384, %c0_40] : memref<1x1152x128xbf16, #tpu.memory_space<vmem>>, vector<1x128x128xbf16>
    %34 = vector.shape_cast %33 : vector<1x128x128xbf16> to vector<128x128xbf16>
    %c0_41 = arith.constant 0 : index
    %c0_42 = arith.constant 0 : index
    %35 = vector.load %arg8[%c0_41, %c0_42] : memref<256x128xf32, #tpu.memory_space<vmem>>, vector<256x128xf32>
    %cst_43 = arith.constant dense<0.000000e+00> : vector<256x128xf32>
    %36 = tpu.matmul %32, %34, %cst_43 {dimension_numbers = #tpu.dot_dimension_numbers<[1], [0], [0], [1], [0, 0, 1, 1], [], []>} : vector<256x128xbf16>, vector<128x128xbf16>, vector<256x128xf32> -> vector<256x128xf32>
    %37 = arith.addf %35, %36 : vector<256x128xf32>
    %c0_44 = arith.constant 0 : index
    %c0_45 = arith.constant 0 : index
    %38 = vector.load %arg8[%c0_44, %c0_45] : memref<256x128xf32, #tpu.memory_space<vmem>>, vector<256x128xf32>
    tpu.vector_store %arg8[%c0_44, %c0_45], %37 {strides = array<i32>} : memref<256x128xf32, #tpu.memory_space<vmem>>, vector<256x128xf32>,
    %c0_46 = arith.constant 0 : index
    %c0_47 = arith.constant 0 : index
    %c1_48 = arith.constant 1 : index
    %c1_49 = arith.constant 1 : index
    %c0_50 = arith.constant 0 : index
    %39 = vector.load %arg3[%c0_46, %c0_47, %c1_48, %c1_49, %c0_50] : memref<1x1x18x18x128xbf16, #tpu.memory_space<vmem>>, vector<1x1x16x16x128xbf16>
    %40 = vector.shape_cast %39 : vector<1x1x16x16x128xbf16> to vector<16x16x128xbf16>
    %41 = vector.shape_cast %40 : vector<16x16x128xbf16> to vector<256x128xbf16>
    %c0_51 = arith.constant 0 : index
    %c512 = arith.constant 512 : index
    %c0_52 = arith.constant 0 : index
    %42 = vector.load %arg4[%c0_51, %c512, %c0_52] : memref<1x1152x128xbf16, #tpu.memory_space<vmem>>, vector<1x128x128xbf16>
    %43 = vector.shape_cast %42 : vector<1x128x128xbf16> to vector<128x128xbf16>
    %c0_53 = arith.constant 0 : index
    %c0_54 = arith.constant 0 : index
    %44 = vector.load %arg8[%c0_53, %c0_54] : memref<256x128xf32, #tpu.memory_space<vmem>>, vector<256x128xf32>
    %cst_55 = arith.constant dense<0.000000e+00> : vector<256x128xf32>
    %45 = tpu.matmul %41, %43, %cst_55 {dimension_numbers = #tpu.dot_dimension_numbers<[1], [0], [0], [1], [0, 0, 1, 1], [], []>} : vector<256x128xbf16>, vector<128x128xbf16>, vector<256x128xf32> -> vector<256x128xf32>
    %46 = arith.addf %44, %45 : vector<256x128xf32>
    %c0_56 = arith.constant 0 : index
    %c0_57 = arith.constant 0 : index
    %47 = vector.load %arg8[%c0_56, %c0_57] : memref<256x128xf32, #tpu.memory_space<vmem>>, vector<256x128xf32>
    tpu.vector_store %arg8[%c0_56, %c0_57], %46 {strides = array<i32>} : memref<256x128xf32, #tpu.memory_space<vmem>>, vector<256x128xf32>,
    %c0_58 = arith.constant 0 : index
    %c0_59 = arith.constant 0 : index
    %c1_60 = arith.constant 1 : index
    %c2_61 = arith.constant 2 : index
    %c0_62 = arith.constant 0 : index
    %48 = vector.load %arg3[%c0_58, %c0_59, %c1_60, %c2_61, %c0_62] : memref<1x1x18x18x128xbf16, #tpu.memory_space<vmem>>, vector<1x1x16x16x128xbf16>
    %49 = vector.shape_cast %48 : vector<1x1x16x16x128xbf16> to vector<16x16x128xbf16>
    %50 = vector.shape_cast %49 : vector<16x16x128xbf16> to vector<256x128xbf16>
    %c0_63 = arith.constant 0 : index
    %c640 = arith.constant 640 : index
    %c0_64 = arith.constant 0 : index
    %51 = vector.load %arg4[%c0_63, %c640, %c0_64] : memref<1x1152x128xbf16, #tpu.memory_space<vmem>>, vector<1x128x128xbf16>
    %52 = vector.shape_cast %51 : vector<1x128x128xbf16> to vector<128x128xbf16>
    %c0_65 = arith.constant 0 : index
    %c0_66 = arith.constant 0 : index
    %53 = vector.load %arg8[%c0_65, %c0_66] : memref<256x128xf32, #tpu.memory_space<vmem>>, vector<256x128xf32>
    %cst_67 = arith.constant dense<0.000000e+00> : vector<256x128xf32>
    %54 = tpu.matmul %50, %52, %cst_67 {dimension_numbers = #tpu.dot_dimension_numbers<[1], [0], [0], [1], [0, 0, 1, 1], [], []>} : vector<256x128xbf16>, vector<128x128xbf16>, vector<256x128xf32> -> vector<256x128xf32>
    %55 = arith.addf %53, %54 : vector<256x128xf32>
    %c0_68 = arith.constant 0 : index
    %c0_69 = arith.constant 0 : index
    %56 = vector.load %arg8[%c0_68, %c0_69] : memref<256x128xf32, #tpu.memory_space<vmem>>, vector<256x128xf32>
    tpu.vector_store %arg8[%c0_68, %c0_69], %55 {strides = array<i32>} : memref<256x128xf32, #tpu.memory_space<vmem>>, vector<256x128xf32>,
    %c0_70 = arith.constant 0 : index
    %c0_71 = arith.constant 0 : index
    %c2_72 = arith.constant 2 : index
    %c0_73 = arith.constant 0 : index
    %c0_74 = arith.constant 0 : index
    %57 = vector.load %arg3[%c0_70, %c0_71, %c2_72, %c0_73, %c0_74] : memref<1x1x18x18x128xbf16, #tpu.memory_space<vmem>>, vector<1x1x16x16x128xbf16>
    %58 = vector.shape_cast %57 : vector<1x1x16x16x128xbf16> to vector<16x16x128xbf16>
    %59 = vector.shape_cast %58 : vector<16x16x128xbf16> to vector<256x128xbf16>
    %c0_75 = arith.constant 0 : index
    %c768 = arith.constant 768 : index
    %c0_76 = arith.constant 0 : index
    %60 = vector.load %arg4[%c0_75, %c768, %c0_76] : memref<1x1152x128xbf16, #tpu.memory_space<vmem>>, vector<1x128x128xbf16>
    %61 = vector.shape_cast %60 : vector<1x128x128xbf16> to vector<128x128xbf16>
    %c0_77 = arith.constant 0 : index
    %c0_78 = arith.constant 0 : index
    %62 = vector.load %arg8[%c0_77, %c0_78] : memref<256x128xf32, #tpu.memory_space<vmem>>, vector<256x128xf32>
    %cst_79 = arith.constant dense<0.000000e+00> : vector<256x128xf32>
    %63 = tpu.matmul %59, %61, %cst_79 {dimension_numbers = #tpu.dot_dimension_numbers<[1], [0], [0], [1], [0, 0, 1, 1], [], []>} : vector<256x128xbf16>, vector<128x128xbf16>, vector<256x128xf32> -> vector<256x128xf32>
    %64 = arith.addf %62, %63 : vector<256x128xf32>
    %c0_80 = arith.constant 0 : index
    %c0_81 = arith.constant 0 : index
    %65 = vector.load %arg8[%c0_80, %c0_81] : memref<256x128xf32, #tpu.memory_space<vmem>>, vector<256x128xf32>
    tpu.vector_store %arg8[%c0_80, %c0_81], %64 {strides = array<i32>} : memref<256x128xf32, #tpu.memory_space<vmem>>, vector<256x128xf32>,
    %c0_82 = arith.constant 0 : index
    %c0_83 = arith.constant 0 : index
    %c2_84 = arith.constant 2 : index
    %c1_85 = arith.constant 1 : index
    %c0_86 = arith.constant 0 : index
    %66 = vector.load %arg3[%c0_82, %c0_83, %c2_84, %c1_85, %c0_86] : memref<1x1x18x18x128xbf16, #tpu.memory_space<vmem>>, vector<1x1x16x16x128xbf16>
    %67 = vector.shape_cast %66 : vector<1x1x16x16x128xbf16> to vector<16x16x128xbf16>
    %68 = vector.shape_cast %67 : vector<16x16x128xbf16> to vector<256x128xbf16>
    %c0_87 = arith.constant 0 : index
    %c896 = arith.constant 896 : index
    %c0_88 = arith.constant 0 : index
    %69 = vector.load %arg4[%c0_87, %c896, %c0_88] : memref<1x1152x128xbf16, #tpu.memory_space<vmem>>, vector<1x128x128xbf16>
    %70 = vector.shape_cast %69 : vector<1x128x128xbf16> to vector<128x128xbf16>
    %c0_89 = arith.constant 0 : index
    %c0_90 = arith.constant 0 : index
    %71 = vector.load %arg8[%c0_89, %c0_90] : memref<256x128xf32, #tpu.memory_space<vmem>>, vector<256x128xf32>
    %cst_91 = arith.constant dense<0.000000e+00> : vector<256x128xf32>
    %72 = tpu.matmul %68, %70, %cst_91 {dimension_numbers = #tpu.dot_dimension_numbers<[1], [0], [0], [1], [0, 0, 1, 1], [], []>} : vector<256x128xbf16>, vector<128x128xbf16>, vector<256x128xf32> -> vector<256x128xf32>
    %73 = arith.addf %71, %72 : vector<256x128xf32>
    %c0_92 = arith.constant 0 : index
    %c0_93 = arith.constant 0 : index
    %74 = vector.load %arg8[%c0_92, %c0_93] : memref<256x128xf32, #tpu.memory_space<vmem>>, vector<256x128xf32>
    tpu.vector_store %arg8[%c0_92, %c0_93], %73 {strides = array<i32>} : memref<256x128xf32, #tpu.memory_space<vmem>>, vector<256x128xf32>,
    %c0_94 = arith.constant 0 : index
    %c0_95 = arith.constant 0 : index
    %c2_96 = arith.constant 2 : index
    %c2_97 = arith.constant 2 : index
    %c0_98 = arith.constant 0 : index
    %75 = vector.load %arg3[%c0_94, %c0_95, %c2_96, %c2_97, %c0_98] : memref<1x1x18x18x128xbf16, #tpu.memory_space<vmem>>, vector<1x1x16x16x128xbf16>
    %76 = vector.shape_cast %75 : vector<1x1x16x16x128xbf16> to vector<16x16x128xbf16>
    %77 = vector.shape_cast %76 : vector<16x16x128xbf16> to vector<256x128xbf16>
    %c0_99 = arith.constant 0 : index
    %c1024 = arith.constant 1024 : index
    %c0_100 = arith.constant 0 : index
    %78 = vector.load %arg4[%c0_99, %c1024, %c0_100] : memref<1x1152x128xbf16, #tpu.memory_space<vmem>>, vector<1x128x128xbf16>
    %79 = vector.shape_cast %78 : vector<1x128x128xbf16> to vector<128x128xbf16>
    %c0_101 = arith.constant 0 : index
    %c0_102 = arith.constant 0 : index
    %80 = vector.load %arg8[%c0_101, %c0_102] : memref<256x128xf32, #tpu.memory_space<vmem>>, vector<256x128xf32>
    %cst_103 = arith.constant dense<0.000000e+00> : vector<256x128xf32>
    %81 = tpu.matmul %77, %79, %cst_103 {dimension_numbers = #tpu.dot_dimension_numbers<[1], [0], [0], [1], [0, 0, 1, 1], [], []>} : vector<256x128xbf16>, vector<128x128xbf16>, vector<256x128xf32> -> vector<256x128xf32>
    %82 = arith.addf %80, %81 : vector<256x128xf32>
    %c0_104 = arith.constant 0 : index
    %c0_105 = arith.constant 0 : index
    %83 = vector.load %arg8[%c0_104, %c0_105] : memref<256x128xf32, #tpu.memory_space<vmem>>, vector<256x128xf32>
    tpu.vector_store %arg8[%c0_104, %c0_105], %82 {strides = array<i32>} : memref<256x128xf32, #tpu.memory_space<vmem>>, vector<256x128xf32>,
    %c2_i32 = arith.constant 2 : i32
    %84 = arith.cmpi eq, %arg2, %c2_i32 : i32
    %85 = arith.extui %84 : i1 to i32
    %c0_i32_106 = arith.constant 0 : i32
    %86 = arith.cmpi ne, %85, %c0_i32_106 : i32
    scf.if %86 {
      %c0_107 = arith.constant 0 : index
      %c0_108 = arith.constant 0 : index
      %87 = vector.load %arg8[%c0_107, %c0_108] : memref<256x128xf32, #tpu.memory_space<vmem>>, vector<256x128xf32>
      %c0_109 = arith.constant 0 : index
      %c0_110 = arith.constant 0 : index
      %88 = vector.load %arg5[%c0_109, %c0_110] : memref<1x128xf32, #tpu.memory_space<vmem>>, vector<1x128xf32>
      %89 = vector.broadcast %88 : vector<1x128xf32> to vector<256x128xf32>
      %90 = arith.mulf %87, %89 : vector<256x128xf32>
      %c0_111 = arith.constant 0 : index
      %c0_112 = arith.constant 0 : index
      %91 = vector.load %arg6[%c0_111, %c0_112] : memref<1x128xf32, #tpu.memory_space<vmem>>, vector<1x128xf32>
      %92 = vector.broadcast %91 : vector<1x128xf32> to vector<256x128xf32>
      %93 = arith.addf %90, %92 : vector<256x128xf32>
      %cst_113 = arith.constant 0.000000e+00 : f32
      %94 = vector.broadcast %cst_113 : f32 to vector<256x128xf32>
      %95 = arith.maximumf %93, %94 : vector<256x128xf32>
      %c0_114 = arith.constant 0 : index
      %c0_115 = arith.constant 0 : index
      %c0_116 = arith.constant 0 : index
      %c0_117 = arith.constant 0 : index
      %96 = vector.load %arg7[%c0_114, %c0_115, %c0_116, %c0_117] : memref<1x1x256x128xf32, #tpu.memory_space<vmem>>, vector<1x1x256x128xf32>
      %97 = vector.shape_cast %96 : vector<1x1x256x128xf32> to vector<256x128xf32>
      %98 = vector.shape_cast %95 : vector<256x128xf32> to vector<1x1x256x128xf32>
      tpu.vector_store %arg7[%c0_114, %c0_115, %c0_116, %c0_117], %98 {strides = array<i32>} : memref<1x1x256x128xf32, #tpu.memory_space<vmem>>, vector<1x1x256x128xf32>,
    } else {
    }
    return
  }
  func.func @transform_0(%arg0: i32, %arg1: i32, %arg2: i32) -> (i32, i32, i32, i32, i32) {
    %0 = arith.addi %arg1, %arg2 : i32
    %c0_i32 = arith.constant 0 : i32
    %c0_i32_0 = arith.constant 0 : i32
    %c0_i32_1 = arith.constant 0 : i32
    %c0_i32_2 = arith.constant 0 : i32
    return %arg0, %0, %c0_i32, %c0_i32_0, %c0_i32_1 : i32, i32, i32, i32, i32
  }
  func.func @transform_1(%arg0: i32, %arg1: i32, %arg2: i32) -> (i32, i32, i32) {
    %c0_i32 = arith.constant 0 : i32
    %c0_i32_0 = arith.constant 0 : i32
    %c0_i32_1 = arith.constant 0 : i32
    return %arg2, %c0_i32, %c0_i32_0 : i32, i32, i32
  }
  func.func @transform_2(%arg0: i32, %arg1: i32, %arg2: i32) -> (i32, i32) {
    %c0_i32 = arith.constant 0 : i32
    %c0_i32_0 = arith.constant 0 : i32
    %c0_i32_1 = arith.constant 0 : i32
    return %c0_i32, %c0_i32_0 : i32, i32
  }
  func.func @transform_3(%arg0: i32, %arg1: i32, %arg2: i32) -> (i32, i32) {
    %c0_i32 = arith.constant 0 : i32
    %c0_i32_0 = arith.constant 0 : i32
    %c0_i32_1 = arith.constant 0 : i32
    return %c0_i32, %c0_i32_0 : i32, i32
  }
  func.func @transform_4(%arg0: i32, %arg1: i32, %arg2: i32) -> (i32, i32, i32, i32) {
    %c0_i32 = arith.constant 0 : i32
    %c0_i32_0 = arith.constant 0 : i32
    %c0_i32_1 = arith.constant 0 : i32
    return %arg0, %arg1, %c0_i32, %c0_i32_0 : i32, i32, i32, i32
  }
}

module attributes {stable_mosaic.version = 11 : i64} {
  func.func @_mm_kernel(%arg0: i32, %arg1: i32, %arg2: i32, %arg3: memref<256x128xbf16, #tpu.memory_space<vmem>>, %arg4: memref<128x128xbf16, #tpu.memory_space<vmem>>, %arg5: memref<1x128xf32, #tpu.memory_space<vmem>>, %arg6: memref<1x128xf32, #tpu.memory_space<vmem>>, %arg7: memref<256x128xf32, #tpu.memory_space<vmem>>, %arg8: memref<256x128xf32, #tpu.memory_space<vmem>>) attributes {dimension_semantics = [#tpu.dimension_semantics<parallel>, #tpu.dimension_semantics<parallel>, #tpu.dimension_semantics<arbitrary>], iteration_bounds = array<i64: 16, 1, 1>, scalar_prefetch = 0 : i64, scratch_operands = 1 : i64, tpu.core_type = #tpu.core_type<tc>, window_params = [{transform_indices = @transform_0, window_bounds = array<i64: 256, 128>}, {transform_indices = @transform_1, window_bounds = array<i64: 128, 128>}, {transform_indices = @transform_2, window_bounds = array<i64: 1, 128>}, {transform_indices = @transform_3, window_bounds = array<i64: 1, 128>}, {transform_indices = @transform_4, window_bounds = array<i64: 256, 128>}]} {
    %c0_i32 = arith.constant 0 : i32
    %0 = arith.cmpi eq, %arg2, %c0_i32 : i32
    %1 = arith.extui %0 : i1 to i32
    %c0_i32_0 = arith.constant 0 : i32
    %2 = arith.cmpi ne, %1, %c0_i32_0 : i32
    scf.if %2 {
      %cst_10 = arith.constant 0.000000e+00 : f32
      %12 = vector.broadcast %cst_10 : f32 to vector<256x128xf32>
      %c0_11 = arith.constant 0 : index
      %c0_12 = arith.constant 0 : index
      %13 = vector.load %arg8[%c0_11, %c0_12] : memref<256x128xf32, #tpu.memory_space<vmem>>, vector<256x128xf32>
      tpu.vector_store %arg8[%c0_11, %c0_12], %12 {strides = array<i32>} : memref<256x128xf32, #tpu.memory_space<vmem>>, vector<256x128xf32>,
    } else {
    }
    %c0 = arith.constant 0 : index
    %c0_1 = arith.constant 0 : index
    %3 = vector.load %arg8[%c0, %c0_1] : memref<256x128xf32, #tpu.memory_space<vmem>>, vector<256x128xf32>
    %c0_2 = arith.constant 0 : index
    %c0_3 = arith.constant 0 : index
    %4 = vector.load %arg3[%c0_2, %c0_3] : memref<256x128xbf16, #tpu.memory_space<vmem>>, vector<256x128xbf16>
    %c0_4 = arith.constant 0 : index
    %c0_5 = arith.constant 0 : index
    %5 = vector.load %arg4[%c0_4, %c0_5] : memref<128x128xbf16, #tpu.memory_space<vmem>>, vector<128x128xbf16>
    %cst = arith.constant dense<0.000000e+00> : vector<256x128xf32>
    %6 = tpu.matmul %4, %5, %cst {dimension_numbers = #tpu.dot_dimension_numbers<[1], [0], [0], [1], [0, 0, 1, 1], [], []>} : vector<256x128xbf16>, vector<128x128xbf16>, vector<256x128xf32> -> vector<256x128xf32>
    %7 = arith.addf %3, %6 : vector<256x128xf32>
    %c0_6 = arith.constant 0 : index
    %c0_7 = arith.constant 0 : index
    %8 = vector.load %arg8[%c0_6, %c0_7] : memref<256x128xf32, #tpu.memory_space<vmem>>, vector<256x128xf32>
    tpu.vector_store %arg8[%c0_6, %c0_7], %7 {strides = array<i32>} : memref<256x128xf32, #tpu.memory_space<vmem>>, vector<256x128xf32>,
    %c0_i32_8 = arith.constant 0 : i32
    %9 = arith.cmpi eq, %arg2, %c0_i32_8 : i32
    %10 = arith.extui %9 : i1 to i32
    %c0_i32_9 = arith.constant 0 : i32
    %11 = arith.cmpi ne, %10, %c0_i32_9 : i32
    scf.if %11 {
      %c0_10 = arith.constant 0 : index
      %c0_11 = arith.constant 0 : index
      %12 = vector.load %arg8[%c0_10, %c0_11] : memref<256x128xf32, #tpu.memory_space<vmem>>, vector<256x128xf32>
      %c0_12 = arith.constant 0 : index
      %c0_13 = arith.constant 0 : index
      %13 = vector.load %arg5[%c0_12, %c0_13] : memref<1x128xf32, #tpu.memory_space<vmem>>, vector<1x128xf32>
      %14 = vector.broadcast %13 : vector<1x128xf32> to vector<256x128xf32>
      %15 = arith.mulf %12, %14 : vector<256x128xf32>
      %c0_14 = arith.constant 0 : index
      %c0_15 = arith.constant 0 : index
      %16 = vector.load %arg6[%c0_14, %c0_15] : memref<1x128xf32, #tpu.memory_space<vmem>>, vector<1x128xf32>
      %17 = vector.broadcast %16 : vector<1x128xf32> to vector<256x128xf32>
      %18 = arith.addf %15, %17 : vector<256x128xf32>
      %cst_16 = arith.constant 0.000000e+00 : f32
      %19 = vector.broadcast %cst_16 : f32 to vector<256x128xf32>
      %20 = arith.maximumf %18, %19 : vector<256x128xf32>
      %c0_17 = arith.constant 0 : index
      %c0_18 = arith.constant 0 : index
      %21 = vector.load %arg7[%c0_17, %c0_18] : memref<256x128xf32, #tpu.memory_space<vmem>>, vector<256x128xf32>
      tpu.vector_store %arg7[%c0_17, %c0_18], %20 {strides = array<i32>} : memref<256x128xf32, #tpu.memory_space<vmem>>, vector<256x128xf32>,
    } else {
    }
    return
  }
  func.func @transform_0(%arg0: i32, %arg1: i32, %arg2: i32) -> (i32, i32) {
    %c0_i32 = arith.constant 0 : i32
    return %arg0, %arg2 : i32, i32
  }
  func.func @transform_1(%arg0: i32, %arg1: i32, %arg2: i32) -> (i32, i32) {
    %c0_i32 = arith.constant 0 : i32
    return %arg2, %arg1 : i32, i32
  }
  func.func @transform_2(%arg0: i32, %arg1: i32, %arg2: i32) -> (i32, i32) {
    %c0_i32 = arith.constant 0 : i32
    %c0_i32_0 = arith.constant 0 : i32
    return %c0_i32, %arg1 : i32, i32
  }
  func.func @transform_3(%arg0: i32, %arg1: i32, %arg2: i32) -> (i32, i32) {
    %c0_i32 = arith.constant 0 : i32
    %c0_i32_0 = arith.constant 0 : i32
    return %c0_i32, %arg1 : i32, i32
  }
  func.func @transform_4(%arg0: i32, %arg1: i32, %arg2: i32) -> (i32, i32) {
    %c0_i32 = arith.constant 0 : i32
    return %arg0, %arg1 : i32, i32
  }
}

module attributes {stable_mosaic.version = 11 : i64} {
  func.func @_pool_kernel(%arg0: i32, %arg1: i32, %arg2: i32, %arg3: memref<1x1x18x18x128xbf16, #tpu.memory_space<vmem>>, %arg4: memref<1x1x16x16x128xbf16, #tpu.memory_space<vmem>>, %arg5: memref<16x16x128xbf16, #tpu.memory_space<vmem>>) attributes {dimension_semantics = [#tpu.dimension_semantics<parallel>, #tpu.dimension_semantics<parallel>, #tpu.dimension_semantics<arbitrary>], iteration_bounds = array<i64: 2, 8, 3>, scalar_prefetch = 0 : i64, scratch_operands = 1 : i64, tpu.core_type = #tpu.core_type<tc>, window_params = [{transform_indices = @transform_0, window_bounds = array<i64: 1, 1, 18, 18, 128>}, {transform_indices = @transform_1, window_bounds = array<i64: 1, 1, 16, 16, 128>}]} {
    %c0_i32 = arith.constant 0 : i32
    %0 = arith.cmpi eq, %arg2, %c0_i32 : i32
    %1 = arith.extui %0 : i1 to i32
    %c0_i32_0 = arith.constant 0 : i32
    %2 = arith.cmpi ne, %1, %c0_i32_0 : i32
    scf.if %2 {
      %cst = arith.constant 0xFF80 : bf16
      %35 = vector.broadcast %cst : bf16 to vector<16x16x128xbf16>
      %c0_50 = arith.constant 0 : index
      %c0_51 = arith.constant 0 : index
      %c0_52 = arith.constant 0 : index
      %36 = vector.load %arg5[%c0_50, %c0_51, %c0_52] : memref<16x16x128xbf16, #tpu.memory_space<vmem>>, vector<16x16x128xbf16>
      tpu.vector_store %arg5[%c0_50, %c0_51, %c0_52], %35 {strides = array<i32>} : memref<16x16x128xbf16, #tpu.memory_space<vmem>>, vector<16x16x128xbf16>,
    } else {
    }
    %c0 = arith.constant 0 : index
    %c0_1 = arith.constant 0 : index
    %c0_2 = arith.constant 0 : index
    %c0_3 = arith.constant 0 : index
    %c0_4 = arith.constant 0 : index
    %3 = vector.load %arg3[%c0, %c0_1, %c0_2, %c0_3, %c0_4] : memref<1x1x18x18x128xbf16, #tpu.memory_space<vmem>>, vector<1x1x16x16x128xbf16>
    %4 = vector.shape_cast %3 : vector<1x1x16x16x128xbf16> to vector<16x16x128xbf16>
    %c0_5 = arith.constant 0 : index
    %c0_6 = arith.constant 0 : index
    %c0_7 = arith.constant 0 : index
    %c1 = arith.constant 1 : index
    %c0_8 = arith.constant 0 : index
    %5 = vector.load %arg3[%c0_5, %c0_6, %c0_7, %c1, %c0_8] : memref<1x1x18x18x128xbf16, #tpu.memory_space<vmem>>, vector<1x1x16x16x128xbf16>
    %6 = vector.shape_cast %5 : vector<1x1x16x16x128xbf16> to vector<16x16x128xbf16>
    %7 = arith.maximumf %4, %6 : vector<16x16x128xbf16>
    %c0_9 = arith.constant 0 : index
    %c0_10 = arith.constant 0 : index
    %c0_11 = arith.constant 0 : index
    %c2 = arith.constant 2 : index
    %c0_12 = arith.constant 0 : index
    %8 = vector.load %arg3[%c0_9, %c0_10, %c0_11, %c2, %c0_12] : memref<1x1x18x18x128xbf16, #tpu.memory_space<vmem>>, vector<1x1x16x16x128xbf16>
    %9 = vector.shape_cast %8 : vector<1x1x16x16x128xbf16> to vector<16x16x128xbf16>
    %10 = arith.maximumf %7, %9 : vector<16x16x128xbf16>
    %c0_13 = arith.constant 0 : index
    %c0_14 = arith.constant 0 : index
    %c1_15 = arith.constant 1 : index
    %c0_16 = arith.constant 0 : index
    %c0_17 = arith.constant 0 : index
    %11 = vector.load %arg3[%c0_13, %c0_14, %c1_15, %c0_16, %c0_17] : memref<1x1x18x18x128xbf16, #tpu.memory_space<vmem>>, vector<1x1x16x16x128xbf16>
    %12 = vector.shape_cast %11 : vector<1x1x16x16x128xbf16> to vector<16x16x128xbf16>
    %13 = arith.maximumf %10, %12 : vector<16x16x128xbf16>
    %c0_18 = arith.constant 0 : index
    %c0_19 = arith.constant 0 : index
    %c1_20 = arith.constant 1 : index
    %c1_21 = arith.constant 1 : index
    %c0_22 = arith.constant 0 : index
    %14 = vector.load %arg3[%c0_18, %c0_19, %c1_20, %c1_21, %c0_22] : memref<1x1x18x18x128xbf16, #tpu.memory_space<vmem>>, vector<1x1x16x16x128xbf16>
    %15 = vector.shape_cast %14 : vector<1x1x16x16x128xbf16> to vector<16x16x128xbf16>
    %16 = arith.maximumf %13, %15 : vector<16x16x128xbf16>
    %c0_23 = arith.constant 0 : index
    %c0_24 = arith.constant 0 : index
    %c1_25 = arith.constant 1 : index
    %c2_26 = arith.constant 2 : index
    %c0_27 = arith.constant 0 : index
    %17 = vector.load %arg3[%c0_23, %c0_24, %c1_25, %c2_26, %c0_27] : memref<1x1x18x18x128xbf16, #tpu.memory_space<vmem>>, vector<1x1x16x16x128xbf16>
    %18 = vector.shape_cast %17 : vector<1x1x16x16x128xbf16> to vector<16x16x128xbf16>
    %19 = arith.maximumf %16, %18 : vector<16x16x128xbf16>
    %c0_28 = arith.constant 0 : index
    %c0_29 = arith.constant 0 : index
    %c2_30 = arith.constant 2 : index
    %c0_31 = arith.constant 0 : index
    %c0_32 = arith.constant 0 : index
    %20 = vector.load %arg3[%c0_28, %c0_29, %c2_30, %c0_31, %c0_32] : memref<1x1x18x18x128xbf16, #tpu.memory_space<vmem>>, vector<1x1x16x16x128xbf16>
    %21 = vector.shape_cast %20 : vector<1x1x16x16x128xbf16> to vector<16x16x128xbf16>
    %22 = arith.maximumf %19, %21 : vector<16x16x128xbf16>
    %c0_33 = arith.constant 0 : index
    %c0_34 = arith.constant 0 : index
    %c2_35 = arith.constant 2 : index
    %c1_36 = arith.constant 1 : index
    %c0_37 = arith.constant 0 : index
    %23 = vector.load %arg3[%c0_33, %c0_34, %c2_35, %c1_36, %c0_37] : memref<1x1x18x18x128xbf16, #tpu.memory_space<vmem>>, vector<1x1x16x16x128xbf16>
    %24 = vector.shape_cast %23 : vector<1x1x16x16x128xbf16> to vector<16x16x128xbf16>
    %25 = arith.maximumf %22, %24 : vector<16x16x128xbf16>
    %c0_38 = arith.constant 0 : index
    %c0_39 = arith.constant 0 : index
    %c2_40 = arith.constant 2 : index
    %c2_41 = arith.constant 2 : index
    %c0_42 = arith.constant 0 : index
    %26 = vector.load %arg3[%c0_38, %c0_39, %c2_40, %c2_41, %c0_42] : memref<1x1x18x18x128xbf16, #tpu.memory_space<vmem>>, vector<1x1x16x16x128xbf16>
    %27 = vector.shape_cast %26 : vector<1x1x16x16x128xbf16> to vector<16x16x128xbf16>
    %28 = arith.maximumf %25, %27 : vector<16x16x128xbf16>
    %c0_43 = arith.constant 0 : index
    %c0_44 = arith.constant 0 : index
    %c0_45 = arith.constant 0 : index
    %29 = vector.load %arg5[%c0_43, %c0_44, %c0_45] : memref<16x16x128xbf16, #tpu.memory_space<vmem>>, vector<16x16x128xbf16>
    %30 = arith.maximumf %29, %28 : vector<16x16x128xbf16>
    %c0_46 = arith.constant 0 : index
    %c0_47 = arith.constant 0 : index
    %c0_48 = arith.constant 0 : index
    %31 = vector.load %arg5[%c0_46, %c0_47, %c0_48] : memref<16x16x128xbf16, #tpu.memory_space<vmem>>, vector<16x16x128xbf16>
    tpu.vector_store %arg5[%c0_46, %c0_47, %c0_48], %30 {strides = array<i32>} : memref<16x16x128xbf16, #tpu.memory_space<vmem>>, vector<16x16x128xbf16>,
    %c2_i32 = arith.constant 2 : i32
    %32 = arith.cmpi eq, %arg2, %c2_i32 : i32
    %33 = arith.extui %32 : i1 to i32
    %c0_i32_49 = arith.constant 0 : i32
    %34 = arith.cmpi ne, %33, %c0_i32_49 : i32
    scf.if %34 {
      %c0_50 = arith.constant 0 : index
      %c0_51 = arith.constant 0 : index
      %c0_52 = arith.constant 0 : index
      %35 = vector.load %arg5[%c0_50, %c0_51, %c0_52] : memref<16x16x128xbf16, #tpu.memory_space<vmem>>, vector<16x16x128xbf16>
      %c0_53 = arith.constant 0 : index
      %c0_54 = arith.constant 0 : index
      %c0_55 = arith.constant 0 : index
      %c0_56 = arith.constant 0 : index
      %c0_57 = arith.constant 0 : index
      %36 = vector.load %arg4[%c0_53, %c0_54, %c0_55, %c0_56, %c0_57] : memref<1x1x16x16x128xbf16, #tpu.memory_space<vmem>>, vector<1x1x16x16x128xbf16>
      %37 = vector.shape_cast %36 : vector<1x1x16x16x128xbf16> to vector<16x16x128xbf16>
      %38 = vector.shape_cast %35 : vector<16x16x128xbf16> to vector<1x1x16x16x128xbf16>
      tpu.vector_store %arg4[%c0_53, %c0_54, %c0_55, %c0_56, %c0_57], %38 {strides = array<i32>} : memref<1x1x16x16x128xbf16, #tpu.memory_space<vmem>>, vector<1x1x16x16x128xbf16>,
    } else {
    }
    return
  }
  func.func @transform_0(%arg0: i32, %arg1: i32, %arg2: i32) -> (i32, i32, i32, i32, i32) {
    %0 = arith.addi %arg1, %arg2 : i32
    %c0_i32 = arith.constant 0 : i32
    %c0_i32_0 = arith.constant 0 : i32
    %c0_i32_1 = arith.constant 0 : i32
    %c0_i32_2 = arith.constant 0 : i32
    return %arg0, %0, %c0_i32, %c0_i32_0, %c0_i32_1 : i32, i32, i32, i32, i32
  }
  func.func @transform_1(%arg0: i32, %arg1: i32, %arg2: i32) -> (i32, i32, i32, i32, i32) {
    %c0_i32 = arith.constant 0 : i32
    %c0_i32_0 = arith.constant 0 : i32
    %c0_i32_1 = arith.constant 0 : i32
    %c0_i32_2 = arith.constant 0 : i32
    return %arg0, %arg1, %c0_i32, %c0_i32_0, %c0_i32_1 : i32, i32, i32, i32, i32
  }
}

</mosaic_0001>

<bundles_post_ra>
// kernel: _lambda_.10
= control target key start
LH: loop header
LB: loop body
LE: loop exit
PB: predicated region body
PF: predicated region fallthrough
CT: control target
= control target key end

     0   :  { %s1598_s15 = smov 0   ;;  %s1600_s16 = smov 0   ;;  %s1772_s0 = inlined_call_operand.vmem [shape: bf16[4096,128], index: 0, kind: input, shape index: {}]   ;;  %s1773_s1 = inlined_call_operand.vmem [shape: bf16[128,128], index: 1, kind: input, shape index: {}]   ;;  %s1774_s2 = inlined_call_operand.vmem [shape: f32[1,128], index: 2, kind: input, shape index: {}]   ;;  %s1775_s3 = inlined_call_operand.vmem [shape: f32[1,128], index: 3, kind: input, shape index: {}]   ;;  %s1776_s4 = inlined_call_operand.vmem [shape: bf16[4096,128], index: 4, kind: output, shape index: {}]  }
   0x1   :  { %s1602_s17 = smov 0  }
   0x2 LB: > { %s33_s18 = sadd.s32 1, %s1567_s16  ;;  %p1221_p0 = scmp.ge.s32.totalorder %s1571_s17, 1  ;;  %s1571_s17 = sphi %s1602_s17, %s14_s17   ;;  %s1567_s16 = sphi %s1600_s16, %s1778_s16   ;;  %s1563_s15 = sphi %s1598_s15, %s1777_s15  }
   0x3   : > { %p35_p1 = scmp.ge.s32.totalorder %s33_s18, 16  ;;  %p221_p2 = scmp.lt.s32.totalorder %s1571_s17, 17 }
   0x5   : > { %s1780_s18 = smov (%p35_p1, %s33_s18), 0  ;;  %p222_p3 = pnand %p1221_p0, %p221_p2 }
   0x6   : > { %v1525_v0 = vld [vmem:[%s1773_s1] sm:$0xff] (!%p222_p3)   ;;  %s1222_s21 = sshll.u32 (!%p222_p3), %s1563_s15, 5  ;;  %v1526_v1 = vld [vmem:[%s1773_s1 + $0x8] sm:$0xff] (!%p222_p3)   ;;  %v1527_v2 = vld [vmem:[%s1773_s1 + $0x10] sm:$0xff] (!%p222_p3)  }
   0x7   : > { %225 = sbr.rel (%p222_p3) target bundleno = 288 (0x120), region = 36  ;;  %p268_p4 = scmp.lt.s32.totalorder (!%p222_p3), %s1222_s21, 511  ;;  %1437 = vmatprep.subr.bf16.mxu0 (!%p222_p3), %v1525_v0  ;;  %1485 = vmatprep.subr.bf16.mxu1 (!%p222_p3), %v1525_v0  ;;  %v1528_v3 = vld [vmem:[%s1773_s1 + $0x18] sm:$0xff] (!%p222_p3)   ;;  %v1529_v6 = vld [vmem:[%s1773_s1 + $0x20] sm:$0xff] (!%p222_p3)   ;;  %v1530_v7 = vld [vmem:[%s1773_s1 + $0x28] sm:$0xff] (!%p222_p3)  }
   0x8   : > { %1438 = vmatpush3.bf16.msra.mxu0 (!%p222_p3), %v1525_v0  ;;  %1493 = vmatpush3.bf16.msra.mxu1 (!%p222_p3), %v1525_v0  ;;  %v1531_v8 = vld [vmem:[%s1773_s1 + $0x30] sm:$0xff] (!%p222_p3)   ;;  %v1532_v9 = vld [vmem:[%s1773_s1 + $0x38] sm:$0xff] (!%p222_p3)   ;;  %v1669_v24 = vld [vmem:[%s1774_s2] ss:$0 sm:$0xff] (!%p222_p3) }
   0x9   : > { %1439 = vmatprep.subr.bf16.mxu0 (!%p222_p3), %v1526_v1  ;;  %1486 = vmatprep.subr.bf16.mxu1 (!%p222_p3), %v1526_v1  ;;  %v1674_v26 = vld [vmem:[%s1775_s3] ss:$0 sm:$0xff] (!%p222_p3) }
   0xc   : > { %1440 = vmatpush3.bf16.msra.mxu0 (!%p222_p3), %v1526_v1  ;;  %1494 = vmatpush3.bf16.msra.mxu1 (!%p222_p3), %v1526_v1 }
   0xd   : > { %1441 = vmatprep.subr.bf16.mxu0 (!%p222_p3), %v1527_v2  ;;  %1487 = vmatprep.subr.bf16.mxu1 (!%p222_p3), %v1527_v2 }
   0xe   : > { %s1782_s21 = smov (!%p268_p4, %s1222_s21), 511 }
   0xf   : > { %s1223_s26 = sshll.u32 %s1782_s21, 2 }
  0x10   : > { %s1633_s29 = scalar_lea.vmem %s1772_s0, %s1223_s26  ;;  %1442 = vmatpush3.bf16.msra.mxu0 %v1527_v2  ;;  %1495 = vmatpush3.bf16.msra.mxu1 %v1527_v2  ;;  %s1697_s24 = scalar_lea.vmem %s1776_s4, %s1223_s26 }
  0x11   : > { %v1533_v4 = vld [vmem:[%s1633_s29] sm:$0xff]   ;;  %1443 = vmatprep.subr.bf16.mxu0 %v1528_v3  ;;  %1488 = vmatprep.subr.bf16.mxu1 %v1528_v3  ;;  %v1535_v10 = vld [vmem:[%s1633_s29 + $0x8] sm:$0xff]   ;;  %v1537_v12 = vld [vmem:[%s1633_s29 + $0x10] sm:$0xff]  }
  0x12   : > { %v1534_v5 = vld [vmem:[%s1633_s29 + $0x40] sm:$0xff]   ;;  %1453 = vmatprep.mubr.bf16.mxu0 %v1533_v4  ;;  %v1536_v11 = vld [vmem:[%s1633_s29 + $0x48] sm:$0xff]   ;;  %v1538_v13 = vld [vmem:[%s1633_s29 + $0x50] sm:$0xff]  }
  0x13   : > { %1469 = vmatprep.mubr.bf16.mxu1 %v1534_v5  ;;  %v1539_v14 = vld [vmem:[%s1633_s29 + $0x18] sm:$0xff]   ;;  %v1541_v16 = vld [vmem:[%s1633_s29 + $0x20] sm:$0xff]   ;;  %v1543_v18 = vld [vmem:[%s1633_s29 + $0x28] sm:$0xff]  }
  0x14   : > { %1444 = vmatpush3.bf16.msra.mxu0 %v1528_v3  ;;  %1496 = vmatpush3.bf16.msra.mxu1 %v1528_v3  ;;  %v1540_v15 = vld [vmem:[%s1633_s29 + $0x58] sm:$0xff]   ;;  %v1542_v17 = vld [vmem:[%s1633_s29 + $0x60] sm:$0xff]   ;;  %v1544_v19 = vld [vmem:[%s1633_s29 + $0x68] sm:$0xff]  }
  0x15   : > { %1445 = vmatprep.subr.bf16.mxu0 %v1529_v6  ;;  %1489 = vmatprep.subr.bf16.mxu1 %v1529_v6  ;;  %v1545_v20 = vld [vmem:[%s1633_s29 + $0x30] sm:$0xff]   ;;  %v1547_v22 = vld [vmem:[%s1633_s29 + $0x38] sm:$0xff]  }
  0x16   : > { %v1546_v21 = vld [vmem:[%s1633_s29 + $0x70] sm:$0xff]   ;;  %v1548_v23 = vld [vmem:[%s1633_s29 + $0x78] sm:$0xff]  }
  0x18   : > { %1446 = vmatpush3.bf16.msra.mxu0 %v1529_v6  ;;  %1497 = vmatpush3.bf16.msra.mxu1 %v1529_v6 }
  0x19   : > { %1447 = vmatprep.subr.bf16.mxu0 %v1530_v7  ;;  %1490 = vmatprep.subr.bf16.mxu1 %v1530_v7 }
  0x1c   : > { %1448 = vmatpush3.bf16.msra.mxu0 %v1530_v7  ;;  %1498 = vmatpush3.bf16.msra.mxu1 %v1530_v7 }
  0x1d   : > { %1449 = vmatprep.subr.bf16.mxu0 %v1531_v8  ;;  %1491 = vmatprep.subr.bf16.mxu1 %v1531_v8 }
  0x20   : > { %1450 = vmatpush3.bf16.msra.mxu0 %v1531_v8  ;;  %1499 = vmatpush3.bf16.msra.mxu1 %v1531_v8 }
  0x21   : > { %1451 = vmatprep.subr.bf16.mxu0 %v1532_v9  ;;  %1492 = vmatprep.subr.bf16.mxu1 %v1532_v9 }
  0x24   : > { %1452 = vmatpush3.bf16.msra.mxu0 %v1532_v9  ;;  %1500 = vmatpush3.bf16.msra.mxu1 %v1532_v9 }
  0x27   : > { %1454 = vmatmul.mubr.bf16.vlgmr.msra.gmra.mrb[0].mxu0 %v1535_v10  ;;  %1470 = vmatmul.mubr.bf16.vlgmr.msra.gmra.mrb[0].mxu1 %v1536_v11 }
  0x28   : > { %1457 = vmatprep.mubr.bf16.mxu0 %v1537_v12  ;;  %1473 = vmatprep.mubr.bf16.mxu1 %v1538_v13 }
  0x2f   : > { %1458 = vmatmul.mubr.bf16.gmra.mrb[4].mxu0 %v1539_v14  ;;  %1474 = vmatmul.mubr.bf16.gmra.mrb[4].mxu1 %v1540_v15 }
  0x30   : > { %1461 = vmatprep.mubr.bf16.mxu0 %v1541_v16  ;;  %1477 = vmatprep.mubr.bf16.mxu1 %v1542_v17 }
  0x37   : > { %1462 = vmatmul.mubr.bf16.gmra.mrb[8].mxu0 %v1543_v18  ;;  %1478 = vmatmul.mubr.bf16.gmra.mrb[8].mxu1 %v1544_v19 }
  0x38   : > { %1465 = vmatprep.mubr.bf16.mxu0 %v1545_v20  ;;  %1481 = vmatprep.mubr.bf16.mxu1 %v1546_v21 }
  0x3f   : > { %1466 = vmatmul.mubr.bf16.gmra.mrb[12].mxu0 %v1547_v22  ;;  %1482 = vmatmul.mubr.bf16.gmra.mrb[12].mxu1 %v1548_v23 }
  0xfa   : > { %v1455_v25 = vpop.f32.mrb[0].mxu0  ;;  %v1471_v27 = vpop.f32.mrb[0].mxu1 }
  0xfb   : > { %v830_v28 = vmul.f32 %v1455_v25, %v1669_v24  ;;  %v846_v29 = vmul.f32 %v1471_v27, %v1669_v24  ;;  %v595_v30 = vpop.f32.mrb[1].mxu0  ;;  %v659_v31 = vpop.f32.mrb[1].mxu1 }
  0xfc   : > { %v828_v32 = vmul.f32 %v1669_v24, %v595_v30  ;;  %v844_v33 = vmul.f32 %v1669_v24, %v659_v31  ;;  %v1456_v34 = vpop.f32.mrb[2].mxu0  ;;  %v1472_v35 = vpop.f32.mrb[2].mxu1 }
  0xfd   : > { %v869_v36 = vadd.f32 %v1674_v26, %v830_v28  ;;  %v885_v37 = vadd.f32 %v1674_v26, %v846_v29  ;;  %v831_v38 = vmul.f32 %v1456_v34, %v1669_v24  ;;  %v847_v39 = vmul.f32 %v1472_v35, %v1669_v24  ;;  %v598_v40 = vpop.f32.mrb[3].mxu0  ;;  %v662_v41 = vpop.f32.mrb[3].mxu1 }
  0xfe   : > { %v867_v42 = vadd.f32 %v1674_v26, %v828_v32  ;;  %v883_v43 = vadd.f32 %v1674_v26, %v844_v33  ;;  %v829_v44 = vmul.f32 %v1669_v24, %v598_v40  ;;  %v845_v45 = vmul.f32 %v1669_v24, %v662_v41 }
  0xff   : > { %v870_v46 = vadd.f32 %v1674_v26, %v831_v38  ;;  %v886_v47 = vadd.f32 %v1674_v26, %v847_v39  ;;  %v901_v50 = vmax.f32 %v869_v36, 0.0  ;;  %v917_v51 = vmax.f32 %v885_v37, 0.0 }
 0x100   : > { %v868_v48 = vadd.f32 %v1674_v26, %v829_v44  ;;  %v884_v49 = vadd.f32 %v1674_v26, %v845_v45  ;;  %v899_v54 = vmax.f32 %v867_v42, 0.0  ;;  %v915_v55 = vmax.f32 %v883_v43, 0.0 }
 0x101   : > { %v902_v52 = vmax.f32 %v870_v46, 0.0  ;;  %v918_v53 = vmax.f32 %v886_v47, 0.0 }
 0x102   : > { %v900_v56 = vmax.f32 %v868_v48, 0.0  ;;  %v916_v57 = vmax.f32 %v884_v49, 0.0  ;;  %v1459_v58 = vpop.f32.mrb[4].mxu0  ;;  %v1475_v59 = vpop.f32.mrb[4].mxu1 }
 0x103   : > { %v1326_v60 = vpack.c.bf16 %v902_v52, %v901_v50  ;;  %v1366_v61 = vpack.c.bf16 %v918_v53, %v917_v51  ;;  %v834_v62 = vmul.f32 %v1459_v58, %v1669_v24  ;;  %v850_v63 = vmul.f32 %v1475_v59, %v1669_v24  ;;  %v611_v0 = vpop.f32.mrb[5].mxu0  ;;  %v675_v1 = vpop.f32.mrb[5].mxu1 }
 0x104   : > { %v1321_v2 = vpack.c.bf16 %v900_v56, %v899_v54  ;;  %v1361_v3 = vpack.c.bf16 %v916_v57, %v915_v55  ;;  %v832_v4 = vmul.f32 %v1669_v24, %v611_v0  ;;  %v848_v5 = vmul.f32 %v1669_v24, %v675_v1  ;;  %v1460_v6 = vpop.f32.mrb[6].mxu0  ;;  %v1476_v7 = vpop.f32.mrb[6].mxu1 }
 0x105   : > { %1398 = vst [vmem:[%s1697_s24 + $0x8] sm:$0xff] %v1326_v60   ;;  %1406 = vst [vmem:[%s1697_s24 + $0x48] sm:$0xff] %v1366_v61   ;;  %v873_v8 = vadd.f32 %v1674_v26, %v834_v62  ;;  %v889_v9 = vadd.f32 %v1674_v26, %v850_v63  ;;  %v835_v10 = vmul.f32 %v1460_v6, %v1669_v24  ;;  %v614_v12 = vpop.f32.mrb[7].mxu0  ;;  %v678_v13 = vpop.f32.mrb[7].mxu1 }
 0x106   : > { %v851_v11 = vmul.f32 %v1476_v7, %v1669_v24  ;;  %1322 = vst [vmem:[%s1697_s24] sm:$0xff] %v1321_v2   ;;  %1405 = vst [vmem:[%s1697_s24 + $0x40] sm:$0xff] %v1361_v3   ;;  %v871_v14 = vadd.f32 %v1674_v26, %v832_v4  ;;  %v887_v15 = vadd.f32 %v1674_v26, %v848_v5 }
 0x107   : > { %v833_v16 = vmul.f32 %v1669_v24, %v614_v12  ;;  %v849_v17 = vmul.f32 %v1669_v24, %v678_v13  ;;  %v874_v18 = vadd.f32 %v1674_v26, %v835_v10  ;;  %v905_v22 = vmax.f32 %v873_v8, 0.0 }
 0x108   : > { %v890_v19 = vadd.f32 %v1674_v26, %v851_v11  ;;  %v921_v23 = vmax.f32 %v889_v9, 0.0  ;;  %v903_v28 = vmax.f32 %v871_v14, 0.0  ;;  %v919_v29 = vmax.f32 %v887_v15, 0.0 }
 0x109   : > { %v872_v20 = vadd.f32 %v1674_v26, %v833_v16  ;;  %v888_v21 = vadd.f32 %v1674_v26, %v849_v17  ;;  %v906_v25 = vmax.f32 %v874_v18, 0.0 }
 0x10a   : > { %v922_v27 = vmax.f32 %v890_v19, 0.0  ;;  %v1463_v32 = vpop.f32.mrb[8].mxu0  ;;  %v1479_v33 = vpop.f32.mrb[8].mxu1 }
 0x10b   : > { %v904_v30 = vmax.f32 %v872_v20, 0.0  ;;  %v920_v31 = vmax.f32 %v888_v21, 0.0  ;;  %v1336_v34 = vpack.c.bf16 %v906_v25, %v905_v22  ;;  %v838_v36 = vmul.f32 %v1463_v32, %v1669_v24  ;;  %v627_v38 = vpop.f32.mrb[9].mxu0  ;;  %v691_v39 = vpop.f32.mrb[9].mxu1 }
 0x10c   : > { %v1376_v35 = vpack.c.bf16 %v922_v27, %v921_v23  ;;  %v854_v37 = vmul.f32 %v1479_v33, %v1669_v24  ;;  %v836_v42 = vmul.f32 %v1669_v24, %v627_v38  ;;  %v852_v43 = vmul.f32 %v1669_v24, %v691_v39  ;;  %v1464_v44 = vpop.f32.mrb[10].mxu0  ;;  %v1480_v45 = vpop.f32.mrb[10].mxu1 }
 0x10d   : > { %v1331_v40 = vpack.c.bf16 %v904_v30, %v903_v28  ;;  %v1371_v41 = vpack.c.bf16 %v920_v31, %v919_v29  ;;  %1400 = vst [vmem:[%s1697_s24 + $0x18] sm:$0xff] %v1336_v34   ;;  %v877_v46 = vadd.f32 %v1674_v26, %v838_v36  ;;  %v839_v48 = vmul.f32 %v1464_v44, %v1669_v24  ;;  %v630_v50 = vpop.f32.mrb[11].mxu0  ;;  %v694_v51 = vpop.f32.mrb[11].mxu1 }
 0x10e   : > { %1408 = vst [vmem:[%s1697_s24 + $0x58] sm:$0xff] %v1376_v35   ;;  %v893_v47 = vadd.f32 %v1674_v26, %v854_v37  ;;  %v855_v49 = vmul.f32 %v1480_v45, %v1669_v24  ;;  %v875_v52 = vadd.f32 %v1674_v26, %v836_v42  ;;  %v891_v53 = vadd.f32 %v1674_v26, %v852_v43 }
 0x10f   : > { %1399 = vst [vmem:[%s1697_s24 + $0x10] sm:$0xff] %v1331_v40   ;;  %1407 = vst [vmem:[%s1697_s24 + $0x50] sm:$0xff] %v1371_v41   ;;  %v837_v54 = vmul.f32 %v1669_v24, %v630_v50  ;;  %v853_v55 = vmul.f32 %v1669_v24, %v694_v51  ;;  %v878_v56 = vadd.f32 %v1674_v26, %v839_v48  ;;  %v909_v60 = vmax.f32 %v877_v46, 0.0 }
 0x110   : > { %v894_v57 = vadd.f32 %v1674_v26, %v855_v49  ;;  %v925_v61 = vmax.f32 %v893_v47, 0.0  ;;  %v907_v0 = vmax.f32 %v875_v52, 0.0  ;;  %v923_v1 = vmax.f32 %v891_v53, 0.0 }
 0x111   : > { %v876_v58 = vadd.f32 %v1674_v26, %v837_v54  ;;  %v892_v59 = vadd.f32 %v1674_v26, %v853_v55  ;;  %v910_v62 = vmax.f32 %v878_v56, 0.0 }
 0x112   : > { %v926_v63 = vmax.f32 %v894_v57, 0.0  ;;  %v1467_v4 = vpop.f32.mrb[12].mxu0  ;;  %v1483_v5 = vpop.f32.mrb[12].mxu1 }
 0x113   : > { %v908_v2 = vmax.f32 %v876_v58, 0.0  ;;  %v924_v3 = vmax.f32 %v892_v59, 0.0  ;;  %v1346_v6 = vpack.c.bf16 %v910_v62, %v909_v60  ;;  %v842_v8 = vmul.f32 %v1467_v4, %v1669_v24  ;;  %v643_v10 = vpop.f32.mrb[13].mxu0  ;;  %v707_v11 = vpop.f32.mrb[13].mxu1 }
 0x114   : > { %v1386_v7 = vpack.c.bf16 %v926_v63, %v925_v61  ;;  %v858_v9 = vmul.f32 %v1483_v5, %v1669_v24  ;;  %v840_v14 = vmul.f32 %v1669_v24, %v643_v10  ;;  %v856_v15 = vmul.f32 %v1669_v24, %v707_v11  ;;  %v1468_v16 = vpop.f32.mrb[14].mxu0  ;;  %v1484_v17 = vpop.f32.mrb[14].mxu1 }
 0x115   : > { %v1341_v12 = vpack.c.bf16 %v908_v2, %v907_v0  ;;  %v1381_v13 = vpack.c.bf16 %v924_v3, %v923_v1  ;;  %1402 = vst [vmem:[%s1697_s24 + $0x28] sm:$0xff] %v1346_v6   ;;  %v881_v18 = vadd.f32 %v1674_v26, %v842_v8  ;;  %v843_v20 = vmul.f32 %v1468_v16, %v1669_v24  ;;  %v646_v22 = vpop.f32.mrb[15].mxu0  ;;  %v710_v23 = vpop.f32.mrb[15].mxu1 }
 0x116   : > { %1410 = vst [vmem:[%s1697_s24 + $0x68] sm:$0xff] %v1386_v7   ;;  %v897_v19 = vadd.f32 %v1674_v26, %v858_v9  ;;  %v859_v21 = vmul.f32 %v1484_v17, %v1669_v24  ;;  %v879_v25 = vadd.f32 %v1674_v26, %v840_v14  ;;  %v895_v27 = vadd.f32 %v1674_v26, %v856_v15 }
 0x117   : > { %1401 = vst [vmem:[%s1697_s24 + $0x20] sm:$0xff] %v1341_v12   ;;  %1409 = vst [vmem:[%s1697_s24 + $0x60] sm:$0xff] %v1381_v13   ;;  %v841_v28 = vmul.f32 %v1669_v24, %v646_v22  ;;  %v857_v29 = vmul.f32 %v1669_v24, %v710_v23  ;;  %v882_v30 = vadd.f32 %v1674_v26, %v843_v20  ;;  %v913_v34 = vmax.f32 %v881_v18, 0.0 }
 0x118   : > { %v898_v31 = vadd.f32 %v1674_v26, %v859_v21  ;;  %v929_v35 = vmax.f32 %v897_v19, 0.0  ;;  %v911_v38 = vmax.f32 %v879_v25, 0.0  ;;  %v927_v39 = vmax.f32 %v895_v27, 0.0 }
 0x119   : > { %v880_v32 = vadd.f32 %v1674_v26, %v841_v28  ;;  %v896_v33 = vadd.f32 %v1674_v26, %v857_v29  ;;  %v914_v36 = vmax.f32 %v882_v30, 0.0 }
 0x11a   : > { %v930_v37 = vmax.f32 %v898_v31, 0.0 }
 0x11b   : > { %v912_v40 = vmax.f32 %v880_v32, 0.0  ;;  %v928_v24 = vmax.f32 %v896_v33, 0.0  ;;  %v1356_v41 = vpack.c.bf16 %v914_v36, %v913_v34 }
 0x11c   : > { %v1396_v42 = vpack.c.bf16 %v930_v37, %v929_v35 }
 0x11d   : > { %v1351_v43 = vpack.c.bf16 %v912_v40, %v911_v38  ;;  %v1391_v44 = vpack.c.bf16 %v928_v24, %v927_v39  ;;  %1404 = vst [vmem:[%s1697_s24 + $0x38] sm:$0xff] %v1356_v41  }
 0x11e   : > { %1412 = vst [vmem:[%s1697_s24 + $0x78] sm:$0xff] %v1396_v42  }
 0x11f   : > { %1403 = vst [vmem:[%s1697_s24 + $0x30] sm:$0xff] %v1351_v43   ;;  %1411 = vst [vmem:[%s1697_s24 + $0x70] sm:$0xff] %v1391_v44  }
 0x120 PF: > { %s14_s17 = sadd.s32 1, %s1571_s17   ;;  %s1777_s15 = smov %s1567_s16 }
 0x121   : > { %p11_p5 = scmp.ge.s32.totalorder %s14_s17, 18   ;;  %s1778_s16 = smov %s1780_s18 }
 0x123   :  { %13 = sbr.rel (!%p11_p5) target bundleno = 2 (0x2), region = 83 }

// kernel: _lambda_.7
= control target key start
LH: loop header
LB: loop body
LE: loop exit
PB: predicated region body
PF: predicated region fallthrough
CT: control target
= control target key end

     0   :  { %s1311_s15 = smov 0   ;;  %s1313_s16 = smov 0   ;;  %s1498_s0 = inlined_call_operand.vmem [shape: bf16[4096,128], index: 0, kind: input, shape index: {}]   ;;  %s1499_s1 = inlined_call_operand.vmem [shape: bf16[128,128], index: 1, kind: input, shape index: {}]   ;;  %s1500_s2 = inlined_call_operand.vmem [shape: f32[1,128], index: 2, kind: input, shape index: {}]   ;;  %s1501_s3 = inlined_call_operand.vmem [shape: f32[1,128], index: 3, kind: input, shape index: {}]   ;;  %s1502_s4 = inlined_call_operand.vmem [shape: f32[4096,128], index: 4, kind: output, shape index: {}]  }
   0x1   :  { %s1315_s17 = smov 0  }
   0x2 LB: > { %s33_s18 = sadd.s32 1, %s1280_s16  ;;  %p1093_p0 = scmp.ge.s32.totalorder %s1284_s17, 1  ;;  %s1284_s17 = sphi %s1315_s17, %s14_s17   ;;  %s1280_s16 = sphi %s1313_s16, %s1504_s16   ;;  %s1276_s15 = sphi %s1311_s15, %s1503_s15  }
   0x3   : > { %p35_p1 = scmp.ge.s32.totalorder %s33_s18, 16  ;;  %p221_p2 = scmp.lt.s32.totalorder %s1284_s17, 17 }
   0x5   : > { %s1506_s18 = smov (%p35_p1, %s33_s18), 0  ;;  %p222_p3 = pnand %p1093_p0, %p221_p2 }
   0x6   : > { %v1238_v0 = vld [vmem:[%s1499_s1] sm:$0xff] (!%p222_p3)   ;;  %s1094_s21 = sshll.u32 (!%p222_p3), %s1276_s15, 5  ;;  %v1239_v1 = vld [vmem:[%s1499_s1 + $0x8] sm:$0xff] (!%p222_p3)   ;;  %v1240_v2 = vld [vmem:[%s1499_s1 + $0x10] sm:$0xff] (!%p222_p3)  }
   0x7   : > { %225 = sbr.rel (%p222_p3) target bundleno = 285 (0x11d), region = 36  ;;  %p268_p4 = scmp.lt.s32.totalorder (!%p222_p3), %s1094_s21, 511  ;;  %1150 = vmatprep.subr.bf16.mxu0 (!%p222_p3), %v1238_v0  ;;  %1198 = vmatprep.subr.bf16.mxu1 (!%p222_p3), %v1238_v0  ;;  %v1241_v3 = vld [vmem:[%s1499_s1 + $0x18] sm:$0xff] (!%p222_p3)   ;;  %v1242_v6 = vld [vmem:[%s1499_s1 + $0x20] sm:$0xff] (!%p222_p3)   ;;  %v1243_v7 = vld [vmem:[%s1499_s1 + $0x28] sm:$0xff] (!%p222_p3)  }
   0x8   : > { %1151 = vmatpush3.bf16.msra.mxu0 (!%p222_p3), %v1238_v0  ;;  %1206 = vmatpush3.bf16.msra.mxu1 (!%p222_p3), %v1238_v0  ;;  %v1244_v8 = vld [vmem:[%s1499_s1 + $0x30] sm:$0xff] (!%p222_p3)   ;;  %v1245_v9 = vld [vmem:[%s1499_s1 + $0x38] sm:$0xff] (!%p222_p3)   ;;  %v1380_v24 = vld [vmem:[%s1500_s2] ss:$0 sm:$0xff] (!%p222_p3) }
   0x9   : > { %1152 = vmatprep.subr.bf16.mxu0 (!%p222_p3), %v1239_v1  ;;  %1199 = vmatprep.subr.bf16.mxu1 (!%p222_p3), %v1239_v1  ;;  %v1385_v26 = vld [vmem:[%s1501_s3] ss:$0 sm:$0xff] (!%p222_p3) }
   0xc   : > { %1153 = vmatpush3.bf16.msra.mxu0 (!%p222_p3), %v1239_v1  ;;  %1207 = vmatpush3.bf16.msra.mxu1 (!%p222_p3), %v1239_v1 }
   0xd   : > { %1154 = vmatprep.subr.bf16.mxu0 (!%p222_p3), %v1240_v2  ;;  %1200 = vmatprep.subr.bf16.mxu1 (!%p222_p3), %v1240_v2 }
   0xe   : > { %s1508_s21 = smov (!%p268_p4, %s1094_s21), 511 }
   0xf   : > { %s1095_s26 = sshll.u32 %s1508_s21, 2  ;;  %s1097_s22 = sshll.u32 %s1508_s21, 3 }
  0x10   : > { %s1344_s29 = scalar_lea.vmem %s1498_s0, %s1095_s26  ;;  %1155 = vmatpush3.bf16.msra.mxu0 %v1240_v2  ;;  %1208 = vmatpush3.bf16.msra.mxu1 %v1240_v2  ;;  %s1399_s24 = scalar_lea.vmem %s1502_s4, %s1097_s22 }
  0x11   : > { %v1246_v4 = vld [vmem:[%s1344_s29] sm:$0xff]   ;;  %1156 = vmatprep.subr.bf16.mxu0 %v1241_v3  ;;  %1201 = vmatprep.subr.bf16.mxu1 %v1241_v3  ;;  %v1248_v10 = vld [vmem:[%s1344_s29 + $0x8] sm:$0xff]   ;;  %v1250_v12 = vld [vmem:[%s1344_s29 + $0x10] sm:$0xff]  }
  0x12   : > { %v1247_v5 = vld [vmem:[%s1344_s29 + $0x40] sm:$0xff]   ;;  %1166 = vmatprep.mubr.bf16.mxu0 %v1246_v4  ;;  %v1249_v11 = vld [vmem:[%s1344_s29 + $0x48] sm:$0xff]   ;;  %v1251_v13 = vld [vmem:[%s1344_s29 + $0x50] sm:$0xff]  }
  0x13   : > { %1182 = vmatprep.mubr.bf16.mxu1 %v1247_v5  ;;  %v1252_v14 = vld [vmem:[%s1344_s29 + $0x18] sm:$0xff]   ;;  %v1254_v16 = vld [vmem:[%s1344_s29 + $0x20] sm:$0xff]   ;;  %v1256_v18 = vld [vmem:[%s1344_s29 + $0x28] sm:$0xff]  }
  0x14   : > { %1157 = vmatpush3.bf16.msra.mxu0 %v1241_v3  ;;  %1209 = vmatpush3.bf16.msra.mxu1 %v1241_v3  ;;  %v1253_v15 = vld [vmem:[%s1344_s29 + $0x58] sm:$0xff]   ;;  %v1255_v17 = vld [vmem:[%s1344_s29 + $0x60] sm:$0xff]   ;;  %v1257_v19 = vld [vmem:[%s1344_s29 + $0x68] sm:$0xff]  }
  0x15   : > { %1158 = vmatprep.subr.bf16.mxu0 %v1242_v6  ;;  %1202 = vmatprep.subr.bf16.mxu1 %v1242_v6  ;;  %v1258_v20 = vld [vmem:[%s1344_s29 + $0x30] sm:$0xff]   ;;  %v1260_v22 = vld [vmem:[%s1344_s29 + $0x38] sm:$0xff]  }
  0x16   : > { %v1259_v21 = vld [vmem:[%s1344_s29 + $0x70] sm:$0xff]   ;;  %v1261_v23 = vld [vmem:[%s1344_s29 + $0x78] sm:$0xff]  }
  0x18   : > { %1159 = vmatpush3.bf16.msra.mxu0 %v1242_v6  ;;  %1210 = vmatpush3.bf16.msra.mxu1 %v1242_v6 }
  0x19   : > { %1160 = vmatprep.subr.bf16.mxu0 %v1243_v7  ;;  %1203 = vmatprep.subr.bf16.mxu1 %v1243_v7 }
  0x1c   : > { %1161 = vmatpush3.bf16.msra.mxu0 %v1243_v7  ;;  %1211 = vmatpush3.bf16.msra.mxu1 %v1243_v7 }
  0x1d   : > { %1162 = vmatprep.subr.bf16.mxu0 %v1244_v8  ;;  %1204 = vmatprep.subr.bf16.mxu1 %v1244_v8 }
  0x20   : > { %1163 = vmatpush3.bf16.msra.mxu0 %v1244_v8  ;;  %1212 = vmatpush3.bf16.msra.mxu1 %v1244_v8 }
  0x21   : > { %1164 = vmatprep.subr.bf16.mxu0 %v1245_v9  ;;  %1205 = vmatprep.subr.bf16.mxu1 %v1245_v9 }
  0x24   : > { %1165 = vmatpush3.bf16.msra.mxu0 %v1245_v9  ;;  %1213 = vmatpush3.bf16.msra.mxu1 %v1245_v9 }
  0x27   : > { %1167 = vmatmul.mubr.bf16.vlgmr.msra.gmra.mrb[0].mxu0 %v1248_v10  ;;  %1183 = vmatmul.mubr.bf16.vlgmr.msra.gmra.mrb[0].mxu1 %v1249_v11 }
  0x28   : > { %1170 = vmatprep.mubr.bf16.mxu0 %v1250_v12  ;;  %1186 = vmatprep.mubr.bf16.mxu1 %v1251_v13 }
  0x2f   : > { %1171 = vmatmul.mubr.bf16.gmra.mrb[4].mxu0 %v1252_v14  ;;  %1187 = vmatmul.mubr.bf16.gmra.mrb[4].mxu1 %v1253_v15 }
  0x30   : > { %1174 = vmatprep.mubr.bf16.mxu0 %v1254_v16  ;;  %1190 = vmatprep.mubr.bf16.mxu1 %v1255_v17 }
  0x37   : > { %1175 = vmatmul.mubr.bf16.gmra.mrb[8].mxu0 %v1256_v18  ;;  %1191 = vmatmul.mubr.bf16.gmra.mrb[8].mxu1 %v1257_v19 }
  0x38   : > { %1178 = vmatprep.mubr.bf16.mxu0 %v1258_v20  ;;  %1194 = vmatprep.mubr.bf16.mxu1 %v1259_v21 }
  0x3f   : > { %1179 = vmatmul.mubr.bf16.gmra.mrb[12].mxu0 %v1260_v22  ;;  %1195 = vmatmul.mubr.bf16.gmra.mrb[12].mxu1 %v1261_v23 }
  0xfa   : > { %v1168_v25 = vpop.f32.mrb[0].mxu0  ;;  %v1184_v27 = vpop.f32.mrb[0].mxu1 }
  0xfb   : > { %v830_v28 = vmul.f32 %v1168_v25, %v1380_v24  ;;  %v846_v29 = vmul.f32 %v1184_v27, %v1380_v24  ;;  %v595_v30 = vpop.f32.mrb[1].mxu0  ;;  %v659_v31 = vpop.f32.mrb[1].mxu1 }
  0xfc   : > { %v828_v32 = vmul.f32 %v1380_v24, %v595_v30  ;;  %v844_v33 = vmul.f32 %v1380_v24, %v659_v31  ;;  %v1169_v34 = vpop.f32.mrb[2].mxu0  ;;  %v1185_v35 = vpop.f32.mrb[2].mxu1 }
  0xfd   : > { %v869_v36 = vadd.f32 %v1385_v26, %v830_v28  ;;  %v885_v37 = vadd.f32 %v1385_v26, %v846_v29  ;;  %v831_v38 = vmul.f32 %v1169_v34, %v1380_v24  ;;  %v847_v39 = vmul.f32 %v1185_v35, %v1380_v24  ;;  %v598_v40 = vpop.f32.mrb[3].mxu0  ;;  %v662_v41 = vpop.f32.mrb[3].mxu1 }
  0xfe   : > { %v867_v42 = vadd.f32 %v1385_v26, %v828_v32  ;;  %v883_v43 = vadd.f32 %v1385_v26, %v844_v33  ;;  %v829_v44 = vmul.f32 %v1380_v24, %v598_v40  ;;  %v845_v45 = vmul.f32 %v1380_v24, %v662_v41 }
  0xff   : > { %v901_v46 = vmax.f32 %v869_v36, 0.0  ;;  %v917_v47 = vmax.f32 %v885_v37, 0.0  ;;  %v870_v48 = vadd.f32 %v1385_v26, %v831_v38  ;;  %v886_v49 = vadd.f32 %v1385_v26, %v847_v39 }
 0x100   : > { %v899_v50 = vmax.f32 %v867_v42, 0.0  ;;  %v915_v51 = vmax.f32 %v883_v43, 0.0  ;;  %v868_v52 = vadd.f32 %v1385_v26, %v829_v44  ;;  %v884_v53 = vadd.f32 %v1385_v26, %v845_v45 }
 0x101   : > { %933 = vst [vmem:[%s1399_s24 + $0x10] sm:$0xff] %v901_v46  ;;  %949 = vst [vmem:[%s1399_s24 + $0x90] sm:$0xff] %v917_v47  ;;  %v902_v54 = vmax.f32 %v870_v48, 0.0  ;;  %v918_v55 = vmax.f32 %v886_v49, 0.0 }
 0x102   : > { %931 = vst [vmem:[%s1399_s24] sm:$0xff] %v899_v50  ;;  %947 = vst [vmem:[%s1399_s24 + $0x80] sm:$0xff] %v915_v51  ;;  %v900_v56 = vmax.f32 %v868_v52, 0.0  ;;  %v916_v57 = vmax.f32 %v884_v53, 0.0  ;;  %v1172_v58 = vpop.f32.mrb[4].mxu0  ;;  %v1188_v59 = vpop.f32.mrb[4].mxu1 }
 0x103   : > { %934 = vst [vmem:[%s1399_s24 + $0x18] sm:$0xff] %v902_v54  ;;  %950 = vst [vmem:[%s1399_s24 + $0x98] sm:$0xff] %v918_v55  ;;  %v834_v60 = vmul.f32 %v1172_v58, %v1380_v24  ;;  %v850_v61 = vmul.f32 %v1188_v59, %v1380_v24  ;;  %v611_v62 = vpop.f32.mrb[5].mxu0  ;;  %v675_v63 = vpop.f32.mrb[5].mxu1 }
 0x104   : > { %932 = vst [vmem:[%s1399_s24 + $0x8] sm:$0xff] %v900_v56  ;;  %948 = vst [vmem:[%s1399_s24 + $0x88] sm:$0xff] %v916_v57  ;;  %v832_v0 = vmul.f32 %v1380_v24, %v611_v62  ;;  %v848_v1 = vmul.f32 %v1380_v24, %v675_v63  ;;  %v1173_v2 = vpop.f32.mrb[6].mxu0  ;;  %v1189_v3 = vpop.f32.mrb[6].mxu1 }
 0x105   : > { %v873_v4 = vadd.f32 %v1385_v26, %v834_v60  ;;  %v889_v5 = vadd.f32 %v1385_v26, %v850_v61  ;;  %v835_v6 = vmul.f32 %v1173_v2, %v1380_v24  ;;  %v851_v7 = vmul.f32 %v1189_v3, %v1380_v24  ;;  %v614_v8 = vpop.f32.mrb[7].mxu0  ;;  %v678_v9 = vpop.f32.mrb[7].mxu1 }
 0x106   : > { %v871_v10 = vadd.f32 %v1385_v26, %v832_v0  ;;  %v887_v11 = vadd.f32 %v1385_v26, %v848_v1  ;;  %v833_v12 = vmul.f32 %v1380_v24, %v614_v8  ;;  %v849_v13 = vmul.f32 %v1380_v24, %v678_v9 }
 0x107   : > { %v905_v14 = vmax.f32 %v873_v4, 0.0  ;;  %v921_v15 = vmax.f32 %v889_v5, 0.0  ;;  %v874_v16 = vadd.f32 %v1385_v26, %v835_v6  ;;  %v890_v17 = vadd.f32 %v1385_v26, %v851_v7 }
 0x108   : > { %v903_v18 = vmax.f32 %v871_v10, 0.0  ;;  %v919_v19 = vmax.f32 %v887_v11, 0.0  ;;  %v872_v20 = vadd.f32 %v1385_v26, %v833_v12  ;;  %v888_v21 = vadd.f32 %v1385_v26, %v849_v13 }
 0x109   : > { %937 = vst [vmem:[%s1399_s24 + $0x30] sm:$0xff] %v905_v14  ;;  %953 = vst [vmem:[%s1399_s24 + $0xb0] sm:$0xff] %v921_v15  ;;  %v906_v22 = vmax.f32 %v874_v16, 0.0  ;;  %v922_v23 = vmax.f32 %v890_v17, 0.0 }
 0x10a   : > { %935 = vst [vmem:[%s1399_s24 + $0x20] sm:$0xff] %v903_v18  ;;  %951 = vst [vmem:[%s1399_s24 + $0xa0] sm:$0xff] %v919_v19  ;;  %v904_v25 = vmax.f32 %v872_v20, 0.0  ;;  %v920_v27 = vmax.f32 %v888_v21, 0.0  ;;  %v1176_v28 = vpop.f32.mrb[8].mxu0  ;;  %v1192_v29 = vpop.f32.mrb[8].mxu1 }
 0x10b   : > { %938 = vst [vmem:[%s1399_s24 + $0x38] sm:$0xff] %v906_v22  ;;  %954 = vst [vmem:[%s1399_s24 + $0xb8] sm:$0xff] %v922_v23  ;;  %v838_v30 = vmul.f32 %v1176_v28, %v1380_v24  ;;  %v854_v31 = vmul.f32 %v1192_v29, %v1380_v24  ;;  %v627_v32 = vpop.f32.mrb[9].mxu0  ;;  %v691_v33 = vpop.f32.mrb[9].mxu1 }
 0x10c   : > { %936 = vst [vmem:[%s1399_s24 + $0x28] sm:$0xff] %v904_v25  ;;  %952 = vst [vmem:[%s1399_s24 + $0xa8] sm:$0xff] %v920_v27  ;;  %v836_v34 = vmul.f32 %v1380_v24, %v627_v32  ;;  %v852_v35 = vmul.f32 %v1380_v24, %v691_v33  ;;  %v1177_v36 = vpop.f32.mrb[10].mxu0  ;;  %v1193_v37 = vpop.f32.mrb[10].mxu1 }
 0x10d   : > { %v877_v38 = vadd.f32 %v1385_v26, %v838_v30  ;;  %v893_v39 = vadd.f32 %v1385_v26, %v854_v31  ;;  %v839_v40 = vmul.f32 %v1177_v36, %v1380_v24  ;;  %v855_v41 = vmul.f32 %v1193_v37, %v1380_v24  ;;  %v630_v42 = vpop.f32.mrb[11].mxu0  ;;  %v694_v43 = vpop.f32.mrb[11].mxu1 }
 0x10e   : > { %v875_v44 = vadd.f32 %v1385_v26, %v836_v34  ;;  %v891_v45 = vadd.f32 %v1385_v26, %v852_v35  ;;  %v837_v46 = vmul.f32 %v1380_v24, %v630_v42  ;;  %v853_v47 = vmul.f32 %v1380_v24, %v694_v43 }
 0x10f   : > { %v909_v48 = vmax.f32 %v877_v38, 0.0  ;;  %v925_v49 = vmax.f32 %v893_v39, 0.0  ;;  %v878_v50 = vadd.f32 %v1385_v26, %v839_v40  ;;  %v894_v51 = vadd.f32 %v1385_v26, %v855_v41 }
 0x110   : > { %v907_v52 = vmax.f32 %v875_v44, 0.0  ;;  %v923_v53 = vmax.f32 %v891_v45, 0.0  ;;  %v876_v54 = vadd.f32 %v1385_v26, %v837_v46  ;;  %v892_v55 = vadd.f32 %v1385_v26, %v853_v47 }
 0x111   : > { %941 = vst [vmem:[%s1399_s24 + $0x50] sm:$0xff] %v909_v48  ;;  %957 = vst [vmem:[%s1399_s24 + $0xd0] sm:$0xff] %v925_v49  ;;  %v910_v56 = vmax.f32 %v878_v50, 0.0  ;;  %v926_v57 = vmax.f32 %v894_v51, 0.0 }
 0x112   : > { %939 = vst [vmem:[%s1399_s24 + $0x40] sm:$0xff] %v907_v52  ;;  %955 = vst [vmem:[%s1399_s24 + $0xc0] sm:$0xff] %v923_v53  ;;  %v908_v58 = vmax.f32 %v876_v54, 0.0  ;;  %v924_v59 = vmax.f32 %v892_v55, 0.0  ;;  %v1180_v60 = vpop.f32.mrb[12].mxu0  ;;  %v1196_v61 = vpop.f32.mrb[12].mxu1 }
 0x113   : > { %942 = vst [vmem:[%s1399_s24 + $0x58] sm:$0xff] %v910_v56  ;;  %958 = vst [vmem:[%s1399_s24 + $0xd8] sm:$0xff] %v926_v57  ;;  %v842_v62 = vmul.f32 %v1180_v60, %v1380_v24  ;;  %v858_v63 = vmul.f32 %v1196_v61, %v1380_v24  ;;  %v643_v0 = vpop.f32.mrb[13].mxu0  ;;  %v707_v1 = vpop.f32.mrb[13].mxu1 }
 0x114   : > { %940 = vst [vmem:[%s1399_s24 + $0x48] sm:$0xff] %v908_v58  ;;  %956 = vst [vmem:[%s1399_s24 + $0xc8] sm:$0xff] %v924_v59  ;;  %v840_v2 = vmul.f32 %v1380_v24, %v643_v0  ;;  %v856_v3 = vmul.f32 %v1380_v24, %v707_v1  ;;  %v1181_v4 = vpop.f32.mrb[14].mxu0  ;;  %v1197_v5 = vpop.f32.mrb[14].mxu1 }
 0x115   : > { %v881_v6 = vadd.f32 %v1385_v26, %v842_v62  ;;  %v897_v7 = vadd.f32 %v1385_v26, %v858_v63  ;;  %v843_v8 = vmul.f32 %v1181_v4, %v1380_v24  ;;  %v859_v9 = vmul.f32 %v1197_v5, %v1380_v24  ;;  %v646_v10 = vpop.f32.mrb[15].mxu0  ;;  %v710_v11 = vpop.f32.mrb[15].mxu1 }
 0x116   : > { %v879_v12 = vadd.f32 %v1385_v26, %v840_v2  ;;  %v895_v13 = vadd.f32 %v1385_v26, %v856_v3  ;;  %v841_v14 = vmul.f32 %v1380_v24, %v646_v10  ;;  %v857_v15 = vmul.f32 %v1380_v24, %v710_v11 }
 0x117   : > { %v913_v16 = vmax.f32 %v881_v6, 0.0  ;;  %v929_v17 = vmax.f32 %v897_v7, 0.0  ;;  %v882_v18 = vadd.f32 %v1385_v26, %v843_v8  ;;  %v898_v19 = vadd.f32 %v1385_v26, %v859_v9 }
 0x118   : > { %v911_v20 = vmax.f32 %v879_v12, 0.0  ;;  %v927_v21 = vmax.f32 %v895_v13, 0.0  ;;  %v880_v22 = vadd.f32 %v1385_v26, %v841_v14  ;;  %v896_v23 = vadd.f32 %v1385_v26, %v857_v15 }
 0x119   : > { %945 = vst [vmem:[%s1399_s24 + $0x70] sm:$0xff] %v913_v16  ;;  %961 = vst [vmem:[%s1399_s24 + $0xf0] sm:$0xff] %v929_v17  ;;  %v914_v25 = vmax.f32 %v882_v18, 0.0  ;;  %v930_v24 = vmax.f32 %v898_v19, 0.0 }
 0x11a   : > { %943 = vst [vmem:[%s1399_s24 + $0x60] sm:$0xff] %v911_v20  ;;  %959 = vst [vmem:[%s1399_s24 + $0xe0] sm:$0xff] %v927_v21  ;;  %v912_v27 = vmax.f32 %v880_v22, 0.0  ;;  %v928_v28 = vmax.f32 %v896_v23, 0.0 }
 0x11b   : > { %946 = vst [vmem:[%s1399_s24 + $0x78] sm:$0xff] %v914_v25  ;;  %962 = vst [vmem:[%s1399_s24 + $0xf8] sm:$0xff] %v930_v24 }
 0x11c   : > { %944 = vst [vmem:[%s1399_s24 + $0x68] sm:$0xff] %v912_v27  ;;  %960 = vst [vmem:[%s1399_s24 + $0xe8] sm:$0xff] %v928_v28 }
 0x11d PF: > { %s14_s17 = sadd.s32 1, %s1284_s17   ;;  %s1503_s15 = smov %s1280_s16 }
 0x11e   : > { %p11_p5 = scmp.ge.s32.totalorder %s14_s17, 18   ;;  %s1504_s16 = smov %s1506_s18 }
 0x120   :  { %13 = sbr.rel (!%p11_p5) target bundleno = 2 (0x2), region = 83 }

// kernel: _lambda_.12
= control target key start
LH: loop header
LB: loop body
LE: loop exit
PB: predicated region body
PF: predicated region fallthrough
CT: control target
= control target key end

     0   :  { %s3272_s6 = smov 0   ;;  %s3274_s7 = smov 0   ;;  %s6361_s0 = inlined_call_operand.vmem [shape: bf16[2,10,18,18,128], index: 0, kind: input, shape index: {}]   ;;  %s6362_s1 = inlined_call_operand.vmem [shape: bf16[2,8,16,16,128], index: 1, kind: output, shape index: {}]  }
   0x1   :  { %s3276_s8 = smov 0   ;;  %s3278_s9 = smov 0  }
   0x2   :  { %s3280_s10 = smov 0   ;;  %s3282_s11 = smov 0  }
   0x3   :  { %s3284_s12 = smov 0  }
   0x4 LB: > { %s23_s13 = sadd.s32 1, %s3247_s9  ;;  %s26_s14 = sadd.s32 1, %s3251_s10  ;;  %s3259_s12 = sphi %s3284_s12, %s11_s12   ;;  %s3255_s11 = sphi %s3282_s11, %s7144_s11   ;;  %s3251_s10 = sphi %s3280_s10, %s7143_s10   ;;  %s3247_s9 = sphi %s3278_s9, %s7142_s9   ;;  %s3243_s8 = sphi %s3276_s8, %s7141_s8   ;;  %s3239_s7 = sphi %s3274_s7, %s7140_s7   ;;  %s3235_s6 = sphi %s3272_s6, %s7139_s6  }
   0x5   : > { %p24_p0 = scmp.ge.s32.totalorder %s23_s13, 3  ;;  %p2881_p1 = scmp.ge.s32.totalorder %s3259_s12, 1 }
   0x6   : > { %p118_p2 = scmp.lt.s32.totalorder %s3259_s12, 49  ;;  %s30_s15 = sadd.s32 1, %s3255_s11 }
   0x7   : > { %s7146_s13 = smov (%p24_p0, %s23_s13), 0  ;;  %s7148_s14 = smov (!%p24_p0, %s26_s14), %s3251_s10 }
   0x8   : > { %p119_p3 = pnand %p2881_p1, %p118_p2  ;;  %p28_p4 = scmp.ge.s32.totalorder %s7148_s14, 8 }
   0xa   : > { %s7150_s14 = smov (%p28_p4, %s7148_s14), 0  ;;  %s7152_s15 = smov (!%p28_p4, %s30_s15), %s3255_s11 }
   0xb   : > { %p32_p5 = scmp.ge.s32.totalorder %s7152_s15, 2  ;;  %122 = sbr.rel (%p119_p3) target bundleno = 424 (0x1a8), region = 24 }
   0xd   : > { %s7154_s15 = smov (%p32_p5, %s7152_s15), 0 }
  0x12   : > { %s147_s16 = sadd.s32 %s3235_s6, %s3239_s7  ;;  %p148_p6 = scmp.lt.s32.totalorder %s3243_s8, 1 }
  0x13   : > { %p150_p7 = scmp.lt.s32.totalorder %s147_s16, 9  ;;  %p160_p8 = scmp.lt.s32.totalorder %s3239_s7, 7 }
  0x14   : > { %s7156_s8 = smov (!%p148_p6, %s3243_s8), 1  ;;  %p2886_p9 = scmp.ne.s32.totalorder %s3235_s6, 0 }
  0x15   : > { %s7158_s16 = smov (!%p150_p7, %s147_s16), 9  ;;  %s3115_s17 = smul.u32 540, %s7156_s8  ;;  %v3261_v0 = vmov (!%p2886_p9), 4286644096  }
  0x16   : > { %s3114_s18 = smul.u32 54, %s7158_s16  ;;  %s2884_s19 = sshll.u32 %s7156_s8, 8  ;;  %172 = vst [vmem:[#allocation2] sm:$0xff] (!%p2886_p9), %v3261_v0  ;;  %173 = vst [vmem:[#allocation2 + $0x8] sm:$0xff] (!%p2886_p9), %v3261_v0 }
  0x17   : > { %s7160_s7 = smov (!%p160_p8, %s3239_s7), 7  ;;  %171 = sbr.rel (%p2886_p9) target bundleno = 31 (0x1f), region = 28 }
  0x18   : > { %s154_s20 = sadd.s32 %s3115_s17, %s3114_s18  ;;  %s2883_s22 = sshll.u32 %s7160_s7, 5  ;;  %174 = vst [vmem:[#allocation2 + $0x10] sm:$0xff] (!%p2886_p9), %v3261_v0  ;;  %175 = vst [vmem:[#allocation2 + $0x18] sm:$0xff] (!%p2886_p9), %v3261_v0 }
  0x19   : > { %s2882_s21 = sshll.u32 %s154_s20, 2  ;;  %s164_s26 = sadd.s32 %s2884_s19, %s2883_s22  ;;  %176 = vst [vmem:[#allocation2 + $0x20] sm:$0xff] (!%p2886_p9), %v3261_v0  ;;  %177 = vst [vmem:[#allocation2 + $0x28] sm:$0xff] (!%p2886_p9), %v3261_v0 }
  0x1a   : > { %s3325_s25 = scalar_lea.vmem %s6361_s0, %s2882_s21  ;;  %s2885_s27 = sshll.u32 %s164_s26, 2  ;;  %178 = vst [vmem:[#allocation2 + $0x30] sm:$0xff] (!%p2886_p9), %v3261_v0  ;;  %179 = vst [vmem:[#allocation2 + $0x38] sm:$0xff] (!%p2886_p9), %v3261_v0 }
  0x1b   : > { %s3330_s30 = scalar_lea.vmem %s6362_s1, %s2885_s27  ;;  %180 = vst [vmem:[#allocation2 + $0x40] sm:$0xff] (!%p2886_p9), %v3261_v0  ;;  %181 = vst [vmem:[#allocation2 + $0x48] sm:$0xff] (!%p2886_p9), %v3261_v0 }
  0x1c   : > { %182 = vst [vmem:[#allocation2 + $0x50] sm:$0xff] (!%p2886_p9), %v3261_v0  ;;  %183 = vst [vmem:[#allocation2 + $0x58] sm:$0xff] (!%p2886_p9), %v3261_v0 }
  0x1d   : > { %184 = vst [vmem:[#allocation2 + $0x60] sm:$0xff] (!%p2886_p9), %v3261_v0  ;;  %185 = vst [vmem:[#allocation2 + $0x68] sm:$0xff] (!%p2886_p9), %v3261_v0 }
  0x1e   : > { %186 = vst [vmem:[#allocation2 + $0x70] sm:$0xff] %v3261_v0  ;;  %187 = vst [vmem:[#allocation2 + $0x78] sm:$0xff] %v3261_v0 }
  0x1f PF: > { %v3334_v1 = vld [vmem:[%s3325_s25] sm:$0xf]  ;;  %v3337_v2 = vld [vmem:[%s3325_s25 + $0x4] sm:$0xf]  ;;  %v3340_v3 = vld [vmem:[%s3325_s25 + $0xc] sm:$0xf] }
  0x20   : > { %v3343_v4 = vld [vmem:[%s3325_s25 + $0x8] sm:$0x1]  ;;  %v3346_v5 = vld [vmem:[%s3325_s25 + $0x10] sm:$0xf]  ;;  %vm236_vm0 = vsmask.f32 3328 }
  0x21   : > { %6540 = vst [vmem:[#allocation3_spill] sm:$0xff] %v3343_v4  ;;  %vm237_vm1 = vsmask.f32 7440  ;;  %v240_v6 = vshrl.u32 %v3334_v1, 16  ;;  %v243_v7 = vshll.u32 %v3334_v1, 16  ;;  %v249_v9 = vshll.u32 %v3337_v2, 16 }
  0x22   : > { %v3351_v8 = vld [vmem:[%s3325_s25 + $0x18] sm:$0xf]  ;;  %v253_v10 = vshrl.u32 %v3337_v2, 16  ;;  %v259_v11 = vshll.u32 %v3343_v4, 16  ;;  %v264_v12 = vshrl.u32 %v3340_v3, 16  ;;  %v267_v16 = vshll.u32 %v3340_v3, 16  ;;  %vm3374_vm2 = vmor %vm236_vm0, %vm237_vm1 }
  0x23   : > { %v3358_v13 = vld [vmem:[%s3325_s25 + $0x14] sm:$0x1]  ;;  %v242_v14 = vrot.slane %v240_v6, 4  ;;  %v245_v15 = vrot.slane %v243_v7, 5  ;;  %v273_v17 = vshll.u32 %v3346_v5, 16  ;;  %v3365_v19 = vrot.slane %v249_v9, 5 }
  0x24   : > { %6541 = vst [vmem:[#allocation4_spill] sm:$0xff] %v3358_v13  ;;  %v3363_v18 = vld [vmem:[%s3325_s25 + $0x1c] sm:$0xf]  ;;  %v255_v20 = vrot.slane %v253_v10, 4  ;;  %v3367_v21 = vrot.slane %v259_v11, 5  ;;  %v266_v22 = vrot.slane %v264_v12, 4 }
  0x25   : > { %v246_v23 = vor.u32 %v245_v15, %v242_v14  ;;  %v269_v24 = vrot.slane %v267_v16, 5  ;;  %v3369_v25 = vrot.slane %v273_v17, 5  ;;  %v277_v26 = vshrl.u32 %v3346_v5, 16  ;;  %v3383_v32 = vld [vmem:[%s3325_s25 + $0x20] sm:$0x1]  ;;  %p3079_p10 = scmp.ne.s32.totalorder %s3235_s6, 2 }
  0x26   : > { %v6542_v27 = vmov 0  ;;  %v256_v28 = vor.u32 %v255_v20, %v3365_v19  ;;  %v283_v29 = vshll.u32 %v3358_v13, 16  ;;  %v288_v30 = vshrl.u32 %v3351_v8, 16  ;;  %6545 = vst [vmem:[#allocation6_spill] sm:$0xff] %v3383_v32  ;;  %v3389_v37 = vld [vmem:[%s3325_s25 + $0x24] sm:$0xf] }
  0x27   : > { %v6543_v27 = vsel %vm3374_vm2, 4294967295, %v6542_v27  ;;  %v291_v31 = vshll.u32 %v3351_v8, 16  ;;  %v3385_v33 = vrot.slane %v246_v23, 4  ;;  %v270_v34 = vor.u32 %v269_v24, %v266_v22  ;;  %v3396_v42 = vld [vmem:[%s3325_s25 + $0x28] sm:$0xf] }
  0x28   : > { %6544 = vst [vmem:[#allocation5_spill] sm:$0xff] %v6543_v27  ;;  %v279_v35 = vrot.slane %v277_v26, 4  ;;  %v297_v36 = vshll.u32 %v3363_v18, 16  ;;  %v3391_v38 = vrot.slane %v256_v28, 4  ;;  %v3393_v39 = vrot.slane %v283_v29, 5 }
  0x29   : > { %v290_v40 = vrot.slane %v288_v30, 4  ;;  %v293_v41 = vrot.slane %v291_v31, 5  ;;  %v3402_v44 = vrot.slane %v270_v34, 4  ;;  %v301_v49 = vshrl.u32 %v3363_v18, 16  ;;  %v3414_v51 = vld [vmem:[%s3325_s25 + $0x2c] sm:$0x1] }
  0x2a   : > { %v280_v45 = vor.u32 %v279_v35, %v3369_v25  ;;  %v3405_v46 = vrot.slane %v297_v36, 5  ;;  %v307_v50 = vshll.u32 %v3383_v32, 16  ;;  %6546 = vst [vmem:[#allocation7_spill] sm:$0xff] %v3414_v51  ;;  %v312_v54 = vshrl.u32 %v3389_v37, 16  ;;  %v3425_v56 = vld [vmem:[%s3325_s25 + $0x30] sm:$0xf] }
  0x2b   : > { %v294_v48 = vor.u32 %v293_v41, %v290_v40  ;;  %v315_v55 = vshll.u32 %v3389_v37, 16  ;;  %v303_v58 = vrot.slane %v301_v49, 4  ;;  %v321_v60 = vshll.u32 %v3396_v42, 16  ;;  %v3433_v61 = vld [vmem:[%s3325_s25 + $0x34] sm:$0xf] }
  0x2c   : > { %v3420_v53 = vrot.slane %v280_v45, 4  ;;  %v3429_v59 = vrot.slane %v307_v50, 5  ;;  %v314_v63 = vrot.slane %v312_v54, 4  ;;  %v325_v6 = vshrl.u32 %v3396_v42, 16  ;;  %v3449_v12 = vld [vmem:[%s3325_s25 + $0x38] sm:$0x1] }
  0x2d   : > { %v3427_v57 = vrot.slane %v294_v48, 4  ;;  %v317_v0 = vrot.slane %v315_v55, 5  ;;  %v304_v9 = vor.u32 %v303_v58, %v3405_v46  ;;  %v3445_v10 = vrot.slane %v321_v60, 5  ;;  %6547 = vst [vmem:[#allocation8_spill] sm:$0xff] %v3449_v12  ;;  %v3454_v20 = vld [vmem:[%s3325_s25 + $0x3c] sm:$0xf] }
  0x2e   : > { %v331_v11 = vshll.u32 %v3414_v51, 16  ;;  %v327_v15 = vrot.slane %v325_v6, 4  ;;  %v336_v16 = vshrl.u32 %v3425_v56, 16  ;;  %v339_v17 = vshll.u32 %v3425_v56, 16  ;;  %v3463_v28 = vld [vmem:[%s3325_s25 + $0x40] sm:$0xf] }
  0x2f   : > { %v318_v14 = vor.u32 %v317_v0, %v314_v63  ;;  %v3456_v22 = vrot.slane %v304_v9, 4  ;;  %v345_v24 = vshll.u32 %v3433_v61, 16  ;;  %v349_v26 = vshrl.u32 %v3433_v61, 16  ;;  %v3476_v45 = vld [vmem:[%s3325_s25 + $0x44] sm:$0x1] }
  0x30   : > { %v3458_v23 = vrot.slane %v331_v11, 5  ;;  %v328_v30 = vor.u32 %v327_v15, %v3445_v10  ;;  %v338_v31 = vrot.slane %v336_v16, 4  ;;  %v341_v34 = vrot.slane %v339_v17, 5  ;;  %6548 = vst [vmem:[#allocation9_spill] sm:$0xff] %v3476_v45  ;;  %v3486_v55 = vld [vmem:[%s3325_s25 + $0x48] sm:$0xf] }
  0x31   : > { %v3465_v29 = vrot.slane %v318_v14, 4  ;;  %v3472_v36 = vrot.slane %v345_v24, 5  ;;  %v351_v40 = vrot.slane %v349_v26, 4  ;;  %v355_v41 = vshll.u32 %v3449_v12, 16  ;;  %6549 = vst [vmem:[#allocation10_spill] sm:$0xff] %v3486_v55 }
  0x32   : > { %v3482_v49 = vrot.slane %v328_v30, 4  ;;  %v342_v50 = vor.u32 %v341_v34, %v338_v31  ;;  %v360_v54 = vshrl.u32 %v3454_v20, 16  ;;  %v363_v63 = vshll.u32 %v3454_v20, 16  ;;  %v3494_v6 = vld [vmem:[%s3325_s25 + $0x4c] sm:$0xf] }
  0x33   : > { %v352_v58 = vor.u32 %v351_v40, %v3472_v36  ;;  %v3489_v60 = vrot.slane %v355_v41, 5  ;;  %v369_v0 = vshll.u32 %v3463_v28, 16  ;;  %6550 = vst [vmem:[#allocation11_spill] sm:$0xff] %v3494_v6  ;;  %v373_v15 = vshrl.u32 %v3463_v28, 16  ;;  %v3504_v16 = vld [vmem:[%s3325_s25 + $0x54] sm:$0xf] }
  0x34   : > { %v3500_v11 = vrot.slane %v342_v50, 4  ;;  %v362_v14 = vrot.slane %v360_v54, 4  ;;  %6551 = vst [vmem:[#allocation12_spill] sm:$0xff] %v3504_v16  ;;  %v365_v24 = vrot.slane %v363_v63, 5  ;;  %v379_v30 = vshll.u32 %v3476_v45, 16 }
  0x35   : > { %v3506_v17 = vrot.slane %v352_v58, 4  ;;  %v3508_v26 = vrot.slane %v369_v0, 5  ;;  %v3512_v31 = vld [vmem:[%s3325_s25 + $0x50] sm:$0x1]  ;;  %v375_v40 = vrot.slane %v373_v15, 4  ;;  %v384_v41 = vshrl.u32 %v3486_v55, 16 }
  0x36   : > { %6552 = vst [vmem:[#allocation13_spill] sm:$0xff] %v3512_v31  ;;  %v387_v50 = vshll.u32 %v3486_v55, 16  ;;  %v366_v58 = vor.u32 %v365_v24, %v362_v14  ;;  %v3524_v63 = vrot.slane %v379_v30, 5  ;;  %v393_v0 = vshll.u32 %v3494_v6, 16  ;;  %v3528_v9 = vld [vmem:[%s3325_s25 + $0x58] sm:$0xf] }
  0x37   : > { %6554 = vst [vmem:[#allocation15_spill] sm:$0xff] %v3528_v9  ;;  %v376_v34 = vor.u32 %v375_v40, %v3508_v26  ;;  %v386_v15 = vrot.slane %v384_v41, 4  ;;  %v397_v35 = vshrl.u32 %v3494_v6, 16  ;;  %v3533_v7 = vld [vmem:[%s3325_s25 + $0x60] sm:$0xf]  ;;  %v403_v14 = vshll.u32 %v3512_v31, 16 }
  0x38   : > { %6553 = vst [vmem:[#allocation14_spill] sm:$0xff] %v3524_v63  ;;  %v389_v48 = vrot.slane %v387_v50, 5  ;;  %6555 = vst [vmem:[#allocation16_spill] sm:$0xff] %v3533_v7  ;;  %v3535_v62 = vrot.slane %v366_v58, 4  ;;  %v3537_v52 = vrot.slane %v393_v0, 5  ;;  %v408_v24 = vshrl.u32 %v3504_v16, 16 }
  0x39   : > { %v3542_v30 = vld [vmem:[%s3325_s25 + $0x5c] sm:$0x1]  ;;  %v3544_v54 = vrot.slane %v376_v34, 4  ;;  %v399_v41 = vrot.slane %v397_v35, 4  ;;  %v411_v50 = vshll.u32 %v3504_v16, 16  ;;  %v3551_v0 = vrot.slane %v403_v14, 5 }
  0x3a   : > { %6556 = vst [vmem:[#allocation17_spill] sm:$0xff] %v3537_v52  ;;  %6557 = vst [vmem:[#allocation18_spill] sm:$0xff] %v3542_v30  ;;  %v390_v40 = vor.u32 %v389_v48, %v386_v15  ;;  %v410_v47 = vrot.slane %v408_v24, 4  ;;  %v417_v43 = vshll.u32 %v3528_v9, 16  ;;  %v3555_v31 = vld [vmem:[%s3325_s25 + $0x64] sm:$0xf] }
  0x3b   : > { %6558 = vst [vmem:[#allocation19_spill] sm:$0xff] %v3551_v0  ;;  %6559 = vst [vmem:[#allocation20_spill] sm:$0xff] %v3555_v31  ;;  %v400_v34 = vor.u32 %v399_v41, %v3537_v52  ;;  %v413_v15 = vrot.slane %v411_v50, 5  ;;  %v421_v14 = vshrl.u32 %v3528_v9, 16  ;;  %v427_v24 = vshll.u32 %v3542_v30, 16 }
  0x3c   : > { %v3561_v48 = vrot.slane %v390_v40, 4  ;;  %v3564_v45 = vrot.slane %v417_v43, 5  ;;  %v432_v58 = vshrl.u32 %v3533_v7, 16  ;;  %v3570_v12 = vld [vmem:[%s3325_s25 + $0x6c] sm:$0xf]  ;;  %v435_v50 = vshll.u32 %v3533_v7, 16 }
  0x3d   : > { %6562 = vst [vmem:[#allocation23_spill] sm:$0xff] %v3570_v12  ;;  %v3573_v51 = vld [vmem:[%s3325_s25 + $0x68] sm:$0x1]  ;;  %v3579_v41 = vrot.slane %v400_v34, 4  ;;  %v414_v43 = vor.u32 %v413_v15, %v410_v47  ;;  %v423_v35 = vrot.slane %v421_v14, 4  ;;  %v3582_v30 = vrot.slane %v427_v24, 5 }
  0x3e   : > { %6560 = vst [vmem:[#allocation21_spill] sm:$0xff] %v3561_v48  ;;  %6561 = vst [vmem:[#allocation22_spill] sm:$0xff] %v3564_v45  ;;  %v434_v32 = vrot.slane %v432_v58, 4  ;;  %v441_v13 = vshll.u32 %v3555_v31, 16  ;;  %v3586_v4 = vld [vmem:[%s3325_s25 + $0x70] sm:$0xf] }
  0x3f   : > { %6563 = vst [vmem:[#allocation24_spill] sm:$0xff] %v3573_v51  ;;  %6564 = vst [vmem:[#allocation25_spill] sm:$0xff] %v3579_v41  ;;  %v3592_v34 = vrot.slane %v414_v43, 4  ;;  %v437_v9 = vrot.slane %v435_v50, 5  ;;  %v445_v47 = vshrl.u32 %v3555_v31, 16  ;;  %v424_v15 = vor.u32 %v423_v35, %v3564_v45 }
  0x40   : > { %6565 = vst [vmem:[#allocation26_spill] sm:$0xff] %v3582_v30  ;;  %6566 = vst [vmem:[#allocation27_spill] sm:$0xff] %v3586_v4  ;;  %v3596_v14 = vrot.slane %v441_v13, 5  ;;  %v451_v58 = vshll.u32 %v3573_v51, 16  ;;  %v456_v24 = vshrl.u32 %v3570_v12, 16  ;;  %v459_v13 = vshll.u32 %v3570_v12, 16 }
  0x41   : > { %6567 = vst [vmem:[#allocation28_spill] sm:$0xff] %v3592_v34  ;;  %v3601_v7 = vld [vmem:[%s3325_s25 + $0x78] sm:$0xf]  ;;  %v3604_v16 = vld [vmem:[%s3325_s25 + $0x74] sm:$0x1]  ;;  %v438_v50 = vor.u32 %v437_v9, %v434_v32  ;;  %v447_v40 = vrot.slane %v445_v47, 4 }
  0x42   : > { %6568 = vst [vmem:[#allocation29_spill] sm:$0xff] %v3596_v14  ;;  %6569 = vst [vmem:[#allocation30_spill] sm:$0xff] %v3601_v7  ;;  %v3611_v35 = vrot.slane %v424_v15, 4  ;;  %v3613_v51 = vrot.slane %v451_v58, 5  ;;  %v458_v31 = vrot.slane %v456_v24, 4  ;;  %v465_v0 = vshll.u32 %v3586_v4, 16 }
  0x43   : > { %6570 = vst [vmem:[#allocation31_spill] sm:$0xff] %v3604_v16  ;;  %v3617_v41 = vld [vmem:[%s3325_s25 + $0x7c] sm:$0xf]  ;;  %v3619_v6 = vrot.slane %v438_v50, 4  ;;  %v448_v52 = vor.u32 %v447_v40, %v3596_v14  ;;  %v461_v43 = vrot.slane %v459_v13, 5  ;;  %v469_v32 = vshrl.u32 %v3586_v4, 16 }
  0x44   : > { %6571 = vst [vmem:[#allocation32_spill] sm:$0xff] %v3611_v35  ;;  %6572 = vst [vmem:[#allocation33_spill] sm:$0xff] %v3613_v51  ;;  %v3627_v47 = vrot.slane %v465_v0, 5  ;;  %v475_v15 = vshll.u32 %v3604_v16, 16  ;;  %v480_v58 = vshrl.u32 %v3601_v7, 16  ;;  %v483_v12 = vshll.u32 %v3601_v7, 16 }
  0x45   : > { %6573 = vst [vmem:[#allocation34_spill] sm:$0xff] %v3617_v41  ;;  %6574 = vst [vmem:[#allocation35_spill] sm:$0xff] %v3619_v6  ;;  %v3632_v24 = vld [vmem:[%s3325_s25 + $0x84] sm:$0xf]  ;;  %v3635_v50 = vld [vmem:[%s3325_s25 + $0x80] sm:$0x1]  ;;  %v462_v4 = vor.u32 %v461_v43, %v458_v31 }
  0x46   : > { %6575 = vst [vmem:[#allocation36_spill] sm:$0xff] %v3627_v47  ;;  %6576 = vst [vmem:[#allocation37_spill] sm:$0xff] %v3632_v24  ;;  %v3641_v13 = vrot.slane %v448_v52, 4  ;;  %v471_v0 = vrot.slane %v469_v32, 4  ;;  %v3643_v9 = vrot.slane %v475_v15, 5  ;;  %v482_v16 = vrot.slane %v480_v58, 4 }
  0x47   : > { %6577 = vst [vmem:[#allocation38_spill] sm:$0xff] %v3635_v50  ;;  %v489_v30 = vshll.u32 %v3617_v41, 16  ;;  %v3648_v35 = vld [vmem:[%s3325_s25 + $0x88] sm:$0xf]  ;;  %v3654_v40 = vrot.slane %v462_v4, 4  ;;  %v493_v31 = vshrl.u32 %v3617_v41, 16 }
  0x48   : > { %6578 = vst [vmem:[#allocation39_spill] sm:$0xff] %v3641_v13  ;;  %6579 = vst [vmem:[#allocation40_spill] sm:$0xff] %v3643_v9  ;;  %v472_v52 = vor.u32 %v471_v0, %v3627_v47  ;;  %v3659_v43 = vld [vmem:[%s3325_s25 + $0x90] sm:$0xf]  ;;  %v485_v32 = vrot.slane %v483_v12, 5  ;;  %v499_v58 = vshll.u32 %v3635_v50, 16 }
  0x49   : > { %6580 = vst [vmem:[#allocation41_spill] sm:$0xff] %v3648_v35  ;;  %6581 = vst [vmem:[#allocation42_spill] sm:$0xff] %v3654_v40  ;;  %v3661_v15 = vrot.slane %v489_v30, 5  ;;  %v504_v7 = vshrl.u32 %v3632_v24, 16  ;;  %v3666_v14 = vld [vmem:[%s3325_s25 + $0x8c] sm:$0x1] }
  0x4a   : > { %6582 = vst [vmem:[#allocation43_spill] sm:$0xff] %v3659_v43  ;;  %6584 = vst [vmem:[#allocation45_spill] sm:$0xff] %v3666_v14  ;;  %v3672_v0 = vrot.slane %v472_v52, 4  ;;  %v495_v45 = vrot.slane %v493_v31, 4  ;;  %v507_v12 = vshll.u32 %v3632_v24, 16  ;;  %v486_v30 = vor.u32 %v485_v32, %v482_v16 }
  0x4b   : > { %6583 = vst [vmem:[#allocation44_spill] sm:$0xff] %v3661_v15  ;;  %v3675_v41 = vrot.slane %v499_v58, 5  ;;  %v506_v50 = vrot.slane %v504_v7, 4  ;;  %v513_v51 = vshll.u32 %v3648_v35, 16  ;;  %v3679_v13 = vld [vmem:[%s3325_s25 + $0x94] sm:$0xf] }
  0x4c   : > { %6585 = vst [vmem:[#allocation46_spill] sm:$0xff] %v3672_v0  ;;  %6587 = vst [vmem:[#allocation48_spill] sm:$0xff] %v3679_v13  ;;  %v496_v52 = vor.u32 %v495_v45, %v3661_v15  ;;  %v509_v4 = vrot.slane %v507_v12, 5  ;;  %v517_v31 = vshrl.u32 %v3648_v35, 16  ;;  %v3688_v24 = vld [vmem:[%s3325_s25 + $0x9c] sm:$0xf] }
  0x4d   : > { %6586 = vst [vmem:[#allocation47_spill] sm:$0xff] %v3675_v41  ;;  %6588 = vst [vmem:[#allocation49_spill] sm:$0xff] %v3688_v24  ;;  %v3690_v16 = vrot.slane %v486_v30, 4  ;;  %v3692_v7 = vrot.slane %v513_v51, 5  ;;  %v523_v32 = vshll.u32 %v3666_v14, 16  ;;  %v528_v58 = vshrl.u32 %v3659_v43, 16 }
  0x4e   : > { %v3697_v47 = vld [vmem:[%s3325_s25 + $0x98] sm:$0x1]  ;;  %v3699_v40 = vrot.slane %v496_v52, 4  ;;  %v510_v6 = vor.u32 %v509_v4, %v506_v50  ;;  %v519_v45 = vrot.slane %v517_v31, 4  ;;  %v531_v12 = vshll.u32 %v3659_v43, 16 }
  0x4f   : > { %6589 = vst [vmem:[#allocation50_spill] sm:$0xff] %v3690_v16  ;;  %6590 = vst [vmem:[#allocation51_spill] sm:$0xff] %v3692_v7  ;;  %v3706_v30 = vrot.slane %v523_v32, 5  ;;  %v530_v14 = vrot.slane %v528_v58, 4  ;;  %v537_v35 = vshll.u32 %v3679_v13, 16  ;;  %v541_v32 = vshrl.u32 %v3679_v13, 16 }
  0x50   : > { %6591 = vst [vmem:[#allocation52_spill] sm:$0xff] %v3697_v47  ;;  %6592 = vst [vmem:[#allocation53_spill] sm:$0xff] %v3699_v40  ;;  %v3710_v9 = vld [vmem:[%s3325_s25 + $0xa0] sm:$0xf]  ;;  %v3716_v4 = vrot.slane %v510_v6, 4  ;;  %v520_v52 = vor.u32 %v519_v45, %v3692_v7  ;;  %v533_v31 = vrot.slane %v531_v12, 5 }
  0x51   : > { %6593 = vst [vmem:[#allocation54_spill] sm:$0xff] %v3706_v30  ;;  %6594 = vst [vmem:[#allocation55_spill] sm:$0xff] %v3710_v9  ;;  %v3719_v43 = vrot.slane %v537_v35, 5  ;;  %v547_v58 = vshll.u32 %v3697_v47, 16  ;;  %v552_v51 = vshrl.u32 %v3688_v24, 16  ;;  %v555_v12 = vshll.u32 %v3688_v24, 16 }
  0x52   : > { %6595 = vst [vmem:[#allocation56_spill] sm:$0xff] %v3716_v4  ;;  %v3725_v15 = vld [vmem:[%s3325_s25 + $0xa8] sm:$0xf]  ;;  %v3728_v16 = vld [vmem:[%s3325_s25 + $0xa4] sm:$0x1]  ;;  %v3734_v45 = vrot.slane %v520_v52, 4  ;;  %v534_v35 = vor.u32 %v533_v31, %v530_v14 }
  0x53   : > { %6596 = vst [vmem:[#allocation57_spill] sm:$0xff] %v3719_v43  ;;  %6597 = vst [vmem:[#allocation58_spill] sm:$0xff] %v3725_v15  ;;  %v543_v50 = vrot.slane %v541_v32, 4  ;;  %v3737_v47 = vrot.slane %v547_v58, 5  ;;  %v554_v13 = vrot.slane %v552_v51, 4  ;;  %v561_v41 = vshll.u32 %v3710_v9, 16 }
  0x54   : > { %6598 = vst [vmem:[#allocation59_spill] sm:$0xff] %v3728_v16  ;;  %6599 = vst [vmem:[#allocation60_spill] sm:$0xff] %v3734_v45  ;;  %v3741_v40 = vld [vmem:[%s3325_s25 + $0xac] sm:$0xf]  ;;  %v3747_v52 = vrot.slane %v534_v35, 4  ;;  %v557_v7 = vrot.slane %v555_v12, 5 }
  0x55   : > { %6600 = vst [vmem:[#allocation61_spill] sm:$0xff] %v3741_v40  ;;  %v565_v14 = vshrl.u32 %v3710_v9, 16  ;;  %v544_v31 = vor.u32 %v543_v50, %v3719_v43  ;;  %v3751_v32 = vrot.slane %v561_v41, 5  ;;  %v571_v51 = vshll.u32 %v3728_v16, 16  ;;  %v3756_v24 = vld [vmem:[%s3325_s25 + $0xb4] sm:$0xf] }
  0x56   : > { %6601 = vst [vmem:[#allocation62_spill] sm:$0xff] %v3747_v52  ;;  %v576_v58 = vshrl.u32 %v3725_v15, 16  ;;  %v3759_v4 = vld [vmem:[%s3325_s25 + $0xb0] sm:$0x1]  ;;  %v558_v12 = vor.u32 %v557_v7, %v554_v13  ;;  %v579_v50 = vshll.u32 %v3725_v15, 16  ;;  %v585_v30 = vshll.u32 %v3741_v40, 16 }
  0x57   : > { %6602 = vst [vmem:[#allocation63_spill] sm:$0xff] %v3759_v4  ;;  %v567_v6 = vrot.slane %v565_v14, 4  ;;  %v3766_v41 = vrot.slane %v544_v31, 4  ;;  %v3768_v9 = vrot.slane %v571_v51, 5  ;;  %v3772_v45 = vld [vmem:[%s3325_s25 + $0xb8] sm:$0xf] }
  0x58   : > { %v578_v16 = vrot.slane %v576_v58, 4  ;;  %v3774_v0 = vrot.slane %v558_v12, 4  ;;  %v581_v48 = vrot.slane %v579_v50, 5  ;;  %v589_v13 = vshrl.u32 %v3741_v40, 16  ;;  %v3785_v58 = vld [vmem:[%s3325_s25 + $0xbc] sm:$0x1] }
  0x59   : > { %v568_v34 = vor.u32 %v567_v6, %v3751_v32  ;;  %v550_v7 = vsel %vm3374_vm2, %v3766_v41, %v3737_v47  ;;  %v587_v14 = vrot.slane %v585_v30, 5  ;;  %v595_v31 = vshll.u32 %v3759_v4, 16 }
  0x5a   : > { %v600_v51 = vshrl.u32 %v3756_v24, 16  ;;  %v564_v6 = vsel %vm3374_vm2, %v3774_v0, %v3751_v32  ;;  %v582_v50 = vor.u32 %v581_v48, %v578_v16  ;;  %v591_v35 = vrot.slane %v589_v13, 4 }
  0x5b   : > { %v569_v12 = vrot.slane %v568_v34, 4  ;;  %v597_v40 = vrot.slane %v595_v31, 5  ;;  %v603_v43 = vshll.u32 %v3756_v24, 16  ;;  %v609_v47 = vshll.u32 %v3772_v45, 16 }
  0x5c   : > { %v602_v15 = vrot.slane %v600_v51, 4  ;;  %v583_v41 = vrot.slane %v582_v50, 4  ;;  %v592_v4 = vor.u32 %v591_v35, %v587_v14  ;;  %v613_v52 = vshrl.u32 %v3772_v45, 16  ;;  %v6626_v50 = vld [vmem:[#allocation22_spill] sm:$0xff] }
  0x5d   : > { %v574_v30 = vsel %vm3374_vm2, %v569_v12, %v3768_v9  ;;  %v605_v55 = vrot.slane %v603_v43, 5  ;;  %v611_v63 = vrot.slane %v609_v47, 5  ;;  %v619_v34 = vshll.u32 %v3785_v58, 16  ;;  %v6624_v12 = vld [vmem:[#allocation12_spill] sm:$0xff] }
  0x5e   : > { %v6603_v48 = vsel %vm3374_vm2, %v3385_v33, %v3365_v19  ;;  %v588_v16 = vsel %vm3374_vm2, %v583_v41, %v587_v14  ;;  %v593_v9 = vrot.slane %v592_v4, 4  ;;  %v615_v32 = vrot.slane %v613_v52, 4  ;;  %v6622_v14 = vld [vmem:[#allocation19_spill] sm:$0xff] }
  0x5f   : > { %v3804_v0 = vmax.bf16 %v6603_v48, %v3334_v1  ;;  %v6604_v43 = vsel %vm3374_vm2, %v3391_v38, %v3367_v21  ;;  %v606_v13 = vor.u32 %v605_v55, %v602_v15  ;;  %v621_v31 = vrot.slane %v619_v34, 5  ;;  %v6618_v15 = vld [vmem:[#allocation17_spill] sm:$0xff]  ;;  %v6628_v48 = vld [vmem:[#allocation15_spill] sm:$0xff] }
  0x60   : > { %v3814_v35 = vmax.bf16 %v6604_v43, %v3337_v2  ;;  %v6605_v1 = vsel %vm3374_vm2, %v3402_v44, %v3369_v25  ;;  %v6606_v33 = vsel %vm3374_vm2, %v3420_v53, %v3393_v39  ;;  %v598_v21 = vsel %vm3374_vm2, %v593_v9, %v597_v40  ;;  %v6629_v9 = vld [vmem:[#allocation32_spill] sm:$0xff] }
  0x61   : > { %v3822_v19 = vmax.bf16 %v6605_v1, %v3340_v3  ;;  %v3830_v4 = vmax.bf16 %v6606_v33, %v3346_v5  ;;  %v616_v38 = vor.u32 %v615_v32, %v611_v63  ;;  %v6607_v25 = vsel %vm3374_vm2, %v3427_v57, %v3405_v46  ;;  %v6630_v32 = vld [vmem:[#allocation26_spill] sm:$0xff]  ;;  %v6632_v1 = vld [vmem:[#allocation16_spill] sm:$0xff]  ;;  %v6633_v33 = vld [vmem:[#allocation35_spill] sm:$0xff] }
  0x62   : > { %v3840_v3 = vmax.bf16 %v6607_v25, %v3351_v8  ;;  %v6608_v39 = vsel %vm3374_vm2, %v3456_v22, %v3429_v59  ;;  %v607_v53 = vrot.slane %v606_v13, 4  ;;  %v6609_v55 = vsel %vm3374_vm2, %v3465_v29, %v3445_v10 }
  0x63   : > { %v3848_v44 = vmax.bf16 %v6608_v39, %v3363_v18  ;;  %v3856_v40 = vmax.bf16 %v6609_v55, %v3389_v37  ;;  %v6610_v8 = vsel %vm3374_vm2, %v3482_v49, %v3458_v23  ;;  %v6611_v57 = vsel %vm3374_vm2, %v3500_v11, %v3472_v36  ;;  %v6616_v11 = vld [vmem:[#allocation10_spill] sm:$0xff]  ;;  %v6638_v55 = vld [vmem:[#allocation33_spill] sm:$0xff] }
  0x64   : > { %v3864_v46 = vmax.bf16 %v6610_v8, %v3396_v42  ;;  %v3872_v59 = vmax.bf16 %v6611_v57, %v3425_v56  ;;  %v617_v22 = vrot.slane %v616_v38, 4  ;;  %v6612_v37 = vsel %vm3374_vm2, %v3506_v17, %v3489_v60  ;;  %v6614_v56 = vld [vmem:[#allocation14_spill] sm:$0xff]  ;;  %v6617_v17 = vld [vmem:[#allocation21_spill] sm:$0xff] }
  0x65   : > { %v3880_v10 = vmax.bf16 %v6612_v37, %v3433_v61  ;;  %v6613_v23 = vsel %vm3374_vm2, %v3535_v62, %v3508_v26  ;;  %v6615_v36 = vsel %vm3374_vm2, %v3544_v54, %v6614_v56  ;;  %v612_v60 = vsel %vm3374_vm2, %v607_v53, %v611_v63  ;;  %v6621_v26 = vld [vmem:[#allocation25_spill] sm:$0xff]  ;;  %v6625_v63 = vld [vmem:[#allocation28_spill] sm:$0xff]  ;;  %v6641_v37 = vld [vmem:[#allocation42_spill] sm:$0xff] }
  0x66   : > { %v3888_v29 = vmax.bf16 %v6613_v23, %v3454_v20  ;;  %v3896_v49 = vmax.bf16 %v6615_v36, %v3463_v28  ;;  %v6619_v52 = vsel %vm3374_vm2, %v6617_v17, %v6618_v15  ;;  %v6620_v20 = vld [vmem:[#allocation11_spill] sm:$0xff]  ;;  %v6623_v54 = vsel %vm3374_vm2, %v6621_v26, %v6622_v14  ;;  %v6634_v38 = vld [vmem:[#allocation29_spill] sm:$0xff]  ;;  %v6636_v53 = vld [vmem:[#allocation20_spill] sm:$0xff] }
  0x67   : > { %v3906_v62 = vmax.bf16 %v6619_v52, %v6616_v11  ;;  %v3914_v51 = vmax.bf16 %v6623_v54, %v6620_v20  ;;  %v6627_v47 = vsel %vm3374_vm2, %v6625_v63, %v6626_v50  ;;  %v622_v34 = vsel %vm3374_vm2, %v617_v22, %v621_v31  ;;  %v6637_v31 = vld [vmem:[#allocation39_spill] sm:$0xff]  ;;  %v6642_v23 = vld [vmem:[#allocation36_spill] sm:$0xff]  ;;  %v6645_v17 = vld [vmem:[#allocation46_spill] sm:$0xff] }
  0x68   : > { %v3922_v41 = vmax.bf16 %v6627_v47, %v6624_v12  ;;  %v6631_v43 = vsel %vm3374_vm2, %v6629_v9, %v6630_v32  ;;  %v6635_v25 = vsel %vm3374_vm2, %v6633_v33, %v6634_v38  ;;  %v6639_v8 = vsel %vm3374_vm2, %v6637_v31, %v6638_v55  ;;  %v6640_v22 = vld [vmem:[#allocation23_spill] sm:$0xff]  ;;  %v6646_v15 = vld [vmem:[#allocation40_spill] sm:$0xff]  ;;  %v6649_v14 = vld [vmem:[#allocation30_spill] sm:$0xff] }
  0x69   : > { %v3932_v13 = vmax.bf16 %v6631_v43, %v6628_v48  ;;  %v3940_v39 = vmax.bf16 %v6635_v25, %v6632_v1  ;;  %v3948_v57 = vmax.bf16 %v6639_v8, %v6636_v53  ;;  %v6643_v56 = vsel %vm3374_vm2, %v6641_v37, %v6642_v23  ;;  %v6644_v11 = vld [vmem:[#allocation27_spill] sm:$0xff]  ;;  %v6650_v54 = vld [vmem:[#allocation50_spill] sm:$0xff]  ;;  %v6651_v12 = vld [vmem:[#allocation44_spill] sm:$0xff] }
  0x6a   : > { %v3956_v36 = vmax.bf16 %v6643_v56, %v6640_v22  ;;  %v6647_v52 = vsel %vm3374_vm2, %v6645_v17, %v6646_v15  ;;  %v6652_v63 = vsel %vm3374_vm2, %v6650_v54, %v6651_v12  ;;  %v6654_v47 = vld [vmem:[#allocation34_spill] sm:$0xff]  ;;  %v6655_v9 = vld [vmem:[#allocation53_spill] sm:$0xff]  ;;  %v6656_v32 = vld [vmem:[#allocation47_spill] sm:$0xff]  ;;  %vm751_vm3 = vcmask 1042432  }
  0x6b   : > { %v3964_v26 = vmax.bf16 %v6647_v52, %v6644_v11  ;;  %v3972_v50 = vmax.bf16 %v6652_v63, %v6649_v14  ;;  %v6657_v43 = vsel %vm3374_vm2, %v6655_v9, %v6656_v32  ;;  %v6659_v33 = vld [vmem:[#allocation37_spill] sm:$0xff]  ;;  %v6660_v38 = vld [vmem:[#allocation56_spill] sm:$0xff]  ;;  %v6661_v25 = vld [vmem:[#allocation51_spill] sm:$0xff]  ;;  %vm752_vm4 = vcmask 1046532  }
  0x6c   : > { %v3980_v1 = vmax.bf16 %v6657_v43, %v6654_v47  ;;  %v6662_v31 = vsel %vm3374_vm2, %v6660_v38, %v6661_v25  ;;  %v6664_v8 = vld [vmem:[#allocation41_spill] sm:$0xff]  ;;  %v6665_v22 = vld [vmem:[#allocation60_spill] sm:$0xff]  ;;  %v6666_v37 = vld [vmem:[#allocation54_spill] sm:$0xff] }
  0x6d   : > { %6648 = vst [vmem:[#allocation14_spill] sm:$0xff] %v3964_v26  ;;  %6653 = vst [vmem:[#allocation10_spill] sm:$0xff] %v3972_v50  ;;  %v3988_v55 = vmax.bf16 %v6662_v31, %v6659_v33  ;;  %v6667_v23 = vsel %vm3374_vm2, %v6665_v22, %v6666_v37  ;;  %v6669_v17 = vld [vmem:[#allocation43_spill] sm:$0xff]  ;;  %v6670_v15 = vld [vmem:[#allocation62_spill] sm:$0xff] }
  0x6e   : > { %6658 = vst [vmem:[#allocation21_spill] sm:$0xff] %v3980_v1  ;;  %v3996_v56 = vmax.bf16 %v6667_v23, %v6664_v8  ;;  %v6671_v52 = vld [vmem:[#allocation57_spill] sm:$0xff]  ;;  %v6674_v12 = vld [vmem:[#allocation48_spill] sm:$0xff]  ;;  %v687_v9 = vld [vmem:[%s3325_s25] sm:$0xe] }
  0x6f   : > { %6663 = vst [vmem:[#allocation17_spill] sm:$0xff] %v3988_v55  ;;  %v6672_v14 = vsel %vm3374_vm2, %v6670_v15, %v6671_v52  ;;  %v4007_v63 = vmax.bf16 %v550_v7, %v6674_v12  ;;  %v688_v32 = vld [vmem:[%s3325_s25 + $0xc] sm:$0xe]  ;;  %v6676_v43 = vld [vmem:[#allocation49_spill] sm:$0xff]  ;;  %v6678_v38 = vld [vmem:[#allocation55_spill] sm:$0xff]  ;;  %v4025_v15 = vmax.bf16 %v612_v60, %v3756_v24  ;;  %v4028_v7 = vmax.bf16 %v622_v34, %v3772_v45 }
  0x70   : > { %6668 = vst [vmem:[#allocation11_spill] sm:$0xff] %v3996_v56  ;;  %v4004_v54 = vmax.bf16 %v6672_v14, %v6669_v17  ;;  %v4012_v33 = vmax.bf16 %v564_v6, %v6676_v43  ;;  %v4015_v25 = vmax.bf16 %v574_v30, %v6678_v38  ;;  %v6680_v31 = vld [vmem:[#allocation58_spill] sm:$0xff]  ;;  %v6682_v37 = vld [vmem:[#allocation61_spill] sm:$0xff]  ;;  %v690_v52 = vld [vmem:[%s3325_s25 + $0x24] sm:$0xe]  ;;  %v6686_v6 = vmov 0 }
  0x71   : > { %6675 = vst [vmem:[#allocation19_spill] sm:$0xff] %v4007_v63  ;;  %v4018_v22 = vmax.bf16 %v588_v16, %v6680_v31  ;;  %v4021_v23 = vmax.bf16 %v598_v21, %v6682_v37  ;;  %v689_v17 = vld [vmem:[%s3325_s25 + $0x18] sm:$0xe]  ;;  %6684 = vst [vmem:[#allocation32_spill] sm:$0xff] %v4025_v15  ;;  %v2887_v30 = vrot.slane %v687_v9, 9  ;;  %v756_v16 = vrot.slane %v3337_v2, 5 }
  0x72   : > { %6673 = vst [vmem:[#allocation25_spill] sm:$0xff] %v4004_v54  ;;  %6677 = vst [vmem:[#allocation12_spill] sm:$0xff] %v4012_v33  ;;  %v6689_v21 = vld [vmem:[#allocation3_spill] sm:$0xff]  ;;  %v2888_v43 = vrot.slane %v688_v32, 9  ;;  %v691_v24 = vld [vmem:[%s3325_s25 + $0x30] sm:$0xe] }
  0x73   : > { %6679 = vst [vmem:[#allocation28_spill] sm:$0xff] %v4015_v25  ;;  %6681 = vst [vmem:[#allocation22_spill] sm:$0xff] %v4018_v22  ;;  %v759_v14 = vrot.slane %v6689_v21, 5  ;;  %v763_v60 = vrot.slane %v3346_v5, 5  ;;  %v6690_v34 = vld [vmem:[#allocation4_spill] sm:$0xff]  ;;  %v2889_v27 = vrot.slane %v689_v17, 9 }
  0x74   : > { %6683 = vst [vmem:[#allocation15_spill] sm:$0xff] %v4021_v23  ;;  %6685 = vst [vmem:[#allocation26_spill] sm:$0xff] %v4028_v7  ;;  %v766_v31 = vrot.slane %v6690_v34, 5  ;;  %v770_v7 = vrot.slane %v3363_v18, 5  ;;  %v758_v23 = vrot.slane %v756_v16, 4  ;;  %v6691_v9 = vld [vmem:[#allocation6_spill] sm:$0xff] }
  0x75   : > { %vm4031_vm5 = vmor %vm751_vm3, %vm752_vm4  ;;  %v773_v22 = vrot.slane %v6691_v9, 5  ;;  %v2890_v2 = vrot.slane %v690_v52, 9  ;;  %v692_v21 = vld [vmem:[%s3325_s25 + $0x3c] sm:$0xe]  ;;  %v765_v5 = vrot.slane %v763_v60, 4  ;;  %v6692_v9 = vld [vmem:[#allocation7_spill] sm:$0xff] }
  0x76   : > { %v6687_v6 = vsel %vm4031_vm5, 4294967295, %v6686_v6  ;;  %v4043_v15 = vsel %vm4031_vm5, %v2887_v30, %v756_v16  ;;  %v4049_v32 = vsel %vm4031_vm5, %v2888_v43, %v763_v60  ;;  %v4053_v17 = vsel %vm4031_vm5, %v2889_v27, %v770_v7  ;;  %v693_v34 = vld [vmem:[%s3325_s25 + $0x48] sm:$0xe]  ;;  %v695_v63 = vld [vmem:[%s3325_s25 + $0x60] sm:$0xe] }
  0x77   : > { %6688 = vst [vmem:[#allocation16_spill] sm:$0xff] %v6687_v6  ;;  %v772_v18 = vrot.slane %v770_v7, 4  ;;  %v4058_v30 = vsel %vm4031_vm5, %v758_v23, %v759_v14  ;;  %v777_v16 = vrot.slane %v3396_v42, 5  ;;  %v780_v52 = vrot.slane %v6692_v9, 5  ;;  %v6693_v60 = vld [vmem:[#allocation8_spill] sm:$0xff] }
  0x78   : > { %v2891_v25 = vrot.slane %v691_v24, 9  ;;  %v4064_v43 = vsel %vm4031_vm5, %v765_v5, %v766_v31  ;;  %v784_v7 = vrot.slane %v3433_v61, 5  ;;  %v787_v23 = vrot.slane %v6693_v60, 5  ;;  %v694_v14 = vld [vmem:[%s3325_s25 + $0x54] sm:$0xe] }
  0x79   : > { %v4068_v27 = vsel %vm4031_vm5, %v772_v18, %v773_v22  ;;  %v4075_v42 = vsel %vm4031_vm5, %v2890_v2, %v777_v16  ;;  %v779_v9 = vrot.slane %v777_v16, 4  ;;  %v2892_v24 = vrot.slane %v692_v21, 9  ;;  %v6694_v5 = vld [vmem:[#allocation9_spill] sm:$0xff]  ;;  %v697_v56 = vld [vmem:[%s3325_s25 + $0x78] sm:$0xe] }
  0x7a   : > { %v791_v33 = vrot.slane %v3463_v28, 5  ;;  %v4080_v31 = vsel %vm4031_vm5, %v2891_v25, %v784_v7  ;;  %v786_v22 = vrot.slane %v784_v7, 4  ;;  %v794_v18 = vrot.slane %v6694_v5, 5  ;;  %v696_v25 = vld [vmem:[%s3325_s25 + $0x6c] sm:$0xe]  ;;  %v6695_v7 = vld [vmem:[#allocation13_spill] sm:$0xff] }
  0x7b   : > { %v2893_v61 = vrot.slane %v693_v34, 9  ;;  %v4086_v60 = vsel %vm4031_vm5, %v779_v9, %v780_v52  ;;  %v798_v28 = vrot.slane %v6620_v20, 5  ;;  %v801_v34 = vrot.slane %v6695_v7, 5  ;;  %v6696_v20 = vld [vmem:[#allocation18_spill] sm:$0xff]  ;;  %v699_v1 = vld [vmem:[%s3325_s25 + $0x90] sm:$0xe] }
  0x7c   : > { %v4090_v2 = vsel %vm4031_vm5, %v2892_v24, %v791_v33  ;;  %v793_v21 = vrot.slane %v791_v33, 4  ;;  %v4096_v16 = vsel %vm4031_vm5, %v786_v22, %v787_v23  ;;  %v2894_v5 = vrot.slane %v694_v14, 9  ;;  %v701_v26 = vld [vmem:[%s3325_s25 + $0xa8] sm:$0xe]  ;;  %v4413_v6 = vld [vmem:[%s3325_s25 + $0xac] sm:$0xf] }
  0x7d   : > { %v805_v54 = vrot.slane %v6628_v48, 5  ;;  %v4106_v33 = vsel %vm4031_vm5, %v2893_v61, %v798_v28  ;;  %v800_v9 = vrot.slane %v798_v28, 4  ;;  %v808_v24 = vrot.slane %v6696_v20, 5  ;;  %v6697_v61 = vld [vmem:[#allocation24_spill] sm:$0xff]  ;;  %6747 = vst [vmem:[#allocation55_spill] sm:$0xff] %v4413_v6 }
  0x7e   : > { %v4102_v52 = vsel %vm4031_vm5, %v793_v21, %v794_v18  ;;  %v2895_v22 = vrot.slane %v695_v63, 9  ;;  %v812_v48 = vrot.slane %v6636_v53, 5  ;;  %v698_v18 = vld [vmem:[%s3325_s25 + $0x84] sm:$0xe]  ;;  %v815_v28 = vrot.slane %v6697_v61, 5 }
  0x7f   : > { %v4112_v23 = vsel %vm4031_vm5, %v2894_v5, %v805_v54  ;;  %v807_v14 = vrot.slane %v805_v54, 4  ;;  %v4118_v21 = vsel %vm4031_vm5, %v800_v9, %v801_v34  ;;  %v2896_v7 = vrot.slane %v696_v25, 9  ;;  %v6698_v53 = vld [vmem:[#allocation31_spill] sm:$0xff] }
  0x80   : > { %v819_v20 = vrot.slane %v6644_v11, 5  ;;  %v4128_v54 = vsel %vm4031_vm5, %v2895_v22, %v812_v48  ;;  %v814_v63 = vrot.slane %v812_v48, 4  ;;  %v822_v5 = vrot.slane %v6698_v53, 5  ;;  %v6699_v22 = vld [vmem:[#allocation38_spill] sm:$0xff] }
  0x81   : > { %v4124_v55 = vsel %vm4031_vm5, %v807_v14, %v808_v24  ;;  %v2897_v9 = vrot.slane %v697_v56, 9  ;;  %v826_v11 = vrot.slane %v6654_v47, 5  ;;  %v700_v24 = vld [vmem:[%s3325_s25 + $0x9c] sm:$0xe]  ;;  %v829_v48 = vrot.slane %v6699_v22, 5  ;;  %v6701_v47 = vld [vmem:[#allocation45_spill] sm:$0xff] }
  0x82   : > { %v4134_v34 = vsel %vm4031_vm5, %v2896_v7, %v819_v20  ;;  %v821_v25 = vrot.slane %v819_v20, 4  ;;  %v4140_v14 = vsel %vm4031_vm5, %v814_v63, %v815_v28  ;;  %v2898_v61 = vrot.slane %v698_v18, 9  ;;  %v702_v22 = vld [vmem:[%s3325_s25 + $0xb4] sm:$0xe] }
  0x83   : > { %v833_v53 = vrot.slane %v6664_v8, 5  ;;  %v4150_v56 = vsel %vm4031_vm5, %v2897_v9, %v826_v11  ;;  %v828_v7 = vrot.slane %v826_v11, 4  ;;  %v836_v20 = vrot.slane %v6701_v47, 5 }
  0x84   : > { %v4146_v50 = vsel %vm4031_vm5, %v821_v25, %v822_v5  ;;  %6700 = vst [vmem:[#allocation35_spill] sm:$0xff] %v4150_v56  ;;  %v2899_v18 = vrot.slane %v699_v1, 9  ;;  %v840_v8 = vrot.slane %v6674_v12, 5  ;;  %v6702_v25 = vld [vmem:[#allocation52_spill] sm:$0xff]  ;;  %v2900_v56 = vrot.slane %v700_v24, 9  ;;  %v6704_v12 = vld [vmem:[#allocation59_spill] sm:$0xff] }
  0x85   : > { %v4156_v28 = vsel %vm4031_vm5, %v2898_v61, %v833_v53  ;;  %v835_v63 = vrot.slane %v833_v53, 4  ;;  %v4162_v5 = vsel %vm4031_vm5, %v828_v7, %v829_v48  ;;  %v843_v9 = vrot.slane %v6702_v25, 5 }
  0x86   : > { %v847_v11 = vrot.slane %v6678_v38, 5  ;;  %v4172_v61 = vsel %vm4031_vm5, %v2899_v18, %v840_v8  ;;  %v842_v1 = vrot.slane %v840_v8, 4  ;;  %v850_v53 = vrot.slane %v6704_v12, 5 }
  0x87   : > { %v4168_v47 = vsel %vm4031_vm5, %v835_v63, %v836_v20  ;;  %v2901_v25 = vrot.slane %v701_v26, 9  ;;  %v854_v24 = vrot.slane %v6682_v37, 5  ;;  %v6705_v20 = vld [vmem:[#allocation63_spill] sm:$0xff]  ;;  %v861_v18 = vrot.slane %v3772_v45, 5 }
  0x88   : > { %6703 = vst [vmem:[#allocation29_spill] sm:$0xff] %v4168_v47  ;;  %v4177_v48 = vsel %vm4031_vm5, %v2900_v56, %v847_v11  ;;  %v849_v7 = vrot.slane %v847_v11, 4  ;;  %v4182_v38 = vsel %vm4031_vm5, %v842_v1, %v843_v9  ;;  %v857_v63 = vrot.slane %v6705_v20, 5 }
  0x89   : > { %v2902_v47 = vrot.slane %v702_v22, 9  ;;  %v4192_v56 = vsel %vm4031_vm5, %v2901_v25, %v854_v24  ;;  %v856_v26 = vrot.slane %v854_v24, 4  ;;  %v864_v37 = vrot.slane %v3785_v58, 5  ;;  %v6722_v24 = vld [vmem:[#allocation15_spill] sm:$0xff] }
  0x8a   : > { %v4188_v8 = vsel %vm4031_vm5, %v849_v7, %v850_v53  ;;  %v863_v11 = vrot.slane %v861_v18, 4  ;;  %v898_v22 = vmax.bf16 %v4043_v15, %v3804_v0  ;;  %v899_v45 = vmax.bf16 %v4058_v30, %v3814_v35  ;;  %v4285_v7 = vld [vmem:[%s3325_s25 + $0x34] sm:$0xf] }
  0x8b   : > { %v4197_v9 = vsel %vm4031_vm5, %v2902_v47, %v861_v18  ;;  %v4205_v1 = vsel %vm4031_vm5, %v856_v26, %v857_v63  ;;  %v900_v12 = vmax.bf16 %v4049_v32, %v3822_v19  ;;  %v901_v58 = vmax.bf16 %v4064_v43, %v3830_v4  ;;  %v6706_v32 = vld [vmem:[#allocation14_spill] sm:$0xff]  ;;  %6720 = vst [vmem:[#allocation23_spill] sm:$0xff] %v4285_v7  ;;  %v4299_v26 = vld [vmem:[%s3325_s25 + $0x40] sm:$0xf] }
  0x8c   : > { %v902_v47 = vmax.bf16 %v4053_v17, %v3840_v3  ;;  %v4215_v53 = vsel %vm4031_vm5, %v863_v11, %v864_v37  ;;  %v903_v0 = vmax.bf16 %v4068_v27, %v3848_v44  ;;  %v904_v35 = vmax.bf16 %v4075_v42, %v3856_v40  ;;  %v6707_v17 = vld [vmem:[#allocation10_spill] sm:$0xff]  ;;  %v6711_v27 = vld [vmem:[#allocation11_spill] sm:$0xff]  ;;  %6725 = vst [vmem:[#allocation42_spill] sm:$0xff] %v4299_v26  ;;  %v4302_v37 = vld [vmem:[%s3325_s25 + $0x48] sm:$0xf] }
  0x8d   : > { %v905_v15 = vmax.bf16 %v4086_v60, %v3864_v46  ;;  %v906_v19 = vmax.bf16 %v4080_v31, %v3872_v59  ;;  %v907_v4 = vmax.bf16 %v4096_v16, %v3880_v10  ;;  %v908_v3 = vmax.bf16 %v4090_v2, %v3888_v29  ;;  %v4256_v31 = vld [vmem:[%s3325_s25 + $0xc] sm:$0xf]  ;;  %v4265_v60 = vld [vmem:[%s3325_s25 + $0x1c] sm:$0xf]  ;;  %v6715_v2 = vld [vmem:[#allocation25_spill] sm:$0xff] }
  0x8e   : > { %v909_v44 = vmax.bf16 %v4102_v52, %v3896_v49  ;;  %v910_v40 = vmax.bf16 %v4106_v33, %v3906_v62  ;;  %v911_v46 = vmax.bf16 %v4118_v21, %v3914_v51  ;;  %v912_v59 = vmax.bf16 %v4112_v23, %v3922_v41  ;;  %v6708_v41 = vld [vmem:[#allocation35_spill] sm:$0xff]  ;;  %6714 = vst [vmem:[#allocation39_spill] sm:$0xff] %v4265_v60  ;;  %v6717_v23 = vld [vmem:[#allocation12_spill] sm:$0xff]  ;;  %v6724_v63 = vld [vmem:[#allocation26_spill] sm:$0xff] }
  0x8f   : > { %v913_v10 = vmax.bf16 %v4124_v55, %v3932_v13  ;;  %v914_v29 = vmax.bf16 %v4128_v54, %v3940_v39  ;;  %v915_v49 = vmax.bf16 %v4140_v14, %v3948_v57  ;;  %v916_v62 = vmax.bf16 %v4134_v34, %v3956_v36  ;;  %v6709_v13 = vld [vmem:[#allocation21_spill] sm:$0xff]  ;;  %v6716_v52 = vld [vmem:[#allocation19_spill] sm:$0xff]  ;;  %v6718_v54 = vld [vmem:[#allocation28_spill] sm:$0xff] }
  0x90   : > { %v917_v51 = vmax.bf16 %v4146_v50, %v6706_v32  ;;  %v918_v30 = vmax.bf16 %v6708_v41, %v6707_v17  ;;  %v919_v55 = vmax.bf16 %v4162_v5, %v6709_v13  ;;  %v6710_v39 = vld [vmem:[#allocation17_spill] sm:$0xff]  ;;  %v4262_v50 = vld [vmem:[%s3325_s25 + $0x18] sm:$0xf]  ;;  %v922_v16 = vmax.bf16 %v4172_v61, %v6715_v2  ;;  %v4276_v14 = vld [vmem:[%s3325_s25 + $0x24] sm:$0xf] }
  0x91   : > { %v920_v43 = vmax.bf16 %v4156_v28, %v6710_v39  ;;  %v6712_v57 = vld [vmem:[#allocation29_spill] sm:$0xff]  ;;  %v923_v33 = vmax.bf16 %v4182_v38, %v6716_v52  ;;  %v924_v21 = vmax.bf16 %v4177_v48, %v6717_v23  ;;  %v925_v34 = vmax.bf16 %v4188_v8, %v6718_v54  ;;  %v4279_v28 = vld [vmem:[%s3325_s25 + $0x28] sm:$0xf]  ;;  %v6721_v61 = vld [vmem:[#allocation22_spill] sm:$0xff] }
  0x92   : > { %v921_v42 = vmax.bf16 %v6712_v57, %v6711_v27  ;;  %v4259_v36 = vld [vmem:[%s3325_s25 + $0x10] sm:$0xf]  ;;  %6719 = vst [vmem:[#allocation33_spill] sm:$0xff] %v4279_v28  ;;  %v926_v25 = vmax.bf16 %v4192_v56, %v6721_v61  ;;  %v927_v48 = vmax.bf16 %v4205_v1, %v6722_v24  ;;  %v6723_v38 = vld [vmem:[#allocation32_spill] sm:$0xff]  ;;  %v929_v18 = vmax.bf16 %v4215_v53, %v6724_v63  ;;  %v4296_v8 = vld [vmem:[%s3325_s25 + $0x3c] sm:$0xf] }
  0x93   : > { %6713 = vst [vmem:[#allocation20_spill] sm:$0xff] %v4259_v36  ;;  %v4282_v5 = vld [vmem:[%s3325_s25 + $0x30] sm:$0xf]  ;;  %v928_v20 = vmax.bf16 %v4197_v9, %v6723_v38  ;;  %v4305_v11 = vld [vmem:[%s3325_s25 + $0x4c] sm:$0xf]  ;;  %v4317_v9 = vmax.bf16 %v4256_v31, %v898_v22  ;;  %v4320_v53 = vmax.bf16 %v4259_v36, %v899_v45  ;;  %v4323_v17 = vmax.bf16 %v4262_v50, %v900_v12 }
  0x94   : > { %6726 = vst [vmem:[#allocation36_spill] sm:$0xff] %v4305_v11  ;;  %v4308_v56 = vld [vmem:[%s3325_s25 + $0x54] sm:$0xf]  ;;  %v4311_v1 = vld [vmem:[%s3325_s25 + $0x58] sm:$0xf]  ;;  %v4326_v41 = vmax.bf16 %v4265_v60, %v901_v58  ;;  %v4338_v22 = vmax.bf16 %v4276_v14, %v902_v47  ;;  %v4341_v45 = vmax.bf16 %v4279_v28, %v903_v0  ;;  %v4344_v12 = vmax.bf16 %v4282_v5, %v904_v35 }
  0x95   : > { %6727 = vst [vmem:[#allocation27_spill] sm:$0xff] %v4311_v1  ;;  %v4314_v32 = vld [vmem:[%s3325_s25 + $0x60] sm:$0xf]  ;;  %v4329_v13 = vld [vmem:[%s3325_s25 + $0x64] sm:$0xf]  ;;  %v4347_v58 = vmax.bf16 %v4285_v7, %v905_v15  ;;  %v4359_v47 = vmax.bf16 %v4296_v8, %v906_v19  ;;  %v4362_v0 = vmax.bf16 %v4299_v26, %v907_v4  ;;  %v4365_v35 = vmax.bf16 %v4302_v37, %v908_v3 }
  0x96   : > { %6728 = vst [vmem:[#allocation46_spill] sm:$0xff] %v4329_v13  ;;  %v4332_v39 = vld [vmem:[%s3325_s25 + $0x6c] sm:$0xf]  ;;  %v4335_v27 = vld [vmem:[%s3325_s25 + $0x70] sm:$0xf]  ;;  %v4368_v15 = vmax.bf16 %v4305_v11, %v909_v44  ;;  %v4380_v19 = vmax.bf16 %v4308_v56, %v910_v40  ;;  %v4383_v4 = vmax.bf16 %v4311_v1, %v911_v46  ;;  %v4386_v3 = vmax.bf16 %v4314_v32, %v912_v59 }
  0x97   : > { %6729 = vst [vmem:[#allocation40_spill] sm:$0xff] %v4335_v27  ;;  %6730 = vst [vmem:[#allocation30_spill] sm:$0xff] %v4347_v58  ;;  %v4350_v57 = vld [vmem:[%s3325_s25 + $0x78] sm:$0xf]  ;;  %v4353_v2 = vld [vmem:[%s3325_s25 + $0x7c] sm:$0xf]  ;;  %v4389_v44 = vmax.bf16 %v4329_v13, %v913_v10  ;;  %v4401_v40 = vmax.bf16 %v4332_v39, %v914_v29  ;;  %v4404_v46 = vmax.bf16 %v4335_v27, %v915_v49 }
  0x98   : > { %6731 = vst [vmem:[#allocation50_spill] sm:$0xff] %v4353_v2  ;;  %v4356_v52 = vld [vmem:[%s3325_s25 + $0x84] sm:$0xf]  ;;  %6732 = vst [vmem:[#allocation44_spill] sm:$0xff] %v4359_v47  ;;  %v4371_v23 = vld [vmem:[%s3325_s25 + $0x88] sm:$0xf]  ;;  %v4407_v59 = vmax.bf16 %v4350_v57, %v916_v62  ;;  %v4410_v10 = vmax.bf16 %v4353_v2, %v917_v51 }
  0x99   : > { %6733 = vst [vmem:[#allocation34_spill] sm:$0xff] %v4362_v0  ;;  %6734 = vst [vmem:[#allocation53_spill] sm:$0xff] %v4365_v35  ;;  %v4374_v54 = vld [vmem:[%s3325_s25 + $0x90] sm:$0xf]  ;;  %v4377_v61 = vld [vmem:[%s3325_s25 + $0x94] sm:$0xf]  ;;  %v4425_v29 = vmax.bf16 %v4371_v23, %v919_v55 }
  0x9a   : > { %6735 = vst [vmem:[#allocation47_spill] sm:$0xff] %v4368_v15  ;;  %6736 = vst [vmem:[#allocation37_spill] sm:$0xff] %v4371_v23  ;;  %v4392_v24 = vld [vmem:[%s3325_s25 + $0x9c] sm:$0xf]  ;;  %v4395_v38 = vld [vmem:[%s3325_s25 + $0xa0] sm:$0xf]  ;;  %v4428_v49 = vmax.bf16 %v4374_v54, %v920_v43  ;;  %v4431_v62 = vmax.bf16 %v4377_v61, %v921_v42  ;;  %v4449_v43 = vmax.bf16 %v4413_v6, %v925_v34 }
  0x9b   : > { %6737 = vst [vmem:[#allocation56_spill] sm:$0xff] %v4377_v61  ;;  %6738 = vst [vmem:[#allocation51_spill] sm:$0xff] %v4380_v19  ;;  %v4398_v63 = vld [vmem:[%s3325_s25 + $0xa8] sm:$0xf]  ;;  %v4434_v51 = vld [vmem:[%s3325_s25 + $0xc0] sm:$0xf] }
  0x9c   : > { %6739 = vst [vmem:[#allocation41_spill] sm:$0xff] %v4383_v4  ;;  %6740 = vst [vmem:[#allocation60_spill] sm:$0xff] %v4386_v3  ;;  %v4419_v3 = vld [vmem:[%s3325_s25 + $0xb8] sm:$0xf]  ;;  %v4422_v4 = vmax.bf16 %v4356_v52, %v918_v30  ;;  %v4443_v30 = vmax.bf16 %v4395_v38, %v923_v33  ;;  %v4446_v55 = vmax.bf16 %v4398_v63, %v924_v21  ;;  %v1012_v21 = vshrl.u32 %v4256_v31, 16 }
  0x9d   : > { %6741 = vst [vmem:[#allocation54_spill] sm:$0xff] %v4389_v44  ;;  %6742 = vst [vmem:[#allocation43_spill] sm:$0xff] %v4395_v38  ;;  %v4416_v44 = vld [vmem:[%s3325_s25 + $0xb4] sm:$0xf]  ;;  %v1021_v34 = vshll.u32 %v4259_v36, 16  ;;  %v1156_v58 = vshrl.u32 %v4308_v56, 16 }
  0x9e   : > { %6743 = vst [vmem:[#allocation62_spill] sm:$0xff] %v4401_v40  ;;  %6744 = vst [vmem:[#allocation57_spill] sm:$0xff] %v4404_v46  ;;  %v4455_v42 = vmax.bf16 %v4416_v44, %v926_v25  ;;  %v1049_v46 = vshrl.u32 %v4265_v60, 16 }
  0x9f   : > { %6745 = vst [vmem:[#allocation48_spill] sm:$0xff] %v4407_v59  ;;  %6746 = vst [vmem:[#allocation49_spill] sm:$0xff] %v4410_v10  ;;  %v4437_v10 = vld [vmem:[%s3325_s25 + $0xc4] sm:$0xf]  ;;  %v4440_v59 = vmax.bf16 %v4392_v24, %v922_v16  ;;  %v4461_v16 = vmax.bf16 %v4434_v51, %v928_v20  ;;  %v1039_v20 = vshll.u32 %v4262_v50, 16 }
  0xa0   : > { %6748 = vst [vmem:[#allocation58_spill] sm:$0xff] %v4419_v3  ;;  %6749 = vst [vmem:[#allocation61_spill] sm:$0xff] %v4422_v4  ;;  %v4464_v33 = vmax.bf16 %v4437_v10, %v929_v18  ;;  %v1014_v18 = vrot.slane %v1012_v21, 4  ;;  %v1060_v21 = vshrl.u32 %v4276_v14, 16 }
  0xa1   : > { %6750 = vst [vmem:[#allocation3_spill] sm:$0xff] %v4425_v29  ;;  %6751 = vst [vmem:[#allocation4_spill] sm:$0xff] %v4428_v49  ;;  %v4452_v49 = vld [vmem:[%s3325_s25 + $0x14] sm:$0x1] }
  0xa2   : > { %6752 = vst [vmem:[#allocation6_spill] sm:$0xff] %v4431_v62  ;;  %6753 = vst [vmem:[#allocation7_spill] sm:$0xff] %v4440_v59  ;;  %v4458_v62 = vmax.bf16 %v4419_v3, %v927_v48  ;;  %v1031_v25 = vshll.u32 %v4452_v49, 16  ;;  %v1036_v48 = vshrl.u32 %v4262_v50, 16 }
  0xa3   : > { %6754 = vst [vmem:[#allocation8_spill] sm:$0xff] %v4443_v30  ;;  %6755 = vst [vmem:[#allocation9_spill] sm:$0xff] %v4446_v55  ;;  %v1015_v55 = vshll.u32 %v4256_v31, 16  ;;  %v4471_v30 = vld [vmem:[%s3325_s25 + $0x20] sm:$0x1] }
  0xa4   : > { %6756 = vst [vmem:[#allocation13_spill] sm:$0xff] %v4449_v43  ;;  %6757 = vst [vmem:[#allocation18_spill] sm:$0xff] %v4452_v49  ;;  %v1025_v43 = vshrl.u32 %v4259_v36, 16  ;;  %v1038_v59 = vrot.slane %v1036_v48, 4  ;;  %v1041_v36 = vrot.slane %v1039_v20, 5  ;;  %v1055_v50 = vshll.u32 %v4471_v30, 16 }
  0xa5   : > { %6758 = vst [vmem:[#allocation24_spill] sm:$0xff] %v4455_v42  ;;  %6759 = vst [vmem:[#allocation31_spill] sm:$0xff] %v4458_v62  ;;  %v4477_v62 = vrot.slane %v1021_v34, 5  ;;  %v4479_v42 = vrot.slane %v1031_v25, 5  ;;  %v4490_v34 = vld [vmem:[%s3325_s25 + $0x2c] sm:$0x1] }
  0xa6   : > { %6760 = vst [vmem:[#allocation38_spill] sm:$0xff] %v4461_v16  ;;  %6761 = vst [vmem:[#allocation45_spill] sm:$0xff] %v4464_v33  ;;  %v1045_v16 = vshll.u32 %v4265_v60, 16  ;;  %v1017_v33 = vrot.slane %v1015_v55, 5  ;;  %v1027_v31 = vrot.slane %v1025_v43, 4  ;;  %v1042_v40 = vor.u32 %v1041_v36, %v1038_v59 }
  0xa7   : > { %6762 = vst [vmem:[#allocation52_spill] sm:$0xff] %v4471_v30  ;;  %v1063_v55 = vshll.u32 %v4276_v14, 16  ;;  %v1069_v43 = vshll.u32 %v4279_v28, 16  ;;  %6763 = vst [vmem:[#allocation59_spill] sm:$0xff] %v4490_v34  ;;  %v4496_v48 = vrot.slane %v1055_v50, 5  ;;  %v6896_v14 = vld [vmem:[#allocation46_spill] sm:$0xff] }
  0xa8   : > { %v4481_v29 = vrot.slane %v1045_v16, 5  ;;  %v1018_v4 = vor.u32 %v1017_v33, %v1014_v18  ;;  %v1028_v49 = vor.u32 %v1027_v31, %v4477_v62  ;;  %v1051_v33 = vrot.slane %v1049_v46, 4 }
  0xa9   : > { %v4498_v20 = vrot.slane %v1042_v40, 4  ;;  %v1062_v18 = vrot.slane %v1060_v21, 4  ;;  %v1065_v36 = vrot.slane %v1063_v55, 5  ;;  %v4500_v59 = vrot.slane %v1069_v43, 5  ;;  %v4519_v43 = vld [vmem:[%s3325_s25 + $0x38] sm:$0x1] }
  0xaa   : > { %v4492_v25 = vrot.slane %v1018_v4, 4  ;;  %v4494_v16 = vrot.slane %v1028_v49, 4  ;;  %v1052_v46 = vor.u32 %v1051_v33, %v4481_v29  ;;  %v1073_v49 = vshrl.u32 %v4279_v28, 16  ;;  %6765 = vst [vmem:[#allocation63_spill] sm:$0xff] %v4519_v43 }
  0xab   : > { %v1066_v50 = vor.u32 %v1065_v36, %v1062_v18  ;;  %v1079_v21 = vshll.u32 %v4490_v34, 16  ;;  %v1084_v55 = vshrl.u32 %v4282_v5, 16  ;;  %v1087_v33 = vshll.u32 %v4282_v5, 16 }
  0xac   : > { %v4521_v31 = vrot.slane %v1052_v46, 4  ;;  %v1075_v4 = vrot.slane %v1073_v49, 4  ;;  %v1093_v28 = vshll.u32 %v4285_v7, 16  ;;  %v1097_v18 = vshrl.u32 %v4285_v7, 16  ;;  %v4544_v7 = vld [vmem:[%s3325_s25 + $0x44] sm:$0x1] }
  0xad   : > { %v4525_v30 = vrot.slane %v1066_v50, 4  ;;  %v4527_v60 = vrot.slane %v1079_v21, 5  ;;  %v1086_v40 = vrot.slane %v1084_v55, 4  ;;  %v1089_v34 = vrot.slane %v1087_v33, 5  ;;  %6766 = vst [vmem:[#allocation14_spill] sm:$0xff] %v4544_v7 }
  0xae   : > { %v1076_v46 = vor.u32 %v1075_v4, %v4500_v59  ;;  %v4535_v49 = vrot.slane %v1093_v28, 5  ;;  %v1099_v50 = vrot.slane %v1097_v18, 4  ;;  %v1103_v21 = vshll.u32 %v4519_v43, 16 }
  0xaf   : > { %v1108_v55 = vshrl.u32 %v4296_v8, 16  ;;  %v1090_v36 = vor.u32 %v1089_v34, %v1086_v40  ;;  %v1111_v4 = vshll.u32 %v4296_v8, 16  ;;  %v1117_v28 = vshll.u32 %v4299_v26, 16 }
  0xb0   : > { %v4546_v19 = vrot.slane %v1076_v46, 4  ;;  %v1100_v33 = vor.u32 %v1099_v50, %v4535_v49  ;;  %v4551_v15 = vrot.slane %v1103_v21, 5  ;;  %v1121_v18 = vshrl.u32 %v4299_v26, 16 }
  0xb1   : > { %v1110_v5 = vrot.slane %v1108_v55, 4  ;;  %v4558_v46 = vrot.slane %v1090_v36, 4  ;;  %v1113_v35 = vrot.slane %v1111_v4, 5  ;;  %v4560_v34 = vrot.slane %v1117_v28, 5  ;;  %v4567_v55 = vld [vmem:[%s3325_s25 + $0x50] sm:$0x1] }
  0xb2   : > { %6767 = vst [vmem:[#allocation10_spill] sm:$0xff] %v4551_v15  ;;  %v4562_v8 = vrot.slane %v1100_v33, 4  ;;  %v1123_v40 = vrot.slane %v1121_v18, 4  ;;  %v1127_v50 = vshll.u32 %v4544_v7, 16  ;;  %v1132_v21 = vshrl.u32 %v4302_v37, 16  ;;  %6770 = vst [vmem:[#allocation17_spill] sm:$0xff] %v4567_v55 }
  0xb3   : > { %6768 = vst [vmem:[#allocation35_spill] sm:$0xff] %v4560_v34  ;;  %v1114_v36 = vor.u32 %v1113_v35, %v1110_v5  ;;  %v1135_v4 = vshll.u32 %v4302_v37, 16  ;;  %v1141_v28 = vshll.u32 %v4305_v11, 16  ;;  %v1145_v35 = vshrl.u32 %v4305_v11, 16  ;;  %v4593_v15 = vld [vmem:[%s3325_s25 + $0x5c] sm:$0x1] }
  0xb4   : > { %6769 = vst [vmem:[#allocation21_spill] sm:$0xff] %v4562_v8  ;;  %v1124_v18 = vor.u32 %v1123_v40, %v4560_v34  ;;  %v4580_v43 = vrot.slane %v1127_v50, 5  ;;  %v1134_v7 = vrot.slane %v1132_v21, 4  ;;  %v1151_v5 = vshll.u32 %v4567_v55, 16  ;;  %6771 = vst [vmem:[#allocation11_spill] sm:$0xff] %v4593_v15 }
  0xb5   : > { %v4582_v0 = vrot.slane %v1114_v36, 4  ;;  %v1137_v47 = vrot.slane %v1135_v4, 5  ;;  %v4584_v26 = vrot.slane %v1141_v28, 5  ;;  %v1159_v33 = vshll.u32 %v4308_v56, 16  ;;  %v4616_v4 = vld [vmem:[%s3325_s25 + $0x68] sm:$0x1] }
  0xb6   : > { %v4587_v37 = vrot.slane %v1124_v18, 4  ;;  %v1147_v21 = vrot.slane %v1145_v35, 4  ;;  %v1165_v36 = vshll.u32 %v4311_v1, 16  ;;  %v4604_v28 = vrot.slane %v1151_v5, 5  ;;  %6774 = vst [vmem:[#allocation19_spill] sm:$0xff] %v4616_v4 }
  0xb7   : > { %v1138_v50 = vor.u32 %v1137_v47, %v1134_v7  ;;  %v1158_v56 = vrot.slane %v1156_v58, 4  ;;  %v1161_v18 = vrot.slane %v1159_v33, 5  ;;  %v1169_v7 = vshrl.u32 %v4311_v1, 16 }
  0xb8   : > { %6772 = vst [vmem:[#allocation29_spill] sm:$0xff] %v4604_v28  ;;  %v1148_v11 = vor.u32 %v1147_v21, %v4584_v26  ;;  %v4609_v8 = vrot.slane %v1165_v36, 5  ;;  %v1175_v35 = vshll.u32 %v4593_v15, 16  ;;  %v1180_v40 = vshrl.u32 %v4314_v32, 16 }
  0xb9   : > { %v4606_v55 = vrot.slane %v1138_v50, 4  ;;  %v1162_v47 = vor.u32 %v1161_v18, %v1158_v56  ;;  %v1183_v34 = vshll.u32 %v4314_v32, 16  ;;  %v1171_v5 = vrot.slane %v1169_v7, 4 }
  0xba   : > { %6773 = vst [vmem:[#allocation25_spill] sm:$0xff] %v4609_v8  ;;  %v4622_v33 = vrot.slane %v1148_v11, 4  ;;  %v1189_v50 = vshll.u32 %v4329_v13, 16  ;;  %v4627_v36 = vrot.slane %v1175_v35, 5  ;;  %v1182_v56 = vrot.slane %v1180_v40, 4 }
  0xbb   : > { %v4625_v21 = vrot.slane %v1162_v47, 4  ;;  %v1185_v18 = vrot.slane %v1183_v34, 5  ;;  %v1172_v15 = vor.u32 %v1171_v5, %v4609_v8  ;;  %v1193_v11 = vshrl.u32 %v4329_v13, 16  ;;  %v4644_v35 = vld [vmem:[%s3325_s25 + $0x74] sm:$0x1] }
  0xbc   : > { %6775 = vst [vmem:[#allocation12_spill] sm:$0xff] %v4627_v36  ;;  %v4634_v58 = vrot.slane %v1189_v50, 5  ;;  %v1199_v40 = vshll.u32 %v4616_v4, 16  ;;  %v1204_v34 = vshrl.u32 %v4332_v39, 16  ;;  %6777 = vst [vmem:[#allocation22_spill] sm:$0xff] %v4644_v35  ;;  %v1207_v50 = vshll.u32 %v4332_v39, 16 }
  0xbd   : > { %v1186_v47 = vor.u32 %v1185_v18, %v1182_v56  ;;  %v4646_v1 = vrot.slane %v1172_v15, 4  ;;  %v1195_v5 = vrot.slane %v1193_v11, 4  ;;  %v1213_v32 = vshll.u32 %v4335_v27, 16 }
  0xbe   : > { %6776 = vst [vmem:[#allocation28_spill] sm:$0xff] %v4634_v58  ;;  %v4652_v28 = vrot.slane %v1199_v40, 5  ;;  %v1206_v7 = vrot.slane %v1204_v34, 4  ;;  %v1217_v56 = vshrl.u32 %v4335_v27, 16  ;;  %v1209_v4 = vrot.slane %v1207_v50, 5 }
  0xbf   : > { %v4650_v13 = vrot.slane %v1186_v47, 4  ;;  %v1196_v15 = vor.u32 %v1195_v5, %v4634_v58  ;;  %v4660_v11 = vrot.slane %v1213_v32, 5  ;;  %v1223_v40 = vshll.u32 %v4644_v35, 16  ;;  %v4669_v27 = vld [vmem:[%s3325_s25 + $0x80] sm:$0x1] }
  0xc0   : > { %6778 = vst [vmem:[#allocation15_spill] sm:$0xff] %v4652_v28  ;;  %v1219_v47 = vrot.slane %v1217_v56, 4  ;;  %v1228_v34 = vshrl.u32 %v4350_v57, 16  ;;  %6780 = vst [vmem:[#allocation26_spill] sm:$0xff] %v4669_v27  ;;  %v1210_v18 = vor.u32 %v1209_v4, %v1206_v7  ;;  %v1231_v5 = vshll.u32 %v4350_v57, 16 }
  0xc1   : > { %6779 = vst [vmem:[#allocation32_spill] sm:$0xff] %v4660_v11  ;;  %v4671_v8 = vrot.slane %v1196_v15, 4  ;;  %v1237_v32 = vshll.u32 %v4353_v2, 16  ;;  %v4676_v36 = vrot.slane %v1223_v40, 5  ;;  %v1241_v56 = vshrl.u32 %v4353_v2, 16 }
  0xc2   : > { %v1220_v50 = vor.u32 %v1219_v47, %v4660_v11  ;;  %v1230_v39 = vrot.slane %v1228_v34, 4  ;;  %v4683_v15 = vrot.slane %v1210_v18, 4  ;;  %v1233_v58 = vrot.slane %v1231_v5, 5  ;;  %v4692_v34 = vld [vmem:[%s3325_s25 + $0x8c] sm:$0x1] }
  0xc3   : > { %6781 = vst [vmem:[#allocation64_spill] sm:$0xff] %v4671_v8  ;;  %6782 = vst [vmem:[#allocation65_spill] sm:$0xff] %v4676_v36  ;;  %v4685_v4 = vrot.slane %v1237_v32, 5  ;;  %v1243_v7 = vrot.slane %v1241_v56, 4  ;;  %v1247_v47 = vshll.u32 %v4669_v27, 16  ;;  %v1252_v40 = vshrl.u32 %v4356_v52, 16 }
  0xc4   : > { %v4687_v57 = vrot.slane %v1220_v50, 4  ;;  %6785 = vst [vmem:[#allocation68_spill] sm:$0xff] %v4692_v34  ;;  %v1234_v18 = vor.u32 %v1233_v58, %v1230_v39  ;;  %v1255_v5 = vshll.u32 %v4356_v52, 16  ;;  %v1261_v32 = vshll.u32 %v4371_v23, 16  ;;  %v4718_v36 = vld [vmem:[%s3325_s25 + $0x98] sm:$0x1] }
  0xc5   : > { %6783 = vst [vmem:[#allocation66_spill] sm:$0xff] %v4685_v4  ;;  %v1244_v56 = vor.u32 %v1243_v7, %v4685_v4  ;;  %v4705_v35 = vrot.slane %v1247_v47, 5  ;;  %v1254_v27 = vrot.slane %v1252_v40, 4  ;;  %v1265_v58 = vshrl.u32 %v4371_v23, 16  ;;  %6786 = vst [vmem:[#allocation69_spill] sm:$0xff] %v4718_v36 }
  0xc6   : > { %6784 = vst [vmem:[#allocation67_spill] sm:$0xff] %v4687_v57  ;;  %v4707_v28 = vrot.slane %v1234_v18, 4  ;;  %v1257_v8 = vrot.slane %v1255_v5, 5  ;;  %v4709_v2 = vrot.slane %v1261_v32, 5  ;;  %v1271_v39 = vshll.u32 %v4692_v34, 16 }
  0xc7   : > { %v4712_v52 = vrot.slane %v1244_v56, 4  ;;  %v1276_v11 = vshrl.u32 %v4374_v54, 16  ;;  %v1279_v50 = vshll.u32 %v4374_v54, 16  ;;  %v1267_v40 = vrot.slane %v1265_v58, 4  ;;  %v4741_v5 = vld [vmem:[%s3325_s25 + $0xa4] sm:$0x1] }
  0xc8   : > { %v1258_v47 = vor.u32 %v1257_v8, %v1254_v27  ;;  %v1285_v18 = vshll.u32 %v4377_v61, 16  ;;  %v4729_v32 = vrot.slane %v1271_v39, 5  ;;  %v1289_v27 = vshrl.u32 %v4377_v61, 16  ;;  %6789 = vst [vmem:[#allocation72_spill] sm:$0xff] %v4741_v5 }
  0xc9   : > { %v1278_v54 = vrot.slane %v1276_v11, 4  ;;  %v1281_v56 = vrot.slane %v1279_v50, 5  ;;  %v1268_v23 = vor.u32 %v1267_v40, %v4709_v2  ;;  %v1295_v58 = vshll.u32 %v4718_v36, 16 }
  0xca   : > { %6787 = vst [vmem:[#allocation70_spill] sm:$0xff] %v4729_v32  ;;  %v4731_v34 = vrot.slane %v1258_v47, 4  ;;  %v4734_v57 = vrot.slane %v1285_v18, 5  ;;  %v1300_v7 = vshrl.u32 %v4392_v24, 16  ;;  %v1303_v4 = vshll.u32 %v4392_v24, 16 }
  0xcb   : > { %v1282_v8 = vor.u32 %v1281_v56, %v1278_v54  ;;  %v4747_v50 = vrot.slane %v1268_v23, 4  ;;  %v1291_v39 = vrot.slane %v1289_v27, 4  ;;  %v1309_v47 = vshll.u32 %v4395_v38, 16 }
  0xcc   : > { %6788 = vst [vmem:[#allocation71_spill] sm:$0xff] %v4734_v57  ;;  %v4752_v18 = vrot.slane %v1295_v58, 5  ;;  %v1302_v54 = vrot.slane %v1300_v7, 4  ;;  %v1305_v56 = vrot.slane %v1303_v4, 5  ;;  %v1313_v23 = vshrl.u32 %v4395_v38, 16 }
  0xcd   : > { %6790 = vst [vmem:[#allocation73_spill] sm:$0xff] %v4747_v50  ;;  %v4750_v40 = vrot.slane %v1282_v8, 4  ;;  %v1292_v36 = vor.u32 %v1291_v39, %v4734_v57  ;;  %v4759_v11 = vrot.slane %v1309_v47, 5  ;;  %v1319_v7 = vshll.u32 %v4741_v5, 16  ;;  %v4769_v58 = vld [vmem:[%s3325_s25 + $0xb0] sm:$0x1] }
  0xce   : > { %6792 = vst [vmem:[#allocation75_spill] sm:$0xff] %v4752_v18  ;;  %v1306_v8 = vor.u32 %v1305_v56, %v1302_v54  ;;  %v1324_v4 = vshrl.u32 %v4398_v63, 16  ;;  %6794 = vst [vmem:[#allocation77_spill] sm:$0xff] %v4769_v58  ;;  %v1315_v39 = vrot.slane %v1313_v23, 4  ;;  %v1327_v47 = vshll.u32 %v4398_v63, 16 }
  0xcf   : > { %6791 = vst [vmem:[#allocation74_spill] sm:$0xff] %v4750_v40  ;;  %6793 = vst [vmem:[#allocation76_spill] sm:$0xff] %v4759_v11  ;;  %v4771_v61 = vrot.slane %v1292_v36, 4  ;;  %v1333_v24 = vshll.u32 %v4413_v6, 16  ;;  %v4777_v32 = vrot.slane %v1319_v7, 5  ;;  %v1337_v54 = vshrl.u32 %v4413_v6, 16 }
  0xd0   : > { %v4775_v38 = vrot.slane %v1306_v8, 4  ;;  %v1326_v27 = vrot.slane %v1324_v4, 4  ;;  %v1316_v36 = vor.u32 %v1315_v39, %v4759_v11  ;;  %v1329_v5 = vrot.slane %v1327_v47, 5  ;;  %v4794_v6 = vld [vmem:[%s3325_s25 + $0xbc] sm:$0x1] }
  0xd1   : > { %6795 = vst [vmem:[#allocation78_spill] sm:$0xff] %v4771_v61  ;;  %v4785_v23 = vrot.slane %v1333_v24, 5  ;;  %v1339_v8 = vrot.slane %v1337_v54, 4  ;;  %v1343_v7 = vshll.u32 %v4769_v58, 16  ;;  %v1348_v4 = vshrl.u32 %v4416_v44, 16  ;;  %6797 = vst [vmem:[#allocation80_spill] sm:$0xff] %v4794_v6 }
  0xd2   : > { %6796 = vst [vmem:[#allocation79_spill] sm:$0xff] %v4775_v38  ;;  %v4796_v57 = vrot.slane %v1316_v36, 4  ;;  %v1330_v56 = vor.u32 %v1329_v5, %v1326_v27  ;;  %v1351_v39 = vshll.u32 %v4416_v44, 16  ;;  %v1357_v24 = vshll.u32 %v4419_v3, 16 }
  0xd3   : > { %v1340_v47 = vor.u32 %v1339_v8, %v4785_v23  ;;  %v4801_v18 = vrot.slane %v1343_v7, 5  ;;  %v1350_v63 = vrot.slane %v1348_v4, 4  ;;  %v1361_v54 = vshrl.u32 %v4419_v3, 16  ;;  %v4811_v8 = vld [vmem:[%s3325_s25 + $0xc8] sm:$0x1] }
  0xd4   : > { %v1322_v58 = vsel %vm3374_vm2, %v4796_v57, %v4777_v32  ;;  %v1331_v36 = vrot.slane %v1330_v56, 4  ;;  %v1353_v11 = vrot.slane %v1351_v39, 5  ;;  %v1359_v38 = vrot.slane %v1357_v24, 5 }
  0xd5   : > { %v1341_v5 = vrot.slane %v1340_v47, 4  ;;  %v1363_v27 = vrot.slane %v1361_v54, 4  ;;  %v1367_v44 = vshll.u32 %v4794_v6, 16  ;;  %v1372_v61 = vshrl.u32 %v4434_v51, 16 }
  0xd6   : > { %v1336_v7 = vsel %vm3374_vm2, %v1331_v36, %v4785_v23  ;;  %v1354_v4 = vor.u32 %v1353_v11, %v1350_v63  ;;  %v1375_v3 = vshll.u32 %v4434_v51, 16  ;;  %v1381_v57 = vshll.u32 %v4437_v10, 16 }
  0xd7   : > { %v1346_v32 = vsel %vm3374_vm2, %v1341_v5, %v4801_v18  ;;  %v1364_v56 = vor.u32 %v1363_v27, %v1359_v38  ;;  %v1369_v39 = vrot.slane %v1367_v44, 5  ;;  %v1374_v24 = vrot.slane %v1372_v61, 4  ;;  %v6809_v27 = vld [vmem:[#allocation44_spill] sm:$0xff]  ;;  %v6812_v44 = vld [vmem:[#allocation34_spill] sm:$0xff] }
  0xd8   : > { %v1355_v47 = vrot.slane %v1354_v4, 4  ;;  %v1377_v54 = vrot.slane %v1375_v3, 5  ;;  %v1383_v6 = vrot.slane %v1381_v57, 5  ;;  %v1385_v40 = vshrl.u32 %v4437_v10, 16 }
  0xd9   : > { %v1365_v50 = vrot.slane %v1364_v56, 4  ;;  %v1391_v23 = vshll.u32 %v4811_v8, 16  ;;  %v6798_v51 = vsel %vm3374_vm2, %v4492_v25, %v4477_v62  ;;  %v6799_v61 = vsel %vm3374_vm2, %v4494_v16, %v4479_v42 }
  0xda   : > { %v4829_v11 = vmax.bf16 %v6798_v51, %v4317_v9  ;;  %v4837_v3 = vmax.bf16 %v6799_v61, %v4320_v53  ;;  %v1360_v18 = vsel %vm3374_vm2, %v1355_v47, %v1359_v38  ;;  %v1378_v63 = vor.u32 %v1377_v54, %v1374_v24  ;;  %v6819_v47 = vld [vmem:[#allocation51_spill] sm:$0xff] }
  0xdb   : > { %v1387_v36 = vrot.slane %v1385_v40, 4  ;;  %v6800_v9 = vsel %vm3374_vm2, %v4498_v20, %v4481_v29  ;;  %v1370_v25 = vsel %vm3374_vm2, %v1365_v50, %v1369_v39  ;;  %v1393_v5 = vrot.slane %v1391_v23, 5  ;;  %v6816_v39 = vld [vmem:[#allocation47_spill] sm:$0xff]  ;;  %v6823_v23 = vld [vmem:[#allocation12_spill] sm:$0xff] }
  0xdc   : > { %v4847_v62 = vmax.bf16 %v6800_v9, %v4323_v17  ;;  %v6801_v53 = vsel %vm3374_vm2, %v4521_v31, %v4496_v48  ;;  %v6802_v29 = vsel %vm3374_vm2, %v4525_v30, %v4500_v59  ;;  %v1379_v42 = vrot.slane %v1378_v63, 4  ;;  %v6806_v30 = vld [vmem:[#allocation21_spill] sm:$0xff]  ;;  %v6807_v59 = vld [vmem:[#allocation10_spill] sm:$0xff]  ;;  %v6826_v63 = vld [vmem:[#allocation28_spill] sm:$0xff] }
  0xdd   : > { %v4857_v38 = vmax.bf16 %v6801_v53, %v4326_v41  ;;  %v4865_v17 = vmax.bf16 %v6802_v29, %v4338_v22  ;;  %v1388_v16 = vor.u32 %v1387_v36, %v1383_v6  ;;  %v6803_v20 = vsel %vm3374_vm2, %v4546_v19, %v4527_v60  ;;  %v6805_v22 = vld [vmem:[#allocation30_spill] sm:$0xff]  ;;  %v6810_v60 = vld [vmem:[#allocation35_spill] sm:$0xff] }
  0xde   : > { %v4873_v50 = vmax.bf16 %v6803_v20, %v4341_v45  ;;  %v6804_v41 = vsel %vm3374_vm2, %v4558_v46, %v4535_v49  ;;  %v6808_v31 = vsel %vm3374_vm2, %v6806_v30, %v6807_v59  ;;  %v6811_v45 = vsel %vm3374_vm2, %v4582_v0, %v6810_v60  ;;  %v6814_v46 = vld [vmem:[#allocation53_spill] sm:$0xff]  ;;  %v6828_v53 = vld [vmem:[#allocation54_spill] sm:$0xff]  ;;  %v6830_v29 = vld [vmem:[#allocation15_spill] sm:$0xff] }
  0xdf   : > { %v4881_v48 = vmax.bf16 %v6804_v41, %v4344_v12  ;;  %v4889_v40 = vmax.bf16 %v6808_v31, %v6805_v22  ;;  %v4897_v19 = vmax.bf16 %v6811_v45, %v6809_v27  ;;  %v6813_v12 = vsel %vm3374_vm2, %v4587_v37, %v4580_v43  ;;  %v6817_v43 = vld [vmem:[#allocation29_spill] sm:$0xff]  ;;  %v6832_v20 = vld [vmem:[#allocation62_spill] sm:$0xff]  ;;  %v6836_v59 = vld [vmem:[#allocation67_spill] sm:$0xff] }
  0xe0   : > { %v4905_v49 = vmax.bf16 %v6813_v12, %v6812_v44  ;;  %v6815_v4 = vsel %vm3374_vm2, %v4606_v55, %v4584_v26  ;;  %v1384_v0 = vsel %vm3374_vm2, %v1379_v42, %v1383_v6  ;;  %v1389_v56 = vrot.slane %v1388_v16, 4  ;;  %v6820_v26 = vld [vmem:[#allocation25_spill] sm:$0xff]  ;;  %v6839_v45 = vld [vmem:[#allocation48_spill] sm:$0xff]  ;;  %v6840_v44 = vld [vmem:[#allocation66_spill] sm:$0xff] }
  0xe1   : > { %v4913_v57 = vmax.bf16 %v6815_v4, %v6814_v46  ;;  %v6818_v37 = vsel %vm3374_vm2, %v4622_v33, %v6817_v43  ;;  %v6821_v55 = vsel %vm3374_vm2, %v4625_v21, %v6820_v26  ;;  %v6822_v6 = vld [vmem:[#allocation41_spill] sm:$0xff]  ;;  %v6824_v51 = vsel %vm3374_vm2, %v4646_v1, %v6823_v23  ;;  %v6825_v33 = vld [vmem:[#allocation60_spill] sm:$0xff] }
  0xe2   : > { %v4923_v24 = vmax.bf16 %v6818_v37, %v6816_v39  ;;  %v4931_v54 = vmax.bf16 %v6821_v55, %v6819_v47  ;;  %v4939_v61 = vmax.bf16 %v6824_v51, %v6822_v6  ;;  %v6827_v36 = vsel %vm3374_vm2, %v4650_v13, %v6826_v63  ;;  %v6829_v21 = vld [vmem:[#allocation64_spill] sm:$0xff]  ;;  %v6835_v30 = vld [vmem:[#allocation57_spill] sm:$0xff]  ;;  %v6849_v47 = vld [vmem:[#allocation70_spill] sm:$0xff] }
  0xe3   : > { %v4947_v9 = vmax.bf16 %v6827_v36, %v6825_v33  ;;  %v6831_v42 = vsel %vm3374_vm2, %v6829_v21, %v6830_v29  ;;  %v6833_v1 = vld [vmem:[#allocation32_spill] sm:$0xff]  ;;  %v1394_v13 = vsel %vm3374_vm2, %v1389_v56, %v1393_v5  ;;  %v6837_v31 = vld [vmem:[#allocation65_spill] sm:$0xff]  ;;  %v6843_v5 = vsel %vm3374_vm2, %v4712_v52, %v4705_v35  ;;  %v6853_v52 = vld [vmem:[#allocation74_spill] sm:$0xff] }
  0xe4   : > { %v4955_v16 = vmax.bf16 %v6831_v42, %v6828_v53  ;;  %v6834_v41 = vsel %vm3374_vm2, %v4683_v15, %v6833_v1  ;;  %v6838_v27 = vsel %vm3374_vm2, %v6836_v59, %v6837_v31  ;;  %v6841_v15 = vsel %vm3374_vm2, %v4707_v28, %v6840_v44  ;;  %v6842_v46 = vld [vmem:[#allocation49_spill] sm:$0xff]  ;;  %v6847_v28 = vld [vmem:[#allocation3_spill] sm:$0xff]  ;;  %v6852_v35 = vld [vmem:[#allocation4_spill] sm:$0xff] }
  0xe5   : > { %v4963_v22 = vmax.bf16 %v6834_v41, %v6832_v20  ;;  %v4973_v60 = vmax.bf16 %v6838_v27, %v6835_v30  ;;  %v4981_v12 = vmax.bf16 %v6841_v15, %v6839_v45  ;;  %v4989_v4 = vmax.bf16 %v6843_v5, %v6842_v46  ;;  %v6844_v56 = vld [vmem:[#allocation61_spill] sm:$0xff]  ;;  %v6854_v6 = vld [vmem:[#allocation71_spill] sm:$0xff]  ;;  %v2951_v53 = vld [vmem:[%s3325_s25 + $0xc] sm:$0xe] }
  0xe6   : > { %v6845_v39 = vsel %vm3374_vm2, %v4731_v34, %v4709_v2  ;;  %v6848_v37 = vld [vmem:[#allocation73_spill] sm:$0xff]  ;;  %v6855_v23 = vsel %vm3374_vm2, %v6853_v52, %v6854_v6  ;;  %v6857_v2 = vld [vmem:[#allocation6_spill] sm:$0xff]  ;;  %v6859_v33 = vld [vmem:[#allocation75_spill] sm:$0xff] }
  0xe7   : > { %v4997_v43 = vmax.bf16 %v6845_v39, %v6844_v56  ;;  %v6850_v26 = vsel %vm3374_vm2, %v6848_v37, %v6849_v47  ;;  %v5013_v51 = vmax.bf16 %v6855_v23, %v6852_v35  ;;  %v6858_v34 = vld [vmem:[#allocation78_spill] sm:$0xff]  ;;  %v6862_v29 = vld [vmem:[#allocation7_spill] sm:$0xff]  ;;  %v6864_v20 = vld [vmem:[#allocation76_spill] sm:$0xff] }
  0xe8   : > { %v5005_v55 = vmax.bf16 %v6850_v26, %v6847_v28  ;;  %v6860_v63 = vsel %vm3374_vm2, %v6858_v34, %v6859_v33  ;;  %v2952_v21 = vld [vmem:[%s3325_s25 + $0x18] sm:$0xe]  ;;  %v6863_v42 = vld [vmem:[#allocation79_spill] sm:$0xff]  ;;  %v6867_v30 = vld [vmem:[#allocation8_spill] sm:$0xff] }
  0xe9   : > { %6846 = vst [vmem:[#allocation30_spill] sm:$0xff] %v4997_v43  ;;  %6856 = vst [vmem:[#allocation10_spill] sm:$0xff] %v5013_v51  ;;  %v5021_v36 = vmax.bf16 %v6860_v63, %v6857_v2  ;;  %v6865_v1 = vsel %vm3374_vm2, %v6863_v42, %v6864_v20  ;;  %v5034_v59 = vmax.bf16 %v1322_v58, %v6867_v30  ;;  %v6869_v31 = vld [vmem:[#allocation9_spill] sm:$0xff]  ;;  %v2953_v15 = vld [vmem:[%s3325_s25 + $0x24] sm:$0xe]  ;;  %v2968_v23 = vrot.slane %v2952_v21, 9 }
  0xea   : > { %6851 = vst [vmem:[#allocation21_spill] sm:$0xff] %v5005_v55  ;;  %v5031_v41 = vmax.bf16 %v6865_v1, %v6862_v29  ;;  %v5037_v27 = vmax.bf16 %v1336_v7, %v6869_v31  ;;  %v6871_v45 = vld [vmem:[#allocation13_spill] sm:$0xff]  ;;  %v6873_v46 = vld [vmem:[#allocation24_spill] sm:$0xff]  ;;  %v6875_v56 = vld [vmem:[#allocation31_spill] sm:$0xff]  ;;  %v2967_v7 = vrot.slane %v2951_v53, 9  ;;  %v2969_v63 = vrot.slane %v2953_v15, 9 }
  0xeb   : > { %6861 = vst [vmem:[#allocation44_spill] sm:$0xff] %v5021_v36  ;;  %6868 = vst [vmem:[#allocation34_spill] sm:$0xff] %v5034_v59  ;;  %v5040_v44 = vmax.bf16 %v1346_v32, %v6871_v45  ;;  %v5044_v5 = vmax.bf16 %v1360_v18, %v6873_v46  ;;  %v5047_v39 = vmax.bf16 %v1370_v25, %v6875_v56  ;;  %v6877_v28 = vld [vmem:[#allocation38_spill] sm:$0xff]  ;;  %v6879_v47 = vld [vmem:[#allocation45_spill] sm:$0xff] }
  0xec   : > { %6866 = vst [vmem:[#allocation35_spill] sm:$0xff] %v5031_v41  ;;  %6870 = vst [vmem:[#allocation53_spill] sm:$0xff] %v5037_v27  ;;  %v5050_v37 = vmax.bf16 %v1384_v0, %v6877_v28  ;;  %v5053_v58 = vmax.bf16 %v1394_v13, %v6879_v47  ;;  %v2954_v26 = vld [vmem:[%s3325_s25 + $0x30] sm:$0xe]  ;;  %v6881_v35 = vld [vmem:[#allocation20_spill] sm:$0xff] }
  0xed   : > { %6872 = vst [vmem:[#allocation47_spill] sm:$0xff] %v5040_v44  ;;  %6874 = vst [vmem:[#allocation29_spill] sm:$0xff] %v5044_v5  ;;  %v1525_v52 = vrot.slane %v6881_v35, 5  ;;  %v6882_v32 = vld [vmem:[#allocation18_spill] sm:$0xff]  ;;  %v6883_v2 = vld [vmem:[#allocation39_spill] sm:$0xff]  ;;  %v2970_v30 = vrot.slane %v2954_v26, 9 }
  0xee   : > { %6876 = vst [vmem:[#allocation51_spill] sm:$0xff] %v5047_v39  ;;  %6878 = vst [vmem:[#allocation25_spill] sm:$0xff] %v5050_v37  ;;  %v1528_v6 = vrot.slane %v6882_v32, 5  ;;  %v2955_v18 = vld [vmem:[%s3325_s25 + $0x3c] sm:$0xe]  ;;  %v1532_v34 = vrot.slane %v6883_v2, 5 }
  0xef   : > { %6880 = vst [vmem:[#allocation41_spill] sm:$0xff] %v5053_v58  ;;  %v6884_v25 = vld [vmem:[#allocation52_spill] sm:$0xff]  ;;  %v6885_v0 = vld [vmem:[#allocation33_spill] sm:$0xff]  ;;  %v5064_v13 = vsel %vm4031_vm5, %v2967_v7, %v1525_v52  ;;  %v1527_v20 = vrot.slane %v1525_v52, 4  ;;  %v6887_v53 = vld [vmem:[#allocation59_spill] sm:$0xff]  ;;  %v2971_v52 = vrot.slane %v2955_v18, 9 }
  0xf0   : > { %v1535_v33 = vrot.slane %v6884_v25, 5  ;;  %v1539_v29 = vrot.slane %v6885_v0, 5  ;;  %v1542_v1 = vrot.slane %v6887_v53, 5  ;;  %v2956_v31 = vld [vmem:[%s3325_s25 + $0x48] sm:$0xe]  ;;  %v5070_v21 = vsel %vm4031_vm5, %v2968_v23, %v1532_v34  ;;  %v6888_v47 = vld [vmem:[#allocation23_spill] sm:$0xff] }
  0xf1   : > { %v1534_v45 = vrot.slane %v1532_v34, 4  ;;  %v2957_v56 = vld [vmem:[%s3325_s25 + $0x54] sm:$0xe]  ;;  %v5079_v28 = vsel %vm4031_vm5, %v1527_v20, %v1528_v6  ;;  %v1546_v7 = vrot.slane %v6888_v47, 5  ;;  %v6889_v35 = vld [vmem:[#allocation63_spill] sm:$0xff]  ;;  %v6890_v2 = vld [vmem:[#allocation42_spill] sm:$0xff] }
  0xf2   : > { %v5074_v15 = vsel %vm4031_vm5, %v2969_v63, %v1539_v29  ;;  %v1541_v46 = vrot.slane %v1539_v29, 4  ;;  %v1549_v26 = vrot.slane %v6889_v35, 5  ;;  %v1553_v34 = vrot.slane %v6890_v2, 5  ;;  %v6891_v25 = vld [vmem:[#allocation14_spill] sm:$0xff]  ;;  %v2958_v63 = vld [vmem:[%s3325_s25 + $0x60] sm:$0xe] }
  0xf3   : > { %v5085_v32 = vsel %vm4031_vm5, %v1534_v45, %v1535_v33  ;;  %v1556_v6 = vrot.slane %v6891_v25, 5  ;;  %v5096_v0 = vsel %vm4031_vm5, %v2970_v30, %v1546_v7  ;;  %v1548_v29 = vrot.slane %v1546_v7, 4  ;;  %v6892_v20 = vld [vmem:[#allocation36_spill] sm:$0xff]  ;;  %v6893_v45 = vld [vmem:[#allocation17_spill] sm:$0xff]  ;;  %v6894_v7 = vld [vmem:[#allocation27_spill] sm:$0xff] }
  0xf4   : > { %v5089_v23 = vsel %vm4031_vm5, %v1541_v46, %v1542_v1  ;;  %v2972_v18 = vrot.slane %v2956_v31, 9  ;;  %v1560_v53 = vrot.slane %v6892_v20, 5  ;;  %v5101_v33 = vsel %vm4031_vm5, %v2971_v52, %v1553_v34  ;;  %v2959_v35 = vld [vmem:[%s3325_s25 + $0x6c] sm:$0xe]  ;;  %v2960_v52 = vld [vmem:[%s3325_s25 + $0x78] sm:$0xe] }
  0xf5   : > { %v1555_v1 = vrot.slane %v1553_v34, 4  ;;  %v1563_v46 = vrot.slane %v6893_v45, 5  ;;  %v2973_v47 = vrot.slane %v2957_v56, 9  ;;  %v5107_v2 = vsel %vm4031_vm5, %v1548_v29, %v1549_v26  ;;  %v6895_v20 = vld [vmem:[#allocation11_spill] sm:$0xff]  ;;  %v6900_v5 = vld [vmem:[#allocation50_spill] sm:$0xff]  ;;  %v6904_v41 = vld [vmem:[#allocation56_spill] sm:$0xff] }
  0xf6   : > { %v5111_v30 = vsel %vm4031_vm5, %v2972_v18, %v1560_v53  ;;  %v1562_v31 = vrot.slane %v1560_v53, 4  ;;  %v1567_v25 = vrot.slane %v6894_v7, 5  ;;  %v1570_v56 = vrot.slane %v6895_v20, 5  ;;  %v6897_v53 = vld [vmem:[#allocation19_spill] sm:$0xff]  ;;  %v2963_v27 = vld [vmem:[%s3325_s25 + $0x9c] sm:$0xe] }
  0xf7   : > { %v5117_v34 = vsel %vm4031_vm5, %v1555_v1, %v1556_v6  ;;  %v2974_v45 = vrot.slane %v2958_v63, 9  ;;  %v1574_v58 = vrot.slane %v6896_v14, 5  ;;  %v1577_v7 = vrot.slane %v6897_v53, 5  ;;  %v2961_v37 = vld [vmem:[%s3325_s25 + $0x84] sm:$0xe]  ;;  %v6898_v14 = vld [vmem:[#allocation40_spill] sm:$0xff] }
  0xf8   : > { %v5123_v26 = vsel %vm4031_vm5, %v1562_v31, %v1563_v46  ;;  %v5127_v29 = vsel %vm4031_vm5, %v2973_v47, %v1567_v25  ;;  %v1569_v18 = vrot.slane %v1567_v25, 4  ;;  %v2975_v1 = vrot.slane %v2959_v35, 9  ;;  %v2962_v46 = vld [vmem:[%s3325_s25 + $0x90] sm:$0xe]  ;;  %v6899_v47 = vld [vmem:[#allocation22_spill] sm:$0xff] }
  0xf9   : > { %v5133_v6 = vsel %vm4031_vm5, %v2974_v45, %v1574_v58  ;;  %v1576_v63 = vrot.slane %v1574_v58, 4  ;;  %v1581_v20 = vrot.slane %v6898_v14, 5  ;;  %v1584_v25 = vrot.slane %v6899_v47, 5  ;;  %v6901_v45 = vld [vmem:[#allocation26_spill] sm:$0xff]  ;;  %v2965_v51 = vld [vmem:[%s3325_s25 + $0xb4] sm:$0xe] }
  0xfa   : > { %v5139_v31 = vsel %vm4031_vm5, %v1569_v18, %v1570_v56  ;;  %v2976_v39 = vrot.slane %v2960_v52, 9  ;;  %v1588_v53 = vrot.slane %v6900_v5, 5  ;;  %v1591_v14 = vrot.slane %v6901_v45, 5  ;;  %v6902_v5 = vld [vmem:[#allocation37_spill] sm:$0xff]  ;;  %v2966_v55 = vld [vmem:[%s3325_s25 + $0xc0] sm:$0xe] }
  0xfb   : > { %v5145_v44 = vsel %vm4031_vm5, %v1576_v63, %v1577_v7  ;;  %v5149_v58 = vsel %vm4031_vm5, %v2975_v1, %v1581_v20  ;;  %v1583_v35 = vrot.slane %v1581_v20, 4  ;;  %v2977_v18 = vrot.slane %v2961_v37, 9  ;;  %v2964_v7 = vld [vmem:[%s3325_s25 + $0xa8] sm:$0xe]  ;;  %v5434_v42 = vld [vmem:[%s3325_s25 + $0xb8] sm:$0xf] }
  0xfc   : > { %v5155_v56 = vsel %vm4031_vm5, %v2976_v39, %v1588_v53  ;;  %v1590_v52 = vrot.slane %v1588_v53, 4  ;;  %v1595_v47 = vrot.slane %v6902_v5, 5  ;;  %v6903_v1 = vld [vmem:[#allocation68_spill] sm:$0xff]  ;;  %v2978_v59 = vrot.slane %v2962_v46, 9  ;;  %v6906_v53 = vld [vmem:[#allocation69_spill] sm:$0xff]  ;;  %6956 = vst [vmem:[#allocation13_spill] sm:$0xff] %v5434_v42 }
  0xfd   : > { %v5161_v63 = vsel %vm4031_vm5, %v1583_v35, %v1584_v25  ;;  %v1598_v20 = vrot.slane %v6903_v1, 5  ;;  %v1602_v45 = vrot.slane %v6904_v41, 5  ;;  %v1605_v5 = vrot.slane %v6906_v53, 5  ;;  %v6908_v1 = vld [vmem:[#allocation43_spill] sm:$0xff] }
  0xfe   : > { %v5167_v36 = vsel %vm4031_vm5, %v1590_v52, %v1591_v14  ;;  %v5171_v39 = vsel %vm4031_vm5, %v2977_v18, %v1595_v47  ;;  %v1597_v37 = vrot.slane %v1595_v47, 4  ;;  %v2979_v46 = vrot.slane %v2963_v27, 9  ;;  %v6909_v52 = vld [vmem:[#allocation72_spill] sm:$0xff]  ;;  %v6910_v47 = vld [vmem:[#allocation55_spill] sm:$0xff] }
  0xff   : > { %6905 = vst [vmem:[#allocation12_spill] sm:$0xff] %v5171_v39  ;;  %v5177_v25 = vsel %vm4031_vm5, %v2978_v59, %v1602_v45  ;;  %v1604_v35 = vrot.slane %v1602_v45, 4  ;;  %v1609_v41 = vrot.slane %v6908_v1, 5  ;;  %v1612_v18 = vrot.slane %v6909_v52, 5  ;;  %v6912_v45 = vld [vmem:[#allocation77_spill] sm:$0xff] }
 0x100   : > { %6907 = vst [vmem:[#allocation60_spill] sm:$0xff] %v5177_v25  ;;  %v5183_v14 = vsel %vm4031_vm5, %v1597_v37, %v1598_v20  ;;  %v2980_v39 = vrot.slane %v2964_v7, 9  ;;  %v1616_v43 = vrot.slane %v6910_v47, 5  ;;  %v1619_v1 = vrot.slane %v6912_v45, 5  ;;  %v6913_v7 = vld [vmem:[#allocation58_spill] sm:$0xff] }
 0x101   : > { %v5189_v53 = vsel %vm4031_vm5, %v1604_v35, %v1605_v5  ;;  %v5193_v59 = vsel %vm4031_vm5, %v2979_v46, %v1609_v41  ;;  %v1611_v27 = vrot.slane %v1609_v41, 4  ;;  %v2981_v52 = vrot.slane %v2965_v51, 9  ;;  %v6914_v5 = vld [vmem:[#allocation80_spill] sm:$0xff] }
 0x102   : > { %6911 = vst [vmem:[#allocation28_spill] sm:$0xff] %v5189_v53  ;;  %v5198_v20 = vsel %vm4031_vm5, %v2980_v39, %v1616_v43  ;;  %v1618_v37 = vrot.slane %v1616_v43, 4  ;;  %v1623_v25 = vrot.slane %v6913_v7, 5  ;;  %v1626_v35 = vrot.slane %v6914_v5, 5  ;;  %v6931_v7 = vld [vmem:[#allocation51_spill] sm:$0xff] }
 0x103   : > { %v5203_v47 = vsel %vm4031_vm5, %v1611_v27, %v1612_v18  ;;  %v2982_v53 = vrot.slane %v2966_v55, 9  ;;  %v1630_v46 = vrot.slane %v4437_v10, 5  ;;  %v1633_v51 = vrot.slane %v4811_v8, 5 }
 0x104   : > { %v5209_v41 = vsel %vm4031_vm5, %v1618_v37, %v1619_v1  ;;  %v5213_v39 = vsel %vm4031_vm5, %v2981_v52, %v1623_v25  ;;  %v1625_v43 = vrot.slane %v1623_v25, 4  ;;  %v1667_v55 = vmax.bf16 %v5064_v13, %v4829_v11  ;;  %v5306_v37 = vld [vmem:[%s3325_s25 + $0x40] sm:$0xf] }
 0x105   : > { %v5218_v18 = vsel %vm4031_vm5, %v2982_v53, %v1630_v46  ;;  %v1632_v27 = vrot.slane %v1630_v46, 4  ;;  %v1668_v10 = vmax.bf16 %v5079_v28, %v4837_v3  ;;  %v1669_v25 = vmax.bf16 %v5070_v21, %v4847_v62  ;;  %v6915_v21 = vld [vmem:[#allocation30_spill] sm:$0xff]  ;;  %6929 = vst [vmem:[#allocation62_spill] sm:$0xff] %v5306_v37 }
 0x106   : > { %v5226_v45 = vsel %vm4031_vm5, %v1625_v43, %v1626_v35  ;;  %v1670_v8 = vmax.bf16 %v5085_v32, %v4857_v38  ;;  %v1671_v53 = vmax.bf16 %v5074_v15, %v4865_v17  ;;  %v1672_v11 = vmax.bf16 %v5089_v23, %v4873_v50  ;;  %v6920_v23 = vld [vmem:[#allocation44_spill] sm:$0xff]  ;;  %v6933_v35 = vld [vmem:[#allocation41_spill] sm:$0xff] }
 0x107   : > { %v5236_v1 = vsel %vm4031_vm5, %v1632_v27, %v1633_v51  ;;  %v1673_v3 = vmax.bf16 %v5096_v0, %v4881_v48  ;;  %v1674_v13 = vmax.bf16 %v5107_v2, %v4889_v40  ;;  %v1675_v62 = vmax.bf16 %v5101_v33, %v4897_v19  ;;  %v6919_v28 = vld [vmem:[#allocation60_spill] sm:$0xff]  ;;  %v5277_v33 = vld [vmem:[%s3325_s25 + $0x18] sm:$0xf]  ;;  %v6924_v2 = vld [vmem:[#allocation35_spill] sm:$0xff] }
 0x108   : > { %v1676_v38 = vmax.bf16 %v5117_v34, %v4905_v49  ;;  %v1677_v17 = vmax.bf16 %v5111_v30, %v4913_v57  ;;  %v1678_v50 = vmax.bf16 %v5123_v26, %v4923_v24  ;;  %v1679_v48 = vmax.bf16 %v5127_v29, %v4931_v54  ;;  %v6925_v34 = vld [vmem:[#allocation34_spill] sm:$0xff]  ;;  %v6926_v29 = vld [vmem:[#allocation53_spill] sm:$0xff]  ;;  %v5320_v43 = vld [vmem:[%s3325_s25 + $0x4c] sm:$0xf] }
 0x109   : > { %v1680_v40 = vmax.bf16 %v5139_v31, %v4939_v61  ;;  %v1681_v19 = vmax.bf16 %v5133_v6, %v4947_v9  ;;  %v1682_v49 = vmax.bf16 %v5145_v44, %v4955_v16  ;;  %v1683_v57 = vmax.bf16 %v5149_v58, %v4963_v22  ;;  %v6916_v9 = vld [vmem:[#allocation12_spill] sm:$0xff]  ;;  %v6917_v16 = vld [vmem:[#allocation21_spill] sm:$0xff]  ;;  %v6918_v22 = vld [vmem:[#allocation10_spill] sm:$0xff]  ;;  %6934 = vst [vmem:[#allocation32_spill] sm:$0xff] %v5320_v43 }
 0x10a   : > { %v1684_v24 = vmax.bf16 %v5161_v63, %v4973_v60  ;;  %v1685_v54 = vmax.bf16 %v5155_v56, %v4981_v12  ;;  %v1686_v61 = vmax.bf16 %v5167_v36, %v4989_v4  ;;  %v1687_v15 = vmax.bf16 %v6916_v9, %v6915_v21  ;;  %v6921_v60 = vld [vmem:[#allocation28_spill] sm:$0xff]  ;;  %v5280_v12 = vld [vmem:[%s3325_s25 + $0x1c] sm:$0xf]  ;;  %v5283_v4 = vld [vmem:[%s3325_s25 + $0x24] sm:$0xf] }
 0x10b   : > { %v1688_v44 = vmax.bf16 %v5183_v14, %v6917_v16  ;;  %v1689_v32 = vmax.bf16 %v6919_v28, %v6918_v22  ;;  %v1690_v0 = vmax.bf16 %v6921_v60, %v6920_v23  ;;  %6922 = vst [vmem:[#allocation54_spill] sm:$0xff] %v5280_v12  ;;  %v5286_v36 = vld [vmem:[%s3325_s25 + $0x28] sm:$0xf]  ;;  %v1691_v30 = vmax.bf16 %v5193_v59, %v6924_v2  ;;  %v6927_v31 = vld [vmem:[#allocation47_spill] sm:$0xff]  ;;  %v5297_v56 = vld [vmem:[%s3325_s25 + $0x30] sm:$0xf] }
 0x10c   : > { %6923 = vst [vmem:[#allocation64_spill] sm:$0xff] %v5286_v36  ;;  %v1692_v26 = vmax.bf16 %v5203_v47, %v6925_v34  ;;  %v1693_v6 = vmax.bf16 %v5198_v20, %v6926_v29  ;;  %v1694_v58 = vmax.bf16 %v5209_v41, %v6927_v31  ;;  %v5300_v63 = vld [vmem:[%s3325_s25 + $0x34] sm:$0xf]  ;;  %v5303_v14 = vld [vmem:[%s3325_s25 + $0x3c] sm:$0xf]  ;;  %v1696_v20 = vmax.bf16 %v5226_v45, %v6931_v7 }
 0x10d   : > { %6928 = vst [vmem:[#allocation15_spill] sm:$0xff] %v5300_v63  ;;  %v6930_v59 = vld [vmem:[#allocation29_spill] sm:$0xff]  ;;  %v1698_v46 = vmax.bf16 %v5236_v1, %v6933_v35  ;;  %v5317_v41 = vld [vmem:[%s3325_s25 + $0x48] sm:$0xf]  ;;  %v5326_v27 = vld [vmem:[%s3325_s25 + $0x58] sm:$0xf]  ;;  %v5341_v1 = vmax.bf16 %v5280_v12, %v1668_v10  ;;  %v5344_v9 = vmax.bf16 %v5283_v4, %v1669_v25  ;;  %v5347_v16 = vmax.bf16 %v5286_v36, %v1670_v8 }
 0x10e   : > { %v1695_v52 = vmax.bf16 %v5213_v39, %v6930_v59  ;;  %v6932_v47 = vld [vmem:[#allocation25_spill] sm:$0xff]  ;;  %6935 = vst [vmem:[#allocation57_spill] sm:$0xff] %v5326_v27  ;;  %v5329_v39 = vld [vmem:[%s3325_s25 + $0x60] sm:$0xf]  ;;  %v5332_v45 = vld [vmem:[%s3325_s25 + $0x64] sm:$0xf]  ;;  %v5362_v10 = vmax.bf16 %v5300_v63, %v1672_v11  ;;  %v5365_v25 = vmax.bf16 %v5303_v14, %v1673_v3  ;;  %v5368_v8 = vmax.bf16 %v5306_v37, %v1674_v13 }
 0x10f   : > { %v1697_v5 = vmax.bf16 %v5218_v18, %v6932_v47  ;;  %v5323_v51 = vld [vmem:[%s3325_s25 + $0x54] sm:$0xf]  ;;  %6936 = vst [vmem:[#allocation67_spill] sm:$0xff] %v5332_v45  ;;  %v5335_v21 = vld [vmem:[%s3325_s25 + $0x6c] sm:$0xf]  ;;  %v5338_v18 = vmax.bf16 %v5277_v33, %v1667_v55  ;;  %v5359_v55 = vmax.bf16 %v5297_v56, %v1671_v53  ;;  %v5380_v53 = vmax.bf16 %v5317_v41, %v1675_v62 }
 0x110   : > { %v5350_v22 = vld [vmem:[%s3325_s25 + $0x70] sm:$0xf]  ;;  %v5353_v28 = vld [vmem:[%s3325_s25 + $0x78] sm:$0xf]  ;;  %v5356_v23 = vld [vmem:[%s3325_s25 + $0x7c] sm:$0xf]  ;;  %v5383_v11 = vmax.bf16 %v5320_v43, %v1676_v38  ;;  %v5386_v3 = vmax.bf16 %v5323_v51, %v1677_v17  ;;  %v5389_v13 = vmax.bf16 %v5326_v27, %v1678_v50  ;;  %v5401_v62 = vmax.bf16 %v5329_v39, %v1679_v48 }
 0x111   : > { %6937 = vst [vmem:[#allocation65_spill] sm:$0xff] %v5350_v22  ;;  %6938 = vst [vmem:[#allocation48_spill] sm:$0xff] %v5356_v23  ;;  %v5371_v60 = vld [vmem:[%s3325_s25 + $0x84] sm:$0xf]  ;;  %v5374_v2 = vld [vmem:[%s3325_s25 + $0x88] sm:$0xf]  ;;  %v5404_v38 = vmax.bf16 %v5332_v45, %v1680_v40  ;;  %v5407_v17 = vmax.bf16 %v5335_v21, %v1681_v19  ;;  %v5410_v50 = vmax.bf16 %v5350_v22, %v1682_v49 }
 0x112   : > { %6939 = vst [vmem:[#allocation66_spill] sm:$0xff] %v5368_v8  ;;  %6940 = vst [vmem:[#allocation49_spill] sm:$0xff] %v5374_v2  ;;  %v5377_v34 = vld [vmem:[%s3325_s25 + $0x90] sm:$0xf]  ;;  %v5392_v29 = vld [vmem:[%s3325_s25 + $0x94] sm:$0xf]  ;;  %v5422_v48 = vmax.bf16 %v5353_v28, %v1683_v57  ;;  %v5425_v40 = vmax.bf16 %v5356_v23, %v1684_v24  ;;  %v5428_v19 = vmax.bf16 %v5371_v60, %v1685_v54 }
 0x113   : > { %6941 = vst [vmem:[#allocation61_spill] sm:$0xff] %v5380_v53  ;;  %6942 = vst [vmem:[#allocation3_spill] sm:$0xff] %v5383_v11  ;;  %v5395_v31 = vld [vmem:[%s3325_s25 + $0x9c] sm:$0xf]  ;;  %v5398_v59 = vld [vmem:[%s3325_s25 + $0xa0] sm:$0xf]  ;;  %v5431_v49 = vmax.bf16 %v5374_v2, %v1686_v61  ;;  %v5446_v57 = vmax.bf16 %v5392_v29, %v1688_v44 }
 0x114   : > { %6943 = vst [vmem:[#allocation73_spill] sm:$0xff] %v5386_v3  ;;  %6944 = vst [vmem:[#allocation70_spill] sm:$0xff] %v5389_v13  ;;  %v5413_v7 = vld [vmem:[%s3325_s25 + $0xa8] sm:$0xf]  ;;  %v5416_v47 = vld [vmem:[%s3325_s25 + $0xac] sm:$0xf]  ;;  %v5449_v24 = vmax.bf16 %v5395_v31, %v1689_v32  ;;  %v5452_v54 = vmax.bf16 %v5398_v59, %v1690_v0  ;;  %v5470_v32 = vmax.bf16 %v5434_v42, %v1694_v58 }
 0x115   : > { %6945 = vst [vmem:[#allocation4_spill] sm:$0xff] %v5392_v29  ;;  %6946 = vst [vmem:[#allocation74_spill] sm:$0xff] %v5398_v59  ;;  %v5419_v35 = vld [vmem:[%s3325_s25 + $0xb4] sm:$0xf]  ;;  %v5455_v61 = vld [vmem:[%s3325_s25 + $0xcc] sm:$0xf] }
 0x116   : > { %6947 = vst [vmem:[#allocation71_spill] sm:$0xff] %v5401_v62  ;;  %6948 = vst [vmem:[#allocation6_spill] sm:$0xff] %v5404_v38  ;;  %v5443_v38 = vmax.bf16 %v5377_v34, %v1687_v15  ;;  %v5464_v15 = vmax.bf16 %v5416_v47, %v1692_v26  ;;  %v5467_v44 = vmax.bf16 %v5419_v35, %v1693_v6  ;;  %v1781_v6 = vshrl.u32 %v5277_v33, 16 }
 0x117   : > { %6949 = vst [vmem:[#allocation78_spill] sm:$0xff] %v5407_v17  ;;  %6950 = vst [vmem:[#allocation75_spill] sm:$0xff] %v5410_v50  ;;  %v5437_v50 = vld [vmem:[%s3325_s25 + $0xc0] sm:$0xf]  ;;  %v5440_v17 = vld [vmem:[%s3325_s25 + $0xc4] sm:$0xf] }
 0x118   : > { %6951 = vst [vmem:[#allocation7_spill] sm:$0xff] %v5416_v47  ;;  %6952 = vst [vmem:[#allocation79_spill] sm:$0xff] %v5422_v48  ;;  %v5476_v0 = vmax.bf16 %v5437_v50, %v1695_v52  ;;  %v1790_v58 = vshll.u32 %v5280_v12, 16  ;;  %v1925_v8 = vshrl.u32 %v5329_v39, 16 }
 0x119   : > { %6953 = vst [vmem:[#allocation76_spill] sm:$0xff] %v5425_v40  ;;  %6954 = vst [vmem:[#allocation8_spill] sm:$0xff] %v5428_v19  ;;  %v5461_v19 = vmax.bf16 %v5413_v7, %v1691_v30  ;;  %v5482_v30 = vmax.bf16 %v5455_v61, %v1697_v5  ;;  %v1808_v5 = vshll.u32 %v5283_v4, 16  ;;  %v1818_v40 = vshrl.u32 %v5286_v36, 16 }
 0x11a   : > { %6955 = vst [vmem:[#allocation9_spill] sm:$0xff] %v5431_v49  ;;  %6957 = vst [vmem:[#allocation24_spill] sm:$0xff] %v5440_v17  ;;  %v5458_v49 = vld [vmem:[%s3325_s25 + $0xd0] sm:$0xf] }
 0x11b   : > { %6958 = vst [vmem:[#allocation31_spill] sm:$0xff] %v5443_v38  ;;  %6959 = vst [vmem:[#allocation38_spill] sm:$0xff] %v5446_v57  ;;  %v5485_v26 = vmax.bf16 %v5458_v49, %v1698_v46  ;;  %v1783_v46 = vrot.slane %v1781_v6, 4  ;;  %v1829_v6 = vshrl.u32 %v5297_v56, 16 }
 0x11c   : > { %6960 = vst [vmem:[#allocation45_spill] sm:$0xff] %v5449_v24  ;;  %6961 = vst [vmem:[#allocation20_spill] sm:$0xff] %v5452_v54  ;;  %v5473_v24 = vld [vmem:[%s3325_s25 + $0x20] sm:$0x1]  ;;  %v5479_v54 = vmax.bf16 %v5440_v17, %v1696_v20  ;;  %v1805_v20 = vshrl.u32 %v5283_v4, 16 }
 0x11d   : > { %6962 = vst [vmem:[#allocation18_spill] sm:$0xff] %v5461_v19  ;;  %6963 = vst [vmem:[#allocation39_spill] sm:$0xff] %v5464_v15  ;;  %v5492_v15 = vld [vmem:[%s3325_s25 + $0x2c] sm:$0x1]  ;;  %v1800_v52 = vshll.u32 %v5473_v24, 16 }
 0x11e   : > { %6964 = vst [vmem:[#allocation52_spill] sm:$0xff] %v5467_v44  ;;  %6965 = vst [vmem:[#allocation33_spill] sm:$0xff] %v5470_v32  ;;  %v1784_v44 = vshll.u32 %v5277_v33, 16  ;;  %v1794_v32 = vshrl.u32 %v5280_v12, 16  ;;  %v1807_v19 = vrot.slane %v1805_v20, 4  ;;  %v1810_v12 = vrot.slane %v1808_v5, 5 }
 0x11f   : > { %6966 = vst [vmem:[#allocation59_spill] sm:$0xff] %v5473_v24  ;;  %6967 = vst [vmem:[#allocation23_spill] sm:$0xff] %v5476_v0  ;;  %v5500_v0 = vrot.slane %v1800_v52, 5  ;;  %v1824_v4 = vshll.u32 %v5492_v15, 16 }
 0x120   : > { %6968 = vst [vmem:[#allocation63_spill] sm:$0xff] %v5479_v54  ;;  %6969 = vst [vmem:[#allocation42_spill] sm:$0xff] %v5482_v30  ;;  %v1814_v30 = vshll.u32 %v5286_v36, 16  ;;  %v5498_v54 = vrot.slane %v1790_v58, 5  ;;  %v1796_v33 = vrot.slane %v1794_v32, 4  ;;  %v1811_v48 = vor.u32 %v1810_v12, %v1807_v19 }
 0x121   : > { %6970 = vst [vmem:[#allocation14_spill] sm:$0xff] %v5485_v26  ;;  %6971 = vst [vmem:[#allocation36_spill] sm:$0xff] %v5492_v15  ;;  %v1786_v26 = vrot.slane %v1784_v44, 5  ;;  %v1832_v44 = vshll.u32 %v5297_v56, 16  ;;  %v1838_v32 = vshll.u32 %v5300_v63, 16  ;;  %v5517_v20 = vrot.slane %v1824_v4, 5 }
 0x122   : > { %v5502_v57 = vrot.slane %v1814_v30, 5  ;;  %v1797_v24 = vor.u32 %v1796_v33, %v5498_v54  ;;  %v5511_v58 = vld [vmem:[%s3325_s25 + $0x38] sm:$0x1]  ;;  %v5519_v5 = vrot.slane %v1811_v48, 4 }
 0x123   : > { %v1787_v38 = vor.u32 %v1786_v26, %v1783_v46  ;;  %6972 = vst [vmem:[#allocation17_spill] sm:$0xff] %v5511_v58  ;;  %v1820_v26 = vrot.slane %v1818_v40, 4  ;;  %v1831_v46 = vrot.slane %v1829_v6, 4  ;;  %v1834_v12 = vrot.slane %v1832_v44, 5 }
 0x124   : > { %v5515_v30 = vrot.slane %v1797_v24, 4  ;;  %v5521_v19 = vrot.slane %v1838_v32, 5  ;;  %v1842_v24 = vshrl.u32 %v5300_v63, 16  ;;  %v1848_v6 = vshll.u32 %v5511_v58, 16  ;;  %v5540_v32 = vld [vmem:[%s3325_s25 + $0x44] sm:$0x1] }
 0x125   : > { %v5513_v52 = vrot.slane %v1787_v38, 4  ;;  %v1821_v40 = vor.u32 %v1820_v26, %v5502_v57  ;;  %v1835_v4 = vor.u32 %v1834_v12, %v1831_v46  ;;  %v1853_v44 = vshrl.u32 %v5303_v14, 16  ;;  %6974 = vst [vmem:[#allocation27_spill] sm:$0xff] %v5540_v32 }
 0x126   : > { %v1844_v38 = vrot.slane %v1842_v24, 4  ;;  %v1856_v26 = vshll.u32 %v5303_v14, 16  ;;  %v1862_v63 = vshll.u32 %v5306_v37, 16  ;;  %v5548_v36 = vrot.slane %v1848_v6, 5 }
 0x127   : > { %v5542_v33 = vrot.slane %v1821_v40, 4  ;;  %v5546_v15 = vrot.slane %v1835_v4, 4  ;;  %v1855_v48 = vrot.slane %v1853_v44, 4  ;;  %v1866_v46 = vshrl.u32 %v5306_v37, 16  ;;  %v5565_v37 = vld [vmem:[%s3325_s25 + $0x50] sm:$0x1] }
 0x128   : > { %v1845_v40 = vor.u32 %v1844_v38, %v5521_v19  ;;  %v1858_v58 = vrot.slane %v1856_v26, 5  ;;  %v5556_v24 = vrot.slane %v1862_v63, 5  ;;  %v1872_v6 = vshll.u32 %v5540_v32, 16  ;;  %6975 = vst [vmem:[#allocation11_spill] sm:$0xff] %v5565_v37 }
 0x129   : > { %v1868_v4 = vrot.slane %v1866_v46, 4  ;;  %v1877_v44 = vshrl.u32 %v5317_v41, 16  ;;  %v1880_v38 = vshll.u32 %v5317_v41, 16  ;;  %v1886_v63 = vshll.u32 %v5320_v43, 16 }
 0x12a   : > { %v5567_v62 = vrot.slane %v1845_v40, 4  ;;  %v1859_v12 = vor.u32 %v1858_v58, %v1855_v48  ;;  %v5572_v13 = vrot.slane %v1872_v6, 5  ;;  %v1890_v46 = vshrl.u32 %v5320_v43, 16 }
 0x12b   : > { %v1869_v26 = vor.u32 %v1868_v4, %v5556_v24  ;;  %v1879_v14 = vrot.slane %v1877_v44, 4  ;;  %v1882_v3 = vrot.slane %v1880_v38, 5  ;;  %v5581_v58 = vrot.slane %v1886_v63, 5  ;;  %v5588_v44 = vld [vmem:[%s3325_s25 + $0x5c] sm:$0x1] }
 0x12c   : > { %6976 = vst [vmem:[#allocation46_spill] sm:$0xff] %v5572_v13  ;;  %v5579_v40 = vrot.slane %v1859_v12, 4  ;;  %v1892_v48 = vrot.slane %v1890_v46, 4  ;;  %v1896_v4 = vshll.u32 %v5565_v37, 16  ;;  %v1901_v6 = vshrl.u32 %v5323_v51, 16  ;;  %6979 = vst [vmem:[#allocation22_spill] sm:$0xff] %v5588_v44 }
 0x12d   : > { %6977 = vst [vmem:[#allocation19_spill] sm:$0xff] %v5581_v58  ;;  %v5583_v41 = vrot.slane %v1869_v26, 4  ;;  %v1883_v12 = vor.u32 %v1882_v3, %v1879_v14  ;;  %v1904_v38 = vshll.u32 %v5323_v51, 16  ;;  %v1910_v63 = vshll.u32 %v5326_v27, 16  ;;  %v5614_v13 = vld [vmem:[%s3325_s25 + $0x68] sm:$0x1] }
 0x12e   : > { %v1893_v46 = vor.u32 %v1892_v48, %v5581_v58  ;;  %v5601_v32 = vrot.slane %v1896_v4, 5  ;;  %v1903_v37 = vrot.slane %v1901_v6, 4  ;;  %v1914_v3 = vshrl.u32 %v5326_v27, 16  ;;  %6980 = vst [vmem:[#allocation50_spill] sm:$0xff] %v5614_v13 }
 0x12f   : > { %6978 = vst [vmem:[#allocation40_spill] sm:$0xff] %v5583_v41  ;;  %v5603_v11 = vrot.slane %v1883_v12, 4  ;;  %v1906_v53 = vrot.slane %v1904_v38, 5  ;;  %v5605_v43 = vrot.slane %v1910_v63, 5  ;;  %v1920_v14 = vshll.u32 %v5588_v44, 16 }
 0x130   : > { %v5608_v51 = vrot.slane %v1893_v46, 4  ;;  %v1928_v26 = vshll.u32 %v5329_v39, 16  ;;  %v1916_v6 = vrot.slane %v1914_v3, 4  ;;  %v1934_v12 = vshll.u32 %v5332_v45, 16  ;;  %v5637_v38 = vld [vmem:[%s3325_s25 + $0x74] sm:$0x1] }
 0x131   : > { %v1907_v4 = vor.u32 %v1906_v53, %v1903_v37  ;;  %v5625_v63 = vrot.slane %v1920_v14, 5  ;;  %v1927_v39 = vrot.slane %v1925_v8, 4  ;;  %v1938_v37 = vshrl.u32 %v5332_v45, 16  ;;  %6983 = vst [vmem:[#allocation68_spill] sm:$0xff] %v5637_v38 }
 0x132   : > { %v1930_v46 = vrot.slane %v1928_v26, 5  ;;  %v1917_v27 = vor.u32 %v1916_v6, %v5605_v43  ;;  %v5630_v41 = vrot.slane %v1934_v12, 5  ;;  %v1944_v3 = vshll.u32 %v5614_v13, 16 }
 0x133   : > { %6981 = vst [vmem:[#allocation26_spill] sm:$0xff] %v5625_v63  ;;  %v5627_v44 = vrot.slane %v1907_v4, 4  ;;  %v1949_v48 = vshrl.u32 %v5335_v21, 16  ;;  %v1952_v58 = vshll.u32 %v5335_v21, 16  ;;  %v1940_v14 = vrot.slane %v1938_v37, 4 }
 0x134   : > { %6982 = vst [vmem:[#allocation37_spill] sm:$0xff] %v5630_v41  ;;  %v1931_v53 = vor.u32 %v1930_v46, %v1927_v39  ;;  %v5643_v26 = vrot.slane %v1917_v27, 4  ;;  %v1958_v4 = vshll.u32 %v5350_v22, 16  ;;  %v5648_v12 = vrot.slane %v1944_v3, 5  ;;  %v5665_v3 = vld [vmem:[%s3325_s25 + $0x80] sm:$0x1] }
 0x135   : > { %v1951_v39 = vrot.slane %v1949_v48, 4  ;;  %v1954_v46 = vrot.slane %v1952_v58, 5  ;;  %v1941_v13 = vor.u32 %v1940_v14, %v5630_v41  ;;  %v1962_v27 = vshrl.u32 %v5350_v22, 16  ;;  %6986 = vst [vmem:[#allocation43_spill] sm:$0xff] %v5665_v3 }
 0x136   : > { %v5646_v6 = vrot.slane %v1931_v53, 4  ;;  %6984 = vst [vmem:[#allocation56_spill] sm:$0xff] %v5648_v12  ;;  %v5655_v8 = vrot.slane %v1958_v4, 5  ;;  %v1968_v48 = vshll.u32 %v5637_v38, 16  ;;  %v1973_v58 = vshrl.u32 %v5353_v28, 16 }
 0x137   : > { %v1955_v53 = vor.u32 %v1954_v46, %v1951_v39  ;;  %v5667_v45 = vrot.slane %v1941_v13, 4  ;;  %v1964_v14 = vrot.slane %v1962_v27, 4  ;;  %v1976_v4 = vshll.u32 %v5353_v28, 16 }
 0x138   : > { %6985 = vst [vmem:[#allocation69_spill] sm:$0xff] %v5655_v8  ;;  %v1982_v21 = vshll.u32 %v5356_v23, 16  ;;  %v5673_v63 = vrot.slane %v1968_v48, 5  ;;  %v1975_v37 = vrot.slane %v1973_v58, 4  ;;  %v1986_v39 = vshrl.u32 %v5356_v23, 16 }
 0x139   : > { %v5671_v22 = vrot.slane %v1955_v53, 4  ;;  %v1965_v13 = vor.u32 %v1964_v14, %v5655_v8  ;;  %v1978_v38 = vrot.slane %v1976_v4, 5  ;;  %v1992_v48 = vshll.u32 %v5665_v3, 16  ;;  %v5690_v23 = vld [vmem:[%s3325_s25 + $0x8c] sm:$0x1] }
 0x13a   : > { %6987 = vst [vmem:[#allocation72_spill] sm:$0xff] %v5673_v63  ;;  %v5681_v27 = vrot.slane %v1982_v21, 5  ;;  %v1988_v53 = vrot.slane %v1986_v39, 4  ;;  %v1997_v58 = vshrl.u32 %v5371_v60, 16  ;;  %6989 = vst [vmem:[#allocation77_spill] sm:$0xff] %v5690_v23  ;;  %v2000_v14 = vshll.u32 %v5371_v60, 16 }
 0x13b   : > { %v5692_v41 = vrot.slane %v1965_v13, 4  ;;  %v1979_v46 = vor.u32 %v1978_v38, %v1975_v37  ;;  %v2006_v21 = vshll.u32 %v5374_v2, 16  ;;  %v5697_v12 = vrot.slane %v1992_v48, 5 }
 0x13c   : > { %6988 = vst [vmem:[#allocation55_spill] sm:$0xff] %v5681_v27  ;;  %v1989_v4 = vor.u32 %v1988_v53, %v5681_v27  ;;  %v1999_v28 = vrot.slane %v1997_v58, 4  ;;  %v2010_v39 = vshrl.u32 %v5374_v2, 16  ;;  %v2002_v8 = vrot.slane %v2000_v14, 5  ;;  %v5713_v58 = vld [vmem:[%s3325_s25 + $0x98] sm:$0x1] }
 0x13d   : > { %6990 = vst [vmem:[#allocation58_spill] sm:$0xff] %v5692_v41  ;;  %6991 = vst [vmem:[#allocation80_spill] sm:$0xff] %v5697_v12  ;;  %v5704_v13 = vrot.slane %v1979_v46, 4  ;;  %v5706_v38 = vrot.slane %v2006_v21, 5  ;;  %v2016_v53 = vshll.u32 %v5690_v23, 16  ;;  %v2021_v48 = vshrl.u32 %v5377_v34, 16 }
 0x13e   : > { %v5708_v60 = vrot.slane %v1989_v4, 4  ;;  %v2012_v37 = vrot.slane %v2010_v39, 4  ;;  %6994 = vst [vmem:[#allocation21_spill] sm:$0xff] %v5713_v58  ;;  %v2003_v46 = vor.u32 %v2002_v8, %v1999_v28  ;;  %v2024_v14 = vshll.u32 %v5377_v34, 16  ;;  %v5739_v12 = vld [vmem:[%s3325_s25 + $0xa4] sm:$0x1] }
 0x13f   : > { %6992 = vst [vmem:[#allocation30_spill] sm:$0xff] %v5706_v38  ;;  %v2030_v21 = vshll.u32 %v5392_v29, 16  ;;  %v5726_v3 = vrot.slane %v2016_v53, 5  ;;  %v2023_v23 = vrot.slane %v2021_v48, 4  ;;  %v2034_v8 = vshrl.u32 %v5392_v29, 16  ;;  %6995 = vst [vmem:[#allocation10_spill] sm:$0xff] %v5739_v12 }
 0x140   : > { %6993 = vst [vmem:[#allocation12_spill] sm:$0xff] %v5708_v60  ;;  %v2013_v39 = vor.u32 %v2012_v37, %v5706_v38  ;;  %v5728_v63 = vrot.slane %v2003_v46, 4  ;;  %v2026_v41 = vrot.slane %v2024_v14, 5  ;;  %v2040_v28 = vshll.u32 %v5713_v58, 16  ;;  %v5762_v14 = vld [vmem:[%s3325_s25 + $0xb0] sm:$0x1] }
 0x141   : > { %v5730_v2 = vrot.slane %v2030_v21, 5  ;;  %v2045_v27 = vshrl.u32 %v5395_v31, 16  ;;  %v2048_v4 = vshll.u32 %v5395_v31, 16  ;;  %v2036_v48 = vrot.slane %v2034_v8, 4  ;;  %6998 = vst [vmem:[#allocation28_spill] sm:$0xff] %v5762_v14 }
 0x142   : > { %v5733_v34 = vrot.slane %v2013_v39, 4  ;;  %v2027_v53 = vor.u32 %v2026_v41, %v2023_v23  ;;  %v2054_v46 = vshll.u32 %v5398_v59, 16  ;;  %v5750_v21 = vrot.slane %v2040_v28, 5 }
 0x143   : > { %v2047_v31 = vrot.slane %v2045_v27, 4  ;;  %v2050_v39 = vrot.slane %v2048_v4, 5  ;;  %v2037_v29 = vor.u32 %v2036_v48, %v5730_v2  ;;  %v2058_v23 = vshrl.u32 %v5398_v59, 16 }
 0x144   : > { %6996 = vst [vmem:[#allocation60_spill] sm:$0xff] %v5750_v21  ;;  %v5752_v58 = vrot.slane %v2027_v53, 4  ;;  %v5755_v60 = vrot.slane %v2054_v46, 5  ;;  %v2064_v8 = vshll.u32 %v5739_v12, 16  ;;  %v2069_v37 = vshrl.u32 %v5413_v7, 16 }
 0x145   : > { %v2051_v41 = vor.u32 %v2050_v39, %v2047_v31  ;;  %v2072_v38 = vshll.u32 %v5413_v7, 16  ;;  %v5768_v4 = vrot.slane %v2037_v29, 4  ;;  %v2060_v28 = vrot.slane %v2058_v23, 4 }
 0x146   : > { %6997 = vst [vmem:[#allocation44_spill] sm:$0xff] %v5755_v60  ;;  %v2078_v53 = vshll.u32 %v5416_v47, 16  ;;  %v5773_v46 = vrot.slane %v2064_v8, 5  ;;  %v2071_v31 = vrot.slane %v2069_v37, 4  ;;  %v2082_v29 = vshrl.u32 %v5416_v47, 16 }
 0x147   : > { %6999 = vst [vmem:[#allocation35_spill] sm:$0xff] %v5768_v4  ;;  %v5771_v48 = vrot.slane %v2051_v41, 4  ;;  %v2074_v39 = vrot.slane %v2072_v38, 5  ;;  %v2061_v12 = vor.u32 %v2060_v28, %v5755_v60  ;;  %v2088_v37 = vshll.u32 %v5762_v14, 16  ;;  %v5790_v8 = vld [vmem:[%s3325_s25 + $0xbc] sm:$0x1] }
 0x148   : > { %7001 = vst [vmem:[#allocation53_spill] sm:$0xff] %v5773_v46  ;;  %v5780_v27 = vrot.slane %v2078_v53, 5  ;;  %v2093_v38 = vshrl.u32 %v5419_v35, 16  ;;  %7003 = vst [vmem:[#allocation29_spill] sm:$0xff] %v5790_v8  ;;  %v2084_v28 = vrot.slane %v2082_v29, 4  ;;  %v2096_v53 = vshll.u32 %v5419_v35, 16 }
 0x149   : > { %7000 = vst [vmem:[#allocation34_spill] sm:$0xff] %v5771_v48  ;;  %v2075_v41 = vor.u32 %v2074_v39, %v2071_v31  ;;  %v5792_v59 = vrot.slane %v2061_v12, 4  ;;  %v2102_v7 = vshll.u32 %v5434_v42, 16  ;;  %v5798_v21 = vrot.slane %v2088_v37, 5 }
 0x14a   : > { %7002 = vst [vmem:[#allocation47_spill] sm:$0xff] %v5780_v27  ;;  %v2095_v23 = vrot.slane %v2093_v38, 4  ;;  %v2106_v31 = vshrl.u32 %v5434_v42, 16  ;;  %v2085_v12 = vor.u32 %v2084_v28, %v5780_v27  ;;  %v2098_v14 = vrot.slane %v2096_v53, 5  ;;  %v5815_v42 = vld [vmem:[%s3325_s25 + $0xc8] sm:$0x1] }
 0x14b   : > { %7004 = vst [vmem:[#allocation51_spill] sm:$0xff] %v5792_v59  ;;  %v5796_v47 = vrot.slane %v2075_v41, 4  ;;  %v5806_v29 = vrot.slane %v2102_v7, 5  ;;  %v2112_v37 = vshll.u32 %v5790_v8, 16  ;;  %v2117_v38 = vshrl.u32 %v5437_v50, 16  ;;  %7006 = vst [vmem:[#allocation41_spill] sm:$0xff] %v5815_v42 }
 0x14c   : > { %v2108_v41 = vrot.slane %v2106_v31, 4  ;;  %v5817_v60 = vrot.slane %v2085_v12, 4  ;;  %v2099_v39 = vor.u32 %v2098_v14, %v2095_v23  ;;  %v2120_v28 = vshll.u32 %v5437_v50, 16 }
 0x14d   : > { %7005 = vst [vmem:[#allocation25_spill] sm:$0xff] %v5796_v47  ;;  %v2126_v7 = vshll.u32 %v5440_v17, 16  ;;  %v5822_v46 = vrot.slane %v2112_v37, 5  ;;  %v2119_v35 = vrot.slane %v2117_v38, 4  ;;  %v2130_v31 = vshrl.u32 %v5440_v17, 16 }
 0x14e   : > { %v2109_v53 = vor.u32 %v2108_v41, %v5806_v29  ;;  %v2091_v8 = vsel %vm3374_vm2, %v5817_v60, %v5798_v21  ;;  %v2100_v12 = vrot.slane %v2099_v39, 4  ;;  %v2122_v27 = vrot.slane %v2120_v28, 5  ;;  %v5832_v41 = vld [vmem:[%s3325_s25 + $0xd4] sm:$0x1] }
 0x14f   : > { %v2128_v47 = vrot.slane %v2126_v7, 5  ;;  %v2132_v23 = vrot.slane %v2130_v31, 4  ;;  %v2136_v50 = vshll.u32 %v5815_v42, 16  ;;  %v2141_v59 = vshrl.u32 %v5455_v61, 16 }
 0x150   : > { %v2110_v14 = vrot.slane %v2109_v53, 4  ;;  %v2105_v37 = vsel %vm3374_vm2, %v2100_v12, %v5806_v29  ;;  %v2123_v38 = vor.u32 %v2122_v27, %v2119_v35  ;;  %v2144_v17 = vshll.u32 %v5455_v61, 16 }
 0x151   : > { %v2150_v60 = vshll.u32 %v5458_v49, 16  ;;  %v2133_v39 = vor.u32 %v2132_v23, %v2128_v47  ;;  %v2138_v28 = vrot.slane %v2136_v50, 5  ;;  %v2143_v7 = vrot.slane %v2141_v59, 4  ;;  %v7018_v23 = vld [vmem:[#allocation61_spill] sm:$0xff]  ;;  %v7021_v50 = vld [vmem:[#allocation3_spill] sm:$0xff] }
 0x152   : > { %v2115_v21 = vsel %vm3374_vm2, %v2110_v14, %v5822_v46  ;;  %v2124_v53 = vrot.slane %v2123_v38, 4  ;;  %v2146_v31 = vrot.slane %v2144_v17, 5  ;;  %v2154_v48 = vshrl.u32 %v5458_v49, 16 }
 0x153   : > { %v2152_v42 = vrot.slane %v2150_v60, 5  ;;  %v2134_v4 = vrot.slane %v2133_v39, 4  ;;  %v2160_v29 = vshll.u32 %v5832_v41, 16  ;;  %v7007_v61 = vsel %vm3374_vm2, %v5513_v52, %v5498_v54 }
 0x154   : > { %v5850_v27 = vmax.bf16 %v7007_v61, %v5338_v18  ;;  %v7008_v59 = vsel %vm3374_vm2, %v5515_v30, %v5500_v0  ;;  %v2129_v46 = vsel %vm3374_vm2, %v2124_v53, %v2128_v47  ;;  %v2147_v35 = vor.u32 %v2146_v31, %v2143_v7  ;;  %v7028_v53 = vld [vmem:[#allocation71_spill] sm:$0xff] }
 0x155   : > { %v5858_v17 = vmax.bf16 %v7008_v59, %v5341_v1  ;;  %v2156_v12 = vrot.slane %v2154_v48, 4  ;;  %v7009_v18 = vsel %vm3374_vm2, %v5519_v5, %v5502_v57  ;;  %v2139_v52 = vsel %vm3374_vm2, %v2134_v4, %v2138_v28  ;;  %v7025_v28 = vld [vmem:[#allocation70_spill] sm:$0xff] }
 0x156   : > { %v5868_v54 = vmax.bf16 %v7009_v18, %v5344_v9  ;;  %v2162_v14 = vrot.slane %v2160_v29, 5  ;;  %v7010_v1 = vsel %vm3374_vm2, %v5542_v33, %v5517_v20  ;;  %v7011_v57 = vsel %vm3374_vm2, %v5546_v15, %v5521_v19  ;;  %v7015_v15 = vld [vmem:[#allocation40_spill] sm:$0xff]  ;;  %v7016_v19 = vld [vmem:[#allocation46_spill] sm:$0xff] }
 0x157   : > { %v5878_v47 = vmax.bf16 %v7010_v1, %v5347_v16  ;;  %v5886_v9 = vmax.bf16 %v7011_v57, %v5359_v55  ;;  %v2148_v0 = vrot.slane %v2147_v35, 4  ;;  %v2157_v30 = vor.u32 %v2156_v12, %v2152_v42  ;;  %v7014_v55 = vld [vmem:[#allocation66_spill] sm:$0xff]  ;;  %v7032_v29 = vld [vmem:[#allocation56_spill] sm:$0xff]  ;;  %v7035_v35 = vld [vmem:[#allocation69_spill] sm:$0xff] }
 0x158   : > { %v7012_v5 = vsel %vm3374_vm2, %v5567_v62, %v5548_v36  ;;  %v7013_v16 = vsel %vm3374_vm2, %v5579_v40, %v5556_v24  ;;  %v7017_v33 = vsel %vm3374_vm2, %v7015_v15, %v7016_v19  ;;  %v7019_v36 = vld [vmem:[#allocation19_spill] sm:$0xff]  ;;  %v7023_v40 = vld [vmem:[#allocation73_spill] sm:$0xff]  ;;  %v7024_v38 = vsel %vm3374_vm2, %v5627_v44, %v5605_v43  ;;  %v7039_v57 = vld [vmem:[#allocation72_spill] sm:$0xff] }
 0x159   : > { %v5894_v4 = vmax.bf16 %v7012_v5, %v5362_v10  ;;  %v5902_v20 = vmax.bf16 %v7013_v16, %v5365_v25  ;;  %v5910_v48 = vmax.bf16 %v7017_v33, %v7014_v55  ;;  %v7020_v10 = vsel %vm3374_vm2, %v5603_v11, %v7019_v36  ;;  %v7029_v43 = vld [vmem:[#allocation37_spill] sm:$0xff]  ;;  %v7037_v1 = vld [vmem:[#allocation75_spill] sm:$0xff]  ;;  %v7044_v15 = vld [vmem:[#allocation76_spill] sm:$0xff] }
 0x15a   : > { %v5918_v62 = vmax.bf16 %v7020_v10, %v7018_v23  ;;  %v7022_v25 = vsel %vm3374_vm2, %v5608_v51, %v5601_v32  ;;  %v5934_v60 = vmax.bf16 %v7024_v38, %v7023_v40  ;;  %v2153_v11 = vsel %vm3374_vm2, %v2148_v0, %v2152_v42  ;;  %v7026_v32 = vld [vmem:[#allocation26_spill] sm:$0xff]  ;;  %v7041_v5 = vld [vmem:[#allocation79_spill] sm:$0xff]  ;;  %v7045_v19 = vld [vmem:[#allocation12_spill] sm:$0xff] }
 0x15b   : > { %v5926_v24 = vmax.bf16 %v7022_v25, %v7021_v50  ;;  %v2158_v39 = vrot.slane %v2157_v30, 4  ;;  %v7027_v51 = vsel %vm3374_vm2, %v5643_v26, %v7026_v32  ;;  %v7030_v44 = vsel %vm3374_vm2, %v5646_v6, %v7029_v43  ;;  %v7031_v42 = vld [vmem:[#allocation6_spill] sm:$0xff]  ;;  %v7046_v33 = vld [vmem:[#allocation80_spill] sm:$0xff]  ;;  %v7051_v40 = vld [vmem:[#allocation9_spill] sm:$0xff] }
 0x15c   : > { %v5944_v7 = vmax.bf16 %v7027_v51, %v7025_v28  ;;  %v5952_v31 = vmax.bf16 %v7030_v44, %v7028_v53  ;;  %v7033_v61 = vsel %vm3374_vm2, %v5667_v45, %v7032_v29  ;;  %v7034_v26 = vld [vmem:[#allocation78_spill] sm:$0xff]  ;;  %v7036_v12 = vsel %vm3374_vm2, %v5671_v22, %v7035_v35  ;;  %v7042_v45 = vld [vmem:[#allocation55_spill] sm:$0xff]  ;;  %v7048_v10 = vld [vmem:[#allocation8_spill] sm:$0xff] }
 0x15d   : > { %v5960_v59 = vmax.bf16 %v7033_v61, %v7031_v42  ;;  %v5968_v18 = vmax.bf16 %v7036_v12, %v7034_v26  ;;  %v7038_v6 = vld [vmem:[#allocation58_spill] sm:$0xff]  ;;  %v7043_v16 = vsel %vm3374_vm2, %v5704_v13, %v7042_v45  ;;  %v2163_v22 = vsel %vm3374_vm2, %v2158_v39, %v2162_v14  ;;  %v7053_v39 = vld [vmem:[#allocation31_spill] sm:$0xff]  ;;  %v7058_v53 = vld [vmem:[#allocation60_spill] sm:$0xff] }
 0x15e   : > { %v7040_v0 = vsel %vm3374_vm2, %v7038_v6, %v7039_v57  ;;  %v5984_v55 = vmax.bf16 %v7043_v16, %v7041_v5  ;;  %v7047_v23 = vsel %vm3374_vm2, %v7045_v19, %v7046_v33  ;;  %v7049_v50 = vld [vmem:[#allocation30_spill] sm:$0xff]  ;;  %v7052_v14 = vsel %vm3374_vm2, %v5733_v34, %v5726_v3  ;;  %v7057_v51 = vld [vmem:[#allocation35_spill] sm:$0xff]  ;;  %v7061_v3 = vld [vmem:[#allocation45_spill] sm:$0xff] }
 0x15f   : > { %v5976_v30 = vmax.bf16 %v7040_v0, %v7037_v1  ;;  %v5994_v36 = vmax.bf16 %v7047_v23, %v7044_v15  ;;  %v7050_v13 = vsel %vm3374_vm2, %v5728_v63, %v7049_v50  ;;  %v6010_v38 = vmax.bf16 %v7052_v14, %v7051_v40  ;;  %v7056_v63 = vld [vmem:[#allocation38_spill] sm:$0xff]  ;;  %v7063_v42 = vld [vmem:[#allocation44_spill] sm:$0xff]  ;;  %v7068_v26 = vld [vmem:[#allocation53_spill] sm:$0xff] }
 0x160   : > { %v6002_v25 = vmax.bf16 %v7050_v13, %v7048_v10  ;;  %v7054_v28 = vsel %vm3374_vm2, %v5752_v58, %v5730_v2  ;;  %v7059_v43 = vsel %vm3374_vm2, %v7057_v51, %v7058_v53  ;;  %v7062_v34 = vld [vmem:[#allocation34_spill] sm:$0xff]  ;;  %v7066_v2 = vld [vmem:[#allocation20_spill] sm:$0xff]  ;;  %v7067_v58 = vld [vmem:[#allocation51_spill] sm:$0xff] }
 0x161   : > { %v6018_v32 = vmax.bf16 %v7054_v28, %v7053_v39  ;;  %v6026_v44 = vmax.bf16 %v7059_v43, %v7056_v63  ;;  %v7064_v29 = vsel %vm3374_vm2, %v7062_v34, %v7063_v42  ;;  %v7069_v35 = vsel %vm3374_vm2, %v7067_v58, %v7068_v26  ;;  %v3031_v1 = vld [vmem:[%s3325_s25 + $0x18] sm:$0xe]  ;;  %v3032_v6 = vld [vmem:[%s3325_s25 + $0x24] sm:$0xe]  ;;  %v7072_v0 = vld [vmem:[#allocation25_spill] sm:$0xff] }
 0x162   : > { %v6034_v61 = vmax.bf16 %v7064_v29, %v7061_v3  ;;  %v6042_v12 = vmax.bf16 %v7069_v35, %v7066_v2  ;;  %v7071_v57 = vld [vmem:[#allocation18_spill] sm:$0xff]  ;;  %v7073_v5 = vld [vmem:[#allocation47_spill] sm:$0xff]  ;;  %v7078_v33 = vld [vmem:[#allocation52_spill] sm:$0xff]  ;;  %v3048_v42 = vrot.slane %v3032_v6, 9 }
 0x163   : > { %7055 = vst [vmem:[#allocation5_spill] sm:$0xff] %v6018_v32  ;;  %7060 = vst [vmem:[#allocation66_spill] sm:$0xff] %v6026_v44  ;;  %v7074_v45 = vsel %vm3374_vm2, %v7072_v0, %v7073_v5  ;;  %v7076_v15 = vld [vmem:[#allocation39_spill] sm:$0xff]  ;;  %v6058_v23 = vmax.bf16 %v2105_v37, %v7078_v33  ;;  %v7080_v10 = vld [vmem:[#allocation33_spill] sm:$0xff]  ;;  %v3047_v37 = vrot.slane %v3031_v1, 9 }
 0x164   : > { %7065 = vst [vmem:[#allocation40_spill] sm:$0xff] %v6034_v61  ;;  %7070 = vst [vmem:[#allocation46_spill] sm:$0xff] %v6042_v12  ;;  %v6052_v16 = vmax.bf16 %v7074_v45, %v7071_v57  ;;  %v6055_v19 = vmax.bf16 %v2091_v8, %v7076_v15  ;;  %v6061_v50 = vmax.bf16 %v2115_v21, %v7080_v10  ;;  %v3033_v13 = vld [vmem:[%s3325_s25 + $0x30] sm:$0xe]  ;;  %v7082_v40 = vld [vmem:[#allocation23_spill] sm:$0xff] }
 0x165   : > { %7079 = vst [vmem:[#allocation3_spill] sm:$0xff] %v6058_v23  ;;  %v6065_v14 = vmax.bf16 %v2129_v46, %v7082_v40  ;;  %v7084_v39 = vld [vmem:[#allocation63_spill] sm:$0xff]  ;;  %v7086_v28 = vld [vmem:[#allocation42_spill] sm:$0xff]  ;;  %v3035_v46 = vld [vmem:[%s3325_s25 + $0x48] sm:$0xe]  ;;  %v3049_v26 = vrot.slane %v3033_v13, 9 }
 0x166   : > { %7075 = vst [vmem:[#allocation61_spill] sm:$0xff] %v6052_v16  ;;  %7077 = vst [vmem:[#allocation19_spill] sm:$0xff] %v6055_v19  ;;  %v6068_v56 = vmax.bf16 %v2139_v52, %v7084_v39  ;;  %v6071_v63 = vmax.bf16 %v2153_v11, %v7086_v28  ;;  %v7088_v51 = vld [vmem:[#allocation14_spill] sm:$0xff]  ;;  %v7091_v21 = vld [vmem:[#allocation59_spill] sm:$0xff] }
 0x167   : > { %7081 = vst [vmem:[#allocation73_spill] sm:$0xff] %v6061_v50  ;;  %7083 = vst [vmem:[#allocation70_spill] sm:$0xff] %v6065_v14  ;;  %v6074_v8 = vmax.bf16 %v2163_v22, %v7088_v51  ;;  %v3034_v53 = vld [vmem:[%s3325_s25 + $0x3c] sm:$0xe]  ;;  %v2297_v34 = vrot.slane %v7091_v21, 5  ;;  %v7092_v29 = vld [vmem:[#allocation64_spill] sm:$0xff] }
 0x168   : > { %7085 = vst [vmem:[#allocation26_spill] sm:$0xff] %v6068_v56  ;;  %7087 = vst [vmem:[#allocation71_spill] sm:$0xff] %v6071_v63  ;;  %v7090_v43 = vld [vmem:[#allocation54_spill] sm:$0xff]  ;;  %v2301_v2 = vrot.slane %v7092_v29, 5  ;;  %v7093_v52 = vld [vmem:[#allocation36_spill] sm:$0xff]  ;;  %v3050_v45 = vrot.slane %v3034_v53, 9 }
 0x169   : > { %7089 = vst [vmem:[#allocation37_spill] sm:$0xff] %v6074_v8  ;;  %v2294_v3 = vrot.slane %v7090_v43, 5  ;;  %v2304_v58 = vrot.slane %v7093_v52, 5  ;;  %v7094_v11 = vld [vmem:[#allocation15_spill] sm:$0xff]  ;;  %v7096_v1 = vld [vmem:[#allocation17_spill] sm:$0xff]  ;;  %v7097_v28 = vld [vmem:[#allocation62_spill] sm:$0xff] }
 0x16a   : > { %v2308_v35 = vrot.slane %v7094_v11, 5  ;;  %v2311_v5 = vrot.slane %v7096_v1, 5  ;;  %v3036_v15 = vld [vmem:[%s3325_s25 + $0x54] sm:$0xe]  ;;  %v6091_v6 = vsel %vm4031_vm5, %v3048_v42, %v2301_v2  ;;  %v2303_v33 = vrot.slane %v2301_v2, 4  ;;  %v7099_v42 = vld [vmem:[#allocation32_spill] sm:$0xff] }
 0x16b   : > { %v6085_v22 = vsel %vm4031_vm5, %v3047_v37, %v2294_v3  ;;  %v2296_v0 = vrot.slane %v2294_v3, 4  ;;  %v3037_v40 = vld [vmem:[%s3325_s25 + $0x60] sm:$0xe]  ;;  %v2315_v51 = vrot.slane %v7097_v28, 5  ;;  %v3051_v43 = vrot.slane %v3035_v46, 9  ;;  %v7109_v14 = vld [vmem:[#allocation49_spill] sm:$0xff] }
 0x16c   : > { %v6095_v10 = vsel %vm4031_vm5, %v3049_v26, %v2308_v35  ;;  %v2310_v13 = vrot.slane %v2308_v35, 4  ;;  %v7098_v37 = vld [vmem:[#allocation27_spill] sm:$0xff]  ;;  %v6106_v3 = vsel %vm4031_vm5, %v2303_v33, %v2304_v58  ;;  %v2322_v29 = vrot.slane %v7099_v42, 5  ;;  %v3038_v52 = vld [vmem:[%s3325_s25 + $0x6c] sm:$0xe]  ;;  %v7101_v35 = vld [vmem:[#allocation57_spill] sm:$0xff] }
 0x16d   : > { %v6100_v39 = vsel %vm4031_vm5, %v2296_v0, %v2297_v34  ;;  %v2318_v53 = vrot.slane %v7098_v37, 5  ;;  %v7100_v2 = vld [vmem:[#allocation11_spill] sm:$0xff]  ;;  %v6117_v26 = vsel %vm4031_vm5, %v3050_v45, %v2315_v51  ;;  %v2317_v11 = vrot.slane %v2315_v51, 4  ;;  %v3039_v28 = vld [vmem:[%s3325_s25 + $0x78] sm:$0xe] }
 0x16e   : > { %v6110_v21 = vsel %vm4031_vm5, %v2310_v13, %v2311_v5  ;;  %v2325_v34 = vrot.slane %v7100_v2, 5  ;;  %v3052_v46 = vrot.slane %v3036_v15, 9  ;;  %v2329_v0 = vrot.slane %v7101_v35, 5  ;;  %v7102_v5 = vld [vmem:[#allocation22_spill] sm:$0xff]  ;;  %v7103_v51 = vld [vmem:[#allocation67_spill] sm:$0xff] }
 0x16f   : > { %v6122_v58 = vsel %vm4031_vm5, %v3051_v43, %v2322_v29  ;;  %v2324_v1 = vrot.slane %v2322_v29, 4  ;;  %v2332_v33 = vrot.slane %v7102_v5, 5  ;;  %v3053_v13 = vrot.slane %v3037_v40, 9  ;;  %v3040_v43 = vld [vmem:[%s3325_s25 + $0x84] sm:$0xe]  ;;  %v7104_v2 = vld [vmem:[#allocation50_spill] sm:$0xff] }
 0x170   : > { %v6128_v37 = vsel %vm4031_vm5, %v2317_v11, %v2318_v53  ;;  %v6132_v45 = vsel %vm4031_vm5, %v3052_v46, %v2329_v0  ;;  %v2331_v15 = vrot.slane %v2329_v0, 4  ;;  %v2336_v42 = vrot.slane %v7103_v51, 5  ;;  %v7105_v5 = vld [vmem:[#allocation65_spill] sm:$0xff]  ;;  %v7106_v0 = vld [vmem:[#allocation68_spill] sm:$0xff]  ;;  %v7113_v16 = vld [vmem:[#allocation74_spill] sm:$0xff] }
 0x171   : > { %v6138_v29 = vsel %vm4031_vm5, %v2324_v1, %v2325_v34  ;;  %v2339_v40 = vrot.slane %v7104_v2, 5  ;;  %v3054_v35 = vrot.slane %v3038_v52, 9  ;;  %v2343_v8 = vrot.slane %v7105_v5, 5  ;;  %v3041_v63 = vld [vmem:[%s3325_s25 + $0x90] sm:$0xe]  ;;  %v7107_v2 = vld [vmem:[#allocation48_spill] sm:$0xff] }
 0x172   : > { %v6144_v53 = vsel %vm4031_vm5, %v2331_v15, %v2332_v33  ;;  %v6148_v11 = vsel %vm4031_vm5, %v3053_v13, %v2336_v42  ;;  %v2338_v46 = vrot.slane %v2336_v42, 4  ;;  %v2346_v51 = vrot.slane %v7106_v0, 5  ;;  %v3042_v33 = vld [vmem:[%s3325_s25 + $0x9c] sm:$0xe]  ;;  %v7108_v13 = vld [vmem:[#allocation43_spill] sm:$0xff] }
 0x173   : > { %v6154_v34 = vsel %vm4031_vm5, %v3054_v35, %v2343_v8  ;;  %v2345_v52 = vrot.slane %v2343_v8, 4  ;;  %v3055_v1 = vrot.slane %v3039_v28, 9  ;;  %v2350_v5 = vrot.slane %v7107_v2, 5  ;;  %v7110_v35 = vld [vmem:[#allocation77_spill] sm:$0xff]  ;;  %v3043_v23 = vld [vmem:[%s3325_s25 + $0xa8] sm:$0xe] }
 0x174   : > { %v6160_v15 = vsel %vm4031_vm5, %v2338_v46, %v2339_v40  ;;  %v2353_v42 = vrot.slane %v7108_v13, 5  ;;  %v3056_v56 = vrot.slane %v3040_v43, 9  ;;  %v2357_v0 = vrot.slane %v7109_v14, 5  ;;  %v7111_v14 = vld [vmem:[#allocation4_spill] sm:$0xff]  ;;  %v3045_v61 = vld [vmem:[%s3325_s25 + $0xc0] sm:$0xe] }
 0x175   : > { %v6166_v50 = vsel %vm4031_vm5, %v2345_v52, %v2346_v51  ;;  %v6170_v8 = vsel %vm4031_vm5, %v3055_v1, %v2350_v5  ;;  %v2352_v28 = vrot.slane %v2350_v5, 4  ;;  %v2360_v2 = vrot.slane %v7110_v35, 5  ;;  %v3044_v51 = vld [vmem:[%s3325_s25 + $0xb4] sm:$0xe]  ;;  %v3046_v44 = vld [vmem:[%s3325_s25 + $0xcc] sm:$0xe] }
 0x176   : > { %v6176_v40 = vsel %vm4031_vm5, %v3056_v56, %v2357_v0  ;;  %v2359_v43 = vrot.slane %v2357_v0, 4  ;;  %v3057_v46 = vrot.slane %v3041_v63, 9  ;;  %v2364_v13 = vrot.slane %v7111_v14, 5  ;;  %v7112_v1 = vld [vmem:[#allocation21_spill] sm:$0xff]  ;;  %v7115_v0 = vld [vmem:[#allocation10_spill] sm:$0xff] }
 0x177   : > { %v6182_v52 = vsel %vm4031_vm5, %v2352_v28, %v2353_v42  ;;  %v2367_v5 = vrot.slane %v7112_v1, 5  ;;  %v3058_v19 = vrot.slane %v3042_v33, 9  ;;  %v2371_v35 = vrot.slane %v7113_v16, 5  ;;  %v7117_v1 = vld [vmem:[#allocation7_spill] sm:$0xff] }
 0x178   : > { %v6188_v12 = vsel %vm4031_vm5, %v2359_v43, %v2360_v2  ;;  %v6192_v56 = vsel %vm4031_vm5, %v3057_v46, %v2364_v13  ;;  %v2366_v63 = vrot.slane %v2364_v13, 4  ;;  %v2374_v14 = vrot.slane %v7115_v0, 5  ;;  %v7118_v43 = vld [vmem:[#allocation28_spill] sm:$0xff]  ;;  %v7119_v13 = vld [vmem:[#allocation13_spill] sm:$0xff] }
 0x179   : > { %7114 = vst [vmem:[#allocation6_spill] sm:$0xff] %v6192_v56  ;;  %v6198_v42 = vsel %vm4031_vm5, %v3058_v19, %v2371_v35  ;;  %v2373_v28 = vrot.slane %v2371_v35, 4  ;;  %v3059_v33 = vrot.slane %v3043_v23, 9  ;;  %v2378_v16 = vrot.slane %v7117_v1, 5  ;;  %v7121_v35 = vld [vmem:[#allocation29_spill] sm:$0xff] }
 0x17a   : > { %7116 = vst [vmem:[#allocation56_spill] sm:$0xff] %v6198_v42  ;;  %v6204_v2 = vsel %vm4031_vm5, %v2366_v63, %v2367_v5  ;;  %v2381_v46 = vrot.slane %v7118_v43, 5  ;;  %v3060_v56 = vrot.slane %v3044_v51, 9  ;;  %v2385_v32 = vrot.slane %v7119_v13, 5  ;;  %v7122_v51 = vld [vmem:[#allocation24_spill] sm:$0xff] }
 0x17b   : > { %v6210_v0 = vsel %vm4031_vm5, %v2373_v28, %v2374_v14  ;;  %v6214_v19 = vsel %vm4031_vm5, %v3059_v33, %v2378_v16  ;;  %v2380_v23 = vrot.slane %v2378_v16, 4  ;;  %v2388_v1 = vrot.slane %v7121_v35, 5  ;;  %v7123_v14 = vld [vmem:[#allocation41_spill] sm:$0xff] }
 0x17c   : > { %7120 = vst [vmem:[#allocation78_spill] sm:$0xff] %v6210_v0  ;;  %v6219_v5 = vsel %vm4031_vm5, %v3060_v56, %v2385_v32  ;;  %v2387_v63 = vrot.slane %v2385_v32, 4  ;;  %v3061_v43 = vrot.slane %v3045_v61, 9  ;;  %v2392_v42 = vrot.slane %v7122_v51, 5  ;;  %v2471_v51 = vld [vmem:[#allocation2 + $0x18] sm:$0xff] }
 0x17d   : > { %v6224_v13 = vsel %vm4031_vm5, %v2380_v23, %v2381_v46  ;;  %v2395_v28 = vrot.slane %v7123_v14, 5  ;;  %v3062_v0 = vrot.slane %v3046_v44, 9  ;;  %v2399_v33 = vrot.slane %v5458_v49, 5 }
 0x17e   : > { %v6230_v16 = vsel %vm4031_vm5, %v2387_v63, %v2388_v1  ;;  %v6234_v56 = vsel %vm4031_vm5, %v3061_v43, %v2392_v42  ;;  %v2394_v32 = vrot.slane %v2392_v42, 4  ;;  %v2402_v61 = vrot.slane %v5832_v41, 5  ;;  %v2469_v63 = vld [vmem:[#allocation2 + $0x8] sm:$0xff]  ;;  %v2470_v43 = vld [vmem:[#allocation2 + $0x10] sm:$0xff] }
 0x17f   : > { %v6239_v46 = vsel %vm4031_vm5, %v3062_v0, %v2399_v33  ;;  %v2401_v23 = vrot.slane %v2399_v33, 4  ;;  %v2436_v44 = vmax.bf16 %v6085_v22, %v5850_v27  ;;  %v2437_v49 = vmax.bf16 %v6100_v39, %v5858_v17  ;;  %v7126_v39 = vld [vmem:[#allocation66_spill] sm:$0xff]  ;;  %v2472_v33 = vld [vmem:[#allocation2 + $0x20] sm:$0xff] }
 0x180   : > { %v2396_v35 = vsel %vm4031_vm5, %v2394_v32, %v2395_v28  ;;  %v2438_v1 = vmax.bf16 %v6091_v6, %v5868_v54  ;;  %v2439_v41 = vmax.bf16 %v6106_v3, %v5878_v47  ;;  %v2440_v42 = vmax.bf16 %v6095_v10, %v5886_v9  ;;  %v7124_v6 = vld [vmem:[#allocation5_spill] sm:$0xff]  ;;  %v7127_v3 = vld [vmem:[#allocation40_spill] sm:$0xff] }
 0x181   : > { %v2403_v0 = vsel %vm4031_vm5, %v2401_v23, %v2402_v61  ;;  %v2441_v27 = vmax.bf16 %v6110_v21, %v5894_v4  ;;  %v2442_v17 = vmax.bf16 %v6117_v26, %v5902_v20  ;;  %v2443_v22 = vmax.bf16 %v6128_v37, %v5910_v48  ;;  %v7129_v21 = vld [vmem:[#allocation46_spill] sm:$0xff]  ;;  %v7132_v37 = vld [vmem:[#allocation19_spill] sm:$0xff]  ;;  %v2474_v32 = vld [vmem:[#allocation2 + $0x30] sm:$0xff] }
 0x182   : > { %v2444_v54 = vmax.bf16 %v6122_v58, %v5918_v62  ;;  %v2445_v47 = vmax.bf16 %v6138_v29, %v5926_v24  ;;  %v2446_v9 = vmax.bf16 %v6132_v45, %v5934_v60  ;;  %v2447_v57 = vmax.bf16 %v6144_v53, %v5944_v7  ;;  %v7131_v58 = vld [vmem:[#allocation61_spill] sm:$0xff]  ;;  %v7133_v45 = vld [vmem:[#allocation3_spill] sm:$0xff]  ;;  %v7135_v53 = vld [vmem:[#allocation70_spill] sm:$0xff] }
 0x183   : > { %v2448_v4 = vmax.bf16 %v6148_v11, %v5952_v31  ;;  %v2449_v20 = vmax.bf16 %v6160_v15, %v5960_v59  ;;  %v2450_v48 = vmax.bf16 %v6154_v34, %v5968_v18  ;;  %v2451_v62 = vmax.bf16 %v6166_v50, %v5976_v30  ;;  %v7125_v59 = vld [vmem:[#allocation6_spill] sm:$0xff]  ;;  %v7128_v30 = vld [vmem:[#allocation56_spill] sm:$0xff] }
 0x184   : > { %v2452_v24 = vmax.bf16 %v6170_v8, %v5984_v55  ;;  %v2453_v60 = vmax.bf16 %v6182_v52, %v5994_v36  ;;  %v2454_v7 = vmax.bf16 %v6176_v40, %v6002_v25  ;;  %v2455_v31 = vmax.bf16 %v6188_v12, %v6010_v38  ;;  %v7130_v55 = vld [vmem:[#allocation78_spill] sm:$0xff]  ;;  %v7134_v12 = vld [vmem:[#allocation73_spill] sm:$0xff]  ;;  %v7137_v8 = vld [vmem:[#allocation71_spill] sm:$0xff] }
 0x185   : > { %v2456_v10 = vmax.bf16 %v7125_v59, %v7124_v6  ;;  %v2457_v18 = vmax.bf16 %v6204_v2, %v7126_v39  ;;  %v2458_v50 = vmax.bf16 %v7128_v30, %v7127_v3  ;;  %v2459_v26 = vmax.bf16 %v7130_v55, %v7129_v21  ;;  %v7136_v34 = vld [vmem:[#allocation26_spill] sm:$0xff]  ;;  %v7138_v52 = vld [vmem:[#allocation37_spill] sm:$0xff]  ;;  %v2476_v59 = vld [vmem:[#allocation2 + $0x40] sm:$0xff] }
 0x186   : > { %v2460_v36 = vmax.bf16 %v6214_v19, %v7131_v58  ;;  %v2461_v25 = vmax.bf16 %v6224_v13, %v7132_v37  ;;  %v2462_v38 = vmax.bf16 %v6219_v5, %v7133_v45  ;;  %v2463_v29 = vmax.bf16 %v6230_v16, %v7134_v12  ;;  %v2468_v19 = vld [vmem:[#allocation2] sm:$0xff]  ;;  %v2473_v16 = vld [vmem:[#allocation2 + $0x28] sm:$0xff]  ;;  %v2475_v6 = vld [vmem:[#allocation2 + $0x38] sm:$0xff] }
 0x187   : > { %v2464_v11 = vmax.bf16 %v6234_v56, %v7135_v53  ;;  %v2465_v15 = vmax.bf16 %v2396_v35, %v7136_v34  ;;  %v2466_v40 = vmax.bf16 %v6239_v46, %v7137_v8  ;;  %v2467_v2 = vmax.bf16 %v2403_v0, %v7138_v52  ;;  %v2477_v46 = vld [vmem:[#allocation2 + $0x48] sm:$0xff]  ;;  %v2478_v21 = vld [vmem:[#allocation2 + $0x50] sm:$0xff]  ;;  %v2479_v55 = vld [vmem:[#allocation2 + $0x58] sm:$0xff] }
 0x188   : > { %v3063_v13 = vcombine.low %v2436_v44, %v2437_v49  ;;  %v3064_v14 = vcombine.low %v2438_v1, %v2439_v41  ;;  %v3065_v5 = vcombine.low %v2440_v42, %v2441_v27  ;;  %v3066_v28 = vcombine.low %v2442_v17, %v2443_v22  ;;  %v2480_v44 = vld [vmem:[#allocation2 + $0x60] sm:$0xff]  ;;  %v2481_v27 = vld [vmem:[#allocation2 + $0x68] sm:$0xff]  ;;  %v2482_v17 = vld [vmem:[#allocation2 + $0x70] sm:$0xff] }
 0x189   : > { %v3067_v61 = vcombine.low %v2444_v54, %v2445_v47  ;;  %v3068_v56 = vcombine.low %v2446_v9, %v2447_v57  ;;  %v3069_v23 = vcombine.low %v2448_v4, %v2449_v20  ;;  %v3070_v35 = vcombine.low %v2450_v48, %v2451_v62  ;;  %v2483_v22 = vld [vmem:[#allocation2 + $0x78] sm:$0xff] }
 0x18a   : > { %v3071_v39 = vcombine.low %v2452_v24, %v2453_v60  ;;  %v3072_v0 = vcombine.low %v2454_v7, %v2455_v31  ;;  %v3073_v3 = vcombine.low %v2456_v10, %v2457_v18  ;;  %v3074_v30 = vcombine.low %v2458_v50, %v2459_v26 }
 0x18b   : > { %v3075_v49 = vcombine.low %v2460_v36, %v2461_v25  ;;  %v3076_v1 = vcombine.low %v2462_v38, %v2463_v29  ;;  %v3077_v41 = vcombine.low %v2464_v11, %v2465_v15  ;;  %v3078_v42 = vcombine.low %v2466_v40, %v2467_v2 }
 0x18c   : > { %v2580_v54 = vmax.bf16 %v3063_v13, %v2468_v19  ;;  %v2581_v47 = vmax.bf16 %v3064_v14, %v2469_v63  ;;  %v2582_v9 = vmax.bf16 %v3065_v5, %v2470_v43  ;;  %v2583_v57 = vmax.bf16 %v3066_v28, %v2471_v51 }
 0x18d   : > { %v2584_v4 = vmax.bf16 %v3067_v61, %v2472_v33  ;;  %v2585_v20 = vmax.bf16 %v3068_v56, %v2473_v16  ;;  %v2586_v48 = vmax.bf16 %v3069_v23, %v2474_v32  ;;  %v2587_v62 = vmax.bf16 %v3070_v35, %v2475_v6 }
 0x18e   : > { %v2588_v24 = vmax.bf16 %v3071_v39, %v2476_v59  ;;  %v2589_v60 = vmax.bf16 %v3072_v0, %v2477_v46  ;;  %v2590_v7 = vmax.bf16 %v3073_v3, %v2478_v21  ;;  %v2591_v31 = vmax.bf16 %v3074_v30, %v2479_v55  ;;  %2596 = vst [vmem:[#allocation2] sm:$0xff] %v2580_v54 }
 0x18f   : > { %2597 = vst [vmem:[#allocation2 + $0x8] sm:$0xff] %v2581_v47  ;;  %2598 = vst [vmem:[#allocation2 + $0x10] sm:$0xff] %v2582_v9  ;;  %v2592_v10 = vmax.bf16 %v3075_v49, %v2480_v44  ;;  %v2593_v18 = vmax.bf16 %v3076_v1, %v2481_v27  ;;  %v2594_v50 = vmax.bf16 %v3077_v41, %v2482_v17 }
 0x190   : > { %2599 = vst [vmem:[#allocation2 + $0x18] sm:$0xff] %v2583_v57  ;;  %v2595_v26 = vmax.bf16 %v3078_v42, %v2483_v22  ;;  %2600 = vst [vmem:[#allocation2 + $0x20] sm:$0xff] %v2584_v4  ;;  %2615 = sbr.rel (%p3079_p10) target bundleno = 424 (0x1a8), region = 32 }
 0x191   : > { %2601 = vst [vmem:[#allocation2 + $0x28] sm:$0xff] %v2585_v20  ;;  %2602 = vst [vmem:[#allocation2 + $0x30] sm:$0xff] %v2586_v48 }
 0x192   : > { %2603 = vst [vmem:[#allocation2 + $0x38] sm:$0xff] %v2587_v62  ;;  %2604 = vst [vmem:[#allocation2 + $0x40] sm:$0xff] %v2588_v24 }
 0x193   : > { %2605 = vst [vmem:[#allocation2 + $0x48] sm:$0xff] %v2589_v60  ;;  %2606 = vst [vmem:[#allocation2 + $0x50] sm:$0xff] %v2590_v7 }
 0x194   : > { %2607 = vst [vmem:[#allocation2 + $0x58] sm:$0xff] %v2591_v31  ;;  %2608 = vst [vmem:[#allocation2 + $0x60] sm:$0xff] %v2592_v10 }
 0x195   : > { %2609 = vst [vmem:[#allocation2 + $0x68] sm:$0xff] %v2593_v18  ;;  %2610 = vst [vmem:[#allocation2 + $0x70] sm:$0xff] %v2594_v50  ;;  %v2616_v58 = vld [vmem:[#allocation2] sm:$0xff] (!%p3079_p10) }
 0x196   : > { %2611 = vst [vmem:[#allocation2 + $0x78] sm:$0xff] %v2595_v26  ;;  %v2617_v36 = vld [vmem:[#allocation2 + $0x8] sm:$0xff] (!%p3079_p10)  ;;  %v2618_v37 = vld [vmem:[#allocation2 + $0x10] sm:$0xff] (!%p3079_p10)  ;;  %v3080_v25 = vcombine.low (!%p3079_p10), %v2616_v58, %v2616_v58  ;;  %v3081_v45 = vcombine.high (!%p3079_p10), %v2616_v58, %v2616_v58 }
 0x197   : > { %v3082_v38 = vcombine.low %v2617_v36, %v2617_v36  ;;  %v3083_v12 = vcombine.high %v2617_v36, %v2617_v36  ;;  %v2619_v29 = vld [vmem:[#allocation2 + $0x18] sm:$0xff]  ;;  %v2620_v53 = vld [vmem:[#allocation2 + $0x20] sm:$0xff]  ;;  %v3084_v34 = vcombine.low %v2618_v37, %v2618_v37  ;;  %v3085_v15 = vcombine.high %v2618_v37, %v2618_v37 }
 0x198   : > { %v2621_v11 = vld [vmem:[#allocation2 + $0x28] sm:$0xff]  ;;  %v3086_v8 = vcombine.low %v2619_v29, %v2619_v29  ;;  %v3087_v40 = vcombine.high %v2619_v29, %v2619_v29  ;;  %v2622_v52 = vld [vmem:[#allocation2 + $0x30] sm:$0xff]  ;;  %2744 = vst [vmem:[%s3330_s30] sm:$0xf] %v3080_v25  ;;  %2745 = vst [vmem:[%s3330_s30 + $0x4] sm:$0xf] %v3081_v45  ;;  %v3088_v63 = vcombine.low %v2620_v53, %v2620_v53 }
 0x199   : > { %v2623_v2 = vld [vmem:[#allocation2 + $0x38] sm:$0xff]  ;;  %v2624_v19 = vld [vmem:[#allocation2 + $0x40] sm:$0xff]  ;;  %2746 = vst [vmem:[%s3330_s30 + $0x8] sm:$0xf] %v3082_v38  ;;  %2747 = vst [vmem:[%s3330_s30 + $0xc] sm:$0xf] %v3083_v12  ;;  %v3089_v43 = vcombine.high %v2620_v53, %v2620_v53  ;;  %v3090_v51 = vcombine.low %v2621_v11, %v2621_v11  ;;  %v3091_v13 = vcombine.high %v2621_v11, %v2621_v11 }
 0x19a   : > { %v2625_v14 = vld [vmem:[#allocation2 + $0x48] sm:$0xff]  ;;  %v2626_v5 = vld [vmem:[#allocation2 + $0x50] sm:$0xff]  ;;  %2748 = vst [vmem:[%s3330_s30 + $0x10] sm:$0xf] %v3084_v34  ;;  %2749 = vst [vmem:[%s3330_s30 + $0x14] sm:$0xf] %v3085_v15  ;;  %v3092_v33 = vcombine.low %v2622_v52, %v2622_v52  ;;  %v3093_v16 = vcombine.high %v2622_v52, %v2622_v52  ;;  %v3094_v32 = vcombine.low %v2623_v2, %v2623_v2 }
 0x19b   : > { %v2627_v28 = vld [vmem:[#allocation2 + $0x58] sm:$0xff]  ;;  %2750 = vst [vmem:[%s3330_s30 + $0x18] sm:$0xf] %v3086_v8  ;;  %2751 = vst [vmem:[%s3330_s30 + $0x1c] sm:$0xf] %v3087_v40  ;;  %v3095_v61 = vcombine.high %v2623_v2, %v2623_v2  ;;  %v2628_v56 = vld [vmem:[#allocation2 + $0x60] sm:$0xff]  ;;  %v3096_v35 = vcombine.low %v2624_v19, %v2624_v19  ;;  %v3097_v6 = vcombine.high %v2624_v19, %v2624_v19 }
 0x19c   : > { %v2629_v23 = vld [vmem:[#allocation2 + $0x68] sm:$0xff]  ;;  %2752 = vst [vmem:[%s3330_s30 + $0x20] sm:$0xf] %v3088_v63  ;;  %2753 = vst [vmem:[%s3330_s30 + $0x24] sm:$0xf] %v3089_v43  ;;  %v3098_v59 = vcombine.low %v2625_v14, %v2625_v14  ;;  %v3099_v46 = vcombine.high %v2625_v14, %v2625_v14  ;;  %v2630_v39 = vld [vmem:[#allocation2 + $0x70] sm:$0xff]  ;;  %v3100_v3 = vcombine.low %v2626_v5, %v2626_v5 }
 0x19d   : > { %2754 = vst [vmem:[%s3330_s30 + $0x28] sm:$0xf] %v3090_v51  ;;  %2755 = vst [vmem:[%s3330_s30 + $0x2c] sm:$0xf] %v3091_v13  ;;  %v2631_v0 = vld [vmem:[#allocation2 + $0x78] sm:$0xff]  ;;  %v3101_v30 = vcombine.high %v2626_v5, %v2626_v5  ;;  %v3102_v21 = vcombine.low %v2627_v28, %v2627_v28  ;;  %v3103_v55 = vcombine.high %v2627_v28, %v2627_v28 }
 0x19e   : > { %2756 = vst [vmem:[%s3330_s30 + $0x30] sm:$0xf] %v3092_v33  ;;  %2757 = vst [vmem:[%s3330_s30 + $0x34] sm:$0xf] %v3093_v16  ;;  %v3104_v44 = vcombine.low %v2628_v56, %v2628_v56  ;;  %v3105_v49 = vcombine.high %v2628_v56, %v2628_v56  ;;  %v3106_v1 = vcombine.low %v2629_v23, %v2629_v23 }
 0x19f   : > { %2758 = vst [vmem:[%s3330_s30 + $0x38] sm:$0xf] %v3094_v32  ;;  %2759 = vst [vmem:[%s3330_s30 + $0x3c] sm:$0xf] %v3095_v61  ;;  %v3107_v41 = vcombine.high %v2629_v23, %v2629_v23  ;;  %v3108_v42 = vcombine.low %v2630_v39, %v2630_v39  ;;  %v3109_v27 = vcombine.high %v2630_v39, %v2630_v39 }
 0x1a0   : > { %2760 = vst [vmem:[%s3330_s30 + $0x40] sm:$0xf] %v3096_v35  ;;  %2761 = vst [vmem:[%s3330_s30 + $0x44] sm:$0xf] %v3097_v6  ;;  %v3110_v17 = vcombine.low %v2631_v0, %v2631_v0  ;;  %v3111_v22 = vcombine.high %v2631_v0, %v2631_v0 }
 0x1a1   : > { %2762 = vst [vmem:[%s3330_s30 + $0x48] sm:$0xf] %v3098_v59  ;;  %2763 = vst [vmem:[%s3330_s30 + $0x4c] sm:$0xf] %v3099_v46 }
 0x1a2   : > { %2764 = vst [vmem:[%s3330_s30 + $0x50] sm:$0xf] %v3100_v3  ;;  %2765 = vst [vmem:[%s3330_s30 + $0x54] sm:$0xf] %v3101_v30 }
 0x1a3   : > { %2766 = vst [vmem:[%s3330_s30 + $0x58] sm:$0xf] %v3102_v21  ;;  %2767 = vst [vmem:[%s3330_s30 + $0x5c] sm:$0xf] %v3103_v55 }
 0x1a4   : > { %2768 = vst [vmem:[%s3330_s30 + $0x60] sm:$0xf] %v3104_v44  ;;  %2769 = vst [vmem:[%s3330_s30 + $0x64] sm:$0xf] %v3105_v49 }
 0x1a5   : > { %2770 = vst [vmem:[%s3330_s30 + $0x68] sm:$0xf] %v3106_v1  ;;  %2771 = vst [vmem:[%s3330_s30 + $0x6c] sm:$0xf] %v3107_v41 }
 0x1a6   : > { %2772 = vst [vmem:[%s3330_s30 + $0x70] sm:$0xf] %v3108_v42  ;;  %2773 = vst [vmem:[%s3330_s30 + $0x74] sm:$0xf] %v3109_v27 }
 0x1a7   : > { %2774 = vst [vmem:[%s3330_s30 + $0x78] sm:$0xf] %v3110_v17  ;;  %2775 = vst [vmem:[%s3330_s30 + $0x7c] sm:$0xf] %v3111_v22 }
 0x1a8 PF: > { %s11_s12 = sadd.s32 1, %s3259_s12   ;;  %s7139_s6 = smov %s3247_s9 }
 0x1a9   : > { %p8_p11 = scmp.ge.s32.totalorder %s11_s12, 50   ;;  %s7140_s7 = smov %s3251_s10 }
 0x1aa   : > { %s7141_s8 = smov %s3255_s11  ;;  %s7142_s9 = smov %s7146_s13 }
 0x1ab   : > { %s7143_s10 = smov %s7150_s14  ;;  %s7144_s11 = smov %s7154_s15 }
 0x1ac   :  { %10 = sbr.rel (!%p8_p11) target bundleno = 4 (0x4), region = 64 }

// kernel: _lambda_.9
= control target key start
LH: loop header
LB: loop body
LE: loop exit
PB: predicated region body
PF: predicated region fallthrough
CT: control target
= control target key end

     0   :  { %s8067_s15 = smov 0   ;;  %s8069_s16 = smov 0   ;;  %s9185_s0 = inlined_call_operand.vmem [shape: bf16[2,10,18,18,128], index: 0, kind: input, shape index: {}]   ;;  %s9186_s1 = inlined_call_operand.vmem [shape: bf16[3,1152,128], index: 1, kind: input, shape index: {}]   ;;  %s9187_s2 = inlined_call_operand.vmem [shape: f32[1,128], index: 2, kind: input, shape index: {}]   ;;  %s9188_s3 = inlined_call_operand.vmem [shape: f32[1,128], index: 3, kind: input, shape index: {}]   ;;  %s9189_s4 = inlined_call_operand.vmem [shape: f32[2,8,256,128], index: 4, kind: output, shape index: {}]  }
   0x1   :  { %s8071_s17 = smov 0   ;;  %s8073_s18 = smov 0  }
   0x2   :  { %s8075_s19 = smov 0   ;;  %s8077_s20 = smov 0  }
   0x3   :  { %s8079_s21 = smov 0  }
   0x4 LB: > { %s26_s22 = sadd.s32 1, %s8027_s18  ;;  %s29_s23 = sadd.s32 1, %s8031_s19  ;;  %s8039_s21 = sphi %s8079_s21, %s14_s21   ;;  %s8035_s20 = sphi %s8077_s20, %s9201_s20   ;;  %s8031_s19 = sphi %s8075_s19, %s9200_s19   ;;  %s8027_s18 = sphi %s8073_s18, %s9199_s18   ;;  %s8023_s17 = sphi %s8071_s17, %s9198_s17   ;;  %s8019_s16 = sphi %s8069_s16, %s9197_s16   ;;  %s8015_s15 = sphi %s8067_s15, %s9196_s15  }
   0x5   : > { %p27_p0 = scmp.ge.s32.totalorder %s26_s22, 3  ;;  %p6185_p1 = scmp.ge.s32.totalorder %s8039_s21, 1 }
   0x6   : > { %p203_p2 = scmp.lt.s32.totalorder %s8039_s21, 49  ;;  %s33_s24 = sadd.s32 1, %s8035_s20 }
   0x7   : > { %s9203_s22 = smov (%p27_p0, %s26_s22), 0  ;;  %s9205_s23 = smov (!%p27_p0, %s29_s23), %s8031_s19 }
   0x8   : > { %p204_p3 = pnand %p6185_p1, %p203_p2  ;;  %p31_p4 = scmp.ge.s32.totalorder %s9205_s23, 8 }
   0x9   : > { %s243_s25 = sadd.s32 (!%p204_p3), %s8015_s15, %s8019_s16  ;;  %p244_p6 = scmp.lt.s32.totalorder (!%p204_p3), %s8023_s17, 1 }
   0xa   : > { %s9207_s23 = smov (%p31_p4, %s9205_s23), 0  ;;  %s9209_s24 = smov (!%p31_p4, %s33_s24), %s8035_s20 }
   0xb   : > { %p35_p5 = scmp.ge.s32.totalorder %s9209_s24, 2  ;;  %207 = sbr.rel (%p204_p3) target bundleno = 597 (0x255), region = 36 }
   0xc   : > { %p246_p7 = scmp.lt.s32.totalorder (!%p204_p3), %s243_s25, 9  ;;  %p254_p8 = scmp.lt.s32.totalorder (!%p204_p3), %s8015_s15, 2 }
   0xd   : > { %s9211_s24 = smov (%p35_p5, %s9209_s24), 0  ;;  %p261_p9 = scmp.lt.s32.totalorder (!%p204_p3), %s8019_s16, 7 }
   0xe   : > { %9190 = sst [smem:[#allocation3_spill]] %s9211_s24  ;;  %p6191_p10 = scmp.ne.s32.totalorder (!%p204_p3), %s8015_s15, 0 }
  0x12   : > { %s9213_s17 = smov (!%p244_p6, %s8023_s17), 1  ;;  %s9215_s25 = smov (!%p246_p7, %s243_s25), 9 }
  0x13   : > { %s7798_s26 = smul.u32 540, %s9213_s17  ;;  %s6189_s12 = sshll.u32 %s9213_s17, 8  ;;  %v8041_v0 = vmov (!%p6191_p10), 0.0  }
  0x14   : > { %s7797_s27 = smul.u32 54, %s9215_s25  ;;  %s9217_s16 = smov (!%p261_p9, %s8019_s16), 7  ;;  %273 = vst [vmem:[#allocation2] sm:$0xff] (!%p6191_p10), %v8041_v0  ;;  %274 = vst [vmem:[#allocation2 + $0x8] sm:$0xff] (!%p6191_p10), %v8041_v0 }
  0x15   : > { %s255_s28 = scalar_select %p254_p8, %s8015_s15, 2 }
  0x16   : > { %s250_s29 = sadd.s32 %s7798_s26, %s7797_s27  ;;  %s6188_s13 = sshll.u32 %s9217_s16, 5  ;;  %275 = vst [vmem:[#allocation2 + $0x10] sm:$0xff] (!%p6191_p10), %v8041_v0  ;;  %276 = vst [vmem:[#allocation2 + $0x18] sm:$0xff] (!%p6191_p10), %v8041_v0 }
  0x17   : > { %s6186_s30 = sshll.u32 %s250_s29, 2  ;;  %s7799_s5 = smul.u32 576, %s255_s28  ;;  %277 = vst [vmem:[#allocation2 + $0x20] sm:$0xff] (!%p6191_p10), %v8041_v0  ;;  %278 = vst [vmem:[#allocation2 + $0x28] sm:$0xff] (!%p6191_p10), %v8041_v0 }
  0x18   : > { %s8121_s8 = scalar_lea.vmem %s9185_s0, %s6186_s30  ;;  %s265_s14 = sadd.s32 %s6189_s12, %s6188_s13  ;;  %279 = vst [vmem:[#allocation2 + $0x30] sm:$0xff] (!%p6191_p10), %v8041_v0  ;;  %280 = vst [vmem:[#allocation2 + $0x38] sm:$0xff] (!%p6191_p10), %v8041_v0 }
  0x19   : > { %s8126_s11 = scalar_lea.vmem %s9186_s1, %s7799_s5  ;;  %s6190_s25 = sshll.u32 %s265_s14, 3  ;;  %281 = vst [vmem:[#allocation2 + $0x40] sm:$0xff] (!%p6191_p10), %v8041_v0  ;;  %282 = vst [vmem:[#allocation2 + $0x48] sm:$0xff] (!%p6191_p10), %v8041_v0 }
  0x1a   : > { %s8132_s27 = scalar_lea.vmem %s9189_s4, %s6190_s25  ;;  %272 = sbr.rel (%p6191_p10) target bundleno = 37 (0x25), region = 40  ;;  %283 = vst [vmem:[#allocation2 + $0x50] sm:$0xff] (!%p6191_p10), %v8041_v0  ;;  %284 = vst [vmem:[#allocation2 + $0x58] sm:$0xff] (!%p6191_p10), %v8041_v0 }
  0x1b   : > { %285 = vst [vmem:[#allocation2 + $0x60] sm:$0xff] (!%p6191_p10), %v8041_v0  ;;  %286 = vst [vmem:[#allocation2 + $0x68] sm:$0xff] (!%p6191_p10), %v8041_v0 }
  0x1c   : > { %287 = vst [vmem:[#allocation2 + $0x70] sm:$0xff] (!%p6191_p10), %v8041_v0  ;;  %288 = vst [vmem:[#allocation2 + $0x78] sm:$0xff] (!%p6191_p10), %v8041_v0 }
  0x1d   : > { %289 = vst [vmem:[#allocation2 + $0x80] sm:$0xff] (!%p6191_p10), %v8041_v0  ;;  %290 = vst [vmem:[#allocation2 + $0x88] sm:$0xff] (!%p6191_p10), %v8041_v0 }
  0x1e   : > { %291 = vst [vmem:[#allocation2 + $0x90] sm:$0xff] (!%p6191_p10), %v8041_v0  ;;  %292 = vst [vmem:[#allocation2 + $0x98] sm:$0xff] (!%p6191_p10), %v8041_v0 }
  0x1f   : > { %293 = vst [vmem:[#allocation2 + $0xa0] sm:$0xff] (!%p6191_p10), %v8041_v0  ;;  %294 = vst [vmem:[#allocation2 + $0xa8] sm:$0xff] (!%p6191_p10), %v8041_v0 }
  0x20   : > { %295 = vst [vmem:[#allocation2 + $0xb0] sm:$0xff] (!%p6191_p10), %v8041_v0  ;;  %296 = vst [vmem:[#allocation2 + $0xb8] sm:$0xff] (!%p6191_p10), %v8041_v0 }
  0x21   : > { %297 = vst [vmem:[#allocation2 + $0xc0] sm:$0xff] %v8041_v0  ;;  %298 = vst [vmem:[#allocation2 + $0xc8] sm:$0xff] %v8041_v0 }
  0x22   : > { %299 = vst [vmem:[#allocation2 + $0xd0] sm:$0xff] %v8041_v0  ;;  %300 = vst [vmem:[#allocation2 + $0xd8] sm:$0xff] %v8041_v0 }
  0x23   : > { %301 = vst [vmem:[#allocation2 + $0xe0] sm:$0xff] %v8041_v0  ;;  %302 = vst [vmem:[#allocation2 + $0xe8] sm:$0xff] %v8041_v0 }
  0x24   : > { %303 = vst [vmem:[#allocation2 + $0xf0] sm:$0xff] %v8041_v0  ;;  %304 = vst [vmem:[#allocation2 + $0xf8] sm:$0xff] %v8041_v0 }
  0x25 PF: > { %v7857_v1 = vld [vmem:[%s8126_s11] sm:$0xff]   ;;  %v7859_v3 = vld [vmem:[%s8126_s11 + $0x8] sm:$0xff]   ;;  %v7861_v5 = vld [vmem:[%s8126_s11 + $0x10] sm:$0xff]   ;;  %vm802_vm0 = vsmask.f32 3328  ;;  %vm1670_vm3 = vcmask 1042432  }
  0x26   : > { %v7858_v2 = vld [vmem:[%s8126_s11 + $0x100] sm:$0xff]   ;;  %6933 = vmatprep.subr.bf16.mxu1 %v7857_v1  ;;  %v7860_v4 = vld [vmem:[%s8126_s11 + $0x108] sm:$0xff]   ;;  %v7862_v6 = vld [vmem:[%s8126_s11 + $0x110] sm:$0xff]   ;;  %vm803_vm1 = vsmask.f32 7440  ;;  %vm1671_vm4 = vcmask 1046532  }
  0x27   : > { %7125 = vmatprep.subr.bf16.mxu0 %v7858_v2  ;;  %6934 = vmatpush3.bf16.msra.mxu1 %v7857_v1  ;;  %v7863_v7 = vld [vmem:[%s8126_s11 + $0x18] sm:$0xff]   ;;  %v7865_v9 = vld [vmem:[%s8126_s11 + $0x20] sm:$0xff]   ;;  %v7867_v11 = vld [vmem:[%s8126_s11 + $0x28] sm:$0xff]   ;;  %p6712_p11 = scmp.ne.s32.totalorder %s8015_s15, 2 }
  0x28   : > { %7126 = vmatpush3.bf16.msra.mxu0 %v7858_v2  ;;  %6935 = vmatprep.subr.bf16.mxu1 %v7859_v3  ;;  %v7864_v8 = vld [vmem:[%s8126_s11 + $0x118] sm:$0xff]   ;;  %v7866_v10 = vld [vmem:[%s8126_s11 + $0x120] sm:$0xff]   ;;  %v7868_v12 = vld [vmem:[%s8126_s11 + $0x128] sm:$0xff]  }
  0x29   : > { %7127 = vmatprep.subr.bf16.mxu0 %v7860_v4  ;;  %v7873_v13 = vld [vmem:[%s8121_s8] sm:$0xff]   ;;  %v6336_v14 = vld [vmem:[%s8121_s8 + $0xc] sm:$0xf]  ;;  %v6337_v15 = vld [vmem:[%s8121_s8 + $0x10] sm:$0xf] }
  0x2a   : > { %6949 = vmatprep.mubr.bf16.mxu1 %v7873_v13  ;;  %v6338_v16 = vld [vmem:[%s8121_s8 + $0x14] sm:$0x1]  ;;  %v2669_v17 = vshrl.u32 %v6336_v14, 16  ;;  %v2672_v18 = vshll.u32 %v6336_v14, 16  ;;  %v2678_v20 = vshll.u32 %v6337_v15, 16  ;;  %v2682_v21 = vshrl.u32 %v6337_v15, 16  ;;  %vm8159_vm2 = vmor %vm802_vm0, %vm803_vm1 }
  0x2b   : > { %6936 = vmatpush3.bf16.msra.mxu1 %v7859_v3  ;;  %v7869_v19 = vld [vmem:[%s8126_s11 + $0x30] sm:$0xff]   ;;  %v2688_v22 = vshll.u32 %v6338_v16, 16  ;;  %v6339_v30 = vld [vmem:[%s8121_s8 + $0x18] sm:$0xf]  ;;  %v6340_v31 = vld [vmem:[%s8121_s8 + $0x1c] sm:$0xf] }
  0x2c   : > { %7128 = vmatpush3.bf16.msra.mxu0 %v7860_v4  ;;  %6937 = vmatprep.subr.bf16.mxu1 %v7861_v5  ;;  %v2671_v23 = vrot.slane %v2669_v17, 4  ;;  %v2674_v24 = vrot.slane %v2672_v18, 5  ;;  %v7870_v25 = vld [vmem:[%s8126_s11 + $0x130] sm:$0xff]   ;;  %v2680_v26 = vrot.slane %v2678_v20, 5  ;;  %v2684_v27 = vrot.slane %v2682_v21, 4  ;;  %v7871_v33 = vld [vmem:[%s8126_s11 + $0x38] sm:$0xff]   ;;  %vm8233_vm5 = vmor %vm1670_vm3, %vm1671_vm4 }
  0x2d   : > { %7129 = vmatprep.subr.bf16.mxu0 %v7862_v6  ;;  %v2690_v28 = vrot.slane %v2688_v22, 5  ;;  %v6341_v32 = vld [vmem:[%s8121_s8 + $0x20] sm:$0x1]  ;;  %v2693_v36 = vshrl.u32 %v6339_v30, 16  ;;  %v2696_v37 = vshll.u32 %v6339_v30, 16  ;;  %v2702_v38 = vshll.u32 %v6340_v31, 16 }
  0x2e   : > { %v2675_v29 = vor.u32 %v2674_v24, %v2671_v23  ;;  %v2685_v35 = vor.u32 %v2684_v27, %v2680_v26  ;;  %v7872_v39 = vld [vmem:[%s8126_s11 + $0x138] sm:$0xff]   ;;  %v2706_v41 = vshrl.u32 %v6340_v31, 16  ;;  %v2712_v42 = vshll.u32 %v6341_v32, 16  ;;  %v7875_v48 = vld [vmem:[%s8126_s11 + $0x40] sm:$0xff]   ;;  %v7874_v56 = vld [vmem:[%s8121_s8 + $0xc] sm:$0xff]  }
  0x2f   : > { %6938 = vmatpush3.bf16.msra.mxu1 %v7861_v5  ;;  %v2695_v44 = vrot.slane %v2693_v36, 4  ;;  %v2698_v45 = vrot.slane %v2696_v37, 5  ;;  %v2704_v46 = vrot.slane %v2702_v38, 5  ;;  %v7876_v53 = vld [vmem:[%s8126_s11 + $0x140] sm:$0xff]   ;;  %v6343_v58 = vld [vmem:[%s8121_s8 + $0x28] sm:$0xf] }
  0x30   : > { %7130 = vmatpush3.bf16.msra.mxu0 %v7862_v6  ;;  %6939 = vmatprep.subr.bf16.mxu1 %v7863_v7  ;;  %v2676_v40 = vrot.slane %v2675_v29, 4  ;;  %v2686_v43 = vrot.slane %v2685_v35, 4  ;;  %v2708_v49 = vrot.slane %v2706_v41, 4  ;;  %v2714_v52 = vrot.slane %v2712_v42, 5  ;;  %v6342_v54 = vld [vmem:[%s8121_s8 + $0x24] sm:$0xf] }
  0x31   : > { %7131 = vmatprep.subr.bf16.mxu0 %v7864_v8  ;;  %v2699_v51 = vor.u32 %v2698_v45, %v2695_v44  ;;  %v6344_v59 = vld [vmem:[%s8121_s8 + $0x2c] sm:$0x1]  ;;  %v2717_v60 = vshrl.u32 %v6342_v54, 16  ;;  %v2720_v61 = vshll.u32 %v6342_v54, 16  ;;  %v2726_v63 = vshll.u32 %v6343_v58, 16  ;;  %v7878_v3 = vld [vmem:[%s8121_s8 + $0x18] sm:$0xff]  }
  0x32   : > { %v2681_v47 = vsel %vm8159_vm2, %v2676_v40, %v2680_v26  ;;  %v2691_v50 = vsel %vm8159_vm2, %v2686_v43, %v2690_v28  ;;  %v2709_v57 = vor.u32 %v2708_v49, %v2704_v46  ;;  %v2730_v0 = vshrl.u32 %v6343_v58, 16  ;;  %v6345_v14 = vld [vmem:[%s8121_s8 + $0x30] sm:$0xf]  ;;  %v6346_v15 = vld [vmem:[%s8121_s8 + $0x34] sm:$0xf]  ;;  %v7879_v29 = vld [vmem:[%s8121_s8 + $0x24] sm:$0xff]  }
  0x33   : > { %6940 = vmatpush3.bf16.msra.mxu1 %v7863_v7  ;;  %v6384_v55 = vcombine.low %v2681_v47, %v2691_v50  ;;  %v2700_v62 = vrot.slane %v2699_v51, 4  ;;  %v2736_v1 = vshll.u32 %v6344_v59, 16  ;;  %v2719_v4 = vrot.slane %v2717_v60, 4  ;;  %v7877_v7 = vld [vmem:[%s8126_s11 + $0x148] sm:$0xff]   ;;  %v6347_v18 = vld [vmem:[%s8121_s8 + $0x38] sm:$0x1] }
  0x34   : > { %7132 = vmatpush3.bf16.msra.mxu0 %v7864_v8  ;;  %6941 = vmatprep.subr.bf16.mxu1 %v7865_v9  ;;  %v2710_v2 = vrot.slane %v2709_v57, 4  ;;  %v2722_v5 = vrot.slane %v2720_v61, 5  ;;  %v2728_v8 = vrot.slane %v2726_v63, 5  ;;  %v2744_v20 = vshll.u32 %v6345_v14, 16  ;;  %v7881_v32 = vld [vmem:[%s8126_s11 + $0x150] sm:$0xff]  }
  0x35   : > { %7133 = vmatprep.subr.bf16.mxu0 %v7866_v10  ;;  %7141 = vmatprep.mubr.bf16.mxu0 %v6384_v55  ;;  %v2705_v6 = vsel %vm8159_vm2, %v2700_v62, %v2704_v46  ;;  %v2750_v22 = vshll.u32 %v6346_v15, 16  ;;  %v2754_v23 = vshrl.u32 %v6346_v15, 16  ;;  %v2760_v24 = vshll.u32 %v6347_v18, 16  ;;  %v7883_v37 = vld [vmem:[%s8121_s8 + $0x30] sm:$0xff]   ;;  %v6348_v40 = vld [vmem:[%s8121_s8 + $0x3c] sm:$0xf] }
  0x36   : > { %v2723_v13 = vor.u32 %v2722_v5, %v2719_v4  ;;  %v2746_v27 = vrot.slane %v2744_v20, 5  ;;  %v6349_v41 = vld [vmem:[%s8121_s8 + $0x40] sm:$0xf]  ;;  %v6350_v42 = vld [vmem:[%s8121_s8 + $0x44] sm:$0x1]  ;;  %v2765_v44 = vshrl.u32 %v6348_v40, 16 }
  0x37   : > { %6942 = vmatpush3.bf16.msra.mxu1 %v7865_v9  ;;  %v2732_v9 = vrot.slane %v2730_v0, 4  ;;  %v2752_v30 = vrot.slane %v2750_v22, 5  ;;  %v2756_v31 = vrot.slane %v2754_v23, 4  ;;  %v2762_v36 = vrot.slane %v2760_v24, 5  ;;  %v7885_v55 = vld [vmem:[%s8126_s11 + $0x50] sm:$0xff]   ;;  %v7887_v24 = vld [vmem:[%s8126_s11 + $0x168] sm:$0xff]  }
  0x38   : > { %7134 = vmatpush3.bf16.msra.mxu0 %v7866_v10  ;;  %6943 = vmatprep.subr.bf16.mxu1 %v7867_v11  ;;  %v2738_v10 = vrot.slane %v2736_v1, 5  ;;  %v2724_v21 = vrot.slane %v2723_v13, 4  ;;  %v2768_v45 = vshll.u32 %v6348_v40, 16  ;;  %v2774_v46 = vshll.u32 %v6349_v41, 16  ;;  %v6351_v59 = vld [vmem:[%s8121_s8 + $0x48] sm:$0xf] }
  0x39   : > { %7135 = vmatprep.subr.bf16.mxu0 %v7868_v12  ;;  %v2733_v17 = vor.u32 %v2732_v9, %v2728_v8  ;;  %v2778_v49 = vshrl.u32 %v6349_v41, 16  ;;  %v2784_v50 = vshll.u32 %v6350_v42, 16  ;;  %v6352_v62 = vld [vmem:[%s8121_s8 + $0x4c] sm:$0xf]  ;;  %v6353_v63 = vld [vmem:[%s8121_s8 + $0x50] sm:$0x1] }
  0x3a   : > { %v2729_v28 = vsel %vm8159_vm2, %v2724_v21, %v2728_v8  ;;  %v2776_v54 = vrot.slane %v2774_v46, 5  ;;  %v2789_v0 = vshrl.u32 %v6351_v59, 16  ;;  %v2792_v1 = vshll.u32 %v6351_v59, 16  ;;  %v7886_v9 = vld [vmem:[%s8126_s11 + $0x160] sm:$0xff]   ;;  %v6354_v20 = vld [vmem:[%s8121_s8 + $0x54] sm:$0xf] }
  0x3b   : > { %6944 = vmatpush3.bf16.msra.mxu1 %v7867_v11  ;;  %v7880_v11 = vld [vmem:[%s8126_s11 + $0x48] sm:$0xff]   ;;  %v2780_v57 = vrot.slane %v2778_v49, 4  ;;  %v2786_v58 = vrot.slane %v2784_v50, 5  ;;  %v2802_v4 = vshrl.u32 %v6352_v62, 16  ;;  %v2808_v5 = vshll.u32 %v6353_v63, 16  ;;  %v7889_v40 = vld [vmem:[%s8121_s8 + $0x54] sm:$0xff]  }
  0x3c   : > { %7136 = vmatpush3.bf16.msra.mxu0 %v7868_v12  ;;  %6945 = vmatprep.subr.bf16.mxu1 %v7869_v19  ;;  %v2715_v12 = vsel %vm8159_vm2, %v2710_v2, %v2714_v52  ;;  %v2767_v52 = vrot.slane %v2765_v44, 4  ;;  %v2794_v8 = vrot.slane %v2792_v1, 5  ;;  %v6355_v21 = vld [vmem:[%s8121_s8 + $0x58] sm:$0xf]  ;;  %v6357_v44 = vld [vmem:[%s8121_s8 + $0x60] sm:$0xf] }
  0x3d   : > { %7137 = vmatprep.subr.bf16.mxu0 %v7870_v25  ;;  %v6385_v16 = vcombine.low %v2705_v6, %v2715_v12  ;;  %v2781_v2 = vor.u32 %v2780_v57, %v2776_v54  ;;  %v2804_v13 = vrot.slane %v2802_v4, 4  ;;  %v2810_v18 = vrot.slane %v2808_v5, 5  ;;  %v7890_v41 = vld [vmem:[%s8126_s11 + $0x58] sm:$0xff]   ;;  %v6359_v46 = vld [vmem:[%s8121_s8 + $0x68] sm:$0x1] }
  0x3e   : > { %v2840_v49 = vshll.u32 %v6357_v44, 16  ;;  %v6408_v1 = vld [vmem:[%s8121_s8 + $0xc] sm:$0xe] }
  0x3f   : > { %6946 = vmatpush3.bf16.msra.mxu1 %v7869_v19  ;;  %v2741_v19 = vshrl.u32 %v6345_v14, 16 }
  0x40   : > { %7138 = vmatpush3.bf16.msra.mxu0 %v7870_v25  ;;  %6947 = vmatprep.subr.bf16.mxu1 %v7871_v33  ;;  %v2734_v25 = vrot.slane %v2733_v17, 4  ;;  %v2842_v57 = vrot.slane %v2840_v49, 5 }
  0x41   : > { %7139 = vmatprep.subr.bf16.mxu0 %v7872_v39  ;;  %v2743_v26 = vrot.slane %v2741_v19, 4  ;;  %v7888_v19 = vld [vmem:[%s8121_s8 + $0x48] sm:$0xff]  }
  0x43   : > { %6948 = vmatpush3.bf16.msra.mxu1 %v7871_v33  ;;  %v2739_v33 = vsel %vm8159_vm2, %v2734_v25, %v2738_v10  ;;  %v2747_v35 = vor.u32 %v2746_v27, %v2743_v26  ;;  %v2782_v10 = vrot.slane %v2781_v2, 4  ;;  %v6356_v25 = vld [vmem:[%s8121_s8 + $0x5c] sm:$0x1]  ;;  %v2813_v26 = vshrl.u32 %v6354_v20, 16 }
  0x44   : > { %7140 = vmatpush3.bf16.msra.mxu0 %v7872_v39  ;;  %6981 = vmatprep.subr.bf16.mxu1 %v7875_v48  ;;  %v6386_v38 = vcombine.low %v2729_v28, %v2739_v33  ;;  %v2757_v39 = vor.u32 %v2756_v31, %v2752_v30  ;;  %v2816_v27 = vshll.u32 %v6354_v20, 16  ;;  %v2832_v31 = vshll.u32 %v6356_v25, 16 }
  0x45   : > { %7173 = vmatprep.subr.bf16.mxu0 %v7876_v53  ;;  %v2748_v43 = vrot.slane %v2747_v35, 4  ;;  %v2815_v33 = vrot.slane %v2813_v26, 4 }
  0x46   : > { %6950 = vmatmul.mubr.bf16.vlgmr.msra.gmra.mrb[0].mxu1 %v7874_v56  ;;  %v2758_v47 = vrot.slane %v2757_v39, 4  ;;  %v2818_v35 = vrot.slane %v2816_v27, 5  ;;  %v2834_v39 = vrot.slane %v2832_v31, 5  ;;  %v6415_v31 = vld [vmem:[%s8121_s8 + $0x28] sm:$0xf] }
  0x47   : > { %7142 = vmatmul.mubr.bf16.vlgmr.msra.gmra.mrb[0].mxu0 %v6385_v16  ;;  %6982 = vmatpush3.bf16.msra.mxu1 %v7875_v48  ;;  %v7882_v48 = vld [vmem:[%s8126_s11 + $0x158] sm:$0xff]   ;;  %v2753_v51 = vsel %vm8159_vm2, %v2748_v43, %v2752_v30  ;;  %v2787_v16 = vsel %vm8159_vm2, %v2782_v10, %v2786_v58  ;;  %v2826_v30 = vshrl.u32 %v6355_v21, 16 }
  0x48   : > { %7174 = vmatpush3.bf16.msra.mxu0 %v7876_v53  ;;  %6953 = vmatprep.mubr.bf16.mxu1 %v7878_v3  ;;  %v2770_v53 = vrot.slane %v2768_v45, 5  ;;  %v2763_v56 = vsel %vm8159_vm2, %v2758_v47, %v2762_v36  ;;  %v2798_v3 = vshll.u32 %v6352_v62, 16  ;;  %v2819_v43 = vor.u32 %v2818_v35, %v2815_v33  ;;  %v6358_v45 = vld [vmem:[%s8121_s8 + $0x64] sm:$0xf] }
  0x49   : > { %7175 = vmatprep.subr.bf16.mxu0 %v7877_v7  ;;  %6983 = vmatprep.subr.bf16.mxu1 %v7880_v11  ;;  %v6387_v60 = vcombine.low %v2753_v51, %v2763_v56  ;;  %v2846_v50 = vshll.u32 %v6358_v45, 16  ;;  %v7891_v51 = vld [vmem:[%s8126_s11 + $0x170] sm:$0xff]  }
  0x4a   : > { %7145 = vmatprep.mubr.bf16.mxu0 %v6386_v38  ;;  %v2771_v61 = vor.u32 %v2770_v53, %v2767_v52  ;;  %v2800_v12 = vrot.slane %v2798_v3, 5  ;;  %v2828_v38 = vrot.slane %v2826_v30, 4  ;;  %v2820_v52 = vrot.slane %v2819_v43, 4  ;;  %v6414_v30 = vld [vmem:[%s8121_s8 + $0x24] sm:$0xe] }
  0x4b   : > { %6984 = vmatpush3.bf16.msra.mxu1 %v7880_v11  ;;  %v7884_v11 = vld [vmem:[%s8121_s8 + $0x3c] sm:$0xff]   ;;  %v2850_v53 = vshrl.u32 %v6358_v45, 16  ;;  %v2848_v58 = vrot.slane %v2846_v50, 5  ;;  %v6458_v35 = vrot.slane %v6414_v30, 9  ;;  %v7897_v43 = vld [vmem:[%s8121_s8 + $0x84] sm:$0xff]  }
  0x4c   : > { %7176 = vmatpush3.bf16.msra.mxu0 %v7877_v7  ;;  %6985 = vmatprep.subr.bf16.mxu1 %v7885_v55  ;;  %v2772_v6 = vrot.slane %v2771_v61, 4  ;;  %v2791_v7 = vrot.slane %v2789_v0, 4  ;;  %v2805_v17 = vor.u32 %v2804_v13, %v2800_v12  ;;  %v7892_v61 = vld [vmem:[%s8126_s11 + $0x178] sm:$0xff]   ;;  %v7893_v0 = vld [vmem:[%s8121_s8 + $0x60] sm:$0xff]   ;;  %v6418_v45 = vld [vmem:[%s8121_s8 + $0x34] sm:$0xf] }
  0x4d   : > { %7177 = vmatprep.subr.bf16.mxu0 %v7881_v32 }
  0x4e   : > { %6954 = vmatmul.mubr.bf16.gmra.mrb[4].mxu1 %v7879_v29  ;;  %v2777_v14 = vsel %vm8159_vm2, %v2772_v6, %v2776_v54  ;;  %v2795_v15 = vor.u32 %v2794_v8, %v2791_v7  ;;  %v2806_v28 = vrot.slane %v2805_v17, 4  ;;  %v2822_v29 = vshll.u32 %v6355_v21, 16  ;;  %v6409_v6 = vld [vmem:[%s8121_s8 + $0x10] sm:$0xf]  ;;  %v6410_v7 = vld [vmem:[%s8121_s8 + $0x14] sm:$0x1] }
  0x4f   : > { %6957 = vmatprep.mubr.bf16.mxu1 %v7883_v37  ;;  %6986 = vmatpush3.bf16.msra.mxu1 %v7885_v55  ;;  %v6388_v22 = vcombine.low %v2777_v14, %v2787_v16  ;;  %v2856_v54 = vshll.u32 %v6359_v46, 16  ;;  %v6456_v8 = vrot.slane %v6408_v1, 9  ;;  %v3535_v10 = vrot.slane %v6409_v6, 5  ;;  %v7894_v14 = vld [vmem:[%s8121_s8 + $0x6c] sm:$0xff]   ;;  %v6412_v21 = vld [vmem:[%s8121_s8 + $0x1c] sm:$0xf] }
  0x50   : > { %7178 = vmatpush3.bf16.msra.mxu0 %v7881_v32  ;;  %v2796_v23 = vrot.slane %v2795_v15, 4  ;;  %v2811_v36 = vsel %vm8159_vm2, %v2806_v28, %v2810_v18  ;;  %v2824_v37 = vrot.slane %v2822_v29, 5  ;;  %6987 = vmatprep.subr.bf16.mxu1 %v7890_v41  ;;  %v6411_v18 = vld [vmem:[%s8121_s8 + $0x18] sm:$0xe]  ;;  %v3542_v27 = vrot.slane %v6412_v21, 5  ;;  %v7901_v6 = vld [vmem:[%s8121_s8 + $0x9c] sm:$0xff]  }
  0x51   : > { %7146 = vmatmul.mubr.bf16.gmra.mrb[4].mxu0 %v6387_v60  ;;  %7179 = vmatprep.subr.bf16.mxu0 %v7882_v48  ;;  %v2852_v60 = vrot.slane %v2850_v53, 4  ;;  %v2858_v4 = vrot.slane %v2856_v54, 5  ;;  %v3536_v16 = vsel %vm8233_vm5, %v6456_v8, %v3535_v10  ;;  %v3537_v17 = vrot.slane %v3535_v10, 4  ;;  %v6419_v46 = vld [vmem:[%s8121_s8 + $0x38] sm:$0x1]  ;;  %v7900_v53 = vld [vmem:[%s8121_s8 + $0x90] sm:$0xff]  }
  0x52   : > { %7149 = vmatprep.mubr.bf16.mxu0 %v6388_v22  ;;  %v2801_v32 = vsel %vm8159_vm2, %v2796_v23, %v2800_v12  ;;  %v2829_v47 = vor.u32 %v2828_v38, %v2824_v37  ;;  %v2825_v59 = vsel %vm8159_vm2, %v2820_v52, %v2824_v37  ;;  %v7895_v12 = vld [vmem:[%s8126_s11 + $0x60] sm:$0xff]   ;;  %v6457_v23 = vrot.slane %v6411_v18, 9  ;;  %v6428_v18 = vld [vmem:[%s8121_s8 + $0x5c] sm:$0x1] }
  0x53   : > { %v6389_v42 = vcombine.low %v2801_v32, %v2811_v36  ;;  %6988 = vmatpush3.bf16.msra.mxu1 %v7890_v41  ;;  %v2853_v3 = vor.u32 %v2852_v60, %v2848_v58  ;;  %v6413_v22 = vld [vmem:[%s8121_s8 + $0x20] sm:$0x1]  ;;  %v6416_v32 = vld [vmem:[%s8121_s8 + $0x2c] sm:$0x1]  ;;  %v3544_v33 = vrot.slane %v3542_v27, 4  ;;  %v3549_v36 = vrot.slane %v6415_v31, 5 }
  0x54   : > { %7180 = vmatpush3.bf16.msra.mxu0 %v7882_v48  ;;  %v2837_v48 = vshrl.u32 %v6357_v44, 16  ;;  %v2830_v55 = vrot.slane %v2829_v47, 4  ;;  %6989 = vmatprep.subr.bf16.mxu1 %v7895_v12  ;;  %v3545_v28 = vrot.slane %v6413_v22, 5  ;;  %v7899_v37 = vld [vmem:[%s8126_s11 + $0x180] sm:$0xff]   ;;  %v3543_v38 = vsel %vm8233_vm5, %v6457_v23, %v3542_v27  ;;  %v6417_v44 = vld [vmem:[%s8121_s8 + $0x30] sm:$0xe] }
  0x55   : > { %7181 = vmatprep.subr.bf16.mxu0 %v7886_v9  ;;  %v2854_v13 = vrot.slane %v2853_v3, 4  ;;  %v3550_v41 = vsel %vm8233_vm5, %v6458_v35, %v3549_v36  ;;  %v6459_v47 = vrot.slane %v6417_v44, 9  ;;  %v3559_v52 = vrot.slane %v6419_v46, 5  ;;  %v6425_v3 = vld [vmem:[%s8121_s8 + $0x50] sm:$0x1] }
  0x56   : > { %6958 = vmatmul.mubr.bf16.gmra.mrb[8].mxu1 %v7884_v11  ;;  %v2839_v56 = vrot.slane %v2837_v48, 4  ;;  %v2835_v62 = vsel %vm8159_vm2, %v2830_v55, %v2834_v39  ;;  %v3538_v11 = vrot.slane %v6410_v7, 5  ;;  %v3552_v39 = vrot.slane %v6416_v32, 5  ;;  %v7902_v48 = vld [vmem:[%s8126_s11 + $0x70] sm:$0xff]   ;;  %v6420_v55 = vld [vmem:[%s8121_s8 + $0x3c] sm:$0xe] }
  0x57   : > { %6961 = vmatprep.mubr.bf16.mxu1 %v7888_v19  ;;  %v6390_v2 = vcombine.low %v2825_v59, %v2835_v62  ;;  %v7896_v19 = vld [vmem:[%s8121_s8 + $0x78] sm:$0xff]   ;;  %v2859_v20 = vsel %vm8159_vm2, %v2854_v13, %v2858_v4  ;;  %6990 = vmatpush3.bf16.msra.mxu1 %v7895_v12  ;;  %v6460_v59 = vrot.slane %v6420_v55, 9  ;;  %v6423_v62 = vld [vmem:[%s8121_s8 + $0x48] sm:$0xe]  ;;  %v3573_v10 = vrot.slane %v6425_v3, 5  ;;  %v7907_v31 = vld [vmem:[%s8126_s11 + $0x190] sm:$0xff]  }
  0x58   : > { %7182 = vmatpush3.bf16.msra.mxu0 %v7886_v9  ;;  %v2843_v63 = vor.u32 %v2842_v57, %v2839_v56  ;;  %v3539_v26 = vsel %vm8233_vm5, %v3537_v17, %v3538_v11  ;;  %v6421_v57 = vld [vmem:[%s8121_s8 + $0x40] sm:$0xf]  ;;  %v6461_v7 = vrot.slane %v6423_v62, 9  ;;  %v7903_v11 = vld [vmem:[%s8126_s11 + $0x188] sm:$0xff]   ;;  %v3580_v21 = vrot.slane %v6428_v18, 5 }
  0x59   : > { %7183 = vmatprep.subr.bf16.mxu0 %v7887_v24  ;;  %7150 = vmatmul.mubr.bf16.gmra.mrb[8].mxu0 %v6389_v42  ;;  %v6472_v29 = vcombine.low %v3536_v16, %v3539_v26  ;;  %v3551_v42 = vrot.slane %v3549_v36, 4  ;;  %v3563_v60 = vrot.slane %v6421_v57, 5  ;;  %v6427_v16 = vld [vmem:[%s8121_s8 + $0x58] sm:$0xf]  ;;  %v6429_v27 = vld [vmem:[%s8121_s8 + $0x60] sm:$0xe] }
  0x5a   : > { %v2844_v9 = vrot.slane %v2843_v63, 4  ;;  %7153 = vmatprep.mubr.bf16.mxu0 %v6390_v2  ;;  %v6424_v2 = vld [vmem:[%s8121_s8 + $0x4c] sm:$0xf]  ;;  %v7906_v26 = vld [vmem:[%s8126_s11 + $0x78] sm:$0xff]   ;;  %v6463_v30 = vrot.slane %v6429_v27, 9 }
  0x5b   : > { %v3553_v50 = vsel %vm8233_vm5, %v3551_v42, %v3552_v39  ;;  %v3565_v1 = vrot.slane %v3563_v60, 4  ;;  %v3564_v4 = vsel %vm8233_vm5, %v6460_v59, %v3563_v60  ;;  %v3570_v8 = vrot.slane %v6424_v2, 5  ;;  %v754_v39 = vld [vmem:[%s8121_s8] sm:$0xf]  ;;  %v6432_v46 = vld [vmem:[%s8121_s8 + $0x6c] sm:$0xe] }
  0x5c   : > { %7184 = vmatpush3.bf16.msra.mxu0 %v7887_v24  ;;  %v2849_v15 = vsel %vm8159_vm2, %v2844_v9, %v2848_v58  ;;  %v7898_v24 = vld [vmem:[%s8126_s11 + $0x68] sm:$0xff]   ;;  %v6474_v54 = vcombine.low %v3550_v41, %v3553_v50  ;;  %v6422_v58 = vld [vmem:[%s8121_s8 + $0x44] sm:$0x1]  ;;  %v806_v44 = vshrl.u32 %v754_v39, 16  ;;  %v758_v3 = vld [vmem:[%s8121_s8 + $0x10] sm:$0xf] }
  0x5d   : > { %7185 = vmatprep.subr.bf16.mxu0 %v7891_v51  ;;  %v6391_v25 = vcombine.low %v2849_v15, %v2859_v20  ;;  %6991 = vmatprep.subr.bf16.mxu1 %v7898_v24  ;;  %v3572_v13 = vrot.slane %v3570_v8, 4  ;;  %v6426_v15 = vld [vmem:[%s8121_s8 + $0x54] sm:$0xe]  ;;  %v3577_v20 = vrot.slane %v6427_v16, 5  ;;  %v3571_v22 = vsel %vm8233_vm5, %v6461_v7, %v3570_v8  ;;  %v756_v41 = vld [vmem:[%s8121_s8 + $0x8] sm:$0x1] }
  0x5e   : > { %6962 = vmatmul.mubr.bf16.gmra.mrb[12].mxu1 %v7889_v40  ;;  %v3546_v40 = vsel %vm8233_vm5, %v3544_v33, %v3545_v28  ;;  %v6430_v28 = vld [vmem:[%s8121_s8 + $0x64] sm:$0xf]  ;;  %v825_v50 = vshll.u32 %v756_v41, 16  ;;  %v757_v62 = vld [vmem:[%s8121_s8 + $0xc] sm:$0xf] }
  0x5f   : > { %6965 = vmatprep.mubr.bf16.mxu1 %v7893_v0  ;;  %6992 = vmatpush3.bf16.msra.mxu1 %v7898_v24  ;;  %v6473_v49 = vcombine.low %v3543_v38, %v3546_v40  ;;  %v3574_v23 = vsel %vm8233_vm5, %v3572_v13, %v3573_v10  ;;  %v3584_v33 = vrot.slane %v6430_v28, 5  ;;  %v7905_v38 = vld [vmem:[%s8121_s8 + $0xb4] sm:$0xff]   ;;  %v755_v40 = vld [vmem:[%s8121_s8 + $0x4] sm:$0xf]  ;;  %v830_v7 = vshrl.u32 %v757_v62, 16 }
  0x60   : > { %7186 = vmatpush3.bf16.msra.mxu0 %v7891_v51  ;;  %v3556_v51 = vrot.slane %v6418_v45, 5  ;;  %6993 = vmatprep.subr.bf16.mxu1 %v7902_v48  ;;  %v6477_v36 = vcombine.low %v3571_v22, %v3574_v23  ;;  %v809_v45 = vshll.u32 %v754_v39, 16  ;;  %v833_v8 = vshll.u32 %v757_v62, 16  ;;  %v7911_v10 = vld [vmem:[%s8126_s11 + $0x1a0] sm:$0xff]   ;;  %v761_v41 = vld [vmem:[%s8121_s8 + $0x1c] sm:$0xf] }
  0x61   : > { %7187 = vmatprep.subr.bf16.mxu0 %v7892_v61  ;;  %7154 = vmatmul.mubr.bf16.gmra.mrb[12].mxu0 %v6391_v25  ;;  %v3579_v25 = vrot.slane %v3577_v20, 4  ;;  %v8311_v42 = vsel %vm8233_vm5, %v6463_v30, %v3584_v33  ;;  %v843_v13 = vshrl.u32 %v758_v3, 16  ;;  %v6437_v28 = vld [vmem:[%s8121_s8 + $0x80] sm:$0x1] }
  0x62   : > { %7189 = vmatprep.mubr.bf16.mxu0 %v6472_v29  ;;  %v3558_v56 = vrot.slane %v3556_v51, 4  ;;  %v3557_v63 = vsel %vm8233_vm5, %v6459_v47, %v3556_v51  ;;  %v6431_v29 = vld [vmem:[%s8121_s8 + $0x68] sm:$0x1]  ;;  %v8315_v47 = vld [vmem:[%s8126_s11 + $0x80] sm:$0xff]   ;;  %v6433_v51 = vld [vmem:[%s8121_s8 + $0x70] sm:$0xf] }
  0x63   : > { %6994 = vmatpush3.bf16.msra.mxu1 %v7902_v48  ;;  %v3581_v32 = vsel %vm8233_vm5, %v3579_v25, %v3580_v21  ;;  %v3587_v35 = vrot.slane %v6431_v29, 5  ;;  %v815_v48 = vshll.u32 %v755_v40, 16  ;;  %v811_v55 = vrot.slane %v809_v45, 5  ;;  %v6436_v25 = vld [vmem:[%s8121_s8 + $0x7c] sm:$0xf] }
  0x64   : > { %7188 = vmatpush3.bf16.msra.mxu0 %v7892_v61  ;;  %v3566_v61 = vrot.slane %v6422_v58, 5  ;;  %v3560_v0 = vsel %vm8233_vm5, %v3558_v56, %v3559_v52  ;;  %6995 = vmatprep.subr.bf16.mxu1 %v7906_v26  ;;  %v6464_v52 = vrot.slane %v6432_v46, 9  ;;  %v6434_v56 = vld [vmem:[%s8121_s8 + $0x74] sm:$0x1]  ;;  %v3591_v57 = vrot.slane %v6433_v51, 5  ;;  %v7909_v58 = vld [vmem:[%s8126_s11 + $0x198] sm:$0xff]  }
  0x65   : > { %7221 = vmatprep.subr.bf16.mxu0 %v7899_v37  ;;  %v6475_v12 = vcombine.low %v3557_v63, %v3560_v0  ;;  %v817_v59 = vrot.slane %v815_v48, 5  ;;  %v3594_v2 = vrot.slane %v6434_v56, 5  ;;  %v835_v18 = vrot.slane %v833_v8, 5  ;;  %v6438_v48 = vld [vmem:[%s8121_s8 + $0x84] sm:$0xe] }
  0x66   : > { %6966 = vmatmul.mubr.bf16.gmra.mrb[16].mxu1 %v7894_v14  ;;  %v3567_v9 = vsel %vm8233_vm5, %v3565_v1, %v3566_v61  ;;  %v7904_v14 = vld [vmem:[%s8121_s8 + $0xa8] sm:$0xff]   ;;  %v827_v61 = vrot.slane %v825_v50, 5  ;;  %v3593_v1 = vrot.slane %v3591_v57, 4  ;;  %v845_v23 = vrot.slane %v843_v13, 4 }
  0x67   : > { %6969 = vmatprep.mubr.bf16.mxu1 %v7896_v19  ;;  %v6476_v17 = vcombine.low %v3564_v4, %v3567_v9  ;;  %v6462_v19 = vrot.slane %v6426_v15, 9  ;;  %6996 = vmatpush3.bf16.msra.mxu1 %v7906_v26  ;;  %v759_v4 = vld [vmem:[%s8121_s8 + $0x14] sm:$0x1]  ;;  %v839_v9 = vshll.u32 %v758_v3, 16  ;;  %v3598_v30 = vrot.slane %v6436_v25, 5  ;;  %v7916_v3 = vld [vmem:[%s8126_s11 + $0x1b8] sm:$0xff]  }
  0x68   : > { %7029 = vmatprep.subr.bf16.mxu1 %v8315_v47  ;;  %v3595_v16 = vsel %vm8233_vm5, %v3593_v1, %v3594_v2  ;;  %v863_v46 = vshll.u32 %v761_v41, 16  ;;  %v867_v51 = vshrl.u32 %v761_v41, 16  ;;  %v765_v2 = vld [vmem:[%s8121_s8 + $0x2c] sm:$0x1] }
  0x69   : > { %7190 = vmatmul.mubr.bf16.vlgmr.msra.gmra.mrb[0].mxu0 %v6473_v49  ;;  %v3578_v24 = vsel %vm8233_vm5, %v6462_v19, %v3577_v20  ;;  %v819_v49 = vshrl.u32 %v755_v40, 16  ;;  %v6435_v19 = vld [vmem:[%s8121_s8 + $0x78] sm:$0xe]  ;;  %v7913_v20 = vld [vmem:[%s8126_s11 + $0x1a8] sm:$0xff]   ;;  %v841_v22 = vrot.slane %v839_v9, 5  ;;  %v3600_v40 = vrot.slane %v3598_v30, 4 }
  0x6a   : > { %7193 = vmatprep.mubr.bf16.mxu0 %v6474_v54  ;;  %7222 = vmatpush3.bf16.msra.mxu0 %v7899_v37  ;;  %v6478_v37 = vcombine.low %v3578_v24, %v3581_v32  ;;  %v808_v54 = vrot.slane %v806_v44, 4  ;;  %v6465_v29 = vrot.slane %v6435_v19, 9 }
  0x6b   : > { %7223 = vmatprep.subr.bf16.mxu0 %v7903_v11  ;;  %v821_v60 = vrot.slane %v819_v49, 4 }
  0x6c   : > { %v812_v0 = vor.u32 %v811_v55, %v808_v54  ;;  %v8347_v39 = vsel %vm8233_vm5, %v6465_v29, %v3598_v30  ;;  %v6440_v54 = vld [vmem:[%s8121_s8 + $0x8c] sm:$0x1] }
  0x6d   : > { %v7910_v55 = vld [vmem:[%s8126_s11 + $0x88] sm:$0xff]   ;;  %v3608_v8 = vrot.slane %v6440_v54, 5 }
  0x6e   : > { %6970 = vmatmul.mubr.bf16.gmra.mrb[20].mxu1 %v7897_v43  ;;  %7224 = vmatpush3.bf16.msra.mxu0 %v7903_v11  ;;  %v3586_v43 = vrot.slane %v3584_v33, 4  ;;  %v813_v11 = vrot.slane %v812_v0, 4  ;;  %v846_v33 = vor.u32 %v845_v23, %v841_v22  ;;  %v869_v0 = vrot.slane %v867_v51, 4  ;;  %v6442_v23 = vld [vmem:[%s8121_s8 + $0x94] sm:$0xf] }
  0x6f   : > { %6973 = vmatprep.mubr.bf16.mxu1 %v7900_v53  ;;  %7225 = vmatprep.subr.bf16.mxu0 %v7907_v31  ;;  %v6445_v51 = vld [vmem:[%s8121_s8 + $0xa0] sm:$0xf] }
  0x70   : > { %v8320_v53 = vsel %vm8233_vm5, %v3586_v43, %v3587_v35  ;;  %v818_v21 = vsel %vm8159_vm2, %v813_v11, %v817_v59  ;;  %v3601_v35 = vrot.slane %v6437_v28, 5  ;;  %v847_v43 = vrot.slane %v846_v33, 4  ;;  %v7914_v33 = vld [vmem:[%s8126_s11 + $0x98] sm:$0xff]  }
  0x71   : > { %7194 = vmatmul.mubr.bf16.gmra.mrb[4].mxu0 %v6475_v12  ;;  %v6479_v63 = vcombine.low %v8311_v42, %v8320_v53  ;;  %v3592_v12 = vsel %vm8233_vm5, %v6464_v52, %v3591_v57  ;;  %v762_v42 = vld [vmem:[%s8121_s8 + $0x20] sm:$0x1]  ;;  %v6439_v53 = vld [vmem:[%s8121_s8 + $0x88] sm:$0xf] }
  0x72   : > { %7197 = vmatprep.mubr.bf16.mxu0 %v6476_v17  ;;  %7226 = vmatpush3.bf16.msra.mxu0 %v7907_v31  ;;  %v832_v17 = vrot.slane %v830_v7, 4  ;;  %v6480_v32 = vcombine.low %v3592_v12, %v3595_v16  ;;  %v3602_v50 = vsel %vm8233_vm5, %v3600_v40, %v3601_v35  ;;  %v873_v52 = vshll.u32 %v762_v42, 16  ;;  %v768_v40 = vld [vmem:[%s8121_s8 + $0x38] sm:$0x1] }
  0x73   : > { %7227 = vmatprep.subr.bf16.mxu0 %v7909_v58  ;;  %v6481_v57 = vcombine.low %v8347_v39, %v3602_v50  ;;  %v3605_v7 = vrot.slane %v6439_v53, 5  ;;  %v767_v39 = vld [vmem:[%s8121_s8 + $0x34] sm:$0xf] }
  0x74   : > { %v836_v27 = vor.u32 %v835_v18, %v832_v17  ;;  %v875_v1 = vrot.slane %v873_v52, 5  ;;  %v6441_v17 = vld [vmem:[%s8121_s8 + $0x90] sm:$0xe]  ;;  %v911_v50 = vshll.u32 %v767_v39, 16 }
  0x75   : > { %v7912_v18 = vld [vmem:[%s8126_s11 + $0x90] sm:$0xff]  }
  0x76   : > { %6974 = vmatmul.mubr.bf16.gmra.mrb[24].mxu1 %v7901_v6  ;;  %v822_v6 = vor.u32 %v821_v60, %v817_v59  ;;  %7228 = vmatpush3.bf16.msra.mxu0 %v7909_v58  ;;  %v763_v60 = vld [vmem:[%s8121_s8 + $0x24] sm:$0xf] }
  0x77   : > { %6977 = vmatprep.mubr.bf16.mxu1 %v7904_v14  ;;  %v849_v14 = vshll.u32 %v759_v4, 16  ;;  %7229 = vmatprep.subr.bf16.mxu0 %v7911_v10  ;;  %v881_v11 = vshll.u32 %v763_v60, 16 }
  0x78   : > { %v823_v15 = vrot.slane %v822_v6, 4  ;;  %v6466_v6 = vrot.slane %v6438_v48, 9 }
  0x79   : > { %7198 = vmatmul.mubr.bf16.gmra.mrb[8].mxu0 %v6477_v36  ;;  %v851_v24 = vrot.slane %v849_v14, 5  ;;  %v760_v36 = vld [vmem:[%s8121_s8 + $0x18] sm:$0xf] }
  0x7a   : > { %7201 = vmatprep.mubr.bf16.mxu0 %v6478_v37  ;;  %v828_v26 = vsel %vm8159_vm2, %v823_v15, %v827_v61  ;;  %7230 = vmatpush3.bf16.msra.mxu0 %v7911_v10  ;;  %v7915_v37 = vld [vmem:[%s8126_s11 + $0x1b0] sm:$0xff]   ;;  %v854_v44 = vshrl.u32 %v760_v36, 16  ;;  %v857_v45 = vshll.u32 %v760_v36, 16  ;;  %v764_v61 = vld [vmem:[%s8121_s8 + $0x28] sm:$0xf]  ;;  %v878_v10 = vshrl.u32 %v763_v60, 16 }
  0x7b   : > { %v6216_v31 = vcombine.low %v818_v21, %v828_v26  ;;  %7231 = vmatprep.subr.bf16.mxu0 %v7913_v20  ;;  %v852_v56 = vsel %vm8159_vm2, %v847_v43, %v851_v24  ;;  %v887_v12 = vshll.u32 %v764_v61, 16  ;;  %v3606_v14 = vsel %vm8233_vm5, %v6466_v6, %v3605_v7  ;;  %v8399_v6 = vld [vmem:[%s8126_s11 + $0x1c0] sm:$0xff]  }
  0x7c   : > { %v856_v58 = vrot.slane %v854_v44, 4  ;;  %v859_v59 = vrot.slane %v857_v45, 5  ;;  %v3607_v15 = vrot.slane %v3605_v7, 4  ;;  %v891_v16 = vshrl.u32 %v764_v61, 16  ;;  %v6444_v45 = vld [vmem:[%s8121_s8 + $0x9c] sm:$0xe] }
  0x7d   : > { %v883_v21 = vrot.slane %v881_v11, 5  ;;  %v897_v26 = vshll.u32 %v765_v2, 16  ;;  %v913_v60 = vrot.slane %v911_v50, 5  ;;  %v921_v61 = vshll.u32 %v768_v40, 16 }
  0x7e   : > { %6978 = vmatmul.mubr.bf16.gmra.mrb[28].mxu1 %v7905_v38  ;;  %v837_v38 = vrot.slane %v836_v27, 4  ;;  %7232 = vmatpush3.bf16.msra.mxu0 %v7913_v20  ;;  %v860_v4 = vor.u32 %v859_v59, %v856_v58  ;;  %v880_v20 = vrot.slane %v878_v10, 4  ;;  %v3609_v24 = vsel %vm8233_vm5, %v3607_v15, %v3608_v8  ;;  %v6443_v27 = vld [vmem:[%s8121_s8 + $0x98] sm:$0x1]  ;;  %v6447_v15 = vld [vmem:[%s8121_s8 + $0xa8] sm:$0xe] }
  0x7f   : > { %6997 = vmatprep.mubr.bf16.mxu1 %v6216_v31  ;;  %7233 = vmatprep.subr.bf16.mxu0 %v7915_v37  ;;  %v893_v25 = vrot.slane %v891_v16, 4  ;;  %v6482_v29 = vcombine.low %v3606_v14, %v3609_v24  ;;  %v6467_v31 = vrot.slane %v6441_v17, 9  ;;  %v3615_v42 = vrot.slane %v6443_v27, 5  ;;  %v6449_v24 = vld [vmem:[%s8121_s8 + $0xb0] sm:$0x1] }
  0x80   : > { %v842_v49 = vsel %vm8159_vm2, %v837_v38, %v841_v22  ;;  %v861_v13 = vrot.slane %v860_v4, 4  ;;  %v889_v22 = vrot.slane %v887_v12, 5  ;;  %v884_v30 = vor.u32 %v883_v21, %v880_v20  ;;  %v771_v4 = vld [vmem:[%s8121_s8 + $0x44] sm:$0x1]  ;;  %v6448_v20 = vld [vmem:[%s8121_s8 + $0xac] sm:$0xf] }
  0x81   : > { %7202 = vmatmul.mubr.bf16.gmra.mrb[12].mxu0 %v6479_v63  ;;  %v6217_v62 = vcombine.low %v842_v49, %v852_v56  ;;  %v865_v63 = vrot.slane %v863_v46, 5  ;;  %v3612_v38 = vrot.slane %v6442_v23, 5  ;;  %v6446_v56 = vld [vmem:[%s8121_s8 + $0xa4] sm:$0x1]  ;;  %v923_v7 = vrot.slane %v921_v61, 5 }
  0x82   : > { %7205 = vmatprep.mubr.bf16.mxu0 %v6480_v32  ;;  %7234 = vmatpush3.bf16.msra.mxu0 %v7915_v37  ;;  %v766_v32 = vld [vmem:[%s8121_s8 + $0x30] sm:$0xf]  ;;  %v894_v36 = vor.u32 %v893_v25, %v889_v22  ;;  %v899_v37 = vrot.slane %v897_v26, 5  ;;  %v885_v41 = vrot.slane %v884_v30, 4  ;;  %v6468_v8 = vrot.slane %v6444_v45, 9  ;;  %v7921_v25 = vld [vmem:[%s8126_s11 + $0xa8] sm:$0xff]  }
  0x83   : > { %v870_v9 = vor.u32 %v869_v0, %v865_v63  ;;  %7235 = vmatprep.subr.bf16.mxu0 %v7916_v3  ;;  %v902_v43 = vshrl.u32 %v766_v32, 16  ;;  %v905_v44 = vshll.u32 %v766_v32, 16  ;;  %v3613_v48 = vsel %vm8233_vm5, %v6467_v31, %v3612_v38 }
  0x84   : > { %v895_v46 = vrot.slane %v894_v36, 4  ;;  %v3614_v49 = vrot.slane %v3612_v38, 4  ;;  %v890_v52 = vsel %vm8159_vm2, %v885_v41, %v889_v22  ;;  %v3622_v10 = vrot.slane %v6446_v56, 5  ;;  %v7925_v36 = vld [vmem:[%s8126_s11 + $0xb0] sm:$0xff]   ;;  %v773_v41 = vld [vmem:[%s8121_s8 + $0x4c] sm:$0xf] }
  0x85   : > { %v871_v19 = vrot.slane %v870_v9, 4  ;;  %v904_v53 = vrot.slane %v902_v43, 4  ;;  %v907_v54 = vrot.slane %v905_v44, 5  ;;  %v3619_v9 = vrot.slane %v6445_v51, 5 }
  0x86   : > { %6998 = vmatmul.mubr.bf16.vlgmr.msra.gmra.mrb[0].mxu1 %v6217_v62  ;;  %7236 = vmatpush3.bf16.msra.mxu0 %v7916_v3  ;;  %v900_v58 = vsel %vm8159_vm2, %v895_v46, %v899_v37  ;;  %v3616_v59 = vsel %vm8233_vm5, %v3614_v49, %v3615_v42  ;;  %v769_v62 = vld [vmem:[%s8121_s8 + $0x3c] sm:$0xf]  ;;  %v3626_v40 = vrot.slane %v6448_v20, 5  ;;  %v774_v42 = vld [vmem:[%s8121_s8 + $0x50] sm:$0x1]  ;;  %v3629_v44 = vrot.slane %v6449_v24, 5 }
  0x87   : > { %7030 = vmatpush3.bf16.msra.mxu1 %v8315_v47  ;;  %v866_v47 = vsel %vm8159_vm2, %v861_v13, %v865_v63  ;;  %v876_v28 = vsel %vm8159_vm2, %v871_v19, %v875_v1  ;;  %v770_v63 = vld [vmem:[%s8121_s8 + $0x40] sm:$0xf]  ;;  %v6219_v0 = vcombine.low %v890_v52, %v900_v58  ;;  %v6483_v1 = vcombine.low %v3613_v48, %v3616_v59  ;;  %v6450_v48 = vld [vmem:[%s8121_s8 + $0xb4] sm:$0xe]  ;;  %v6452_v58 = vld [vmem:[%s8121_s8 + $0xbc] sm:$0x1] }
  0x88   : > { %7031 = vmatprep.subr.bf16.mxu1 %v7910_v55  ;;  %v6218_v35 = vcombine.low %v866_v47, %v876_v28  ;;  %v908_v2 = vor.u32 %v907_v54, %v904_v53  ;;  %v926_v13 = vshrl.u32 %v769_v62, 16  ;;  %v929_v14 = vshll.u32 %v769_v62, 16  ;;  %7269 = vmatprep.subr.bf16.mxu0 %v8399_v6  ;;  %v6451_v53 = vld [vmem:[%s8121_s8 + $0xb8] sm:$0xf] }
  0x89   : > { %7206 = vmatmul.mubr.bf16.gmra.mrb[16].mxu0 %v6481_v57  ;;  %v7918_v57 = vld [vmem:[%s8126_s11 + $0xa0] sm:$0xff]   ;;  %v3620_v16 = vsel %vm8233_vm5, %v6468_v8, %v3619_v9  ;;  %v3621_v17 = vrot.slane %v3619_v9, 4  ;;  %v939_v19 = vshrl.u32 %v770_v63, 16  ;;  %v3628_v51 = vrot.slane %v3626_v40, 4  ;;  %v7929_v8 = vld [vmem:[%s8126_s11 + $0xb8] sm:$0xff]  }
  0x8a   : > { %7209 = vmatprep.mubr.bf16.mxu0 %v6482_v29  ;;  %7001 = vmatprep.mubr.bf16.mxu1 %v6218_v35  ;;  %v909_v11 = vrot.slane %v908_v2, 4  ;;  %v928_v23 = vrot.slane %v926_v13, 4  ;;  %v931_v47 = vrot.slane %v929_v14, 5  ;;  %v945_v29 = vshll.u32 %v771_v4, 16  ;;  %v772_v35 = vld [vmem:[%s8121_s8 + $0x48] sm:$0xf] }
  0x8b   : > { %7032 = vmatpush3.bf16.msra.mxu1 %v7910_v55  ;;  %v915_v55 = vshrl.u32 %v767_v39, 16  ;;  %v3623_v26 = vsel %vm8233_vm5, %v3621_v17, %v3622_v10  ;;  %v941_v28 = vrot.slane %v939_v19, 4  ;;  %v950_v45 = vshrl.u32 %v772_v35, 16  ;;  %v6453_v17 = vld [vmem:[%s8121_s8 + $0xc0] sm:$0xe] }
  0x8c   : > { %7033 = vmatprep.subr.bf16.mxu1 %v7912_v18  ;;  %v914_v21 = vsel %vm8159_vm2, %v909_v11, %v913_v60  ;;  %v6484_v31 = vcombine.low %v3620_v16, %v3623_v26  ;;  %v932_v32 = vor.u32 %v931_v47, %v928_v23  ;;  %v947_v39 = vrot.slane %v945_v29, 5  ;;  %v6455_v26 = vld [vmem:[%s8121_s8 + $0xc8] sm:$0x1] }
  0x8d   : > { %v917_v3 = vrot.slane %v915_v55, 4  ;;  %v953_v46 = vshll.u32 %v772_v35, 16  ;;  %v959_v52 = vshll.u32 %v773_v41, 16  ;;  %v952_v55 = vrot.slane %v950_v45, 4  ;;  %v780_v45 = vld [vmem:[%s8121_s8 + $0x68] sm:$0x1] }
  0x8e   : > { %7002 = vmatmul.mubr.bf16.gmra.mrb[4].mxu1 %v6219_v0  ;;  %v933_v43 = vrot.slane %v932_v32, 4  ;;  %v969_v62 = vshll.u32 %v774_v42, 16  ;;  %v776_v0 = vld [vmem:[%s8121_s8 + $0x58] sm:$0xf]  ;;  %v6470_v10 = vrot.slane %v6450_v48, 9  ;;  %v3633_v11 = vrot.slane %v6451_v53, 5 }
  0x8f   : > { %7034 = vmatpush3.bf16.msra.mxu1 %v7912_v18  ;;  %v918_v12 = vor.u32 %v917_v3, %v913_v60  ;;  %v935_v18 = vshll.u32 %v770_v63, 16  ;;  %v955_v56 = vrot.slane %v953_v46, 5  ;;  %v3630_v60 = vsel %vm8233_vm5, %v3628_v51, %v3629_v44  ;;  %v775_v63 = vld [vmem:[%s8121_s8 + $0x54] sm:$0xf]  ;;  %v779_v44 = vld [vmem:[%s8121_s8 + $0x64] sm:$0xf] }
  0x90   : > { %7035 = vmatprep.subr.bf16.mxu1 %v7914_v33  ;;  %v961_v61 = vrot.slane %v959_v52, 5  ;;  %v971_v9 = vrot.slane %v969_v62, 5  ;;  %v977_v16 = vshll.u32 %v775_v63, 16  ;;  %v3635_v19 = vrot.slane %v3633_v11, 4 }
  0x91   : > { %7210 = vmatmul.mubr.bf16.gmra.mrb[20].mxu0 %v6483_v1  ;;  %v919_v22 = vrot.slane %v918_v12, 4  ;;  %v937_v27 = vrot.slane %v935_v18, 5  ;;  %v956_v3 = vor.u32 %v955_v56, %v952_v55  ;;  %v3636_v12 = vrot.slane %v6452_v58, 5  ;;  %v7917_v55 = vld [vmem:[%s8121_s8 + $0x18] sm:$0xff]  }
  0x92   : > { %7213 = vmatprep.mubr.bf16.mxu0 %v6484_v31  ;;  %v3634_v18 = vsel %vm8233_vm5, %v6470_v10, %v3633_v11  ;;  %v983_v20 = vshll.u32 %v776_v0, 16  ;;  %v1007_v53 = vshll.u32 %v779_v44, 16 }
  0x93   : > { %7036 = vmatpush3.bf16.msra.mxu1 %v7914_v33  ;;  %v924_v30 = vsel %vm8159_vm2, %v919_v22, %v923_v7  ;;  %v6469_v33 = vrot.slane %v6447_v15, 9  ;;  %v942_v38 = vor.u32 %v941_v28, %v937_v27  ;;  %v938_v54 = vsel %vm8159_vm2, %v933_v43, %v937_v27  ;;  %v777_v7 = vld [vmem:[%s8121_s8 + $0x5c] sm:$0x1]  ;;  %v6454_v22 = vld [vmem:[%s8121_s8 + $0xc4] sm:$0xf] }
  0x94   : > { %7037 = vmatprep.subr.bf16.mxu1 %v7918_v57  ;;  %v6220_v37 = vcombine.low %v914_v21, %v924_v30  ;;  %v957_v13 = vrot.slane %v956_v3, 4  ;;  %v974_v15 = vshrl.u32 %v775_v63, 16  ;;  %v987_v21 = vshrl.u32 %v776_v0, 16  ;;  %v8441_v27 = vld [vmem:[%s8126_s11 + $0xc0] sm:$0xff]  }
  0x95   : > { %v943_v49 = vrot.slane %v942_v38, 4  ;;  %v3627_v50 = vsel %vm8233_vm5, %v6469_v33, %v3626_v40  ;;  %v3637_v28 = vsel %vm8233_vm5, %v3635_v19, %v3636_v12  ;;  %v985_v29 = vrot.slane %v983_v20, 5 }
  0x96   : > { %7005 = vmatprep.mubr.bf16.mxu1 %v6220_v37  ;;  %v6485_v2 = vcombine.low %v3627_v50, %v3630_v60  ;;  %v962_v23 = vsel %vm8159_vm2, %v957_v13, %v961_v61  ;;  %v976_v24 = vrot.slane %v974_v15, 4  ;;  %v989_v30 = vrot.slane %v987_v21, 4  ;;  %v781_v60 = vld [vmem:[%s8121_s8 + $0x6c] sm:$0xf]  ;;  %v785_v21 = vld [vmem:[%s8121_s8 + $0x7c] sm:$0xf] }
  0x97   : > { %7038 = vmatpush3.bf16.msra.mxu1 %v7918_v57  ;;  %v963_v57 = vshrl.u32 %v773_v41, 16  ;;  %v948_v59 = vsel %vm8159_vm2, %v943_v49, %v947_v39  ;;  %v993_v31 = vshll.u32 %v777_v7, 16  ;;  %v6486_v33 = vcombine.low %v3634_v18, %v3637_v28  ;;  %v778_v41 = vld [vmem:[%s8121_s8 + $0x60] sm:$0xf] }
  0x98   : > { %7039 = vmatprep.subr.bf16.mxu1 %v7921_v25  ;;  %v6221_v1 = vcombine.low %v938_v54, %v948_v59  ;;  %v990_v38 = vor.u32 %v989_v30, %v985_v29  ;;  %v3640_v40 = vrot.slane %v6454_v22, 5  ;;  %v3643_v43 = vrot.slane %v6455_v26, 5 }
  0x99   : > { %v965_v4 = vrot.slane %v963_v57, 4  ;;  %7214 = vmatmul.mubr.bf16.gmra.mrb[24].mxu0 %v6485_v2  ;;  %v995_v39 = vrot.slane %v993_v31, 5  ;;  %v998_v50 = vshrl.u32 %v778_v41, 16  ;;  %v1001_v52 = vshll.u32 %v778_v41, 16  ;;  %v783_v2 = vld [vmem:[%s8121_s8 + $0x74] sm:$0x1] }
  0x9a   : > { %7006 = vmatmul.mubr.bf16.gmra.mrb[8].mxu1 %v6221_v1  ;;  %7217 = vmatprep.mubr.bf16.mxu0 %v6486_v33  ;;  %v991_v46 = vrot.slane %v990_v38, 4  ;;  %v3642_v49 = vrot.slane %v3640_v40, 4  ;;  %v1011_v54 = vshrl.u32 %v779_v44, 16  ;;  %v1017_v59 = vshll.u32 %v780_v45, 16  ;;  %v787_v38 = vld [vmem:[%s8121_s8 + $0x84] sm:$0xf] }
  0x9b   : > { %7040 = vmatpush3.bf16.msra.mxu1 %v7921_v25  ;;  %v966_v14 = vor.u32 %v965_v4, %v961_v61  ;;  %v979_v25 = vrot.slane %v977_v16, 5  ;;  %v1000_v58 = vrot.slane %v998_v50, 4  ;;  %v782_v61 = vld [vmem:[%s8121_s8 + $0x70] sm:$0xf]  ;;  %v1003_v0 = vrot.slane %v1001_v52, 5  ;;  %v7927_v44 = vld [vmem:[%s8126_s11 + $0x1c8] sm:$0xff]  }
  0x9c   : > { %7041 = vmatprep.subr.bf16.mxu1 %v7925_v36  ;;  %v996_v56 = vsel %vm8159_vm2, %v991_v46, %v995_v39  ;;  %v3644_v57 = vsel %vm8233_vm5, %v3642_v49, %v3643_v43  ;;  %v1009_v1 = vrot.slane %v1007_v53, 5  ;;  %v1013_v3 = vrot.slane %v1011_v54, 4  ;;  %v784_v16 = vld [vmem:[%s8121_s8 + $0x78] sm:$0xf]  ;;  %v788_v43 = vld [vmem:[%s8121_s8 + $0x88] sm:$0xf] }
  0x9d   : > { %v967_v47 = vrot.slane %v966_v14, 4  ;;  %v980_v35 = vor.u32 %v979_v25, %v976_v24  ;;  %v1019_v4 = vrot.slane %v1017_v59, 5  ;;  %v1022_v7 = vshrl.u32 %v781_v60, 16  ;;  %v786_v24 = vld [vmem:[%s8121_s8 + $0x80] sm:$0x1]  ;;  %v7931_v59 = vld [vmem:[%s8126_s11 + $0x1d0] sm:$0xff]  }
  0x9e   : > { %v1031_v10 = vshll.u32 %v782_v61, 16  ;;  %v1035_v11 = vshrl.u32 %v782_v61, 16  ;;  %v1041_v12 = vshll.u32 %v783_v2, 16  ;;  %v1014_v13 = vor.u32 %v1013_v3, %v1009_v1  ;;  %v789_v49 = vld [vmem:[%s8121_s8 + $0x8c] sm:$0x1]  ;;  %v7922_v2 = vld [vmem:[%s8121_s8 + $0x3c] sm:$0xff]  }
  0x9f   : > { %7042 = vmatpush3.bf16.msra.mxu1 %v7925_v36  ;;  %v972_v32 = vsel %vm8159_vm2, %v967_v47, %v971_v9  ;;  %v6471_v36 = vrot.slane %v6453_v17, 9  ;;  %v981_v42 = vrot.slane %v980_v35, 4  ;;  %v1004_v9 = vor.u32 %v1003_v0, %v1000_v58  ;;  %v7919_v47 = vld [vmem:[%s8121_s8 + $0x24] sm:$0xff]   ;;  %v790_v3 = vld [vmem:[%s8121_s8 + $0x90] sm:$0xf] }
  0xa0   : > { %7043 = vmatprep.subr.bf16.mxu1 %v7929_v8  ;;  %v6222_v37 = vcombine.low %v962_v23, %v972_v32  ;;  %v1024_v14 = vrot.slane %v1022_v7, 4  ;;  %v1033_v18 = vrot.slane %v1031_v10, 5  ;;  %v1037_v19 = vrot.slane %v1035_v11, 4 }
  0xa1   : > { %v3641_v48 = vsel %vm8233_vm5, %v6471_v36, %v3640_v40  ;;  %v986_v51 = vsel %vm8159_vm2, %v981_v42, %v985_v29  ;;  %v1005_v17 = vrot.slane %v1004_v9, 4  ;;  %v1043_v20 = vrot.slane %v1041_v12, 5  ;;  %v792_v9 = vld [vmem:[%s8121_s8 + $0x98] sm:$0x1] }
  0xa2   : > { %7009 = vmatprep.mubr.bf16.mxu1 %v6222_v37  ;;  %v6223_v62 = vcombine.low %v986_v51, %v996_v56  ;;  %v6487_v63 = vcombine.low %v3641_v48, %v3644_v57  ;;  %v1015_v22 = vrot.slane %v1014_v13, 4  ;;  %v1046_v25 = vshrl.u32 %v784_v16, 16  ;;  %v7920_v37 = vld [vmem:[%s8121_s8 + $0x30] sm:$0xff]  }
  0xa3   : > { %7044 = vmatpush3.bf16.msra.mxu1 %v7929_v8  ;;  %v1025_v8 = vshll.u32 %v781_v60, 16  ;;  %v1049_v26 = vshll.u32 %v784_v16, 16  ;;  %v1010_v28 = vsel %vm8159_vm2, %v1005_v17, %v1009_v1  ;;  %v1038_v29 = vor.u32 %v1037_v19, %v1033_v18 }
  0xa4   : > { %7077 = vmatprep.subr.bf16.mxu1 %v8441_v27  ;;  %7010 = vmatmul.mubr.bf16.gmra.mrb[12].mxu1 %v6223_v62  ;;  %v1055_v30 = vshll.u32 %v785_v21, 16  ;;  %v1059_v31 = vshrl.u32 %v785_v21, 16  ;;  %v1020_v32 = vsel %vm8159_vm2, %v1015_v22, %v1019_v4  ;;  %v1048_v35 = vrot.slane %v1046_v25, 4 }
  0xa5   : > { %7218 = vmatmul.mubr.bf16.gmra.mrb[28].mxu0 %v6487_v63  ;;  %v1027_v15 = vrot.slane %v1025_v8, 5  ;;  %v1051_v36 = vrot.slane %v1049_v26, 5  ;;  %v6224_v39 = vcombine.low %v1010_v28, %v1020_v32  ;;  %v1039_v40 = vrot.slane %v1038_v29, 4  ;;  %v791_v8 = vld [vmem:[%s8121_s8 + $0x94] sm:$0xf] }
  0xa6   : > { %7237 = vmatprep.mubr.bf16.mxu0 %v7917_v55  ;;  %v1057_v41 = vrot.slane %v1055_v30, 5  ;;  %v1061_v42 = vrot.slane %v1059_v31, 4  ;;  %v1065_v48 = vshll.u32 %v786_v24, 16  ;;  %v1070_v50 = vshrl.u32 %v787_v38, 16  ;;  %v794_v28 = vld [vmem:[%s8121_s8 + $0xa0] sm:$0xf] }
  0xa7   : > { %v1028_v23 = vor.u32 %v1027_v15, %v1024_v14  ;;  %v1052_v46 = vor.u32 %v1051_v36, %v1048_v35  ;;  %7013 = vmatprep.mubr.bf16.mxu1 %v6224_v39  ;;  %v1044_v51 = vsel %vm8159_vm2, %v1039_v40, %v1043_v20  ;;  %v1073_v53 = vshll.u32 %v787_v38, 16  ;;  %v7924_v15 = vld [vmem:[%s8121_s8 + $0x48] sm:$0xff]   ;;  %v7935_v20 = vld [vmem:[%s8126_s11 + $0x1d8] sm:$0xff]   ;;  %v795_v29 = vld [vmem:[%s8121_s8 + $0xa4] sm:$0x1] }
  0xa8   : > { %v1062_v52 = vor.u32 %v1061_v42, %v1057_v41  ;;  %v1079_v54 = vshll.u32 %v788_v43, 16  ;;  %v1067_v57 = vrot.slane %v1065_v48, 5  ;;  %v1072_v58 = vrot.slane %v1070_v50, 4  ;;  %v7939_v35 = vld [vmem:[%s8126_s11 + $0x1e0] sm:$0xff]   ;;  %v7926_v40 = vld [vmem:[%s8121_s8 + $0x54] sm:$0xff]  }
  0xa9   : > { %v1029_v33 = vrot.slane %v1028_v23, 4  ;;  %v1053_v56 = vrot.slane %v1052_v46, 4  ;;  %v1075_v61 = vrot.slane %v1073_v53, 5  ;;  %v1083_v63 = vshrl.u32 %v788_v43, 16  ;;  %v796_v53 = vld [vmem:[%s8121_s8 + $0xa8] sm:$0xf] }
  0xaa   : > { %v1063_v60 = vrot.slane %v1062_v52, 4  ;;  %v1081_v62 = vrot.slane %v1079_v54, 5  ;;  %v1089_v1 = vshll.u32 %v789_v49, 16  ;;  %v1094_v10 = vshrl.u32 %v790_v3, 16  ;;  %v797_v54 = vld [vmem:[%s8121_s8 + $0xac] sm:$0xf] }
  0xab   : > { %v1034_v45 = vsel %vm8159_vm2, %v1029_v33, %v1033_v18  ;;  %v1058_v0 = vsel %vm8159_vm2, %v1053_v56, %v1057_v41  ;;  %v1076_v7 = vor.u32 %v1075_v61, %v1072_v58  ;;  %v1097_v13 = vshll.u32 %v790_v3, 16  ;;  %v798_v58 = vld [vmem:[%s8121_s8 + $0xb0] sm:$0x1] }
  0xac   : > { %v6225_v55 = vcombine.low %v1034_v45, %v1044_v51  ;;  %v1068_v4 = vsel %vm8159_vm2, %v1063_v60, %v1067_v57  ;;  %v1091_v12 = vrot.slane %v1089_v1, 5  ;;  %v1103_v14 = vshll.u32 %v791_v8, 16  ;;  %v7928_v45 = vld [vmem:[%s8121_s8 + $0x60] sm:$0xff]  }
  0xad   : > { %7238 = vmatmul.mubr.bf16.vlgmr.msra.gmra.mrb[0].mxu0 %v7919_v47  ;;  %v6226_v11 = vcombine.low %v1058_v0, %v1068_v4  ;;  %v1077_v16 = vrot.slane %v1076_v7, 4  ;;  %v1096_v18 = vrot.slane %v1094_v10, 4  ;;  %v1107_v19 = vshrl.u32 %v791_v8, 16  ;;  %v793_v47 = vld [vmem:[%s8121_s8 + $0x9c] sm:$0xf]  ;;  %v7943_v0 = vld [vmem:[%s8126_s11 + $0x1e8] sm:$0xff]  }
  0xae   : > { %7241 = vmatprep.mubr.bf16.mxu0 %v7920_v37  ;;  %7270 = vmatpush3.bf16.msra.mxu0 %v8399_v6  ;;  %v1085_v6 = vrot.slane %v1083_v63, 4  ;;  %v1099_v21 = vrot.slane %v1097_v13, 5  ;;  %v1105_v22 = vrot.slane %v1103_v14, 5  ;;  %v1113_v23 = vshll.u32 %v792_v9, 16  ;;  %v799_v7 = vld [vmem:[%s8121_s8 + $0xb4] sm:$0xf] }
  0xaf   : > { %7271 = vmatprep.subr.bf16.mxu0 %v7927_v44  ;;  %7014 = vmatmul.mubr.bf16.gmra.mrb[16].mxu1 %v6225_v55  ;;  %v1082_v24 = vsel %vm8159_vm2, %v1077_v16, %v1081_v62  ;;  %v1109_v26 = vrot.slane %v1107_v19, 4  ;;  %v1118_v32 = vshrl.u32 %v793_v47, 16  ;;  %v1121_v33 = vshll.u32 %v793_v47, 16  ;;  %v800_v10 = vld [vmem:[%s8121_s8 + $0xb8] sm:$0xf]  ;;  %v7947_v16 = vld [vmem:[%s8126_s11 + $0x1f0] sm:$0xff]  }
  0xb0   : > { %v1086_v17 = vor.u32 %v1085_v6, %v1081_v62  ;;  %7017 = vmatprep.mubr.bf16.mxu1 %v6226_v11  ;;  %v1100_v30 = vor.u32 %v1099_v21, %v1096_v18  ;;  %v1115_v31 = vrot.slane %v1113_v23, 5  ;;  %v1127_v38 = vshll.u32 %v794_v28, 16  ;;  %v801_v11 = vld [vmem:[%s8121_s8 + $0xbc] sm:$0x1] }
  0xb1   : > { %v1110_v37 = vor.u32 %v1109_v26, %v1105_v22  ;;  %v1131_v39 = vshrl.u32 %v794_v28, 16  ;;  %v1120_v43 = vrot.slane %v1118_v32, 4  ;;  %v1137_v50 = vshll.u32 %v795_v29, 16  ;;  %v7932_v29 = vld [vmem:[%s8121_s8 + $0x78] sm:$0xff]  }
  0xb2   : > { %7272 = vmatpush3.bf16.msra.mxu0 %v7927_v44  ;;  %v1087_v25 = vrot.slane %v1086_v17, 4  ;;  %v1101_v42 = vrot.slane %v1100_v30, 4  ;;  %v1123_v44 = vrot.slane %v1121_v33, 5  ;;  %v1129_v48 = vrot.slane %v1127_v38, 5  ;;  %v7948_v33 = vld [vmem:[%s8126_s11 + $0x1f8] sm:$0xff]  }
  0xb3   : > { %7273 = vmatprep.subr.bf16.mxu0 %v7931_v59  ;;  %v1111_v46 = vrot.slane %v1110_v37, 4  ;;  %v1133_v49 = vrot.slane %v1131_v39, 4  ;;  %v1139_v57 = vrot.slane %v1137_v50, 5  ;;  %v1145_v62 = vshll.u32 %v796_v53, 16  ;;  %v1574_v37 = vld [vmem:[%s8121_s8] sm:$0xe] }
  0xb4   : > { %v1092_v36 = vsel %vm8159_vm2, %v1087_v25, %v1091_v12  ;;  %v1106_v51 = vsel %vm8159_vm2, %v1101_v42, %v1105_v22  ;;  %v1124_v52 = vor.u32 %v1123_v44, %v1120_v43  ;;  %v1151_v63 = vshll.u32 %v797_v54, 16  ;;  %v1575_v38 = vld [vmem:[%s8121_s8 + $0x4] sm:$0xf]  ;;  %v1576_v39 = vld [vmem:[%s8121_s8 + $0x8] sm:$0x1] }
  0xb5   : > { %7242 = vmatmul.mubr.bf16.gmra.mrb[4].mxu0 %v7922_v2  ;;  %v6227_v41 = vcombine.low %v1082_v24, %v1092_v36  ;;  %v1116_v55 = vsel %vm8159_vm2, %v1111_v46, %v1115_v31  ;;  %v1134_v56 = vor.u32 %v1133_v49, %v1129_v48  ;;  %v1155_v3 = vshrl.u32 %v797_v54, 16  ;;  %v7930_v24 = vld [vmem:[%s8121_s8 + $0x6c] sm:$0xff]  }
  0xb6   : > { %7245 = vmatprep.mubr.bf16.mxu0 %v7924_v15  ;;  %7274 = vmatpush3.bf16.msra.mxu0 %v7931_v59  ;;  %v1142_v59 = vshrl.u32 %v796_v53, 16  ;;  %v6228_v60 = vcombine.low %v1106_v51, %v1116_v55  ;;  %v1125_v61 = vrot.slane %v1124_v52, 4  ;;  %v1161_v4 = vshll.u32 %v798_v58, 16  ;;  %v1578_v49 = vld [vmem:[%s8121_s8 + $0x10] sm:$0xf]  ;;  %v7934_v55 = vld [vmem:[%s8121_s8 + $0x84] sm:$0xff]  }
  0xb7   : > { %7275 = vmatprep.subr.bf16.mxu0 %v7935_v20  ;;  %7018 = vmatmul.mubr.bf16.gmra.mrb[20].mxu1 %v6227_v41  ;;  %v1135_v1 = vrot.slane %v1134_v56, 4  ;;  %v1147_v8 = vrot.slane %v1145_v62, 5  ;;  %v1153_v9 = vrot.slane %v1151_v63, 5  ;;  %v1157_v13 = vrot.slane %v1155_v3, 4  ;;  %v1579_v53 = vld [vmem:[%s8121_s8 + $0x14] sm:$0x1] }
  0xb8   : > { %v1144_v2 = vrot.slane %v1142_v59, 4  ;;  %7021 = vmatprep.mubr.bf16.mxu1 %v6228_v60  ;;  %v1130_v6 = vsel %vm8159_vm2, %v1125_v61, %v1129_v48  ;;  %v1163_v14 = vrot.slane %v1161_v4, 5  ;;  %v1166_v15 = vshrl.u32 %v799_v7, 16  ;;  %v1577_v48 = vld [vmem:[%s8121_s8 + $0xc] sm:$0xe]  ;;  %v8535_v56 = vld [vmem:[%s8126_s11 + $0x200] sm:$0xff]  }
  0xb9   : > { %v1140_v12 = vsel %vm8159_vm2, %v1135_v1, %v1139_v57  ;;  %v1169_v19 = vshll.u32 %v799_v7, 16  ;;  %v1158_v21 = vor.u32 %v1157_v13, %v1153_v9  ;;  %v1179_v23 = vshrl.u32 %v800_v10, 16  ;;  %v1580_v1 = vld [vmem:[%s8121_s8 + $0x18] sm:$0xe]  ;;  %v1581_v3 = vld [vmem:[%s8121_s8 + $0x1c] sm:$0xf] }
  0xba   : > { %7276 = vmatpush3.bf16.msra.mxu0 %v7935_v20  ;;  %v6229_v17 = vcombine.low %v1130_v6, %v1140_v12  ;;  %v1148_v18 = vor.u32 %v1147_v8, %v1144_v2  ;;  %v1175_v20 = vshll.u32 %v800_v10, 16  ;;  %v1168_v22 = vrot.slane %v1166_v15, 4  ;;  %v7936_v2 = vld [vmem:[%s8121_s8 + $0x90] sm:$0xff]   ;;  %v1582_v4 = vld [vmem:[%s8121_s8 + $0x20] sm:$0x1] }
  0xbb   : > { %7277 = vmatprep.subr.bf16.mxu0 %v7939_v35  ;;  %v1185_v47 = vshll.u32 %v801_v11, 16  ;;  %v1171_v26 = vrot.slane %v1169_v19, 5  ;;  %v1159_v30 = vrot.slane %v1158_v21, 4  ;;  %v1181_v31 = vrot.slane %v1179_v23, 4  ;;  %v1583_v11 = vld [vmem:[%s8121_s8 + $0x24] sm:$0xe] }
  0xbc   : > { %v1149_v25 = vrot.slane %v1148_v18, 4  ;;  %v1177_v28 = vrot.slane %v1175_v20, 5  ;;  %v6240_v42 = vrot.slane %v1574_v37, 9  ;;  %v1675_v43 = vrot.slane %v1575_v38, 5  ;;  %v1584_v12 = vld [vmem:[%s8121_s8 + $0x28] sm:$0xf] }
  0xbd   : > { %7246 = vmatmul.mubr.bf16.gmra.mrb[8].mxu0 %v7926_v40  ;;  %v1187_v32 = vrot.slane %v1185_v47, 5  ;;  %v1172_v36 = vor.u32 %v1171_v26, %v1168_v22  ;;  %v1164_v40 = vsel %vm8159_vm2, %v1159_v30, %v1163_v14  ;;  %v1678_v46 = vrot.slane %v1576_v39, 5  ;;  %v1585_v13 = vld [vmem:[%s8121_s8 + $0x2c] sm:$0x1]  ;;  %v7938_v23 = vld [vmem:[%s8121_s8 + $0x9c] sm:$0xff]  }
  0xbe   : > { %7249 = vmatprep.mubr.bf16.mxu0 %v7928_v45  ;;  %7278 = vmatpush3.bf16.msra.mxu0 %v7939_v35  ;;  %v1154_v35 = vsel %vm8159_vm2, %v1149_v25, %v1153_v9  ;;  %v1182_v41 = vor.u32 %v1181_v31, %v1177_v28  ;;  %v1676_v51 = vsel %vm8233_vm5, %v6240_v42, %v1675_v43  ;;  %v1677_v52 = vrot.slane %v1675_v43, 4  ;;  %v7937_v22 = vld [vmem:[%s8126_s11 + $0xc8] sm:$0xff]   ;;  %v1587_v25 = vld [vmem:[%s8121_s8 + $0x34] sm:$0xf]  ;;  %v1588_v26 = vld [vmem:[%s8121_s8 + $0x38] sm:$0x1] }
  0xbf   : > { %7279 = vmatprep.subr.bf16.mxu0 %v7943_v0  ;;  %7022 = vmatmul.mubr.bf16.gmra.mrb[24].mxu1 %v6229_v17  ;;  %v6230_v44 = vcombine.low %v1154_v35, %v1164_v40  ;;  %v1173_v45 = vrot.slane %v1172_v36, 4  ;;  %v6241_v54 = vrot.slane %v1577_v48, 9  ;;  %v1682_v58 = vrot.slane %v1578_v49, 5  ;;  %v7940_v31 = vld [vmem:[%s8121_s8 + $0xa8] sm:$0xff]   ;;  %v1590_v35 = vld [vmem:[%s8121_s8 + $0x40] sm:$0xf] }
  0xc0   : > { %v1183_v50 = vrot.slane %v1182_v41, 4  ;;  %v1685_v59 = vrot.slane %v1579_v53, 5  ;;  %v1679_v61 = vsel %vm8233_vm5, %v1677_v52, %v1678_v46  ;;  %v6242_v7 = vrot.slane %v1580_v1, 9  ;;  %v1591_v36 = vld [vmem:[%s8121_s8 + $0x44] sm:$0x1]  ;;  %v7941_v40 = vld [vmem:[%s8126_s11 + $0xd0] sm:$0xff]  }
  0xc1   : > { %7025 = vmatprep.mubr.bf16.mxu1 %v6230_v44  ;;  %v1178_v57 = vsel %vm8159_vm2, %v1173_v45, %v1177_v28  ;;  %v6256_v63 = vcombine.low %v1676_v51, %v1679_v61  ;;  %v1689_v6 = vrot.slane %v1581_v3, 5  ;;  %v1692_v8 = vrot.slane %v1582_v4, 5  ;;  %v1592_v44 = vld [vmem:[%s8121_s8 + $0x48] sm:$0xe]  ;;  %v7942_v48 = vld [vmem:[%s8121_s8 + $0xb4] sm:$0xff]   ;;  %v7944_v61 = vld [vmem:[%s8121_s8 + $0xc0] sm:$0xff]  }
  0xc2   : > { %7280 = vmatpush3.bf16.msra.mxu0 %v7943_v0  ;;  %v1188_v60 = vsel %vm8159_vm2, %v1183_v50, %v1187_v32  ;;  %v1684_v0 = vrot.slane %v1682_v58, 4  ;;  %v1683_v9 = vsel %vm8233_vm5, %v6241_v54, %v1682_v58  ;;  %v6243_v17 = vrot.slane %v1583_v11, 9  ;;  %v1589_v32 = vld [vmem:[%s8121_s8 + $0x3c] sm:$0xe]  ;;  %v1593_v49 = vld [vmem:[%s8121_s8 + $0x4c] sm:$0xf] }
  0xc3   : > { %7281 = vmatprep.subr.bf16.mxu0 %v7947_v16  ;;  %v6231_v62 = vcombine.low %v1178_v57, %v1188_v60  ;;  %v1690_v14 = vsel %vm8233_vm5, %v6242_v7, %v1689_v6  ;;  %v1691_v15 = vrot.slane %v1689_v6, 4  ;;  %v1699_v21 = vrot.slane %v1585_v13, 5  ;;  %v1594_v50 = vld [vmem:[%s8121_s8 + $0x50] sm:$0x1]  ;;  %v7945_v52 = vld [vmem:[%s8126_s11 + $0xd8] sm:$0xff]  }
  0xc4   : > { %v1686_v10 = vsel %vm8233_vm5, %v1684_v0, %v1685_v59  ;;  %v1706_v30 = vrot.slane %v1588_v26, 5  ;;  %v1710_v39 = vrot.slane %v1590_v35, 5  ;;  %v6245_v42 = vrot.slane %v1589_v32, 9  ;;  %v1595_v57 = vld [vmem:[%s8121_s8 + $0x54] sm:$0xe]  ;;  %v7946_v13 = vld [vmem:[%s8121_s8 + $0xcc] sm:$0xff]  }
  0xc5   : > { %7250 = vmatmul.mubr.bf16.gmra.mrb[12].mxu0 %v7930_v24  ;;  %v6257_v18 = vcombine.low %v1683_v9, %v1686_v10  ;;  %v1693_v19 = vsel %vm8233_vm5, %v1691_v15, %v1692_v8  ;;  %v1586_v24 = vld [vmem:[%s8121_s8 + $0x30] sm:$0xe]  ;;  %v1713_v43 = vrot.slane %v1591_v36, 5  ;;  %v6246_v51 = vrot.slane %v1592_v44, 9  ;;  %v1596_v58 = vld [vmem:[%s8121_s8 + $0x58] sm:$0xf] }
  0xc6   : > { %7253 = vmatprep.mubr.bf16.mxu0 %v7932_v29  ;;  %7282 = vmatpush3.bf16.msra.mxu0 %v7947_v16  ;;  %v1696_v16 = vrot.slane %v1584_v12, 5  ;;  %v6258_v47 = vcombine.low %v1690_v14, %v1693_v19  ;;  %v6244_v28 = vrot.slane %v1586_v24, 9  ;;  %v1703_v29 = vrot.slane %v1587_v25, 5  ;;  %v1597_v59 = vld [vmem:[%s8121_s8 + $0x5c] sm:$0x1]  ;;  %v7952_v44 = vld [vmem:[%s8126_s11 + $0xf0] sm:$0xff]  }
  0xc7   : > { %7283 = vmatprep.subr.bf16.mxu0 %v7948_v33  ;;  %7026 = vmatmul.mubr.bf16.gmra.mrb[28].mxu1 %v6231_v62  ;;  %v1712_v46 = vrot.slane %v1710_v39, 4  ;;  %v1717_v54 = vrot.slane %v1593_v49, 5  ;;  %v1724_v62 = vrot.slane %v1596_v58, 5  ;;  %v6247_v1 = vrot.slane %v1595_v57, 9  ;;  %v1598_v9 = vld [vmem:[%s8121_s8 + $0x60] sm:$0xe] }
  0xc8   : > { %7045 = vmatprep.mubr.bf16.mxu1 %v6256_v63  ;;  %v1698_v20 = vrot.slane %v1696_v16, 4  ;;  %v1697_v37 = vsel %vm8233_vm5, %v6243_v17, %v1696_v16  ;;  %v1704_v41 = vsel %vm8233_vm5, %v6244_v28, %v1703_v29  ;;  %v1711_v63 = vsel %vm8233_vm5, %v6245_v42, %v1710_v39  ;;  %v1599_v10 = vld [vmem:[%s8121_s8 + $0x64] sm:$0xf]  ;;  %v1600_v11 = vld [vmem:[%s8121_s8 + $0x68] sm:$0x1] }
  0xc9   : > { %v1719_v60 = vrot.slane %v1717_v54, 4  ;;  %v1714_v0 = vsel %vm8233_vm5, %v1712_v46, %v1713_v43  ;;  %v1726_v3 = vrot.slane %v1724_v62, 4  ;;  %v1727_v4 = vrot.slane %v1597_v59, 5  ;;  %v6552_v17 = vld [vmem:[%s8121_s8 + $0x18] sm:$0xf] }
  0xca   : > { %7284 = vmatpush3.bf16.msra.mxu0 %v7948_v33  ;;  %v1705_v33 = vrot.slane %v1703_v29, 4  ;;  %v1700_v38 = vsel %vm8233_vm5, %v1698_v20, %v1699_v21  ;;  %v1718_v7 = vsel %vm8233_vm5, %v6246_v51, %v1717_v54  ;;  %v6261_v8 = vcombine.low %v1711_v63, %v1714_v0  ;;  %v6553_v20 = vld [vmem:[%s8121_s8 + $0x1c] sm:$0xf]  ;;  %v6554_v21 = vld [vmem:[%s8121_s8 + $0x20] sm:$0x1]  ;;  %v7950_v29 = vld [vmem:[%s8126_s11 + $0xe8] sm:$0xff]  }
  0xcb   : > { %7317 = vmatprep.subr.bf16.mxu0 %v8535_v56  ;;  %v6259_v45 = vcombine.low %v1697_v37, %v1700_v38  ;;  %v8601_v12 = vsel %vm8233_vm5, %v6247_v1, %v1724_v62  ;;  %v6248_v14 = vrot.slane %v1598_v9, 9  ;;  %v1731_v15 = vrot.slane %v1599_v10, 5  ;;  %v1601_v28 = vld [vmem:[%s8121_s8 + $0x6c] sm:$0xe]  ;;  %v1603_v39 = vld [vmem:[%s8121_s8 + $0x74] sm:$0x1] }
  0xcc   : > { %v1734_v16 = vrot.slane %v1600_v11, 5  ;;  %v8607_v19 = vsel %vm8233_vm5, %v1726_v3, %v1727_v4  ;;  %v4538_v25 = vshll.u32 %v6553_v20, 16  ;;  %v4542_v26 = vshrl.u32 %v6553_v20, 16  ;;  %v6556_v51 = vld [vmem:[%s8121_s8 + $0x28] sm:$0xf]  ;;  %v7954_v11 = vld [vmem:[%s8126_s11 + $0xf8] sm:$0xff]  }
  0xcd   : > { %7254 = vmatmul.mubr.bf16.gmra.mrb[16].mxu0 %v7934_v55  ;;  %v1720_v55 = vrot.slane %v1594_v50, 5  ;;  %v1733_v24 = vrot.slane %v1731_v15, 4  ;;  %v4548_v32 = vshll.u32 %v6554_v21, 16  ;;  %v6249_v35 = vrot.slane %v1601_v28, 9  ;;  %v6555_v50 = vld [vmem:[%s8121_s8 + $0x24] sm:$0xf] }
  0xce   : > { %7257 = vmatprep.mubr.bf16.mxu0 %v7936_v2  ;;  %v7949_v2 = vld [vmem:[%s8126_s11 + $0xe0] sm:$0xff]   ;;  %v4540_v37 = vrot.slane %v4538_v25, 5  ;;  %v4544_v38 = vrot.slane %v4542_v26, 4  ;;  %v1741_v43 = vrot.slane %v1603_v39, 5  ;;  %v4553_v54 = vshrl.u32 %v6555_v50, 16 }
  0xcf   : > { %7046 = vmatmul.mubr.bf16.vlgmr.msra.gmra.mrb[0].mxu1 %v6257_v18  ;;  %v1721_v6 = vsel %vm8233_vm5, %v1719_v60, %v1720_v55  ;;  %v1735_v36 = vsel %vm8233_vm5, %v1733_v24, %v1734_v16  ;;  %v4550_v46 = vrot.slane %v4548_v32, 5  ;;  %v4556_v55 = vshll.u32 %v6555_v50, 16  ;;  %v1604_v62 = vld [vmem:[%s8121_s8 + $0x78] sm:$0xe]  ;;  %v1605_v3 = vld [vmem:[%s8121_s8 + $0x7c] sm:$0xf] }
  0xd0   : > { %7078 = vmatpush3.bf16.msra.mxu1 %v8441_v27  ;;  %7049 = vmatprep.mubr.bf16.mxu1 %v6258_v47  ;;  %v1707_v27 = vsel %vm8233_vm5, %v1705_v33, %v1706_v30  ;;  %v6262_v18 = vcombine.low %v1718_v7, %v1721_v6  ;;  %v8613_v47 = vsel %vm8233_vm5, %v6248_v14, %v1731_v15  ;;  %v1602_v33 = vld [vmem:[%s8121_s8 + $0x70] sm:$0xf]  ;;  %v4562_v57 = vshll.u32 %v6556_v51, 16  ;;  %v1606_v4 = vld [vmem:[%s8121_s8 + $0x80] sm:$0x1]  ;;  %v7953_v50 = vld [vmem:[%s8126_s11 + $0x208] sm:$0xff]  }
  0xd1   : > { %7079 = vmatprep.subr.bf16.mxu1 %v7937_v22  ;;  %v6260_v53 = vcombine.low %v1704_v41, %v1707_v27  ;;  %v6263_v41 = vcombine.low %v8601_v12, %v8607_v19  ;;  %v6264_v27 = vcombine.low %v8613_v47, %v1735_v36  ;;  %v4566_v60 = vshrl.u32 %v6556_v51, 16  ;;  %v6558_v10 = vld [vmem:[%s8121_s8 + $0x30] sm:$0xf]  ;;  %v6559_v16 = vld [vmem:[%s8121_s8 + $0x34] sm:$0xf] }
  0xd2   : > { %v4555_v1 = vrot.slane %v4553_v54, 4  ;;  %v4564_v6 = vrot.slane %v4562_v57, 5  ;;  %v6250_v14 = vrot.slane %v1604_v62, 9  ;;  %v1745_v15 = vrot.slane %v1605_v3, 5  ;;  %v1608_v26 = vld [vmem:[%s8121_s8 + $0x88] sm:$0xf] }
  0xd3   : > { %v1748_v19 = vrot.slane %v1606_v4, 5  ;;  %v4577_v20 = vshrl.u32 %v6558_v10, 16  ;;  %v4580_v21 = vshll.u32 %v6558_v10, 16  ;;  %v4586_v25 = vshll.u32 %v6559_v16, 16  ;;  %v1609_v32 = vld [vmem:[%s8121_s8 + $0x8c] sm:$0x1] }
  0xd4   : > { %7080 = vmatpush3.bf16.msra.mxu1 %v7937_v22  ;;  %v4529_v22 = vshrl.u32 %v6552_v17, 16  ;;  %v1746_v47 = vsel %vm8233_vm5, %v6250_v14, %v1745_v15  ;;  %v1747_v24 = vrot.slane %v1745_v15, 4  ;;  %v1610_v3 = vld [vmem:[%s8121_s8 + $0x90] sm:$0xe] }
  0xd5   : > { %7258 = vmatmul.mubr.bf16.gmra.mrb[20].mxu0 %v7938_v23  ;;  %7081 = vmatprep.subr.bf16.mxu1 %v7941_v40  ;;  %v4532_v23 = vshll.u32 %v6552_v17, 16  ;;  %v6560_v17 = vld [vmem:[%s8121_s8 + $0x38] sm:$0x1]  ;;  %v4588_v36 = vrot.slane %v4586_v25, 5 }
  0xd6   : > { %7261 = vmatprep.mubr.bf16.mxu0 %v7940_v31  ;;  %v4531_v30 = vrot.slane %v4529_v22, 4  ;;  %v1607_v22 = vld [vmem:[%s8121_s8 + $0x84] sm:$0xe] }
  0xd7   : > { %7050 = vmatmul.mubr.bf16.gmra.mrb[4].mxu1 %v6259_v45  ;;  %v4534_v31 = vrot.slane %v4532_v23, 5  ;;  %v4545_v45 = vor.u32 %v4544_v38, %v4540_v37 }
  0xd8   : > { %7053 = vmatprep.mubr.bf16.mxu1 %v6260_v53  ;;  %7082 = vmatpush3.bf16.msra.mxu1 %v7941_v40  ;;  %v1738_v40 = vrot.slane %v1602_v33, 5  ;;  %v6557_v53 = vld [vmem:[%s8121_s8 + $0x2c] sm:$0x1] }
  0xd9   : > { %7083 = vmatprep.subr.bf16.mxu1 %v7945_v52  ;;  %v4535_v42 = vor.u32 %v4534_v31, %v4531_v30  ;;  %v4546_v58 = vrot.slane %v4545_v45, 4  ;;  %v4582_v30 = vrot.slane %v4580_v21, 5  ;;  %v4590_v31 = vshrl.u32 %v6559_v16, 16 }
  0xda   : > { %v1740_v49 = vrot.slane %v1738_v40, 4  ;;  %v6251_v45 = vrot.slane %v1607_v22, 9 }
  0xdb   : > { %v4551_v7 = vsel %vm8159_vm2, %v4546_v58, %v4550_v46  ;;  %v1752_v46 = vrot.slane %v1608_v26, 5 }
  0xdc   : > { %7084 = vmatpush3.bf16.msra.mxu1 %v7945_v52  ;;  %v4536_v52 = vrot.slane %v4535_v42, 4  ;;  %v8634_v59 = vsel %vm8233_vm5, %v1740_v49, %v1741_v43  ;;  %v6562_v42 = vld [vmem:[%s8121_s8 + $0x40] sm:$0xf]  ;;  %v6563_v49 = vld [vmem:[%s8121_s8 + $0x44] sm:$0x1] }
  0xdd   : > { %7262 = vmatmul.mubr.bf16.gmra.mrb[24].mxu0 %v7942_v48  ;;  %7085 = vmatprep.subr.bf16.mxu1 %v7949_v2  ;;  %v8627_v48 = vsel %vm8233_vm5, %v6249_v35, %v1738_v40  ;;  %v1749_v35 = vsel %vm8233_vm5, %v1747_v24, %v1748_v19  ;;  %v1754_v57 = vrot.slane %v1752_v46, 4 }
  0xde   : > { %7265 = vmatprep.mubr.bf16.mxu0 %v7944_v61  ;;  %v4572_v61 = vshll.u32 %v6557_v53, 16  ;;  %v4541_v63 = vsel %vm8159_vm2, %v4536_v52, %v4540_v37  ;;  %v6265_v0 = vcombine.low %v8627_v48, %v8634_v59  ;;  %v4596_v37 = vshll.u32 %v6560_v17, 16  ;;  %v1611_v59 = vld [vmem:[%s8121_s8 + $0x94] sm:$0xf]  ;;  %v6565_v17 = vld [vmem:[%s8121_s8 + $0x4c] sm:$0xf] }
  0xdf   : > { %7054 = vmatmul.mubr.bf16.gmra.mrb[8].mxu1 %v6261_v8  ;;  %v4568_v8 = vrot.slane %v4566_v60, 4  ;;  %v6600_v12 = vcombine.low %v4541_v63, %v4551_v7  ;;  %v6266_v39 = vcombine.low %v1746_v47, %v1749_v35  ;;  %v1755_v53 = vrot.slane %v1609_v32, 5  ;;  %v1615_v35 = vld [vmem:[%s8121_s8 + $0xa4] sm:$0x1] }
  0xe0   : > { %7057 = vmatprep.mubr.bf16.mxu1 %v6262_v18  ;;  %7086 = vmatpush3.bf16.msra.mxu1 %v7949_v2  ;;  %v4558_v2 = vrot.slane %v4556_v55, 5  ;;  %v4574_v9 = vrot.slane %v4572_v61, 5  ;;  %v1753_v55 = vsel %vm8233_vm5, %v6251_v45, %v1752_v46  ;;  %v4610_v60 = vshll.u32 %v6562_v42, 16  ;;  %v8667_v61 = vld [vmem:[%s8126_s11 + $0x100] sm:$0xff]  }
  0xe1   : > { %7087 = vmatprep.subr.bf16.mxu1 %v7950_v29  ;;  %v4569_v18 = vor.u32 %v4568_v8, %v4564_v6  ;;  %v1756_v4 = vsel %vm8233_vm5, %v1754_v57, %v1755_v53  ;;  %v4620_v48 = vshll.u32 %v6563_v49, 16  ;;  %v1759_v16 = vrot.slane %v1611_v59, 5 }
  0xe2   : > { %v4634_v26 = vshll.u32 %v6565_v17, 16 }
  0xe3   : > { %v4570_v28 = vrot.slane %v4569_v18, 4  ;;  %v4622_v15 = vrot.slane %v4620_v48, 5  ;;  %v6566_v18 = vld [vmem:[%s8121_s8 + $0x50] sm:$0x1]  ;;  %v1761_v25 = vrot.slane %v1759_v16, 4 }
  0xe4   : > { %7088 = vmatpush3.bf16.msra.mxu1 %v7950_v29  ;;  %v4579_v29 = vrot.slane %v4577_v20, 4 }
  0xe5   : > { %7266 = vmatmul.mubr.bf16.gmra.mrb[28].mxu0 %v7946_v13  ;;  %7089 = vmatprep.subr.bf16.mxu1 %v7952_v44  ;;  %v4559_v13 = vor.u32 %v4558_v2, %v4555_v1  ;;  %v4575_v38 = vsel %vm8159_vm2, %v4570_v28, %v4574_v9  ;;  %v4614_v2 = vshrl.u32 %v6562_v42, 16  ;;  %v6267_v9 = vcombine.low %v1753_v55, %v1756_v4  ;;  %v1614_v28 = vld [vmem:[%s8121_s8 + $0xa0] sm:$0xf] }
  0xe6   : > { %7285 = vmatprep.mubr.bf16.mxu0 %v6600_v12  ;;  %v4583_v40 = vor.u32 %v4582_v30, %v4579_v29  ;;  %v6564_v12 = vld [vmem:[%s8121_s8 + $0x48] sm:$0xf]  ;;  %v7958_v29 = vld [vmem:[%s8126_s11 + $0x218] sm:$0xff]   ;;  %v1769_v55 = vrot.slane %v1615_v35, 5 }
  0xe7   : > { %7058 = vmatmul.mubr.bf16.gmra.mrb[12].mxu1 %v6263_v41  ;;  %v4560_v23 = vrot.slane %v4559_v13, 4  ;;  %v4592_v41 = vrot.slane %v4590_v31, 4  ;;  %v4616_v10 = vrot.slane %v4614_v2, 4  ;;  %v4625_v21 = vshrl.u32 %v6564_v12, 16 }
  0xe8   : > { %7061 = vmatprep.mubr.bf16.mxu1 %v6264_v27  ;;  %7090 = vmatpush3.bf16.msra.mxu1 %v7952_v44  ;;  %v6561_v27 = vld [vmem:[%s8121_s8 + $0x3c] sm:$0xf]  ;;  %v4598_v44 = vrot.slane %v4596_v37, 5  ;;  %v4584_v51 = vrot.slane %v4583_v40, 4  ;;  %v4628_v22 = vshll.u32 %v6564_v12, 16 }
  0xe9   : > { %v4565_v33 = vsel %vm8159_vm2, %v4560_v23, %v4564_v6  ;;  %7091 = vmatprep.subr.bf16.mxu1 %v7954_v11  ;;  %v4593_v52 = vor.u32 %v4592_v41, %v4588_v36  ;;  %v4601_v54 = vshrl.u32 %v6561_v27, 16  ;;  %v4604_v58 = vshll.u32 %v6561_v27, 16  ;;  %v1613_v23 = vld [vmem:[%s8121_s8 + $0x9c] sm:$0xe]  ;;  %v1618_v12 = vld [vmem:[%s8121_s8 + $0xb0] sm:$0x1] }
  0xea   : > { %v6601_v43 = vcombine.low %v4565_v33, %v4575_v38  ;;  %v4589_v62 = vsel %vm8159_vm2, %v4584_v51, %v4588_v36  ;;  %v4612_v6 = vrot.slane %v4610_v60, 5  ;;  %v4627_v31 = vrot.slane %v4625_v21, 4  ;;  %v6569_v51 = vld [vmem:[%s8121_s8 + $0x5c] sm:$0x1] }
  0xeb   : > { %v4594_v63 = vrot.slane %v4593_v52, 4  ;;  %v4603_v1 = vrot.slane %v4601_v54, 4  ;;  %v4606_v7 = vrot.slane %v4604_v58, 5  ;;  %v4630_v32 = vrot.slane %v4628_v22, 5  ;;  %v7961_v52 = vld [vmem:[%s8126_s11 + $0x220] sm:$0xff]  }
  0xec   : > { %7092 = vmatpush3.bf16.msra.mxu1 %v7954_v11  ;;  %v6252_v11 = vrot.slane %v1610_v3, 9  ;;  %v4617_v19 = vor.u32 %v4616_v10, %v4612_v6  ;;  %v4638_v33 = vshrl.u32 %v6565_v17, 16  ;;  %v4636_v38 = vrot.slane %v4634_v26, 5 }
  0xed   : > { %7286 = vmatmul.mubr.bf16.vlgmr.msra.gmra.mrb[0].mxu0 %v6601_v43  ;;  %7365 = vmatprep.subr.bf16.mxu1 %v8667_v61  ;;  %v4599_v8 = vsel %vm8159_vm2, %v4594_v63, %v4598_v44  ;;  %v4607_v14 = vor.u32 %v4606_v7, %v4603_v1  ;;  %v4631_v27 = vor.u32 %v4630_v32, %v4627_v31  ;;  %v6567_v43 = vld [vmem:[%s8121_s8 + $0x54] sm:$0xf]  ;;  %v6568_v44 = vld [vmem:[%s8121_s8 + $0x58] sm:$0xf]  ;;  %v6253_v49 = vrot.slane %v1613_v23, 9 }
  0xee   : > { %7318 = vmatpush3.bf16.msra.mxu0 %v8535_v56  ;;  %v1612_v56 = vld [vmem:[%s8121_s8 + $0x98] sm:$0x1]  ;;  %v6602_v13 = vcombine.low %v4589_v62, %v4599_v8  ;;  %v1760_v24 = vsel %vm8233_vm5, %v6252_v11, %v1759_v16  ;;  %v4618_v30 = vrot.slane %v4617_v19, 4  ;;  %v4640_v42 = vrot.slane %v4638_v33, 4  ;;  %v1616_v7 = vld [vmem:[%s8121_s8 + $0xa8] sm:$0xe] }
  0xef   : > { %7062 = vmatmul.mubr.bf16.gmra.mrb[16].mxu1 %v6265_v0  ;;  %7319 = vmatprep.subr.bf16.mxu0 %v7953_v50  ;;  %v7955_v0 = vld [vmem:[%s8126_s11 + $0x210] sm:$0xff]   ;;  %v1762_v20 = vrot.slane %v1612_v56, 5  ;;  %v4608_v47 = vrot.slane %v4607_v14, 4  ;;  %v4632_v53 = vrot.slane %v4631_v27, 4  ;;  %v4649_v57 = vshrl.u32 %v6567_v43, 16 }
  0xf0   : > { %7065 = vmatprep.mubr.bf16.mxu1 %v6266_v39  ;;  %7289 = vmatprep.mubr.bf16.mxu0 %v6602_v13  ;;  %v4644_v39 = vshll.u32 %v6566_v18, 16  ;;  %v4623_v40 = vsel %vm8159_vm2, %v4618_v30, %v4622_v15  ;;  %v4641_v54 = vor.u32 %v4640_v42, %v4636_v38  ;;  %v4652_v62 = vshll.u32 %v6567_v43, 16  ;;  %v1617_v8 = vld [vmem:[%s8121_s8 + $0xac] sm:$0xf]  ;;  %v6570_v14 = vld [vmem:[%s8121_s8 + $0x60] sm:$0xf] }
  0xf1   : > { %v4613_v36 = vsel %vm8159_vm2, %v4608_v47, %v4612_v6  ;;  %v1763_v37 = vsel %vm8233_vm5, %v1761_v25, %v1762_v20  ;;  %v4658_v63 = vshll.u32 %v6568_v44, 16  ;;  %v4637_v1 = vsel %vm8159_vm2, %v4632_v53, %v4636_v38  ;;  %v6571_v19 = vld [vmem:[%s8121_s8 + $0x64] sm:$0xf]  ;;  %v6572_v20 = vld [vmem:[%s8121_s8 + $0x68] sm:$0x1]  ;;  %v7967_v31 = vld [vmem:[%s8126_s11 + $0x230] sm:$0xff]  }
  0xf2   : > { %7320 = vmatpush3.bf16.msra.mxu0 %v7953_v50  ;;  %v6268_v41 = vcombine.low %v1760_v24, %v1763_v37  ;;  %v6603_v45 = vcombine.low %v4613_v36, %v4623_v40  ;;  %v4646_v46 = vrot.slane %v4644_v39, 5  ;;  %v1766_v50 = vrot.slane %v1614_v28, 5  ;;  %v1619_v24 = vld [vmem:[%s8121_s8 + $0xb4] sm:$0xe]  ;;  %v1620_v30 = vld [vmem:[%s8121_s8 + $0xb8] sm:$0xf] }
  0xf3   : > { %7321 = vmatprep.subr.bf16.mxu0 %v7955_v0  ;;  %v4642_v2 = vrot.slane %v4641_v54, 4  ;;  %v4651_v3 = vrot.slane %v4649_v57, 4  ;;  %v4662_v4 = vshrl.u32 %v6568_v44, 16  ;;  %v4654_v48 = vrot.slane %v4652_v62, 5  ;;  %v1621_v37 = vld [vmem:[%s8121_s8 + $0xbc] sm:$0x1] }
  0xf4   : > { %v1767_v58 = vsel %vm8233_vm5, %v6253_v49, %v1766_v50  ;;  %v1768_v60 = vrot.slane %v1766_v50, 4  ;;  %v4660_v59 = vrot.slane %v4658_v63, 5  ;;  %v6254_v13 = vrot.slane %v1616_v7, 9  ;;  %v6575_v53 = vld [vmem:[%s8121_s8 + $0x74] sm:$0x1]  ;;  %v7968_v54 = vld [vmem:[%s8126_s11 + $0x238] sm:$0xff]  }
  0xf5   : > { %7290 = vmatmul.mubr.bf16.gmra.mrb[4].mxu0 %v6603_v45  ;;  %v4647_v10 = vsel %vm8159_vm2, %v4642_v2, %v4646_v46  ;;  %v4664_v11 = vrot.slane %v4662_v4, 4  ;;  %v4655_v16 = vor.u32 %v4654_v48, %v4651_v3  ;;  %v1773_v18 = vrot.slane %v1617_v8, 5  ;;  %v6573_v45 = vld [vmem:[%s8121_s8 + $0x6c] sm:$0xf]  ;;  %v6574_v46 = vld [vmem:[%s8121_s8 + $0x70] sm:$0xf] }
  0xf6   : > { %7322 = vmatpush3.bf16.msra.mxu0 %v7955_v0  ;;  %v1770_v6 = vsel %vm8233_vm5, %v1768_v60, %v1769_v55  ;;  %v4668_v0 = vshll.u32 %v6569_v51, 16  ;;  %v6604_v15 = vcombine.low %v4637_v1, %v4647_v10  ;;  %v1776_v22 = vrot.slane %v1618_v12, 5  ;;  %v6576_v12 = vld [vmem:[%s8121_s8 + $0x78] sm:$0xf] }
  0xf7   : > { %7066 = vmatmul.mubr.bf16.gmra.mrb[20].mxu1 %v6267_v9  ;;  %7323 = vmatprep.subr.bf16.mxu0 %v7958_v29  ;;  %v7964_v9 = vld [vmem:[%s8126_s11 + $0x228] sm:$0xff]   ;;  %v6269_v56 = vcombine.low %v1767_v58, %v1770_v6  ;;  %v4665_v21 = vor.u32 %v4664_v11, %v4660_v59  ;;  %v4673_v23 = vshrl.u32 %v6570_v14, 16  ;;  %v4676_v47 = vshll.u32 %v6570_v14, 16 }
  0xf8   : > { %7069 = vmatprep.mubr.bf16.mxu1 %v6268_v41  ;;  %v4670_v17 = vrot.slane %v4668_v0, 5  ;;  %7293 = vmatprep.mubr.bf16.mxu0 %v6604_v15  ;;  %v4656_v25 = vrot.slane %v4655_v16, 4  ;;  %v1774_v26 = vsel %vm8233_vm5, %v6254_v13, %v1773_v18  ;;  %v1775_v28 = vrot.slane %v1773_v18, 4  ;;  %v6577_v13 = vld [vmem:[%s8121_s8 + $0x7c] sm:$0xf] }
  0xf9   : > { %v4666_v32 = vrot.slane %v4665_v21, 4  ;;  %v4675_v33 = vrot.slane %v4673_v23, 4  ;;  %v4678_v35 = vrot.slane %v4676_v47, 5  ;;  %v4686_v36 = vshrl.u32 %v6571_v19, 16 }
  0xfa   : > { %7324 = vmatpush3.bf16.msra.mxu0 %v7958_v29  ;;  %v4682_v29 = vshll.u32 %v6571_v19, 16  ;;  %v4661_v38 = vsel %vm8159_vm2, %v4656_v25, %v4660_v59  ;;  %v1777_v39 = vsel %vm8233_vm5, %v1775_v28, %v1776_v22  ;;  %v4692_v41 = vshll.u32 %v6572_v20, 16  ;;  %v6579_v25 = vld [vmem:[%s8121_s8 + $0x84] sm:$0xf] }
  0xfb   : > { %7325 = vmatprep.subr.bf16.mxu0 %v7961_v52  ;;  %v4671_v27 = vsel %vm8159_vm2, %v4666_v32, %v4670_v17  ;;  %v6270_v42 = vcombine.low %v1774_v26, %v1777_v39  ;;  %v4679_v43 = vor.u32 %v4678_v35, %v4675_v33  ;;  %v4688_v44 = vrot.slane %v4686_v36, 4  ;;  %v6578_v17 = vld [vmem:[%s8121_s8 + $0x80] sm:$0x1]  ;;  %v6581_v35 = vld [vmem:[%s8121_s8 + $0x8c] sm:$0x1] }
  0xfc   : > { %v4684_v40 = vrot.slane %v4682_v29, 5  ;;  %v6605_v49 = vcombine.low %v4661_v38, %v4671_v27  ;;  %v4694_v50 = vrot.slane %v4692_v41, 5  ;;  %v6255_v51 = vrot.slane %v1619_v24, 9  ;;  %v7957_v41 = vld [vmem:[%s8121_s8 + $0x18] sm:$0xff]  }
  0xfd   : > { %v4680_v55 = vrot.slane %v4679_v43, 4  ;;  %v1783_v58 = vrot.slane %v1621_v37, 5  ;;  %v4697_v60 = vshrl.u32 %v6573_v45, 16  ;;  %v4700_v1 = vshll.u32 %v6573_v45, 16 }
  0xfe   : > { %7326 = vmatpush3.bf16.msra.mxu0 %v7961_v52  ;;  %v1780_v52 = vrot.slane %v1620_v30, 5  ;;  %v4689_v57 = vor.u32 %v4688_v44, %v4684_v40  ;;  %v4706_v2 = vshll.u32 %v6574_v46, 16  ;;  %v4710_v6 = vshrl.u32 %v6574_v46, 16  ;;  %v7959_v46 = vld [vmem:[%s8121_s8 + $0x24] sm:$0xff]  }
  0xff   : > { %7070 = vmatmul.mubr.bf16.gmra.mrb[24].mxu1 %v6269_v56  ;;  %7327 = vmatprep.subr.bf16.mxu0 %v7964_v9  ;;  %v4685_v3 = vsel %vm8159_vm2, %v4680_v55, %v4684_v40  ;;  %v4699_v7 = vrot.slane %v4697_v60, 4  ;;  %v4702_v59 = vrot.slane %v4700_v1, 5  ;;  %v4716_v8 = vshll.u32 %v6575_v53, 16  ;;  %v6582_v55 = vld [vmem:[%s8121_s8 + $0x90] sm:$0xf] }
 0x100   : > { %7073 = vmatprep.mubr.bf16.mxu1 %v6270_v42  ;;  %7294 = vmatmul.mubr.bf16.gmra.mrb[8].mxu0 %v6605_v49  ;;  %v1781_v62 = vsel %vm8233_vm5, %v6255_v51, %v1780_v52  ;;  %v1782_v63 = vrot.slane %v1780_v52, 4  ;;  %v4690_v4 = vrot.slane %v4689_v57, 4  ;;  %v4708_v0 = vrot.slane %v4706_v2, 5  ;;  %v6583_v57 = vld [vmem:[%s8121_s8 + $0x94] sm:$0xf] }
 0x101   : > { %v4712_v11 = vrot.slane %v4710_v6, 4  ;;  %v4703_v15 = vor.u32 %v4702_v59, %v4699_v7  ;;  %v4718_v16 = vrot.slane %v4716_v8, 5  ;;  %v4721_v18 = vshrl.u32 %v6576_v12, 16  ;;  %v6585_v6 = vld [vmem:[%s8121_s8 + $0x9c] sm:$0xf] }
 0x102   : > { %7328 = vmatpush3.bf16.msra.mxu0 %v7964_v9  ;;  %v1784_v48 = vsel %vm8233_vm5, %v1782_v63, %v1783_v58  ;;  %v7956_v9 = vld [vmem:[%s8121_s8 + $0xc] sm:$0xff]   ;;  %v4695_v10 = vsel %vm8159_vm2, %v4690_v4, %v4694_v50  ;;  %v4724_v20 = vshll.u32 %v6576_v12, 16  ;;  %v4730_v21 = vshll.u32 %v6577_v13, 16  ;;  %v6584_v63 = vld [vmem:[%s8121_s8 + $0x98] sm:$0x1] }
 0x103   : > { %7329 = vmatprep.subr.bf16.mxu0 %v7967_v31  ;;  %v6271_v56 = vcombine.low %v1781_v62, %v1784_v48  ;;  %v6606_v14 = vcombine.low %v4685_v3, %v4695_v10  ;;  %v4713_v19 = vor.u32 %v4712_v11, %v4708_v0  ;;  %v4734_v22 = vshrl.u32 %v6577_v13, 16  ;;  %v7978_v10 = vld [vmem:[%s8126_s11 + $0x108] sm:$0xff]  }
 0x104   : > { %v4704_v23 = vrot.slane %v4703_v15, 4  ;;  %v4723_v47 = vrot.slane %v4721_v18, 4  ;;  %v4740_v24 = vshll.u32 %v6578_v17, 16  ;;  %v4726_v28 = vrot.slane %v4724_v20, 5  ;;  %v7962_v15 = vld [vmem:[%s8121_s8 + $0x3c] sm:$0xff]  }
 0x105   : > { %7297 = vmatprep.mubr.bf16.mxu0 %v6606_v14  ;;  %v4714_v26 = vrot.slane %v4713_v19, 4  ;;  %v4732_v29 = vrot.slane %v4730_v21, 5  ;;  %v4736_v30 = vrot.slane %v4734_v22, 4  ;;  %v4745_v36 = vshrl.u32 %v6579_v25, 16 }
 0x106   : > { %7330 = vmatpush3.bf16.msra.mxu0 %v7967_v31  ;;  %v6580_v31 = vld [vmem:[%s8121_s8 + $0x88] sm:$0xf]  ;;  %v4709_v32 = vsel %vm8159_vm2, %v4704_v23, %v4708_v0  ;;  %v4742_v33 = vrot.slane %v4740_v24, 5  ;;  %v4748_v37 = vshll.u32 %v6579_v25, 16  ;;  %v4727_v39 = vor.u32 %v4726_v28, %v4723_v47 }
 0x107   : > { %7331 = vmatprep.subr.bf16.mxu0 %v7968_v54  ;;  %7074 = vmatmul.mubr.bf16.gmra.mrb[28].mxu1 %v6271_v56  ;;  %v4719_v38 = vsel %vm8159_vm2, %v4714_v26, %v4718_v16  ;;  %v4737_v40 = vor.u32 %v4736_v30, %v4732_v29  ;;  %v4754_v27 = vshll.u32 %v6580_v31, 16  ;;  %v4747_v43 = vrot.slane %v4745_v36, 4  ;;  %v6586_v56 = vld [vmem:[%s8121_s8 + $0xa0] sm:$0xf]  ;;  %v6588_v28 = vld [vmem:[%s8121_s8 + $0xa8] sm:$0xf] }
 0x108   : > { %7093 = vmatprep.mubr.bf16.mxu1 %v7956_v9  ;;  %v6607_v42 = vcombine.low %v4709_v32, %v4719_v38  ;;  %v4750_v44 = vrot.slane %v4748_v37, 5  ;;  %v4758_v45 = vshrl.u32 %v6580_v31, 16  ;;  %v4728_v49 = vrot.slane %v4727_v39, 4  ;;  %v7960_v9 = vld [vmem:[%s8121_s8 + $0x30] sm:$0xff]  }
 0x109   : > { %v4738_v50 = vrot.slane %v4737_v40, 4  ;;  %v4756_v51 = vrot.slane %v4754_v27, 5  ;;  %v4764_v52 = vshll.u32 %v6581_v35, 16  ;;  %v4769_v1 = vshrl.u32 %v6582_v55, 16  ;;  %v6590_v39 = vld [vmem:[%s8121_s8 + $0xb0] sm:$0x1] }
 0x10a   : > { %7332 = vmatpush3.bf16.msra.mxu0 %v7968_v54  ;;  %v4751_v53 = vor.u32 %v4750_v44, %v4747_v43  ;;  %v4760_v54 = vrot.slane %v4758_v45, 4  ;;  %v4733_v58 = vsel %vm8159_vm2, %v4728_v49, %v4732_v29  ;;  %v4772_v7 = vshll.u32 %v6582_v55, 16  ;;  %v7979_v29 = vld [vmem:[%s8126_s11 + $0x110] sm:$0xff]  }
 0x10b   : > { %7298 = vmatmul.mubr.bf16.gmra.mrb[12].mxu0 %v6607_v42  ;;  %v4743_v60 = vsel %vm8159_vm2, %v4738_v50, %v4742_v33  ;;  %v4766_v62 = vrot.slane %v4764_v52, 5  ;;  %v4771_v48 = vrot.slane %v4769_v1, 4  ;;  %v4778_v59 = vshll.u32 %v6583_v57, 16  ;;  %v6589_v33 = vld [vmem:[%s8121_s8 + $0xac] sm:$0xf]  ;;  %v7980_v52 = vld [vmem:[%s8126_s11 + $0x118] sm:$0xff]  }
 0x10c   : > { %v6608_v2 = vcombine.low %v4733_v58, %v4743_v60  ;;  %v4752_v3 = vrot.slane %v4751_v53, 4  ;;  %v4761_v4 = vor.u32 %v4760_v54, %v4756_v51  ;;  %v4782_v0 = vshrl.u32 %v6583_v57, 16  ;;  %v7963_v50 = vld [vmem:[%s8121_s8 + $0x48] sm:$0xff]   ;;  %v6592_v58 = vld [vmem:[%s8121_s8 + $0xb8] sm:$0xf] }
 0x10d   : > { %v4788_v8 = vshll.u32 %v6584_v63, 16  ;;  %v4774_v13 = vrot.slane %v4772_v7, 5  ;;  %v4793_v14 = vshrl.u32 %v6585_v6, 16  ;;  %v4780_v16 = vrot.slane %v4778_v59, 5  ;;  %v7965_v60 = vld [vmem:[%s8121_s8 + $0x54] sm:$0xff]  }
 0x10e   : > { %7301 = vmatprep.mubr.bf16.mxu0 %v6608_v2  ;;  %v4757_v11 = vsel %vm8159_vm2, %v4752_v3, %v4756_v51  ;;  %v4762_v12 = vrot.slane %v4761_v4, 4  ;;  %v4784_v17 = vrot.slane %v4782_v0, 4  ;;  %v4796_v19 = vshll.u32 %v6585_v6, 16  ;;  %v6591_v51 = vld [vmem:[%s8121_s8 + $0xb4] sm:$0xf] }
 0x10f   : > { %7094 = vmatmul.mubr.bf16.vlgmr.msra.gmra.mrb[0].mxu1 %v7957_v41  ;;  %v4790_v18 = vrot.slane %v4788_v8, 5  ;;  %v4775_v21 = vor.u32 %v4774_v13, %v4771_v48  ;;  %v4795_v22 = vrot.slane %v4793_v14, 4  ;;  %v4802_v23 = vshll.u32 %v6586_v56, 16  ;;  %v6593_v2 = vld [vmem:[%s8121_s8 + $0xbc] sm:$0x1] }
 0x110   : > { %7373 = vmatpush3.bf16.msra.mxu1 %v8667_v61  ;;  %7097 = vmatprep.mubr.bf16.mxu1 %v7959_v46  ;;  %v6587_v61 = vld [vmem:[%s8121_s8 + $0xa4] sm:$0x1]  ;;  %v4767_v20 = vsel %vm8159_vm2, %v4762_v12, %v4766_v62  ;;  %v4785_v24 = vor.u32 %v4784_v17, %v4780_v16  ;;  %v4798_v25 = vrot.slane %v4796_v19, 5  ;;  %v4806_v26 = vshrl.u32 %v6586_v56, 16 }
 0x111   : > { %7366 = vmatprep.subr.bf16.mxu1 %v7978_v10  ;;  %v6609_v47 = vcombine.low %v4757_v11, %v4767_v20  ;;  %v4776_v30 = vrot.slane %v4775_v21, 4  ;;  %v4804_v31 = vrot.slane %v4802_v23, 5  ;;  %v4812_v32 = vshll.u32 %v6587_v61, 16  ;;  %v6594_v61 = vld [vmem:[%s8121_s8 + $0xc0] sm:$0xf] }
 0x112   : > { %v4817_v35 = vshrl.u32 %v6588_v28, 16  ;;  %v4786_v36 = vrot.slane %v4785_v24, 4  ;;  %v4799_v37 = vor.u32 %v4798_v25, %v4795_v22  ;;  %v4808_v38 = vrot.slane %v4806_v26, 4  ;;  %v6595_v17 = vld [vmem:[%s8121_s8 + $0xc4] sm:$0xf] }
 0x113   : > { %7302 = vmatmul.mubr.bf16.gmra.mrb[16].mxu0 %v6609_v47  ;;  %v4820_v40 = vshll.u32 %v6588_v28, 16  ;;  %v4781_v41 = vsel %vm8159_vm2, %v4776_v30, %v4780_v16  ;;  %v4814_v27 = vrot.slane %v4812_v32, 5  ;;  %v4826_v43 = vshll.u32 %v6589_v33, 16  ;;  %v6597_v32 = vld [vmem:[%s8121_s8 + $0xcc] sm:$0xf] }
 0x114   : > { %7374 = vmatpush3.bf16.msra.mxu1 %v7978_v10  ;;  %v4819_v42 = vrot.slane %v4817_v35, 4  ;;  %v4791_v44 = vsel %vm8159_vm2, %v4786_v36, %v4790_v18  ;;  %v4800_v45 = vrot.slane %v4799_v37, 4  ;;  %v4809_v46 = vor.u32 %v4808_v38, %v4804_v31  ;;  %v7981_v10 = vld [vmem:[%s8126_s11 + $0x120] sm:$0xff]   ;;  %v6596_v18 = vld [vmem:[%s8121_s8 + $0xc8] sm:$0x1] }
 0x115   : > { %7367 = vmatprep.subr.bf16.mxu1 %v7979_v29  ;;  %v4822_v49 = vrot.slane %v4820_v40, 5  ;;  %v6610_v53 = vcombine.low %v4781_v41, %v4791_v44  ;;  %v4828_v54 = vrot.slane %v4826_v43, 5  ;;  %v4830_v55 = vshrl.u32 %v6589_v33, 16  ;;  %v7982_v33 = vld [vmem:[%s8126_s11 + $0x128] sm:$0xff]   ;;  %v6599_v43 = vld [vmem:[%s8121_s8 + $0xd4] sm:$0x1] }
 0x116   : > { %v4836_v57 = vshll.u32 %v6590_v39, 16  ;;  %v4805_v62 = vsel %vm8159_vm2, %v4800_v45, %v4804_v31  ;;  %v4810_v63 = vrot.slane %v4809_v46, 4  ;;  %v4841_v3 = vshrl.u32 %v6591_v51, 16  ;;  %v7966_v31 = vld [vmem:[%s8121_s8 + $0x60] sm:$0xff]   ;;  %v6598_v39 = vld [vmem:[%s8121_s8 + $0xd0] sm:$0xf] }
 0x117   : > { %7098 = vmatmul.mubr.bf16.gmra.mrb[4].mxu1 %v7960_v9  ;;  %v4823_v1 = vor.u32 %v4822_v49, %v4819_v42  ;;  %7305 = vmatprep.mubr.bf16.mxu0 %v6610_v53  ;;  %v4832_v4 = vrot.slane %v4830_v55, 4  ;;  %v4844_v6 = vshll.u32 %v6591_v51, 16  ;;  %v4850_v48 = vshll.u32 %v6592_v58, 16  ;;  %v7969_v40 = vld [vmem:[%s8121_s8 + $0x6c] sm:$0xff]  }
 0x118   : > { %7101 = vmatprep.mubr.bf16.mxu1 %v7962_v15  ;;  %7375 = vmatpush3.bf16.msra.mxu1 %v7979_v29  ;;  %v4838_v7 = vrot.slane %v4836_v57, 5  ;;  %v4815_v59 = vsel %vm8159_vm2, %v4810_v63, %v4814_v27  ;;  %v4843_v8 = vrot.slane %v4841_v3, 4  ;;  %v4854_v9 = vshrl.u32 %v6592_v58, 16  ;;  %v7983_v55 = vld [vmem:[%s8126_s11 + $0x130] sm:$0xff]  }
 0x119   : > { %7368 = vmatprep.subr.bf16.mxu1 %v7980_v52  ;;  %v4824_v0 = vrot.slane %v4823_v1, 4  ;;  %v6611_v56 = vcombine.low %v4805_v62, %v4815_v59  ;;  %v4833_v11 = vor.u32 %v4832_v4, %v4828_v54  ;;  %v4846_v12 = vrot.slane %v4844_v6, 5  ;;  %v6625_v6 = vld [vmem:[%s8121_s8 + $0x1c] sm:$0xf] }
 0x11a   : > { %v4852_v13 = vrot.slane %v4850_v48, 5  ;;  %v4856_v15 = vrot.slane %v4854_v9, 4  ;;  %v4860_v16 = vshll.u32 %v6593_v2, 16  ;;  %v4865_v21 = vshrl.u32 %v6594_v61, 16  ;;  %v6624_v2 = vld [vmem:[%s8121_s8 + $0x18] sm:$0xe] }
 0x11b   : > { %v4829_v14 = vsel %vm8159_vm2, %v4824_v0, %v4828_v54  ;;  %7306 = vmatmul.mubr.bf16.gmra.mrb[20].mxu0 %v6611_v56  ;;  %v4834_v19 = vrot.slane %v4833_v11, 4  ;;  %v4847_v20 = vor.u32 %v4846_v12, %v4843_v8  ;;  %v4868_v22 = vshll.u32 %v6594_v61, 16  ;;  %v6626_v48 = vld [vmem:[%s8121_s8 + $0x20] sm:$0x1]  ;;  %v7984_v56 = vld [vmem:[%s8126_s11 + $0x138] sm:$0xff]  }
 0x11c   : > { %7376 = vmatpush3.bf16.msra.mxu1 %v7980_v52  ;;  %v4857_v23 = vor.u32 %v4856_v15, %v4852_v13  ;;  %v4862_v47 = vrot.slane %v4860_v16, 5  ;;  %v4874_v24 = vshll.u32 %v6595_v17, 16  ;;  %v4878_v25 = vshrl.u32 %v6595_v17, 16  ;;  %v6627_v61 = vld [vmem:[%s8121_s8 + $0x24] sm:$0xe] }
 0x11d   : > { %7369 = vmatprep.subr.bf16.mxu1 %v7981_v10  ;;  %v4839_v26 = vsel %vm8159_vm2, %v4834_v19, %v4838_v7  ;;  %v4848_v28 = vrot.slane %v4847_v20, 4  ;;  %v4867_v29 = vrot.slane %v4865_v21, 4  ;;  %v4870_v30 = vrot.slane %v4868_v22, 5  ;;  %v6628_v16 = vld [vmem:[%s8121_s8 + $0x28] sm:$0xf] }
 0x11e   : > { %v6612_v35 = vcombine.low %v4829_v14, %v4839_v26  ;;  %v4858_v36 = vrot.slane %v4857_v23, 4  ;;  %v4876_v37 = vrot.slane %v4874_v24, 5  ;;  %v4880_v38 = vrot.slane %v4878_v25, 4  ;;  %v6629_v17 = vld [vmem:[%s8121_s8 + $0x2c] sm:$0x1] }
 0x11f   : > { %7102 = vmatmul.mubr.bf16.gmra.mrb[8].mxu1 %v7963_v50  ;;  %v4853_v41 = vsel %vm8159_vm2, %v4848_v28, %v4852_v13  ;;  %v4871_v27 = vor.u32 %v4870_v30, %v4867_v29  ;;  %v4884_v42 = vshll.u32 %v6596_v18, 16  ;;  %v4889_v44 = vshrl.u32 %v6597_v32, 16  ;;  %v7971_v18 = vld [vmem:[%s8121_s8 + $0x84] sm:$0xff]   ;;  %v6631_v24 = vld [vmem:[%s8121_s8 + $0x34] sm:$0xf] }
 0x120   : > { %7105 = vmatprep.mubr.bf16.mxu1 %v7965_v60  ;;  %7377 = vmatpush3.bf16.msra.mxu1 %v7981_v10  ;;  %v4863_v45 = vsel %vm8159_vm2, %v4858_v36, %v4862_v47  ;;  %v4881_v46 = vor.u32 %v4880_v38, %v4876_v37  ;;  %v4892_v49 = vshll.u32 %v6597_v32, 16  ;;  %v4898_v50 = vshll.u32 %v6598_v39, 16  ;;  %v7970_v10 = vld [vmem:[%s8121_s8 + $0x78] sm:$0xff]   ;;  %v6630_v47 = vld [vmem:[%s8121_s8 + $0x30] sm:$0xe] }
 0x121   : > { %7370 = vmatprep.subr.bf16.mxu1 %v7982_v33  ;;  %7309 = vmatprep.mubr.bf16.mxu0 %v6612_v35  ;;  %v6613_v51 = vcombine.low %v4853_v41, %v4863_v45  ;;  %v4872_v52 = vrot.slane %v4871_v27, 4  ;;  %v4886_v53 = vrot.slane %v4884_v42, 5  ;;  %v4891_v54 = vrot.slane %v4889_v44, 4  ;;  %v6632_v30 = vld [vmem:[%s8121_s8 + $0x38] sm:$0x1]  ;;  %v7972_v36 = vld [vmem:[%s8121_s8 + $0x90] sm:$0xff]  }
 0x122   : > { %v4882_v57 = vrot.slane %v4881_v46, 4  ;;  %v4894_v58 = vrot.slane %v4892_v49, 5  ;;  %v4900_v60 = vrot.slane %v4898_v50, 5  ;;  %v4902_v62 = vshrl.u32 %v6598_v39, 16  ;;  %v6634_v38 = vld [vmem:[%s8121_s8 + $0x40] sm:$0xf] }
 0x123   : > { %7310 = vmatmul.mubr.bf16.gmra.mrb[24].mxu0 %v6613_v51  ;;  %v4877_v63 = vsel %vm8159_vm2, %v4872_v52, %v4876_v37  ;;  %v4908_v1 = vshll.u32 %v6599_v43, 16  ;;  %v6672_v59 = vrot.slane %v6624_v2, 9  ;;  %v5395_v8 = vrot.slane %v6625_v6, 5  ;;  %v6633_v37 = vld [vmem:[%s8121_s8 + $0x3c] sm:$0xe] }
 0x124   : > { %7378 = vmatpush3.bf16.msra.mxu1 %v7982_v33  ;;  %v4887_v3 = vsel %vm8159_vm2, %v4882_v57, %v4886_v53  ;;  %v4895_v4 = vor.u32 %v4894_v58, %v4891_v54  ;;  %v4904_v7 = vrot.slane %v4902_v62, 4  ;;  %v5398_v9 = vrot.slane %v6626_v48, 5  ;;  %v6635_v39 = vld [vmem:[%s8121_s8 + $0x44] sm:$0x1]  ;;  %v7973_v42 = vld [vmem:[%s8121_s8 + $0x9c] sm:$0xff]  }
 0x125   : > { %7371 = vmatprep.subr.bf16.mxu1 %v7983_v55  ;;  %v6614_v0 = vcombine.low %v4877_v63, %v4887_v3  ;;  %v4910_v13 = vrot.slane %v4908_v1, 5  ;;  %v5396_v14 = vsel %vm8233_vm5, %v6672_v59, %v5395_v8  ;;  %v5397_v15 = vrot.slane %v5395_v8, 4  ;;  %v6636_v49 = vld [vmem:[%s8121_s8 + $0x48] sm:$0xe]  ;;  %v6637_v50 = vld [vmem:[%s8121_s8 + $0x4c] sm:$0xf] }
 0x126   : > { %v4896_v11 = vrot.slane %v4895_v4, 4  ;;  %v4905_v12 = vor.u32 %v4904_v7, %v4900_v60  ;;  %v6673_v21 = vrot.slane %v6627_v61, 9  ;;  %v5402_v22 = vrot.slane %v6628_v16, 5  ;;  %v6638_v52 = vld [vmem:[%s8121_s8 + $0x50] sm:$0x1] }
 0x127   : > { %7106 = vmatmul.mubr.bf16.gmra.mrb[12].mxu1 %v7966_v31  ;;  %7313 = vmatprep.mubr.bf16.mxu0 %v6614_v0  ;;  %v5399_v23 = vsel %vm8233_vm5, %v5397_v15, %v5398_v9  ;;  %v5405_v29 = vrot.slane %v6629_v17, 5  ;;  %v6674_v32 = vrot.slane %v6630_v47, 9  ;;  %v5409_v33 = vrot.slane %v6631_v24, 5  ;;  %v6639_v58 = vld [vmem:[%s8121_s8 + $0x54] sm:$0xe] }
 0x128   : > { %7109 = vmatprep.mubr.bf16.mxu1 %v7969_v40  ;;  %7379 = vmatpush3.bf16.msra.mxu1 %v7983_v55  ;;  %v4901_v19 = vsel %vm8159_vm2, %v4896_v11, %v4900_v60  ;;  %v4906_v20 = vrot.slane %v4905_v12, 4  ;;  %v6688_v26 = vcombine.low %v5396_v14, %v5399_v23  ;;  %v5404_v28 = vrot.slane %v5402_v22, 4  ;;  %v6640_v1 = vld [vmem:[%s8121_s8 + $0x58] sm:$0xf]  ;;  %v6641_v2 = vld [vmem:[%s8121_s8 + $0x5c] sm:$0x1] }
 0x129   : > { %7372 = vmatprep.subr.bf16.mxu1 %v7984_v56  ;;  %v5412_v35 = vrot.slane %v6632_v30, 5  ;;  %v5403_v40 = vsel %vm8233_vm5, %v6673_v21, %v5402_v22  ;;  %v5411_v41 = vrot.slane %v5409_v33, 4  ;;  %v6675_v27 = vrot.slane %v6633_v37, 9  ;;  %v6642_v8 = vld [vmem:[%s8121_s8 + $0x60] sm:$0xe]  ;;  %v7975_v14 = vld [vmem:[%s8121_s8 + $0xb4] sm:$0xff]  }
 0x12a   : > { %v4911_v25 = vsel %vm8159_vm2, %v4906_v20, %v4910_v13  ;;  %v5406_v43 = vsel %vm8233_vm5, %v5404_v28, %v5405_v29  ;;  %v5410_v44 = vsel %vm8233_vm5, %v6674_v32, %v5409_v33  ;;  %v5416_v45 = vrot.slane %v6634_v38, 5  ;;  %v6643_v9 = vld [vmem:[%s8121_s8 + $0x64] sm:$0xf]  ;;  %v6645_v17 = vld [vmem:[%s8121_s8 + $0x6c] sm:$0xe] }
 0x12b   : > { %v6615_v31 = vcombine.low %v4901_v19, %v4911_v25  ;;  %v5419_v46 = vrot.slane %v6635_v39, 5  ;;  %v5413_v51 = vsel %vm8233_vm5, %v5411_v41, %v5412_v35  ;;  %v6676_v53 = vrot.slane %v6636_v49, 9  ;;  %v6647_v21 = vld [vmem:[%s8121_s8 + $0x74] sm:$0x1]  ;;  %v6360_v47 = vld [vmem:[%s8121_s8 + $0x6c] sm:$0xf] }
 0x12c   : > { %7380 = vmatpush3.bf16.msra.mxu1 %v7984_v56  ;;  %v5423_v54 = vrot.slane %v6637_v50, 5  ;;  %v5418_v55 = vrot.slane %v5416_v45, 4  ;;  %v5426_v57 = vrot.slane %v6638_v52, 5  ;;  %v6689_v60 = vcombine.low %v5403_v40, %v5406_v43  ;;  %v7974_v56 = vld [vmem:[%s8121_s8 + $0xa8] sm:$0xff]   ;;  %v6361_v29 = vld [vmem:[%s8121_s8 + $0x70] sm:$0xf] }
 0x12d   : > { %7314 = vmatmul.mubr.bf16.gmra.mrb[28].mxu0 %v6615_v31  ;;  %v6690_v62 = vcombine.low %v5410_v44, %v5413_v51  ;;  %v6677_v3 = vrot.slane %v6639_v58, 9  ;;  %v5417_v4 = vsel %vm8233_vm5, %v6675_v27, %v5416_v45  ;;  %v5430_v6 = vrot.slane %v6640_v1, 5  ;;  %v6362_v30 = vld [vmem:[%s8121_s8 + $0x74] sm:$0x1]  ;;  %v6649_v41 = vld [vmem:[%s8121_s8 + $0x7c] sm:$0xf] }
 0x12e   : > { %7333 = vmatprep.mubr.bf16.mxu0 %v6688_v26  ;;  %v5425_v63 = vrot.slane %v5423_v54, 4  ;;  %v5420_v7 = vsel %vm8233_vm5, %v5418_v55, %v5419_v46  ;;  %v5433_v48 = vrot.slane %v6641_v2, 5  ;;  %v5424_v59 = vsel %vm8233_vm5, %v6676_v53, %v5423_v54  ;;  %v6650_v45 = vld [vmem:[%s8121_s8 + $0x80] sm:$0x1]  ;;  %v6363_v46 = vld [vmem:[%s8121_s8 + $0x78] sm:$0xf] }
 0x12f   : > { %7110 = vmatmul.mubr.bf16.gmra.mrb[16].mxu1 %v7970_v10  ;;  %v6644_v10 = vld [vmem:[%s8121_s8 + $0x68] sm:$0x1]  ;;  %v8867_v11 = vsel %vm8233_vm5, %v6677_v3, %v5430_v6  ;;  %v5432_v12 = vrot.slane %v5430_v6, 4  ;;  %v6678_v13 = vrot.slane %v6642_v8, 9  ;;  %v6691_v61 = vcombine.low %v5417_v4, %v5420_v7  ;;  %v6364_v53 = vld [vmem:[%s8121_s8 + $0x7c] sm:$0xf] }
 0x130   : > { %7113 = vmatprep.mubr.bf16.mxu1 %v7971_v18  ;;  %v5427_v0 = vsel %vm8233_vm5, %v5425_v63, %v5426_v57  ;;  %v5437_v15 = vrot.slane %v6643_v9, 5  ;;  %v5440_v16 = vrot.slane %v6644_v10, 5  ;;  %v6646_v18 = vld [vmem:[%s8121_s8 + $0x70] sm:$0xf]  ;;  %v6679_v22 = vrot.slane %v6645_v17, 9  ;;  %v7976_v3 = vld [vmem:[%s8121_s8 + $0xc0] sm:$0xff]  }
 0x131   : > { %v6692_v19 = vcombine.low %v5424_v59, %v5427_v0  ;;  %v8874_v20 = vsel %vm8233_vm5, %v5432_v12, %v5433_v48  ;;  %v5444_v23 = vrot.slane %v6646_v18, 5  ;;  %v5447_v28 = vrot.slane %v6647_v21, 5  ;;  %v6651_v59 = vld [vmem:[%s8121_s8 + $0x84] sm:$0xe] }
 0x132   : > { %v6693_v24 = vcombine.low %v8867_v11, %v8874_v20  ;;  %v8882_v25 = vsel %vm8233_vm5, %v6678_v13, %v5437_v15  ;;  %v5439_v26 = vrot.slane %v5437_v15, 4  ;;  %v2861_v33 = vshrl.u32 %v6360_v47, 16  ;;  %v6653_v15 = vld [vmem:[%s8121_s8 + $0x8c] sm:$0x1] }
 0x133   : > { %v8888_v31 = vsel %vm8233_vm5, %v6679_v22, %v5444_v23  ;;  %v5446_v32 = vrot.slane %v5444_v23, 4  ;;  %v2864_v35 = vshll.u32 %v6360_v47, 16  ;;  %v2870_v38 = vshll.u32 %v6361_v29, 16  ;;  %v6367_v22 = vld [vmem:[%s8121_s8 + $0x88] sm:$0xf] }
 0x134   : > { %v8893_v37 = vsel %vm8233_vm5, %v5439_v26, %v5440_v16  ;;  %v2874_v39 = vshrl.u32 %v6361_v29, 16  ;;  %v2880_v40 = vshll.u32 %v6362_v30, 16  ;;  %v2863_v43 = vrot.slane %v2861_v33, 4  ;;  %v6366_v16 = vld [vmem:[%s8121_s8 + $0x84] sm:$0xf] }
 0x135   : > { %7334 = vmatmul.mubr.bf16.vlgmr.msra.gmra.mrb[0].mxu0 %v6689_v60  ;;  %v6694_v27 = vcombine.low %v8882_v25, %v8893_v37  ;;  %v2866_v44 = vrot.slane %v2864_v35, 5  ;;  %v2872_v50 = vrot.slane %v2870_v38, 5  ;;  %v5451_v57 = vrot.slane %v6649_v41, 5  ;;  %v6368_v29 = vld [vmem:[%s8121_s8 + $0x8c] sm:$0x1] }
 0x136   : > { %7337 = vmatprep.mubr.bf16.mxu0 %v6690_v62  ;;  %v2876_v51 = vrot.slane %v2874_v39, 4  ;;  %v2882_v52 = vrot.slane %v2880_v40, 5  ;;  %v5454_v58 = vrot.slane %v6650_v45, 5  ;;  %v6365_v62 = vld [vmem:[%s8121_s8 + $0x80] sm:$0x1]  ;;  %v2885_v63 = vshrl.u32 %v6363_v46, 16 }
 0x137   : > { %7114 = vmatmul.mubr.bf16.gmra.mrb[20].mxu1 %v7972_v36  ;;  %v6648_v36 = vld [vmem:[%s8121_s8 + $0x78] sm:$0xe]  ;;  %v2867_v54 = vor.u32 %v2866_v44, %v2863_v43  ;;  %v2888_v1 = vshll.u32 %v6363_v46, 16  ;;  %v2894_v2 = vshll.u32 %v6364_v53, 16  ;;  %v5453_v6 = vrot.slane %v5451_v57, 4 }
 0x138   : > { %7117 = vmatprep.mubr.bf16.mxu1 %v7973_v42  ;;  %v8900_v42 = vsel %vm8233_vm5, %v5446_v32, %v5447_v28  ;;  %v6680_v55 = vrot.slane %v6648_v36, 9  ;;  %v2877_v60 = vor.u32 %v2876_v51, %v2872_v50  ;;  %v2898_v48 = vshrl.u32 %v6364_v53, 16  ;;  %v6654_v36 = vld [vmem:[%s8121_s8 + $0x90] sm:$0xe]  ;;  %v6655_v43 = vld [vmem:[%s8121_s8 + $0x94] sm:$0xf] }
 0x139   : > { %v6695_v49 = vcombine.low %v8888_v31, %v8900_v42  ;;  %v2868_v4 = vrot.slane %v2867_v54, 4  ;;  %v2887_v8 = vrot.slane %v2885_v63, 4  ;;  %v2890_v9 = vrot.slane %v2888_v1, 5  ;;  %v6656_v51 = vld [vmem:[%s8121_s8 + $0x98] sm:$0x1] }
 0x13a   : > { %v8911_v7 = vsel %vm8233_vm5, %v6680_v55, %v5451_v57  ;;  %v2878_v0 = vrot.slane %v2877_v60, 4  ;;  %v2896_v10 = vrot.slane %v2894_v2, 5  ;;  %v8919_v13 = vsel %vm8233_vm5, %v5453_v6, %v5454_v58  ;;  %v6369_v53 = vld [vmem:[%s8121_s8 + $0x90] sm:$0xf]  ;;  %v6370_v25 = vld [vmem:[%s8121_s8 + $0x94] sm:$0xf] }
 0x13b   : > { %v2873_v12 = vsel %vm8159_vm2, %v2868_v4, %v2872_v50  ;;  %v6696_v18 = vcombine.low %v8911_v7, %v8919_v13  ;;  %v6681_v21 = vrot.slane %v6651_v59, 9  ;;  %v5461_v32 = vrot.slane %v6653_v15, 5  ;;  %v6371_v63 = vld [vmem:[%s8121_s8 + $0x98] sm:$0x1]  ;;  %v6657_v6 = vld [vmem:[%s8121_s8 + $0x9c] sm:$0xe] }
 0x13c   : > { %v2883_v17 = vsel %vm8159_vm2, %v2878_v0, %v2882_v52  ;;  %v2909_v33 = vshrl.u32 %v6366_v16, 16  ;;  %v2912_v35 = vshll.u32 %v6366_v16, 16  ;;  %v2918_v41 = vshll.u32 %v6367_v22, 16  ;;  %v6374_v31 = vld [vmem:[%s8121_s8 + $0xa4] sm:$0x1] }
 0x13d   : > { %7338 = vmatmul.mubr.bf16.gmra.mrb[4].mxu0 %v6691_v61  ;;  %v2900_v61 = vrot.slane %v2898_v48, 4  ;;  %v6392_v23 = vcombine.low %v2873_v12, %v2883_v17  ;;  %v2922_v50 = vshrl.u32 %v6367_v22, 16  ;;  %v5465_v60 = vrot.slane %v6655_v43, 5 }
 0x13e   : > { %7341 = vmatprep.mubr.bf16.mxu0 %v6692_v19  ;;  %v2891_v19 = vor.u32 %v2890_v9, %v2887_v8  ;;  %v2911_v45 = vrot.slane %v2909_v33, 4  ;;  %v2914_v46 = vrot.slane %v2912_v35, 5  ;;  %v2920_v20 = vrot.slane %v2918_v41, 5  ;;  %v6658_v9 = vld [vmem:[%s8121_s8 + $0xa0] sm:$0xf] }
 0x13f   : > { %7118 = vmatmul.mubr.bf16.gmra.mrb[24].mxu1 %v7974_v56  ;;  %v6652_v56 = vld [vmem:[%s8121_s8 + $0x88] sm:$0xf]  ;;  %v2901_v47 = vor.u32 %v2900_v61, %v2896_v10  ;;  %v2924_v58 = vrot.slane %v2922_v50, 4  ;;  %v2936_v4 = vshll.u32 %v6369_v53, 16  ;;  %v5467_v59 = vrot.slane %v5465_v60, 4 }
 0x140   : > { %7121 = vmatprep.mubr.bf16.mxu1 %v7975_v14  ;;  %v2904_v14 = vshll.u32 %v6365_v62, 16  ;;  %v5458_v28 = vrot.slane %v6652_v56, 5  ;;  %v2892_v30 = vrot.slane %v2891_v19, 4  ;;  %v2915_v57 = vor.u32 %v2914_v46, %v2911_v45  ;;  %v6662_v50 = vld [vmem:[%s8121_s8 + $0xb0] sm:$0x1] }
 0x141   : > { %v2902_v38 = vrot.slane %v2901_v47, 4  ;;  %v5468_v62 = vrot.slane %v6656_v51, 5  ;;  %v2925_v2 = vor.u32 %v2924_v58, %v2920_v20  ;;  %v2942_v0 = vshll.u32 %v6370_v25, 16 }
 0x142   : > { %v2906_v26 = vrot.slane %v2904_v14, 5  ;;  %v8932_v39 = vsel %vm8233_vm5, %v6681_v21, %v5458_v28  ;;  %v5460_v40 = vrot.slane %v5458_v28, 4  ;;  %v2897_v44 = vsel %vm8159_vm2, %v2892_v30, %v2896_v10  ;;  %v6659_v14 = vld [vmem:[%s8121_s8 + $0xa4] sm:$0x1]  ;;  %v6372_v21 = vld [vmem:[%s8121_s8 + $0x9c] sm:$0xf] }
 0x143   : > { %v2916_v1 = vrot.slane %v2915_v57, 4  ;;  %v2946_v8 = vshrl.u32 %v6370_v25, 16  ;;  %v2926_v56 = vrot.slane %v2925_v2, 4  ;;  %v2938_v61 = vrot.slane %v2936_v4, 5  ;;  %v6373_v28 = vld [vmem:[%s8121_s8 + $0xa0] sm:$0xf] }
 0x144   : > { %v2907_v52 = vsel %vm8159_vm2, %v2902_v38, %v2906_v26  ;;  %v8948_v11 = vsel %vm8233_vm5, %v5460_v40, %v5461_v32  ;;  %v5469_v15 = vsel %vm8233_vm5, %v5467_v59, %v5468_v62  ;;  %v2944_v16 = vrot.slane %v2942_v0, 5  ;;  %v6660_v38 = vld [vmem:[%s8121_s8 + $0xa8] sm:$0xe] }
 0x145   : > { %7342 = vmatmul.mubr.bf16.gmra.mrb[8].mxu0 %v6693_v24  ;;  %v2928_v24 = vshll.u32 %v6368_v29, 16  ;;  %v6393_v54 = vcombine.low %v2897_v44, %v2907_v52  ;;  %v6697_v55 = vcombine.low %v8932_v39, %v8948_v11  ;;  %v2921_v10 = vsel %vm8159_vm2, %v2916_v1, %v2920_v20  ;;  %v6377_v1 = vld [vmem:[%s8121_s8 + $0xb0] sm:$0x1] }
 0x146   : > { %7345 = vmatprep.mubr.bf16.mxu0 %v6694_v27  ;;  %v6682_v27 = vrot.slane %v6654_v36, 9  ;;  %v2948_v17 = vrot.slane %v2946_v8, 4  ;;  %v2952_v19 = vshll.u32 %v6371_v63, 16  ;;  %v6683_v26 = vrot.slane %v6657_v6, 9 }
 0x147   : > { %7122 = vmatmul.mubr.bf16.gmra.mrb[28].mxu1 %v7976_v3  ;;  %v2930_v37 = vrot.slane %v2928_v24, 5  ;;  %v2933_v3 = vshrl.u32 %v6369_v53, 16  ;;  %v5472_v33 = vrot.slane %v6658_v9, 5  ;;  %v2957_v35 = vshrl.u32 %v6372_v21, 16  ;;  %v6375_v53 = vld [vmem:[%s8121_s8 + $0xa8] sm:$0xf] }
 0x148   : > { %7157 = vmatprep.mubr.bf16.mxu1 %v6392_v23  ;;  %v8958_v48 = vsel %vm8233_vm5, %v6682_v27, %v5465_v60  ;;  %v2949_v30 = vor.u32 %v2948_v17, %v2944_v16  ;;  %v2954_v32 = vrot.slane %v2952_v19, 5  ;;  %v2960_v36 = vshll.u32 %v6372_v21, 16  ;;  %v6378_v17 = vld [vmem:[%s8121_s8 + $0xb4] sm:$0xf] }
 0x149   : > { %v2935_v12 = vrot.slane %v2933_v3, 4  ;;  %v2931_v22 = vsel %vm8159_vm2, %v2926_v56, %v2930_v37  ;;  %v6698_v23 = vcombine.low %v8958_v48, %v5469_v15  ;;  %v8981_v41 = vsel %vm8233_vm5, %v6683_v26, %v5472_v33  ;;  %v6376_v37 = vld [vmem:[%s8121_s8 + $0xac] sm:$0xf]  ;;  %v6663_v48 = vld [vmem:[%s8121_s8 + $0xb4] sm:$0xe] }
 0x14a   : > { %v6394_v29 = vcombine.low %v2921_v10, %v2931_v22  ;;  %v2950_v40 = vrot.slane %v2949_v30, 4  ;;  %v5474_v7 = vrot.slane %v5472_v33, 4  ;;  %v2966_v13 = vshll.u32 %v6373_v28, 16  ;;  %v6664_v10 = vld [vmem:[%s8121_s8 + $0xb8] sm:$0xf] }
 0x14b   : > { %v2939_v47 = vor.u32 %v2938_v61, %v2935_v12  ;;  %v2959_v44 = vrot.slane %v2957_v35, 4  ;;  %v2962_v45 = vrot.slane %v2960_v36, 5  ;;  %v2970_v46 = vshrl.u32 %v6373_v28, 16  ;;  %v6665_v12 = vld [vmem:[%s8121_s8 + $0xbc] sm:$0x1] }
 0x14c   : > { %v2955_v51 = vsel %vm8159_vm2, %v2950_v40, %v2954_v32  ;;  %v2968_v20 = vrot.slane %v2966_v13, 5  ;;  %v2976_v24 = vshll.u32 %v6374_v31, 16  ;;  %v6684_v60 = vrot.slane %v6660_v38, 9  ;;  %v6380_v32 = vld [vmem:[%s8121_s8 + $0xbc] sm:$0x1] }
 0x14d   : > { %7346 = vmatmul.mubr.bf16.gmra.mrb[12].mxu0 %v6695_v49  ;;  %v2940_v42 = vrot.slane %v2939_v47, 4  ;;  %v5475_v49 = vrot.slane %v6659_v14, 5  ;;  %v2963_v58 = vor.u32 %v2962_v45, %v2959_v44  ;;  %v2972_v25 = vrot.slane %v2970_v46, 4  ;;  %v6379_v47 = vld [vmem:[%s8121_s8 + $0xb8] sm:$0xf] }
 0x14e   : > { %7349 = vmatprep.mubr.bf16.mxu0 %v6696_v18  ;;  %v6661_v18 = vld [vmem:[%s8121_s8 + $0xac] sm:$0xf]  ;;  %v2978_v27 = vrot.slane %v2976_v24, 5  ;;  %v5482_v63 = vrot.slane %v6662_v50, 5  ;;  %v2981_v4 = vshrl.u32 %v6375_v53, 16  ;;  %v2984_v6 = vshll.u32 %v6375_v53, 16 }
 0x14f   : > { %7158 = vmatmul.mubr.bf16.vlgmr.msra.gmra.mrb[16].mxu1 %v6393_v54  ;;  %v2945_v43 = vsel %vm8159_vm2, %v2940_v42, %v2944_v16  ;;  %v5476_v52 = vsel %vm8233_vm5, %v5474_v7, %v5475_v49  ;;  %v5479_v62 = vrot.slane %v6661_v18, 5  ;;  %v2964_v2 = vrot.slane %v2963_v58, 4  ;;  %v6666_v35 = vld [vmem:[%s8121_s8 + $0xc0] sm:$0xe]  ;;  %v6667_v7 = vld [vmem:[%s8121_s8 + $0xc4] sm:$0xf] }
 0x150   : > { %7161 = vmatprep.mubr.bf16.mxu1 %v6394_v29  ;;  %v6395_v54 = vcombine.low %v2945_v43, %v2955_v51  ;;  %v6699_v57 = vcombine.low %v8981_v41, %v5476_v52  ;;  %v2973_v3 = vor.u32 %v2972_v25, %v2968_v20  ;;  %v2990_v8 = vshll.u32 %v6376_v37, 16  ;;  %v6668_v45 = vld [vmem:[%s8121_s8 + $0xc8] sm:$0x1]  ;;  %v6382_v58 = vld [vmem:[%s8121_s8 + $0xc4] sm:$0xf] }
 0x151   : > { %v5480_v59 = vsel %vm8233_vm5, %v6684_v60, %v5479_v62  ;;  %v5481_v0 = vrot.slane %v5479_v62, 4  ;;  %v2994_v9 = vshrl.u32 %v6376_v37, 16  ;;  %v2969_v39 = vsel %vm8159_vm2, %v2964_v2, %v2968_v20  ;;  %v6381_v20 = vld [vmem:[%s8121_s8 + $0xc0] sm:$0xf] }
 0x152   : > { %v2974_v11 = vrot.slane %v2973_v3, 4  ;;  %v2986_v56 = vrot.slane %v2984_v6, 5  ;;  %v2992_v14 = vrot.slane %v2990_v8, 5  ;;  %v3000_v16 = vshll.u32 %v6377_v1, 16  ;;  %v6383_v1 = vld [vmem:[%s8121_s8 + $0xc8] sm:$0x1] }
 0x153   : > { %v5483_v61 = vsel %vm8233_vm5, %v5481_v0, %v5482_v63  ;;  %v2996_v15 = vrot.slane %v2994_v9, 4  ;;  %v5486_v30 = vrot.slane %v6664_v10, 5  ;;  %v5489_v31 = vrot.slane %v6665_v12, 5  ;;  %v6669_v0 = vld [vmem:[%s8121_s8 + $0xcc] sm:$0xe] }
 0x154   : > { %v2979_v19 = vsel %vm8159_vm2, %v2974_v11, %v2978_v27  ;;  %v6700_v21 = vcombine.low %v5480_v59, %v5483_v61  ;;  %v3002_v29 = vrot.slane %v3000_v16, 5  ;;  %v3005_v42 = vshrl.u32 %v6378_v17, 16  ;;  %v6670_v11 = vld [vmem:[%s8121_s8 + $0xd0] sm:$0xf] }
 0x155   : > { %7350 = vmatmul.mubr.bf16.gmra.mrb[16].mxu0 %v6697_v55  ;;  %v2983_v55 = vrot.slane %v2981_v4, 4  ;;  %v6396_v26 = vcombine.low %v2969_v39, %v2979_v19  ;;  %v2997_v28 = vor.u32 %v2996_v15, %v2992_v14  ;;  %v3008_v49 = vshll.u32 %v6378_v17, 16 }
 0x156   : > { %7353 = vmatprep.mubr.bf16.mxu0 %v6698_v23  ;;  %v6685_v23 = vrot.slane %v6663_v48, 9  ;;  %v5488_v40 = vrot.slane %v5486_v30, 4  ;;  %v3014_v41 = vshll.u32 %v6379_v47, 16  ;;  %v3007_v18 = vrot.slane %v3005_v42, 4 }
 0x157   : > { %7162 = vmatmul.mubr.bf16.gmra.mrb[20].mxu1 %v6395_v54  ;;  %v2987_v22 = vor.u32 %v2986_v56, %v2983_v55  ;;  %v2998_v36 = vrot.slane %v2997_v28, 4  ;;  %v3010_v43 = vrot.slane %v3008_v49, 5  ;;  %v3018_v44 = vshrl.u32 %v6379_v47, 16 }
 0x158   : > { %7165 = vmatprep.mubr.bf16.mxu1 %v6396_v26  ;;  %v5487_v38 = vsel %vm8233_vm5, %v6685_v23, %v5486_v30  ;;  %v5490_v50 = vsel %vm8233_vm5, %v5488_v40, %v5489_v31  ;;  %v3016_v51 = vrot.slane %v3014_v41, 5  ;;  %v3024_v52 = vshll.u32 %v6380_v32, 16 }
 0x159   : > { %v2988_v33 = vrot.slane %v2987_v22, 4  ;;  %v3003_v46 = vsel %vm8159_vm2, %v2998_v36, %v3002_v29  ;;  %v6701_v53 = vcombine.low %v5487_v38, %v5490_v50  ;;  %v3011_v54 = vor.u32 %v3010_v43, %v3007_v18 }
 0x15a   : > { %v3026_v25 = vrot.slane %v3024_v52, 5  ;;  %v6686_v37 = vrot.slane %v6666_v35, 9  ;;  %v5493_v27 = vrot.slane %v6667_v7, 5  ;;  %v5496_v60 = vrot.slane %v6668_v45, 5 }
 0x15b   : > { %v2993_v13 = vsel %vm8159_vm2, %v2988_v33, %v2992_v14  ;;  %v3012_v62 = vrot.slane %v3011_v54, 4  ;;  %v3029_v2 = vshrl.u32 %v6381_v20, 16  ;;  %v3032_v3 = vshll.u32 %v6381_v20, 16  ;;  %v6671_v14 = vld [vmem:[%s8121_s8 + $0xd4] sm:$0x1] }
 0x15c   : > { %v6397_v24 = vcombine.low %v2993_v13, %v3003_v46  ;;  %v5494_v4 = vsel %vm8233_vm5, %v6686_v37, %v5493_v27  ;;  %v5495_v6 = vrot.slane %v5493_v27, 4  ;;  %v3038_v48 = vshll.u32 %v6382_v58, 16  ;;  %v355_v20 = vld [vmem:[#allocation2 + $0x10] sm:$0xff] }
 0x15d   : > { %7354 = vmatmul.mubr.bf16.gmra.mrb[20].mxu0 %v6699_v57  ;;  %v3020_v57 = vrot.slane %v3018_v44, 4  ;;  %v3042_v59 = vshrl.u32 %v6382_v58, 16  ;;  %v3017_v8 = vsel %vm8159_vm2, %v3012_v62, %v3016_v51  ;;  %v3031_v10 = vrot.slane %v3029_v2, 4 }
 0x15e   : > { %7357 = vmatprep.mubr.bf16.mxu0 %v6700_v21  ;;  %v3034_v39 = vrot.slane %v3032_v3, 5  ;;  %v5497_v55 = vsel %vm8233_vm5, %v5495_v6, %v5496_v60  ;;  %v3040_v56 = vrot.slane %v3038_v48, 5  ;;  %v3048_v61 = vshll.u32 %v6383_v1, 16  ;;  %v357_v48 = vld [vmem:[#allocation2 + $0x20] sm:$0xff] }
 0x15f   : > { %7166 = vmatmul.mubr.bf16.gmra.mrb[24].mxu1 %v6397_v24  ;;  %v3021_v63 = vor.u32 %v3020_v57, %v3016_v51  ;;  %v3044_v12 = vrot.slane %v3042_v59, 4  ;;  %v6702_v16 = vcombine.low %v5494_v4, %v5497_v55  ;;  %v6687_v19 = vrot.slane %v6669_v0, 9  ;;  %v353_v24 = vld [vmem:[#allocation2] sm:$0xff]  ;;  %v354_v57 = vld [vmem:[#allocation2 + $0x8] sm:$0xff]  ;;  %v359_v4 = vld [vmem:[#allocation2 + $0x30] sm:$0xff] }
 0x160   : > { %v3035_v17 = vor.u32 %v3034_v39, %v3031_v10  ;;  %v3050_v23 = vrot.slane %v3048_v61, 5  ;;  %v5500_v47 = vrot.slane %v6670_v11, 5  ;;  %v5503_v28 = vrot.slane %v6671_v14, 5  ;;  %v360_v59 = vld [vmem:[#allocation2 + $0x38] sm:$0xff] }
 0x161   : > { %v3022_v9 = vrot.slane %v3021_v63, 4  ;;  %v3045_v22 = vor.u32 %v3044_v12, %v3040_v56 }
 0x162   : > { %v3036_v26 = vrot.slane %v3035_v17, 4  ;;  %v5501_v30 = vsel %vm8233_vm5, %v6687_v19, %v5500_v47  ;;  %v5502_v32 = vrot.slane %v5500_v47, 4  ;;  %v361_v19 = vld [vmem:[#allocation2 + $0x40] sm:$0xff] }
 0x163   : > { %v3027_v15 = vsel %vm8159_vm2, %v3022_v9, %v3026_v25  ;;  %v3046_v29 = vrot.slane %v3045_v22, 4 }
 0x164   : > { %v6398_v21 = vcombine.low %v3017_v8, %v3027_v15  ;;  %v3041_v33 = vsel %vm8159_vm2, %v3036_v26, %v3040_v56  ;;  %v5504_v42 = vsel %vm8233_vm5, %v5502_v32, %v5503_v28  ;;  %v358_v8 = vld [vmem:[#allocation2 + $0x28] sm:$0xff] }
 0x165   : > { %7358 = vmatmul.mubr.bf16.gmra.mrb[24].mxu0 %v6701_v53  ;;  %v3051_v31 = vsel %vm8159_vm2, %v3046_v29, %v3050_v23  ;;  %v6703_v35 = vcombine.low %v5501_v30, %v5504_v42  ;;  %v356_v53 = vld [vmem:[#allocation2 + $0x18] sm:$0xff]  ;;  %v362_v23 = vld [vmem:[#allocation2 + $0x48] sm:$0xff] }
 0x166   : > { %7361 = vmatprep.mubr.bf16.mxu0 %v6702_v16  ;;  %7169 = vmatprep.mubr.bf16.mxu1 %v6398_v21  ;;  %v6399_v49 = vcombine.low %v3041_v33, %v3051_v31  ;;  %v363_v16 = vld [vmem:[#allocation2 + $0x50] sm:$0xff]  ;;  %v364_v21 = vld [vmem:[#allocation2 + $0x58] sm:$0xff] }
 0x168   : > { %7170 = vmatmul.mubr.bf16.gmra.mrb[28].mxu1 %v6399_v49 }
 0x16d   : > { %7362 = vmatmul.mubr.bf16.gmra.mrb[28].mxu0 %v6703_v35  ;;  %v367_v35 = vld [vmem:[#allocation2 + $0x70] sm:$0xff] }
 0x1e2   : > { %v7095_v36 = vpop.f32.mrb[0].mxu1 }
 0x1e3   : > { %v2429_v38 = vpop.f32.mrb[1].mxu1  ;;  %v7383_v54 = vadd.f32 %v7095_v36, %v355_v20 }
 0x1e4   : > { %v7096_v40 = vpop.f32.mrb[2].mxu1  ;;  %v7389_v58 = vadd.f32 %v2429_v38, %v353_v24  ;;  %v365_v38 = vld [vmem:[#allocation2 + $0x60] sm:$0xff] }
 0x1e5   : > { %v2432_v41 = vpop.f32.mrb[3].mxu1  ;;  %v7395_v37 = vadd.f32 %v7096_v40, %v356_v53 }
 0x1e6   : > { %v7401_v62 = vadd.f32 %v2432_v41, %v354_v57  ;;  %v368_v41 = vld [vmem:[#allocation2 + $0x78] sm:$0xff] }
 0x1ea   : > { %v7099_v7 = vpop.f32.mrb[4].mxu1 }
 0x1eb   : > { %v2445_v13 = vpop.f32.mrb[5].mxu1  ;;  %v7407_v0 = vadd.f32 %v7099_v7, %v359_v4 }
 0x1ec   : > { %v7100_v18 = vpop.f32.mrb[6].mxu1  ;;  %v7413_v9 = vadd.f32 %v2445_v13, %v357_v48 }
 0x1ed   : > { %v2448_v43 = vpop.f32.mrb[7].mxu1  ;;  %v7419_v39 = vadd.f32 %v7100_v18, %v360_v59  ;;  %v366_v18 = vld [vmem:[#allocation2 + $0x68] sm:$0xff] }
 0x1ee   : > { %v7425_v56 = vadd.f32 %v2448_v43, %v358_v8 }
 0x1f2   : > { %v7103_v44 = vpop.f32.mrb[8].mxu1 }
 0x1f3   : > { %v2461_v45 = vpop.f32.mrb[9].mxu1  ;;  %v7431_v22 = vadd.f32 %v7103_v44, %v363_v16 }
 0x1f4   : > { %v7104_v46 = vpop.f32.mrb[10].mxu1  ;;  %v7437_v47 = vadd.f32 %v2461_v45, %v361_v19 }
 0x1f5   : > { %v2464_v34 = vpop.f32.mrb[11].mxu1  ;;  %v7443_v28 = vadd.f32 %v7104_v46, %v364_v21 }
 0x1f6   : > { %v7449_v32 = vadd.f32 %v2464_v34, %v362_v23 }
 0x1fa   : > { %v9045_v50 = vpop.f32.mrb[12].mxu1 }
 0x1fb   : > { %v9047_v5 = vpop.f32.mrb[13].mxu1  ;;  %v7455_v13 = vadd.f32 %v9045_v50, %v367_v35 }
 0x1fc   : > { %v9049_v51 = vpop.f32.mrb[14].mxu1  ;;  %v7461_v44 = vadd.f32 %v9047_v5, %v365_v38 }
 0x1fd   : > { %v9051_v52 = vpop.f32.mrb[15].mxu1  ;;  %v7467_v34 = vadd.f32 %v9049_v51, %v368_v41 }
 0x1fe   : > { %v7473_v53 = vadd.f32 %v9051_v52, %v366_v18 }
 0x208   : > { %v7335_v25 = vpop.f32.mrb[0].mxu0 }
 0x209   : > { %v7386_v27 = vadd.f32 %v7383_v54, %v7335_v25  ;;  %v5699_v60 = vpop.f32.mrb[1].mxu0 }
 0x20a   : > { %v7392_v63 = vadd.f32 %v7389_v58, %v5699_v60  ;;  %v7336_v1 = vpop.f32.mrb[2].mxu0  ;;  %v371_v58 = vld [vmem:[#allocation2 + $0x90] sm:$0xff]  ;;  %v372_v60 = vld [vmem:[#allocation2 + $0x98] sm:$0xff] }
 0x20b   : > { %5860 = vst [vmem:[#allocation2 + $0x10] sm:$0xff] %v7386_v27  ;;  %v7398_v2 = vadd.f32 %v7395_v37, %v7336_v1  ;;  %v5702_v3 = vpop.f32.mrb[3].mxu0  ;;  %v369_v27 = vld [vmem:[#allocation2 + $0x80] sm:$0xff] }
 0x20c   : > { %5858 = vst [vmem:[#allocation2] sm:$0xff] %v7392_v63  ;;  %v7404_v6 = vadd.f32 %v7401_v62, %v5702_v3  ;;  %v370_v62 = vld [vmem:[#allocation2 + $0x88] sm:$0xff] }
 0x20d   : > { %5861 = vst [vmem:[#allocation2 + $0x18] sm:$0xff] %v7398_v2 }
 0x20e   : > { %5859 = vst [vmem:[#allocation2 + $0x8] sm:$0xff] %v7404_v6 }
 0x210   : > { %v7339_v10 = vpop.f32.mrb[4].mxu0 }
 0x211   : > { %v7410_v11 = vadd.f32 %v7407_v0, %v7339_v10  ;;  %v5715_v55 = vpop.f32.mrb[5].mxu0  ;;  %v375_v0 = vld [vmem:[#allocation2 + $0xb0] sm:$0xff] }
 0x212   : > { %v7416_v12 = vadd.f32 %v7413_v9, %v5715_v55  ;;  %v7340_v61 = vpop.f32.mrb[6].mxu0 }
 0x213   : > { %5864 = vst [vmem:[#allocation2 + $0x30] sm:$0xff] %v7410_v11  ;;  %v7422_v14 = vadd.f32 %v7419_v39, %v7340_v61  ;;  %v5718_v15 = vpop.f32.mrb[7].mxu0  ;;  %v373_v39 = vld [vmem:[#allocation2 + $0xa0] sm:$0xff]  ;;  %v374_v61 = vld [vmem:[#allocation2 + $0xa8] sm:$0xff] }
 0x214   : > { %5862 = vst [vmem:[#allocation2 + $0x20] sm:$0xff] %v7416_v12  ;;  %v7428_v17 = vadd.f32 %v7425_v56, %v5718_v15  ;;  %v376_v56 = vld [vmem:[#allocation2 + $0xb8] sm:$0xff] }
 0x215   : > { %5865 = vst [vmem:[#allocation2 + $0x38] sm:$0xff] %v7422_v14 }
 0x216   : > { %5863 = vst [vmem:[#allocation2 + $0x28] sm:$0xff] %v7428_v17 }
 0x218   : > { %v7343_v26 = vpop.f32.mrb[8].mxu0 }
 0x219   : > { %v7434_v29 = vadd.f32 %v7431_v22, %v7343_v26  ;;  %v5731_v30 = vpop.f32.mrb[9].mxu0 }
 0x21a   : > { %v7440_v33 = vadd.f32 %v7437_v47, %v5731_v30  ;;  %v7344_v31 = vpop.f32.mrb[10].mxu0  ;;  %v379_v47 = vld [vmem:[#allocation2 + $0xd0] sm:$0xff] }
 0x21b   : > { %5868 = vst [vmem:[#allocation2 + $0x50] sm:$0xff] %v7434_v29  ;;  %v7446_v42 = vadd.f32 %v7443_v28, %v7344_v31  ;;  %v5734_v49 = vpop.f32.mrb[11].mxu0  ;;  %v377_v29 = vld [vmem:[#allocation2 + $0xc0] sm:$0xff] }
 0x21c   : > { %5866 = vst [vmem:[#allocation2 + $0x40] sm:$0xff] %v7440_v33  ;;  %v7452_v36 = vadd.f32 %v7449_v32, %v5734_v49  ;;  %v380_v33 = vld [vmem:[#allocation2 + $0xd8] sm:$0xff]  ;;  %v378_v49 = vld [vmem:[#allocation2 + $0xc8] sm:$0xff] }
 0x21d   : > { %5869 = vst [vmem:[#allocation2 + $0x58] sm:$0xff] %v7446_v42 }
 0x21e   : > { %5867 = vst [vmem:[#allocation2 + $0x48] sm:$0xff] %v7452_v36 }
 0x220   : > { %v7347_v45 = vpop.f32.mrb[12].mxu0 }
 0x221   : > { %v7458_v20 = vadd.f32 %v7455_v13, %v7347_v45  ;;  %v5747_v24 = vpop.f32.mrb[13].mxu0 }
 0x222   : > { %v7159_v40 = vpop.f32.mrb[16].mxu1  ;;  %v7464_v54 = vadd.f32 %v7461_v44, %v5747_v24  ;;  %v7348_v57 = vpop.f32.mrb[14].mxu0  ;;  %v381_v24 = vld [vmem:[#allocation2 + $0xe0] sm:$0xff] }
 0x223   : > { %v3310_v7 = vpop.f32.mrb[17].mxu1  ;;  %5872 = vst [vmem:[#allocation2 + $0x70] sm:$0xff] %v7458_v20  ;;  %v7470_v25 = vadd.f32 %v7467_v34, %v7348_v57  ;;  %v5750_v37 = vpop.f32.mrb[15].mxu0  ;;  %v7479_v5 = vadd.f32 %v7159_v40, %v371_v58  ;;  %v383_v20 = vld [vmem:[#allocation2 + $0xf0] sm:$0xff]  ;;  %v384_v57 = vld [vmem:[#allocation2 + $0xf8] sm:$0xff] }
 0x224   : > { %v7160_v43 = vpop.f32.mrb[18].mxu1  ;;  %5870 = vst [vmem:[#allocation2 + $0x60] sm:$0xff] %v7464_v54  ;;  %v7476_v50 = vadd.f32 %v7473_v53, %v5750_v37  ;;  %v7485_v63 = vadd.f32 %v3310_v7, %v369_v27  ;;  %v382_v27 = vld [vmem:[#allocation2 + $0xe8] sm:$0xff] }
 0x225   : > { %v3313_v46 = vpop.f32.mrb[19].mxu1  ;;  %5873 = vst [vmem:[#allocation2 + $0x78] sm:$0xff] %v7470_v25  ;;  %v7491_v51 = vadd.f32 %v7160_v43, %v372_v60 }
 0x226   : > { %5871 = vst [vmem:[#allocation2 + $0x68] sm:$0xff] %v7476_v50  ;;  %v7497_v2 = vadd.f32 %v3313_v46, %v370_v62 }
 0x228   : > { %v7351_v1 = vpop.f32.mrb[16].mxu0 }
 0x229   : > { %v7482_v52 = vadd.f32 %v7479_v5, %v7351_v1  ;;  %v5763_v4 = vpop.f32.mrb[17].mxu0 }
 0x22a   : > { %v7163_v3 = vpop.f32.mrb[20].mxu1  ;;  %v7488_v48 = vadd.f32 %v7485_v63, %v5763_v4  ;;  %v7352_v59 = vpop.f32.mrb[18].mxu0 }
 0x22b   : > { %v3326_v6 = vpop.f32.mrb[21].mxu1  ;;  %5876 = vst [vmem:[#allocation2 + $0x90] sm:$0xff] %v7482_v52  ;;  %v7494_v9 = vadd.f32 %v7491_v51, %v7352_v59  ;;  %v5766_v10 = vpop.f32.mrb[19].mxu0  ;;  %v7503_v12 = vadd.f32 %v7163_v3, %v375_v0  ;;  %v9066_v59 = vld [vmem:[%s9188_s3] ss:$0 sm:$0xff] (!%p6712_p11) }
 0x22c   : > { %v7164_v8 = vpop.f32.mrb[22].mxu1  ;;  %5874 = vst [vmem:[#allocation2 + $0x80] sm:$0xff] %v7488_v48  ;;  %v7500_v55 = vadd.f32 %v7497_v2, %v5766_v10  ;;  %v7509_v14 = vadd.f32 %v3326_v6, %v373_v39  ;;  %v5894_v6 = vld [vmem:[#allocation2] sm:$0xff] (!%p6712_p11)  ;;  %v5897_v10 = vld [vmem:[#allocation2 + $0x18] sm:$0xff] (!%p6712_p11) }
 0x22d   : > { %v3329_v11 = vpop.f32.mrb[23].mxu1  ;;  %5877 = vst [vmem:[#allocation2 + $0x98] sm:$0xff] %v7494_v9  ;;  %v7515_v15 = vadd.f32 %v7164_v8, %v376_v56  ;;  %v9061_v48 = vld [vmem:[%s9187_s2] ss:$0 sm:$0xff] (!%p6712_p11)  ;;  %v5895_v8 = vld [vmem:[#allocation2 + $0x8] sm:$0xff] (!%p6712_p11)  ;;  %v5896_v9 = vld [vmem:[#allocation2 + $0x10] sm:$0xff] (!%p6712_p11) }
 0x22e   : > { %5875 = vst [vmem:[#allocation2 + $0x88] sm:$0xff] %v7500_v55  ;;  %v7521_v17 = vadd.f32 %v3329_v11, %v374_v61  ;;  %v5933_v0 = vmul.f32 (!%p6712_p11), %v9061_v48, %v5894_v6  ;;  %v5934_v39 = vmul.f32 (!%p6712_p11), %v9061_v48, %v5895_v8  ;;  %v5935_v11 = vmul.f32 (!%p6712_p11), %v9061_v48, %v5896_v9  ;;  %v5898_v56 = vld [vmem:[#allocation2 + $0x20] sm:$0xff] (!%p6712_p11)  ;;  %v5900_v61 = vld [vmem:[#allocation2 + $0x30] sm:$0xff] (!%p6712_p11) }
 0x22f   : > { %v5936_v55 = vmul.f32 (!%p6712_p11), %v9061_v48, %v5897_v10 }
 0x230   : > { %v7355_v16 = vpop.f32.mrb[20].mxu0 }
 0x231   : > { %v7506_v19 = vadd.f32 %v7503_v12, %v7355_v16  ;;  %v5779_v21 = vpop.f32.mrb[21].mxu0  ;;  %v5899_v12 = vld [vmem:[#allocation2 + $0x28] sm:$0xff] (!%p6712_p11) }
 0x232   : > { %v7512_v22 = vadd.f32 %v7509_v14, %v5779_v21  ;;  %v7356_v23 = vpop.f32.mrb[22].mxu0  ;;  %v7167_v32 = vpop.f32.mrb[24].mxu1  ;;  %v5972_v14 = vadd.f32 (!%p6712_p11), %v9066_v59, %v5933_v0  ;;  %v5938_v16 = vmul.f32 (!%p6712_p11), %v9061_v48, %v5899_v12  ;;  %v5973_v21 = vadd.f32 (!%p6712_p11), %v9066_v59, %v5934_v39 }
 0x233   : > { %5880 = vst [vmem:[#allocation2 + $0xb0] sm:$0xff] %v7506_v19  ;;  %v7518_v26 = vadd.f32 %v7515_v15, %v7356_v23  ;;  %v5782_v28 = vpop.f32.mrb[23].mxu0  ;;  %v7527_v31 = vadd.f32 %v7167_v32, %v379_v47  ;;  %v3342_v42 = vpop.f32.mrb[25].mxu1  ;;  %v5937_v15 = vmul.f32 (!%p6712_p11), %v9061_v48, %v5898_v56  ;;  %v5901_v19 = vld [vmem:[#allocation2 + $0x38] sm:$0xff] (!%p6712_p11)  ;;  %v5975_v23 = vadd.f32 (!%p6712_p11), %v9066_v59, %v5936_v55 }
 0x234   : > { %5878 = vst [vmem:[#allocation2 + $0xa0] sm:$0xff] %v7512_v22  ;;  %v7524_v30 = vadd.f32 %v7521_v17, %v5782_v28  ;;  %v7533_v35 = vadd.f32 %v3342_v42, %v377_v29  ;;  %v7168_v36 = vpop.f32.mrb[26].mxu1  ;;  %v5939_v17 = vmul.f32 (!%p6712_p11), %v9061_v48, %v5900_v61  ;;  %v5974_v22 = vadd.f32 (!%p6712_p11), %v9066_v59, %v5935_v11  ;;  %v5905_v42 = vld [vmem:[#allocation2 + $0x58] sm:$0xff] (!%p6712_p11) }
 0x235   : > { %5881 = vst [vmem:[#allocation2 + $0xb8] sm:$0xff] %v7518_v26  ;;  %v7539_v38 = vadd.f32 %v7168_v36, %v380_v33  ;;  %v3345_v40 = vpop.f32.mrb[27].mxu1  ;;  %v5940_v47 = vmul.f32 (!%p6712_p11), %v9061_v48, %v5901_v19  ;;  %v5902_v26 = vld [vmem:[#allocation2 + $0x40] sm:$0xff] (!%p6712_p11)  ;;  %v6004_v28 = vmax.f32 (!%p6712_p11), %v5972_v14, 0.0  ;;  %v5976_v29 = vadd.f32 (!%p6712_p11), %v9066_v59, %v5937_v15  ;;  %v5903_v33 = vld [vmem:[#allocation2 + $0x48] sm:$0xff] (!%p6712_p11) }
 0x236   : > { %5879 = vst [vmem:[#allocation2 + $0xa8] sm:$0xff] %v7524_v30  ;;  %v7545_v7 = vadd.f32 %v3345_v40, %v378_v49  ;;  %v5977_v30 = vadd.f32 (!%p6712_p11), %v9066_v59, %v5938_v16  ;;  %v5978_v32 = vadd.f32 (!%p6712_p11), %v9066_v59, %v5939_v17  ;;  %v6005_v49 = vmax.f32 (!%p6712_p11), %v5973_v21, 0.0  ;;  %v5906_v40 = vld [vmem:[#allocation2 + $0x60] sm:$0xff] (!%p6712_p11) }
 0x237   : > { %v6007_v36 = vmax.f32 (!%p6712_p11), %v5975_v23, 0.0  ;;  %6036 = vst [vmem:[%s8132_s27] sm:$0xff] (!%p6712_p11), %v6004_v28 }
 0x238   : > { %v7359_v41 = vpop.f32.mrb[24].mxu0  ;;  %6037 = vst [vmem:[%s8132_s27 + $0x8] sm:$0xff] (!%p6712_p11), %v6005_v49 }
 0x239   : > { %v7530_v13 = vadd.f32 %v7527_v31, %v7359_v41  ;;  %v5795_v18 = vpop.f32.mrb[25].mxu0  ;;  %v5904_v31 = vld [vmem:[#allocation2 + $0x50] sm:$0xff] (!%p6712_p11)  ;;  %v5907_v41 = vld [vmem:[#allocation2 + $0x68] sm:$0xff] (!%p6712_p11)  ;;  %6039 = vst [vmem:[%s8132_s27 + $0x18] sm:$0xff] (!%p6712_p11), %v6007_v36 }
 0x23a   : > { %v7536_v43 = vadd.f32 %v7533_v35, %v5795_v18  ;;  %v7360_v44 = vpop.f32.mrb[26].mxu0  ;;  %v6006_v35 = vmax.f32 (!%p6712_p11), %v5974_v22, 0.0  ;;  %v6009_v18 = vmax.f32 (!%p6712_p11), %v5977_v30, 0.0  ;;  %v5916_v10 = vld [vmem:[#allocation2 + $0xb0] sm:$0xff] (!%p6712_p11) }
 0x23b   : > { %5884 = vst [vmem:[#allocation2 + $0xd0] sm:$0xff] %v7530_v13  ;;  %v7542_v45 = vadd.f32 %v7539_v38, %v7360_v44  ;;  %v5798_v46 = vpop.f32.mrb[27].mxu0  ;;  %v7171_v53 = vpop.f32.mrb[28].mxu1  ;;  %v5979_v38 = vadd.f32 (!%p6712_p11), %v9066_v59, %v5940_v47  ;;  %v6008_v13 = vmax.f32 (!%p6712_p11), %v5976_v29, 0.0  ;;  %v5941_v44 = vmul.f32 (!%p6712_p11), %v9061_v48, %v5902_v26  ;;  %v5914_v8 = vld [vmem:[#allocation2 + $0xa0] sm:$0xff] (!%p6712_p11) }
 0x23c   : > { %5882 = vst [vmem:[#allocation2 + $0xc0] sm:$0xff] %v7536_v43  ;;  %v7548_v34 = vadd.f32 %v7545_v7, %v5798_v46  ;;  %v7551_v58 = vadd.f32 %v7171_v53, %v383_v20  ;;  %v3358_v25 = vpop.f32.mrb[29].mxu1  ;;  %v5908_v7 = vld [vmem:[#allocation2 + $0x70] sm:$0xff] (!%p6712_p11)  ;;  %v6010_v43 = vmax.f32 (!%p6712_p11), %v5978_v32, 0.0  ;;  %6038 = vst [vmem:[%s8132_s27 + $0x10] sm:$0xff] (!%p6712_p11), %v6006_v35  ;;  %v5943_v20 = vmul.f32 (!%p6712_p11), %v9061_v48, %v5904_v31  ;;  %v5917_v12 = vld [vmem:[#allocation2 + $0xb8] sm:$0xff] (!%p6712_p11) }
 0x23d   : > { %5885 = vst [vmem:[#allocation2 + $0xd8] sm:$0xff] %v7542_v45  ;;  %v7557_v50 = vadd.f32 %v3358_v25, %v381_v24  ;;  %v7172_v60 = vpop.f32.mrb[30].mxu1  ;;  %v5909_v45 = vld [vmem:[#allocation2 + $0x78] sm:$0xff] (!%p6712_p11)  ;;  %v6011_v46 = vmax.f32 (!%p6712_p11), %v5979_v38, 0.0  ;;  %v5944_v24 = vmul.f32 (!%p6712_p11), %v9061_v48, %v5905_v42  ;;  %6040 = vst [vmem:[%s8132_s27 + $0x20] sm:$0xff] (!%p6712_p11), %v6008_v13  ;;  %v5980_v53 = vadd.f32 (!%p6712_p11), %v9066_v59, %v5941_v44  ;;  %v5915_v9 = vld [vmem:[#allocation2 + $0xa8] sm:$0xff] (!%p6712_p11) }
 0x23e   : > { %5883 = vst [vmem:[#allocation2 + $0xc8] sm:$0xff] %v7548_v34  ;;  %v7563_v63 = vadd.f32 %v7172_v60, %v384_v57  ;;  %v3361_v51 = vpop.f32.mrb[31].mxu1  ;;  %v5942_v34 = vmul.f32 (!%p6712_p11), %v9061_v48, %v5903_v33  ;;  %6041 = vst [vmem:[%s8132_s27 + $0x28] sm:$0xff] (!%p6712_p11), %v6009_v18  ;;  %v5946_v57 = vmul.f32 (!%p6712_p11), %v9061_v48, %v5907_v41  ;;  %v5910_v60 = vld [vmem:[#allocation2 + $0x80] sm:$0xff] (!%p6712_p11) }
 0x23f   : > { %v7569_v3 = vadd.f32 %v3361_v51, %v382_v27  ;;  %6042 = vst [vmem:[%s8132_s27 + $0x30] sm:$0xff] (!%p6712_p11), %v6010_v43  ;;  %6043 = vst [vmem:[%s8132_s27 + $0x38] sm:$0xff] (!%p6712_p11), %v6011_v46  ;;  %v5983_v27 = vadd.f32 (!%p6712_p11), %v9066_v59, %v5944_v24  ;;  %v5949_v56 = vmul.f32 (!%p6712_p11), %v9061_v48, %v5910_v60 }
 0x240   : > { %v7363_v54 = vpop.f32.mrb[28].mxu0  ;;  %5893 = sbr.rel (%p6712_p11) target bundleno = 597 (0x255), region = 44  ;;  %v5981_v25 = vadd.f32 (!%p6712_p11), %v9066_v59, %v5942_v34  ;;  %v5953_v19 = vmul.f32 (!%p6712_p11), %v9061_v48, %v5914_v8  ;;  %v5954_v21 = vmul.f32 (!%p6712_p11), %v9061_v48, %v5915_v9  ;;  %v5955_v22 = vmul.f32 (!%p6712_p11), %v9061_v48, %v5916_v10 }
 0x241   : > { %v5811_v37 = vpop.f32.mrb[29].mxu0  ;;  %v7554_v62 = vadd.f32 %v7551_v58, %v7363_v54  ;;  %v5945_v54 = vmul.f32 (!%p6712_p11), %v9061_v48, %v5906_v40  ;;  %v5947_v58 = vmul.f32 (!%p6712_p11), %v9061_v48, %v5908_v7  ;;  %v6015_v6 = vmax.f32 (!%p6712_p11), %v5983_v27, 0.0 }
 0x242   : > { %v7364_v5 = vpop.f32.mrb[30].mxu0  ;;  %v7560_v2 = vadd.f32 %v7557_v50, %v5811_v37  ;;  %v5982_v37 = vadd.f32 (!%p6712_p11), %v9066_v59, %v5943_v20  ;;  %v5948_v50 = vmul.f32 (!%p6712_p11), %v9061_v48, %v5909_v45  ;;  %v5988_v17 = vadd.f32 (!%p6712_p11), %v9066_v59, %v5949_v56  ;;  %v5920_v49 = vld [vmem:[#allocation2 + $0xd0] sm:$0xff] (!%p6712_p11) }
 0x243   : > { %v5814_v1 = vpop.f32.mrb[31].mxu0  ;;  %5888 = vst [vmem:[#allocation2 + $0xf0] sm:$0xff] %v7554_v62  ;;  %v7566_v52 = vadd.f32 %v7563_v63, %v7364_v5  ;;  %v6012_v5 = vmax.f32 (!%p6712_p11), %v5980_v53, 0.0  ;;  %v5984_v62 = vadd.f32 (!%p6712_p11), %v9066_v59, %v5945_v54  ;;  %v5985_v63 = vadd.f32 (!%p6712_p11), %v9066_v59, %v5946_v57  ;;  %6047 = vst [vmem:[%s8132_s27 + $0x58] sm:$0xff] (!%p6712_p11), %v6015_v6  ;;  %v5918_v29 = vld [vmem:[#allocation2 + $0xc0] sm:$0xff] (!%p6712_p11) }
 0x244   : > { %5886 = vst [vmem:[#allocation2 + $0xe0] sm:$0xff] %v7560_v2  ;;  %v7572_v4 = vadd.f32 %v7569_v3, %v5814_v1  ;;  %v5986_v51 = vadd.f32 (!%p6712_p11), %v9066_v59, %v5947_v58  ;;  %v5911_v1 = vld [vmem:[#allocation2 + $0x88] sm:$0xff] (!%p6712_p11)  ;;  %v5912_v2 = vld [vmem:[#allocation2 + $0x90] sm:$0xff] (!%p6712_p11)  ;;  %v5913_v3 = vld [vmem:[#allocation2 + $0x98] sm:$0xff] (!%p6712_p11)  ;;  %v5987_v0 = vadd.f32 (!%p6712_p11), %v9066_v59, %v5948_v50  ;;  %v5956_v28 = vmul.f32 (!%p6712_p11), %v9061_v48, %v5917_v12 }
 0x245   : > { %5889 = vst [vmem:[#allocation2 + $0xf8] sm:$0xff] %v7566_v52  ;;  %v6013_v52 = vmax.f32 (!%p6712_p11), %v5981_v25, 0.0  ;;  %6044 = vst [vmem:[%s8132_s27 + $0x40] sm:$0xff] (!%p6712_p11), %v6012_v5  ;;  %v6016_v39 = vmax.f32 (!%p6712_p11), %v5984_v62, 0.0  ;;  %v6017_v11 = vmax.f32 (!%p6712_p11), %v5985_v63, 0.0  ;;  %v5950_v14 = vmul.f32 (!%p6712_p11), %v9061_v48, %v5911_v1  ;;  %v5919_v42 = vld [vmem:[#allocation2 + $0xc8] sm:$0xff] (!%p6712_p11) }
 0x246   : > { %5887 = vst [vmem:[#allocation2 + $0xe8] sm:$0xff] %v7572_v4  ;;  %v6014_v4 = vmax.f32 (!%p6712_p11), %v5982_v37, 0.0  ;;  %v6018_v55 = vmax.f32 (!%p6712_p11), %v5986_v51, 0.0  ;;  %v6019_v61 = vmax.f32 (!%p6712_p11), %v5987_v0, 0.0  ;;  %v5951_v15 = vmul.f32 (!%p6712_p11), %v9061_v48, %v5912_v2  ;;  %v5921_v35 = vld [vmem:[#allocation2 + $0xd8] sm:$0xff] (!%p6712_p11) }
 0x247   : > { %6045 = vst [vmem:[%s8132_s27 + $0x48] sm:$0xff] %v6013_v52  ;;  %v5952_v16 = vmul.f32 %v9061_v48, %v5913_v3  ;;  %6048 = vst [vmem:[%s8132_s27 + $0x60] sm:$0xff] %v6016_v39  ;;  %v5989_v23 = vadd.f32 %v9066_v59, %v5950_v14  ;;  %v6020_v30 = vmax.f32 %v5988_v17, 0.0  ;;  %v5992_v32 = vadd.f32 %v9066_v59, %v5953_v19 }
 0x248   : > { %6046 = vst [vmem:[%s8132_s27 + $0x50] sm:$0xff] %v6014_v4  ;;  %6049 = vst [vmem:[%s8132_s27 + $0x68] sm:$0xff] %v6017_v11  ;;  %v5990_v47 = vadd.f32 %v9066_v59, %v5951_v15  ;;  %v5993_v33 = vadd.f32 %v9066_v59, %v5954_v21  ;;  %v5994_v31 = vadd.f32 %v9066_v59, %v5955_v22 }
 0x249   : > { %6050 = vst [vmem:[%s8132_s27 + $0x70] sm:$0xff] %v6018_v55  ;;  %6051 = vst [vmem:[%s8132_s27 + $0x78] sm:$0xff] %v6019_v61  ;;  %v5991_v26 = vadd.f32 %v9066_v59, %v5952_v16  ;;  %v6021_v36 = vmax.f32 %v5989_v23, 0.0  ;;  %v5995_v41 = vadd.f32 %v9066_v59, %v5956_v28  ;;  %v6024_v43 = vmax.f32 %v5992_v32, 0.0 }
 0x24a   : > { %v6022_v38 = vmax.f32 %v5990_v47, 0.0  ;;  %v5924_v18 = vld [vmem:[#allocation2 + $0xf0] sm:$0xff]  ;;  %6052 = vst [vmem:[%s8132_s27 + $0x80] sm:$0xff] %v6020_v30  ;;  %v6025_v44 = vmax.f32 %v5993_v33, 0.0  ;;  %v6026_v45 = vmax.f32 %v5994_v31, 0.0  ;;  %v5957_v46 = vmul.f32 %v9061_v48, %v5918_v29 }
 0x24b   : > { %v6023_v40 = vmax.f32 %v5991_v26, 0.0  ;;  %v5922_v7 = vld [vmem:[#allocation2 + $0xe0] sm:$0xff]  ;;  %6053 = vst [vmem:[%s8132_s27 + $0x88] sm:$0xff] %v6021_v36  ;;  %v6027_v20 = vmax.f32 %v5995_v41, 0.0  ;;  %v5958_v24 = vmul.f32 %v9061_v48, %v5919_v42  ;;  %v5959_v53 = vmul.f32 %v9061_v48, %v5920_v49  ;;  %6056 = vst [vmem:[%s8132_s27 + $0xa0] sm:$0xff] %v6024_v43 }
 0x24c   : > { %v5925_v34 = vld [vmem:[#allocation2 + $0xf8] sm:$0xff]  ;;  %6054 = vst [vmem:[%s8132_s27 + $0x90] sm:$0xff] %v6022_v38  ;;  %v5960_v54 = vmul.f32 %v9061_v48, %v5921_v35  ;;  %6057 = vst [vmem:[%s8132_s27 + $0xa8] sm:$0xff] %v6025_v44  ;;  %v5996_v57 = vadd.f32 %v9066_v59, %v5957_v46  ;;  %v5961_v58 = vmul.f32 %v9061_v48, %v5922_v7 }
 0x24d   : > { %v5923_v13 = vld [vmem:[#allocation2 + $0xe8] sm:$0xff]  ;;  %6055 = vst [vmem:[%s8132_s27 + $0x98] sm:$0xff] %v6023_v40  ;;  %6058 = vst [vmem:[%s8132_s27 + $0xb0] sm:$0xff] %v6026_v45  ;;  %v5963_v37 = vmul.f32 %v9061_v48, %v5924_v18  ;;  %v5997_v27 = vadd.f32 %v9066_v59, %v5958_v24  ;;  %v5998_v50 = vadd.f32 %v9066_v59, %v5959_v53 }
 0x24e   : > { %v5962_v25 = vmul.f32 %v9061_v48, %v5923_v13  ;;  %6059 = vst [vmem:[%s8132_s27 + $0xb8] sm:$0xff] %v6027_v20  ;;  %v5999_v60 = vadd.f32 %v9066_v59, %v5960_v54  ;;  %v5964_v5 = vmul.f32 %v9061_v48, %v5925_v34  ;;  %v6028_v62 = vmax.f32 %v5996_v57, 0.0 }
 0x24f   : > { %v6000_v63 = vadd.f32 %v9066_v59, %v5961_v58  ;;  %v6002_v1 = vadd.f32 %v9066_v59, %v5963_v37  ;;  %v6029_v2 = vmax.f32 %v5997_v27, 0.0  ;;  %v6030_v3 = vmax.f32 %v5998_v50, 0.0 }
 0x250   : > { %v6001_v51 = vadd.f32 %v9066_v59, %v5962_v25  ;;  %v6031_v52 = vmax.f32 %v5999_v60, 0.0  ;;  %v6003_v4 = vadd.f32 %v9066_v59, %v5964_v5  ;;  %6060 = vst [vmem:[%s8132_s27 + $0xc0] sm:$0xff] %v6028_v62 }
 0x251   : > { %v6032_v6 = vmax.f32 %v6000_v63, 0.0  ;;  %v6034_v48 = vmax.f32 %v6002_v1, 0.0  ;;  %6061 = vst [vmem:[%s8132_s27 + $0xc8] sm:$0xff] %v6029_v2  ;;  %6062 = vst [vmem:[%s8132_s27 + $0xd0] sm:$0xff] %v6030_v3 }
 0x252   : > { %v6033_v0 = vmax.f32 %v6001_v51, 0.0  ;;  %6063 = vst [vmem:[%s8132_s27 + $0xd8] sm:$0xff] %v6031_v52  ;;  %v6035_v8 = vmax.f32 %v6003_v4, 0.0 }
 0x253   : > { %6064 = vst [vmem:[%s8132_s27 + $0xe0] sm:$0xff] %v6032_v6  ;;  %6066 = vst [vmem:[%s8132_s27 + $0xf0] sm:$0xff] %v6034_v48 }
 0x254   : > { %6065 = vst [vmem:[%s8132_s27 + $0xe8] sm:$0xff] %v6033_v0  ;;  %6067 = vst [vmem:[%s8132_s27 + $0xf8] sm:$0xff] %v6035_v8 }
 0x255 PF: > { %s14_s21 = sadd.s32 1, %s8039_s21   ;;  %s9195_s29 = sld [smem:[#allocation3_spill]] }
 0x256   : > { %p11_p12 = scmp.ge.s32.totalorder %s14_s21, 50   ;;  %s9196_s15 = smov %s8027_s18 }
 0x257   : > { %s9197_s16 = smov %s8031_s19  ;;  %s9198_s17 = smov %s8035_s20 }
 0x258   : > { %s9199_s18 = smov %s9203_s22  ;;  %s9200_s19 = smov %s9207_s23 }
 0x259   :  { %13 = sbr.rel (!%p11_p12) target bundleno = 4 (0x4), region = 79 }
 0x25b   : > { %s9201_s20 = smov %s9195_s29 }

</bundles_post_ra>
